<compile_context>
chip_gen: v5e
topology: v5e:2x2
jax: 0.10.0
libtpu: 0.0.40
codegen_flags: <defaults>
</compile_context>

<pallas_src>
import functools

import jax
import jax.numpy as jnp
from jax import lax
from jax.experimental import pallas as pl
from jax.experimental.pallas import tpu as pltpu

_SUBLANE = 8          # f32 sublane count
_LANE = 128           # lane width
_MAX_BATCH_TILE = 256  # padded batch rows handled by one grid program

# PyTorch LSTM gate order: i, f, g, o.  The 0.5 sigmoid pre-scale is folded
# into the i/f/o blocks; the g (cell candidate) block is left unscaled.
_GATE_SCALE = (0.5, 0.5, 1.0, 0.5)


def _round_up(n, m):
    return ((n + m - 1) // m) * m


# ----------------------------------------------------------------------------
# Fused kernel: LSTM(1,128) -> LSTM(128,64) -> Linear(64,16) -> ReLU
#               -> Linear(16,p), all in one pallas_call program.
# ----------------------------------------------------------------------------
def _fused_lstm_kernel(T,
                       x_ref, wih1_ref, whh1_ref, b1_ref,
                       wih2_ref, whh2_ref, b2_ref,
                       w3_ref, b3_ref, wo_ref, bo_ref,
                       out_ref):
    # x_ref   : (Bt, T)       f32, batch-major input (D_in == 1)
    # wih1_ref: (1, 4*H1)     f32, layer-1 input->gates (0.5 folded on i/f/o)
    # whh1_ref: (H1, 4*H1)    bf16, layer-1 hidden->gates
    # b1_ref  : (1, 4*H1)     f32, layer-1 fused bias
    # wih2_ref: (H1, 4*G2)    bf16, layer-2 input->gates (gate blocks padded)
    # whh2_ref: (H2, 4*G2)    bf16, layer-2 hidden->gates, K = 64 real rows
    # b2_ref  : (1, 4*G2)     f32
    # w3_ref  : (H2, 16)      bf16, head Linear(64,16)
    # b3_ref  : (1, 16)       f32
    # wo_ref  : (16, P)       f32, head Linear(16,p)
    # bo_ref  : (1, P)        f32
    # out_ref : (Bt, P)       f32
    Bt = x_ref.shape[0]
    H1 = whh1_ref.shape[0]          # 128
    H2 = whh2_ref.shape[0]          # 64 (real width of layer 2)
    G2 = whh2_ref.shape[1] // 4     # 128 (padded lane stride per gate block)

    wih1 = wih1_ref[...]            # f32, VPU path
    b1 = b1_ref[...]
    whh1 = whh1_ref[...]            # bf16, MXU operand
    wih2 = wih2_ref[...]            # bf16
    whh2 = whh2_ref[...]            # bf16
    b2 = b2_ref[...]

    def sig(x):
        # sigmoid(z) with the 0.5 pre-scale already folded into x = 0.5*z:
        # one EUP tanh, no extra VPU multiply on the serial chain.
        return 0.5 * jnp.tanh(x) + 0.5

    h1 = jnp.zeros((Bt, H1), jnp.float32)
    c1 = jnp.zeros((Bt, H1), jnp.float32)
    h2 = jnp.zeros((Bt, H2), jnp.float32)
    c2 = jnp.zeros((Bt, H2), jnp.float32)

    # T is small and static -> full unroll.  Layer-2 step t is independent of
    # layer-1 step t+1, so the straight-line code lets the scheduler overlap
    # the two serial chains.
    for t in range(T):
        # ---- layer-1 step t ------------------------------------------------
        # D_in == 1: the input projection is a VPU broadcast-multiply (no MXU)
        # and does not depend on the recurrence (hoistable by the scheduler).
        pre1 = x_ref[:, t:t + 1] * wih1 + b1                      # (Bt, 4*H1)
        g1 = jnp.dot(h1.astype(jnp.bfloat16), whh1,
                     preferred_element_type=jnp.float32) + pre1
        i1 = sig(g1[:, 0 * H1:1 * H1])
        f1 = sig(g1[:, 1 * H1:2 * H1])
        gg1 = jnp.tanh(g1[:, 2 * H1:3 * H1])
        o1 = sig(g1[:, 3 * H1:4 * H1])
        c1 = f1 * c1 + i1 * gg1
        h1 = o1 * jnp.tanh(c1)

        # ---- layer-2 step t (consumes h1[t]) --------------------------------
        h1b = h1.astype(jnp.bfloat16)
        pre2 = jnp.dot(h1b, wih2, preferred_element_type=jnp.float32) + b2
        g2 = jnp.dot(h2.astype(jnp.bfloat16), whh2,
                     preferred_element_type=jnp.float32) + pre2
        # Gate blocks are 128-lane padded; slices start at 128-aligned offsets
        # and take only the 64 real lanes, so padded lanes are never read.
        i2 = sig(g2[:, 0 * G2:0 * G2 + H2])
        f2 = sig(g2[:, 1 * G2:1 * G2 + H2])
        gg2 = jnp.tanh(g2[:, 2 * G2:2 * G2 + H2])
        o2 = sig(g2[:, 3 * G2:3 * G2 + H2])
        c2 = f2 * c2 + i2 * gg2
        h2 = o2 * jnp.tanh(c2)

    # ---- head on the last hidden state: Linear -> ReLU -> Linear ------------
    z = jnp.maximum(
        jnp.dot(h2.astype(jnp.bfloat16), w3_ref[...],
                preferred_element_type=jnp.float32) + b3_ref[...], 0.0)
    out_ref[...] = (jnp.dot(z, wo_ref[...],
                            preferred_element_type=jnp.float32) + bo_ref[...])


# ----------------------------------------------------------------------------
# Weight preparation: transpose torch layout, fuse biases, fold the 0.5
# sigmoid pre-scale into the i/f/o gate blocks, pad each gate block to
# `gate_pad` lanes.  Padded columns / bias lanes are zero (and the kernel
# never reads padded gate lanes anyway, so padding is purely for alignment).
# ----------------------------------------------------------------------------
def _prep_lstm_weights(w_ih, w_hh, b_ih, b_hh, gate_pad):
    # torch shapes: w_ih (4H, D), w_hh (4H, H), biases (4H,), gate order ifgo
    H = w_hh.shape[1]
    D = w_ih.shape[1]
    scale = jnp.asarray(_GATE_SCALE, jnp.float32)
    w_ih_t = jnp.asarray(w_ih, jnp.float32).T.reshape(D, 4, H) * scale.reshape(1, 4, 1)
    w_hh_t = jnp.asarray(w_hh, jnp.float32).T.reshape(H, 4, H) * scale.reshape(1, 4, 1)
    b = ((jnp.asarray(b_ih, jnp.float32) + jnp.asarray(b_hh, jnp.float32))
         .reshape(4, H) * scale.reshape(4, 1))
    pad = gate_pad - H
    w_ih_p = jnp.pad(w_ih_t, ((0, 0), (0, 0), (0, pad))).reshape(D, 4 * gate_pad)
    w_hh_p = jnp.pad(w_hh_t, ((0, 0), (0, 0), (0, pad))).reshape(H, 4 * gate_pad)
    b_p = jnp.pad(b, ((0, 0), (0, pad))).reshape(1, 4 * gate_pad)
    return w_ih_p, w_hh_p, b_p


# ----------------------------------------------------------------------------
# Full model forward (single pallas_call, batch-tiled grid)
# ----------------------------------------------------------------------------
def lstm_model_forward(x, params, l, p):
    assert l == 1, "nn.LSTM(1, 128) requires feature size l == 1"
    B = x.shape[0]
    x = x.reshape(B, -1, l).astype(jnp.float32)          # (B, T, 1)
    T = x.shape[1]

    H1, H2, G2, FEAT = 128, 64, _LANE, 16

    # batch tiling: <= _MAX_BATCH_TILE padded rows per grid program, so both
    # v7x TensorCores get work and per-program VMEM never scales with batch.
    bt = min(_MAX_BATCH_TILE, _round_up(max(B, 1), _SUBLANE))
    Bp = _round_up(B, bt)
    x_bt = jnp.pad(x[..., 0], ((0, Bp - B), (0, 0)))     # (Bp, T), batch-major

    wih1, whh1, b1 = _prep_lstm_weights(*params["l1"], gate_pad=H1)
    wih2, whh2, b2 = _prep_lstm_weights(*params["l2"], gate_pad=G2)
    # bf16 only for MXU operands (exact: 0.5 scale is a power of two);
    # biases and the layer-1 VPU input projection stay f32.
    whh1 = whh1.astype(jnp.bfloat16)
    wih2 = wih2.astype(jnp.bfloat16)
    whh2 = whh2.astype(jnp.bfloat16)
    w3 = jnp.asarray(params["l3"][0], jnp.float32).T.astype(jnp.bfloat16)  # (64,16)
    b3 = jnp.asarray(params["l3"][1], jnp.float32).reshape(1, FEAT)
    wo = jnp.asarray(params["out"][0], jnp.float32).T                      # (16, p)
    bo = jnp.asarray(params["out"][1], jnp.float32).reshape(1, p)

    kernel = functools.partial(_fused_lstm_kernel, T)

    out = pl.pallas_call(
        kernel,
        out_shape=jax.ShapeDtypeStruct((Bp, p), jnp.float32),
        grid=(Bp // bt,),
        in_specs=[
            pl.BlockSpec((bt, T), lambda i: (i, 0)),          # x (batch tile)
            pl.BlockSpec((1, 4 * H1), lambda i: (0, 0)),      # wih1
            pl.BlockSpec((H1, 4 * H1), lambda i: (0, 0)),     # whh1 (bf16)
            pl.BlockSpec((1, 4 * H1), lambda i: (0, 0)),      # b1
            pl.BlockSpec((H1, 4 * G2), lambda i: (0, 0)),     # wih2 (bf16)
            pl.BlockSpec((H2, 4 * G2), lambda i: (0, 0)),     # whh2 (bf16, K=64)
            pl.BlockSpec((1, 4 * G2), lambda i: (0, 0)),      # b2
            pl.BlockSpec((H2, FEAT), lambda i: (0, 0)),       # w3 (bf16)
            pl.BlockSpec((1, FEAT), lambda i: (0, 0)),        # b3
            pl.BlockSpec((FEAT, p), lambda i: (0, 0)),        # wo
            pl.BlockSpec((1, p), lambda i: (0, 0)),           # bo
        ],
        out_specs=pl.BlockSpec((bt, p), lambda i: (i, 0)),
        compiler_params=pltpu.CompilerParams(
            dimension_semantics=("parallel",)),
    )(x_bt, wih1, whh1, b1, wih2, whh2, b2, w3, b3, wo, bo)

    return out[:B].reshape(B, -1, p)                     # (B, 1, p)


# ----------------------------------------------------------------------------
# Pure-JAX reference (mirrors PyTorch semantics) for a correctness check
# ----------------------------------------------------------------------------
def _lstm_ref(x_btd, w_ih, w_hh, b_ih, b_hh):
    B, _, _ = x_btd.shape
    H = w_hh.shape[1]
    w_ih_t = jnp.asarray(w_ih, jnp.float32).T
    w_hh_t = jnp.asarray(w_hh, jnp.float32).T
    b = jnp.asarray(b_ih, jnp.float32) + jnp.asarray(b_hh, jnp.float32)

    def step(carry, x_t):
        h, c = carry
        g = x_t @ w_ih_t + h @ w_hh_t + b
        i, f, gg, o = jnp.split(g, 4, axis=-1)
        i, f, o = jax.nn.sigmoid(i), jax.nn.sigmoid(f), jax.nn.sigmoid(o)
        gg = jnp.tanh(gg)
        c = f * c + i * gg
        h = o * jnp.tanh(c)
        return (h, c), h

    h0 = jnp.zeros((B, H), jnp.float32)
    (_, _), hs = lax.scan(step, (h0, h0), jnp.transpose(x_btd, (1, 0, 2)))
    return jnp.transpose(hs, (1, 0, 2))                  # (B, T, H)


def lstm_model_reference(x, params, l, p):
    B = x.shape[0]
    x = x.reshape(B, -1, l).astype(jnp.float32)
    h1 = _lstm_ref(x, *params["l1"])
    h2 = _lstm_ref(h1, *params["l2"])
    w3, b3 = params["l3"]
    wo, bo = params["out"]
    z = jnp.maximum(h2 @ jnp.asarray(w3, jnp.float32).T + b3, 0.0)
    out = z[:, -1, :] @ jnp.asarray(wo, jnp.float32).T + bo
    return out.reshape(B, -1, p)


# ----------------------------------------------------------------------------
# Deterministic parameter init (shapes follow torch nn.LSTM / nn.Linear)
# ----------------------------------------------------------------------------
def init_params(key, p):
    def uni(k, shape, scale):
        return jax.random.uniform(k, shape, jnp.float32, -scale, scale)

    ks = jax.random.split(key, 12)
    H1, H2, FEAT = 128, 64, 16
    s1, s2 = 1.0 / jnp.sqrt(H1), 1.0 / jnp.sqrt(H2)
    s3, so = 1.0 / jnp.sqrt(H2), 1.0 / jnp.sqrt(FEAT)
    return {
        "l1": (uni(ks[0], (4 * H1, 1), s1),    # weight_ih_l0
               uni(ks[1], (4 * H1, H1), s1),   # weight_hh_l0
               uni(ks[2], (4 * H1,), s1),      # bias_ih_l0
               uni(ks[3], (4 * H1,), s1)),     # bias_hh_l0
        "l2": (uni(ks[4], (4 * H2, H1), s2),
               uni(ks[5], (4 * H2, H2), s2),
               uni(ks[6], (4 * H2,), s2),
               uni(ks[7], (4 * H2,), s2)),
        "l3": (uni(ks[8], (FEAT, H2), s3),     # Linear(64, 16) weight
               uni(ks[9], (FEAT,), s3)),       # bias
        "out": (uni(ks[10], (p, FEAT), so),    # Linear(16, p) weight
                uni(ks[11], (p,), so)),        # bias
    }


if __name__ == "__main__":
    l = 1   # nn.LSTM(1, 128) requires feature size 1
    p = 4   # output size

    key = jax.random.PRNGKey(0)
    k_param, k_x = jax.random.split(key)
    params = init_params(k_param, p)

    # Small input: batch=2, 16 scalar time steps -> reshaped to (2, 16, 1)
    x = jax.random.normal(k_x, (2, 16), jnp.float32)

    fwd = jax.jit(functools.partial(lstm_model_forward, params=params, l=l, p=p))
    y = fwd(x)
    jax.block_until_ready(y)

    assert y.shape == (2, 1, p), y.shape
    assert bool(jnp.all(jnp.isfinite(y)))

    # Tolerance accounts for the intentional bf16 MXU operands (f32 accum);
    # state and gate math stay f32, so the error stays well below this.
    y_ref = lstm_model_reference(x, params, l, p)
    assert bool(jnp.allclose(y, y_ref, atol=2e-2, rtol=2e-2)), (
        "mismatch vs reference", y, y_ref)

    print("KERNEL_OK")
</pallas_src>

<mosaic_0001>
module attributes {stable_mosaic.version = 11 : i64} {
  func.func @_fused_lstm_kernel(%arg0: i32, %arg1: memref<8x16xf32, #tpu.memory_space<vmem>>, %arg2: memref<1x512xf32, #tpu.memory_space<vmem>>, %arg3: memref<128x512xbf16, #tpu.memory_space<vmem>>, %arg4: memref<1x512xf32, #tpu.memory_space<vmem>>, %arg5: memref<128x512xbf16, #tpu.memory_space<vmem>>, %arg6: memref<64x512xbf16, #tpu.memory_space<vmem>>, %arg7: memref<1x512xf32, #tpu.memory_space<vmem>>, %arg8: memref<64x16xbf16, #tpu.memory_space<vmem>>, %arg9: memref<1x16xf32, #tpu.memory_space<vmem>>, %arg10: memref<16x4xf32, #tpu.memory_space<vmem>>, %arg11: memref<1x4xf32, #tpu.memory_space<vmem>>, %arg12: memref<8x4xf32, #tpu.memory_space<vmem>>) attributes {dimension_semantics = [#tpu.dimension_semantics<parallel>], iteration_bounds = array<i64: 1>, scalar_prefetch = 0 : i64, scratch_operands = 0 : i64, tpu.core_type = #tpu.core_type<tc>, window_params = [{transform_indices = @transform_0, window_bounds = array<i64: 8, 16>}, {pipeline_mode = #tpu.pipeline_mode<synchronous>, transform_indices = @transform_1, window_bounds = array<i64: 1, 512>}, {pipeline_mode = #tpu.pipeline_mode<synchronous>, transform_indices = @transform_2, window_bounds = array<i64: 128, 512>}, {pipeline_mode = #tpu.pipeline_mode<synchronous>, transform_indices = @transform_3, window_bounds = array<i64: 1, 512>}, {pipeline_mode = #tpu.pipeline_mode<synchronous>, transform_indices = @transform_4, window_bounds = array<i64: 128, 512>}, {pipeline_mode = #tpu.pipeline_mode<synchronous>, transform_indices = @transform_5, window_bounds = array<i64: 64, 512>}, {pipeline_mode = #tpu.pipeline_mode<synchronous>, transform_indices = @transform_6, window_bounds = array<i64: 1, 512>}, {pipeline_mode = #tpu.pipeline_mode<synchronous>, transform_indices = @transform_7, window_bounds = array<i64: 64, 16>}, {pipeline_mode = #tpu.pipeline_mode<synchronous>, transform_indices = @transform_8, window_bounds = array<i64: 1, 16>}, {pipeline_mode = #tpu.pipeline_mode<synchronous>, transform_indices = @transform_9, window_bounds = array<i64: 16, 4>}, {pipeline_mode = #tpu.pipeline_mode<synchronous>, transform_indices = @transform_10, window_bounds = array<i64: 1, 4>}, {transform_indices = @transform_11, window_bounds = array<i64: 8, 4>}]} {
    %c0 = arith.constant 0 : index
    %c0_0 = arith.constant 0 : index
    %0 = vector.load %arg2[%c0, %c0_0] : memref<1x512xf32, #tpu.memory_space<vmem>>, vector<1x512xf32>
    %c0_1 = arith.constant 0 : index
    %c0_2 = arith.constant 0 : index
    %1 = vector.load %arg4[%c0_1, %c0_2] : memref<1x512xf32, #tpu.memory_space<vmem>>, vector<1x512xf32>
    %c0_3 = arith.constant 0 : index
    %c0_4 = arith.constant 0 : index
    %2 = vector.load %arg3[%c0_3, %c0_4] : memref<128x512xbf16, #tpu.memory_space<vmem>>, vector<128x512xbf16>
    %c0_5 = arith.constant 0 : index
    %c0_6 = arith.constant 0 : index
    %3 = vector.load %arg5[%c0_5, %c0_6] : memref<128x512xbf16, #tpu.memory_space<vmem>>, vector<128x512xbf16>
    %c0_7 = arith.constant 0 : index
    %c0_8 = arith.constant 0 : index
    %4 = vector.load %arg6[%c0_7, %c0_8] : memref<64x512xbf16, #tpu.memory_space<vmem>>, vector<64x512xbf16>
    %c0_9 = arith.constant 0 : index
    %c0_10 = arith.constant 0 : index
    %5 = vector.load %arg7[%c0_9, %c0_10] : memref<1x512xf32, #tpu.memory_space<vmem>>, vector<1x512xf32>
    %cst = arith.constant 0.000000e+00 : f32
    %6 = vector.broadcast %cst : f32 to vector<8x128xf32>
    %cst_11 = arith.constant 0.000000e+00 : f32
    %7 = vector.broadcast %cst_11 : f32 to vector<8x128xf32>
    %cst_12 = arith.constant 0.000000e+00 : f32
    %8 = vector.broadcast %cst_12 : f32 to vector<8x64xf32>
    %cst_13 = arith.constant 0.000000e+00 : f32
    %9 = vector.broadcast %cst_13 : f32 to vector<8x64xf32>
    %c0_14 = arith.constant 0 : index
    %c0_15 = arith.constant 0 : index
    %10 = vector.load %arg1[%c0_14, %c0_15] : memref<8x16xf32, #tpu.memory_space<vmem>>, vector<8x1xf32>
    %11 = vector.broadcast %10 : vector<8x1xf32> to vector<8x512xf32>
    %12 = vector.broadcast %0 : vector<1x512xf32> to vector<8x512xf32>
    %13 = arith.mulf %11, %12 : vector<8x512xf32>
    %14 = vector.broadcast %1 : vector<1x512xf32> to vector<8x512xf32>
    %15 = arith.addf %13, %14 : vector<8x512xf32>
    %16 = arith.truncf %6 : vector<8x128xf32> to vector<8x128xbf16>
    %cst_16 = arith.constant dense<0.000000e+00> : vector<8x512xf32>
    %17 = tpu.matmul %16, %2, %cst_16 {dimension_numbers = #tpu.dot_dimension_numbers<[1], [0], [0], [1], [0, 0, 1, 1], [], []>} : vector<8x128xbf16>, vector<128x512xbf16>, vector<8x512xf32> -> vector<8x512xf32>
    %18 = arith.addf %17, %15 : vector<8x512xf32>
    %19 = vector.extract_strided_slice %18 {offsets = [0, 0], sizes = [8, 128], strides = [1, 1]} : vector<8x512xf32> to vector<8x128xf32>
    %20 = math.tanh %19 : vector<8x128xf32>
    %cst_17 = arith.constant 5.000000e-01 : f32
    %21 = vector.broadcast %cst_17 : f32 to vector<8x128xf32>
    %22 = arith.mulf %21, %20 : vector<8x128xf32>
    %cst_18 = arith.constant 5.000000e-01 : f32
    %23 = vector.broadcast %cst_18 : f32 to vector<8x128xf32>
    %24 = arith.addf %22, %23 : vector<8x128xf32>
    %25 = vector.extract_strided_slice %18 {offsets = [0, 128], sizes = [8, 128], strides = [1, 1]} : vector<8x512xf32> to vector<8x128xf32>
    %26 = math.tanh %25 : vector<8x128xf32>
    %cst_19 = arith.constant 5.000000e-01 : f32
    %27 = vector.broadcast %cst_19 : f32 to vector<8x128xf32>
    %28 = arith.mulf %27, %26 : vector<8x128xf32>
    %cst_20 = arith.constant 5.000000e-01 : f32
    %29 = vector.broadcast %cst_20 : f32 to vector<8x128xf32>
    %30 = arith.addf %28, %29 : vector<8x128xf32>
    %31 = vector.extract_strided_slice %18 {offsets = [0, 256], sizes = [8, 128], strides = [1, 1]} : vector<8x512xf32> to vector<8x128xf32>
    %32 = math.tanh %31 : vector<8x128xf32>
    %33 = vector.extract_strided_slice %18 {offsets = [0, 384], sizes = [8, 128], strides = [1, 1]} : vector<8x512xf32> to vector<8x128xf32>
    %34 = math.tanh %33 : vector<8x128xf32>
    %cst_21 = arith.constant 5.000000e-01 : f32
    %35 = vector.broadcast %cst_21 : f32 to vector<8x128xf32>
    %36 = arith.mulf %35, %34 : vector<8x128xf32>
    %cst_22 = arith.constant 5.000000e-01 : f32
    %37 = vector.broadcast %cst_22 : f32 to vector<8x128xf32>
    %38 = arith.addf %36, %37 : vector<8x128xf32>
    %39 = arith.mulf %30, %7 : vector<8x128xf32>
    %40 = arith.mulf %24, %32 : vector<8x128xf32>
    %41 = arith.addf %39, %40 : vector<8x128xf32>
    %42 = math.tanh %41 : vector<8x128xf32>
    %43 = arith.mulf %38, %42 : vector<8x128xf32>
    %44 = arith.truncf %43 : vector<8x128xf32> to vector<8x128xbf16>
    %cst_23 = arith.constant dense<0.000000e+00> : vector<8x512xf32>
    %45 = tpu.matmul %44, %3, %cst_23 {dimension_numbers = #tpu.dot_dimension_numbers<[1], [0], [0], [1], [0, 0, 1, 1], [], []>} : vector<8x128xbf16>, vector<128x512xbf16>, vector<8x512xf32> -> vector<8x512xf32>
    %46 = vector.broadcast %5 : vector<1x512xf32> to vector<8x512xf32>
    %47 = arith.addf %45, %46 : vector<8x512xf32>
    %48 = arith.truncf %8 : vector<8x64xf32> to vector<8x64xbf16>
    %cst_24 = arith.constant dense<0.000000e+00> : vector<8x512xf32>
    %49 = tpu.matmul %48, %4, %cst_24 {dimension_numbers = #tpu.dot_dimension_numbers<[1], [0], [0], [1], [0, 0, 1, 1], [], []>} : vector<8x64xbf16>, vector<64x512xbf16>, vector<8x512xf32> -> vector<8x512xf32>
    %50 = arith.addf %49, %47 : vector<8x512xf32>
    %51 = vector.extract_strided_slice %50 {offsets = [0, 0], sizes = [8, 64], strides = [1, 1]} : vector<8x512xf32> to vector<8x64xf32>
    %52 = math.tanh %51 : vector<8x64xf32>
    %cst_25 = arith.constant 5.000000e-01 : f32
    %53 = vector.broadcast %cst_25 : f32 to vector<8x64xf32>
    %54 = arith.mulf %53, %52 : vector<8x64xf32>
    %cst_26 = arith.constant 5.000000e-01 : f32
    %55 = vector.broadcast %cst_26 : f32 to vector<8x64xf32>
    %56 = arith.addf %54, %55 : vector<8x64xf32>
    %57 = vector.extract_strided_slice %50 {offsets = [0, 128], sizes = [8, 64], strides = [1, 1]} : vector<8x512xf32> to vector<8x64xf32>
    %58 = math.tanh %57 : vector<8x64xf32>
    %cst_27 = arith.constant 5.000000e-01 : f32
    %59 = vector.broadcast %cst_27 : f32 to vector<8x64xf32>
    %60 = arith.mulf %59, %58 : vector<8x64xf32>
    %cst_28 = arith.constant 5.000000e-01 : f32
    %61 = vector.broadcast %cst_28 : f32 to vector<8x64xf32>
    %62 = arith.addf %60, %61 : vector<8x64xf32>
    %63 = vector.extract_strided_slice %50 {offsets = [0, 256], sizes = [8, 64], strides = [1, 1]} : vector<8x512xf32> to vector<8x64xf32>
    %64 = math.tanh %63 : vector<8x64xf32>
    %65 = vector.extract_strided_slice %50 {offsets = [0, 384], sizes = [8, 64], strides = [1, 1]} : vector<8x512xf32> to vector<8x64xf32>
    %66 = math.tanh %65 : vector<8x64xf32>
    %cst_29 = arith.constant 5.000000e-01 : f32
    %67 = vector.broadcast %cst_29 : f32 to vector<8x64xf32>
    %68 = arith.mulf %67, %66 : vector<8x64xf32>
    %cst_30 = arith.constant 5.000000e-01 : f32
    %69 = vector.broadcast %cst_30 : f32 to vector<8x64xf32>
    %70 = arith.addf %68, %69 : vector<8x64xf32>
    %71 = arith.mulf %62, %9 : vector<8x64xf32>
    %72 = arith.mulf %56, %64 : vector<8x64xf32>
    %73 = arith.addf %71, %72 : vector<8x64xf32>
    %74 = math.tanh %73 : vector<8x64xf32>
    %75 = arith.mulf %70, %74 : vector<8x64xf32>
    %c0_31 = arith.constant 0 : index
    %c1 = arith.constant 1 : index
    %76 = vector.load %arg1[%c0_31, %c1] : memref<8x16xf32, #tpu.memory_space<vmem>>, vector<8x1xf32>
    %77 = vector.broadcast %76 : vector<8x1xf32> to vector<8x512xf32>
    %78 = vector.broadcast %0 : vector<1x512xf32> to vector<8x512xf32>
    %79 = arith.mulf %77, %78 : vector<8x512xf32>
    %80 = vector.broadcast %1 : vector<1x512xf32> to vector<8x512xf32>
    %81 = arith.addf %79, %80 : vector<8x512xf32>
    %82 = arith.truncf %43 : vector<8x128xf32> to vector<8x128xbf16>
    %cst_32 = arith.constant dense<0.000000e+00> : vector<8x512xf32>
    %83 = tpu.matmul %82, %2, %cst_32 {dimension_numbers = #tpu.dot_dimension_numbers<[1], [0], [0], [1], [0, 0, 1, 1], [], []>} : vector<8x128xbf16>, vector<128x512xbf16>, vector<8x512xf32> -> vector<8x512xf32>
    %84 = arith.addf %83, %81 : vector<8x512xf32>
    %85 = vector.extract_strided_slice %84 {offsets = [0, 0], sizes = [8, 128], strides = [1, 1]} : vector<8x512xf32> to vector<8x128xf32>
    %86 = math.tanh %85 : vector<8x128xf32>
    %cst_33 = arith.constant 5.000000e-01 : f32
    %87 = vector.broadcast %cst_33 : f32 to vector<8x128xf32>
    %88 = arith.mulf %87, %86 : vector<8x128xf32>
    %cst_34 = arith.constant 5.000000e-01 : f32
    %89 = vector.broadcast %cst_34 : f32 to vector<8x128xf32>
    %90 = arith.addf %88, %89 : vector<8x128xf32>
    %91 = vector.extract_strided_slice %84 {offsets = [0, 128], sizes = [8, 128], strides = [1, 1]} : vector<8x512xf32> to vector<8x128xf32>
    %92 = math.tanh %91 : vector<8x128xf32>
    %cst_35 = arith.constant 5.000000e-01 : f32
    %93 = vector.broadcast %cst_35 : f32 to vector<8x128xf32>
    %94 = arith.mulf %93, %92 : vector<8x128xf32>
    %cst_36 = arith.constant 5.000000e-01 : f32
    %95 = vector.broadcast %cst_36 : f32 to vector<8x128xf32>
    %96 = arith.addf %94, %95 : vector<8x128xf32>
    %97 = vector.extract_strided_slice %84 {offsets = [0, 256], sizes = [8, 128], strides = [1, 1]} : vector<8x512xf32> to vector<8x128xf32>
    %98 = math.tanh %97 : vector<8x128xf32>
    %99 = vector.extract_strided_slice %84 {offsets = [0, 384], sizes = [8, 128], strides = [1, 1]} : vector<8x512xf32> to vector<8x128xf32>
    %100 = math.tanh %99 : vector<8x128xf32>
    %cst_37 = arith.constant 5.000000e-01 : f32
    %101 = vector.broadcast %cst_37 : f32 to vector<8x128xf32>
    %102 = arith.mulf %101, %100 : vector<8x128xf32>
    %cst_38 = arith.constant 5.000000e-01 : f32
    %103 = vector.broadcast %cst_38 : f32 to vector<8x128xf32>
    %104 = arith.addf %102, %103 : vector<8x128xf32>
    %105 = arith.mulf %96, %41 : vector<8x128xf32>
    %106 = arith.mulf %90, %98 : vector<8x128xf32>
    %107 = arith.addf %105, %106 : vector<8x128xf32>
    %108 = math.tanh %107 : vector<8x128xf32>
    %109 = arith.mulf %104, %108 : vector<8x128xf32>
    %110 = arith.truncf %109 : vector<8x128xf32> to vector<8x128xbf16>
    %cst_39 = arith.constant dense<0.000000e+00> : vector<8x512xf32>
    %111 = tpu.matmul %110, %3, %cst_39 {dimension_numbers = #tpu.dot_dimension_numbers<[1], [0], [0], [1], [0, 0, 1, 1], [], []>} : vector<8x128xbf16>, vector<128x512xbf16>, vector<8x512xf32> -> vector<8x512xf32>
    %112 = vector.broadcast %5 : vector<1x512xf32> to vector<8x512xf32>
    %113 = arith.addf %111, %112 : vector<8x512xf32>
    %114 = arith.truncf %75 : vector<8x64xf32> to vector<8x64xbf16>
    %cst_40 = arith.constant dense<0.000000e+00> : vector<8x512xf32>
    %115 = tpu.matmul %114, %4, %cst_40 {dimension_numbers = #tpu.dot_dimension_numbers<[1], [0], [0], [1], [0, 0, 1, 1], [], []>} : vector<8x64xbf16>, vector<64x512xbf16>, vector<8x512xf32> -> vector<8x512xf32>
    %116 = arith.addf %115, %113 : vector<8x512xf32>
    %117 = vector.extract_strided_slice %116 {offsets = [0, 0], sizes = [8, 64], strides = [1, 1]} : vector<8x512xf32> to vector<8x64xf32>
    %118 = math.tanh %117 : vector<8x64xf32>
    %cst_41 = arith.constant 5.000000e-01 : f32
    %119 = vector.broadcast %cst_41 : f32 to vector<8x64xf32>
    %120 = arith.mulf %119, %118 : vector<8x64xf32>
    %cst_42 = arith.constant 5.000000e-01 : f32
    %121 = vector.broadcast %cst_42 : f32 to vector<8x64xf32>
    %122 = arith.addf %120, %121 : vector<8x64xf32>
    %123 = vector.extract_strided_slice %116 {offsets = [0, 128], sizes = [8, 64], strides = [1, 1]} : vector<8x512xf32> to vector<8x64xf32>
    %124 = math.tanh %123 : vector<8x64xf32>
    %cst_43 = arith.constant 5.000000e-01 : f32
    %125 = vector.broadcast %cst_43 : f32 to vector<8x64xf32>
    %126 = arith.mulf %125, %124 : vector<8x64xf32>
    %cst_44 = arith.constant 5.000000e-01 : f32
    %127 = vector.broadcast %cst_44 : f32 to vector<8x64xf32>
    %128 = arith.addf %126, %127 : vector<8x64xf32>
    %129 = vector.extract_strided_slice %116 {offsets = [0, 256], sizes = [8, 64], strides = [1, 1]} : vector<8x512xf32> to vector<8x64xf32>
    %130 = math.tanh %129 : vector<8x64xf32>
    %131 = vector.extract_strided_slice %116 {offsets = [0, 384], sizes = [8, 64], strides = [1, 1]} : vector<8x512xf32> to vector<8x64xf32>
    %132 = math.tanh %131 : vector<8x64xf32>
    %cst_45 = arith.constant 5.000000e-01 : f32
    %133 = vector.broadcast %cst_45 : f32 to vector<8x64xf32>
    %134 = arith.mulf %133, %132 : vector<8x64xf32>
    %cst_46 = arith.constant 5.000000e-01 : f32
    %135 = vector.broadcast %cst_46 : f32 to vector<8x64xf32>
    %136 = arith.addf %134, %135 : vector<8x64xf32>
    %137 = arith.mulf %128, %73 : vector<8x64xf32>
    %138 = arith.mulf %122, %130 : vector<8x64xf32>
    %139 = arith.addf %137, %138 : vector<8x64xf32>
    %140 = math.tanh %139 : vector<8x64xf32>
    %141 = arith.mulf %136, %140 : vector<8x64xf32>
    %c0_47 = arith.constant 0 : index
    %c2 = arith.constant 2 : index
    %142 = vector.load %arg1[%c0_47, %c2] : memref<8x16xf32, #tpu.memory_space<vmem>>, vector<8x1xf32>
    %143 = vector.broadcast %142 : vector<8x1xf32> to vector<8x512xf32>
    %144 = vector.broadcast %0 : vector<1x512xf32> to vector<8x512xf32>
    %145 = arith.mulf %143, %144 : vector<8x512xf32>
    %146 = vector.broadcast %1 : vector<1x512xf32> to vector<8x512xf32>
    %147 = arith.addf %145, %146 : vector<8x512xf32>
    %148 = arith.truncf %109 : vector<8x128xf32> to vector<8x128xbf16>
    %cst_48 = arith.constant dense<0.000000e+00> : vector<8x512xf32>
    %149 = tpu.matmul %148, %2, %cst_48 {dimension_numbers = #tpu.dot_dimension_numbers<[1], [0], [0], [1], [0, 0, 1, 1], [], []>} : vector<8x128xbf16>, vector<128x512xbf16>, vector<8x512xf32> -> vector<8x512xf32>
    %150 = arith.addf %149, %147 : vector<8x512xf32>
    %151 = vector.extract_strided_slice %150 {offsets = [0, 0], sizes = [8, 128], strides = [1, 1]} : vector<8x512xf32> to vector<8x128xf32>
    %152 = math.tanh %151 : vector<8x128xf32>
    %cst_49 = arith.constant 5.000000e-01 : f32
    %153 = vector.broadcast %cst_49 : f32 to vector<8x128xf32>
    %154 = arith.mulf %153, %152 : vector<8x128xf32>
    %cst_50 = arith.constant 5.000000e-01 : f32
    %155 = vector.broadcast %cst_50 : f32 to vector<8x128xf32>
    %156 = arith.addf %154, %155 : vector<8x128xf32>
    %157 = vector.extract_strided_slice %150 {offsets = [0, 128], sizes = [8, 128], strides = [1, 1]} : vector<8x512xf32> to vector<8x128xf32>
    %158 = math.tanh %157 : vector<8x128xf32>
    %cst_51 = arith.constant 5.000000e-01 : f32
    %159 = vector.broadcast %cst_51 : f32 to vector<8x128xf32>
    %160 = arith.mulf %159, %158 : vector<8x128xf32>
    %cst_52 = arith.constant 5.000000e-01 : f32
    %161 = vector.broadcast %cst_52 : f32 to vector<8x128xf32>
    %162 = arith.addf %160, %161 : vector<8x128xf32>
    %163 = vector.extract_strided_slice %150 {offsets = [0, 256], sizes = [8, 128], strides = [1, 1]} : vector<8x512xf32> to vector<8x128xf32>
    %164 = math.tanh %163 : vector<8x128xf32>
    %165 = vector.extract_strided_slice %150 {offsets = [0, 384], sizes = [8, 128], strides = [1, 1]} : vector<8x512xf32> to vector<8x128xf32>
    %166 = math.tanh %165 : vector<8x128xf32>
    %cst_53 = arith.constant 5.000000e-01 : f32
    %167 = vector.broadcast %cst_53 : f32 to vector<8x128xf32>
    %168 = arith.mulf %167, %166 : vector<8x128xf32>
    %cst_54 = arith.constant 5.000000e-01 : f32
    %169 = vector.broadcast %cst_54 : f32 to vector<8x128xf32>
    %170 = arith.addf %168, %169 : vector<8x128xf32>
    %171 = arith.mulf %162, %107 : vector<8x128xf32>
    %172 = arith.mulf %156, %164 : vector<8x128xf32>
    %173 = arith.addf %171, %172 : vector<8x128xf32>
    %174 = math.tanh %173 : vector<8x128xf32>
    %175 = arith.mulf %170, %174 : vector<8x128xf32>
    %176 = arith.truncf %175 : vector<8x128xf32> to vector<8x128xbf16>
    %cst_55 = arith.constant dense<0.000000e+00> : vector<8x512xf32>
    %177 = tpu.matmul %176, %3, %cst_55 {dimension_numbers = #tpu.dot_dimension_numbers<[1], [0], [0], [1], [0, 0, 1, 1], [], []>} : vector<8x128xbf16>, vector<128x512xbf16>, vector<8x512xf32> -> vector<8x512xf32>
    %178 = vector.broadcast %5 : vector<1x512xf32> to vector<8x512xf32>
    %179 = arith.addf %177, %178 : vector<8x512xf32>
    %180 = arith.truncf %141 : vector<8x64xf32> to vector<8x64xbf16>
    %cst_56 = arith.constant dense<0.000000e+00> : vector<8x512xf32>
    %181 = tpu.matmul %180, %4, %cst_56 {dimension_numbers = #tpu.dot_dimension_numbers<[1], [0], [0], [1], [0, 0, 1, 1], [], []>} : vector<8x64xbf16>, vector<64x512xbf16>, vector<8x512xf32> -> vector<8x512xf32>
    %182 = arith.addf %181, %179 : vector<8x512xf32>
    %183 = vector.extract_strided_slice %182 {offsets = [0, 0], sizes = [8, 64], strides = [1, 1]} : vector<8x512xf32> to vector<8x64xf32>
    %184 = math.tanh %183 : vector<8x64xf32>
    %cst_57 = arith.constant 5.000000e-01 : f32
    %185 = vector.broadcast %cst_57 : f32 to vector<8x64xf32>
    %186 = arith.mulf %185, %184 : vector<8x64xf32>
    %cst_58 = arith.constant 5.000000e-01 : f32
    %187 = vector.broadcast %cst_58 : f32 to vector<8x64xf32>
    %188 = arith.addf %186, %187 : vector<8x64xf32>
    %189 = vector.extract_strided_slice %182 {offsets = [0, 128], sizes = [8, 64], strides = [1, 1]} : vector<8x512xf32> to vector<8x64xf32>
    %190 = math.tanh %189 : vector<8x64xf32>
    %cst_59 = arith.constant 5.000000e-01 : f32
    %191 = vector.broadcast %cst_59 : f32 to vector<8x64xf32>
    %192 = arith.mulf %191, %190 : vector<8x64xf32>
    %cst_60 = arith.constant 5.000000e-01 : f32
    %193 = vector.broadcast %cst_60 : f32 to vector<8x64xf32>
    %194 = arith.addf %192, %193 : vector<8x64xf32>
    %195 = vector.extract_strided_slice %182 {offsets = [0, 256], sizes = [8, 64], strides = [1, 1]} : vector<8x512xf32> to vector<8x64xf32>
    %196 = math.tanh %195 : vector<8x64xf32>
    %197 = vector.extract_strided_slice %182 {offsets = [0, 384], sizes = [8, 64], strides = [1, 1]} : vector<8x512xf32> to vector<8x64xf32>
    %198 = math.tanh %197 : vector<8x64xf32>
    %cst_61 = arith.constant 5.000000e-01 : f32
    %199 = vector.broadcast %cst_61 : f32 to vector<8x64xf32>
    %200 = arith.mulf %199, %198 : vector<8x64xf32>
    %cst_62 = arith.constant 5.000000e-01 : f32
    %201 = vector.broadcast %cst_62 : f32 to vector<8x64xf32>
    %202 = arith.addf %200, %201 : vector<8x64xf32>
    %203 = arith.mulf %194, %139 : vector<8x64xf32>
    %204 = arith.mulf %188, %196 : vector<8x64xf32>
    %205 = arith.addf %203, %204 : vector<8x64xf32>
    %206 = math.tanh %205 : vector<8x64xf32>
    %207 = arith.mulf %202, %206 : vector<8x64xf32>
    %c0_63 = arith.constant 0 : index
    %c3 = arith.constant 3 : index
    %208 = vector.load %arg1[%c0_63, %c3] : memref<8x16xf32, #tpu.memory_space<vmem>>, vector<8x1xf32>
    %209 = vector.broadcast %208 : vector<8x1xf32> to vector<8x512xf32>
    %210 = vector.broadcast %0 : vector<1x512xf32> to vector<8x512xf32>
    %211 = arith.mulf %209, %210 : vector<8x512xf32>
    %212 = vector.broadcast %1 : vector<1x512xf32> to vector<8x512xf32>
    %213 = arith.addf %211, %212 : vector<8x512xf32>
    %214 = arith.truncf %175 : vector<8x128xf32> to vector<8x128xbf16>
    %cst_64 = arith.constant dense<0.000000e+00> : vector<8x512xf32>
    %215 = tpu.matmul %214, %2, %cst_64 {dimension_numbers = #tpu.dot_dimension_numbers<[1], [0], [0], [1], [0, 0, 1, 1], [], []>} : vector<8x128xbf16>, vector<128x512xbf16>, vector<8x512xf32> -> vector<8x512xf32>
    %216 = arith.addf %215, %213 : vector<8x512xf32>
    %217 = vector.extract_strided_slice %216 {offsets = [0, 0], sizes = [8, 128], strides = [1, 1]} : vector<8x512xf32> to vector<8x128xf32>
    %218 = math.tanh %217 : vector<8x128xf32>
    %cst_65 = arith.constant 5.000000e-01 : f32
    %219 = vector.broadcast %cst_65 : f32 to vector<8x128xf32>
    %220 = arith.mulf %219, %218 : vector<8x128xf32>
    %cst_66 = arith.constant 5.000000e-01 : f32
    %221 = vector.broadcast %cst_66 : f32 to vector<8x128xf32>
    %222 = arith.addf %220, %221 : vector<8x128xf32>
    %223 = vector.extract_strided_slice %216 {offsets = [0, 128], sizes = [8, 128], strides = [1, 1]} : vector<8x512xf32> to vector<8x128xf32>
    %224 = math.tanh %223 : vector<8x128xf32>
    %cst_67 = arith.constant 5.000000e-01 : f32
    %225 = vector.broadcast %cst_67 : f32 to vector<8x128xf32>
    %226 = arith.mulf %225, %224 : vector<8x128xf32>
    %cst_68 = arith.constant 5.000000e-01 : f32
    %227 = vector.broadcast %cst_68 : f32 to vector<8x128xf32>
    %228 = arith.addf %226, %227 : vector<8x128xf32>
    %229 = vector.extract_strided_slice %216 {offsets = [0, 256], sizes = [8, 128], strides = [1, 1]} : vector<8x512xf32> to vector<8x128xf32>
    %230 = math.tanh %229 : vector<8x128xf32>
    %231 = vector.extract_strided_slice %216 {offsets = [0, 384], sizes = [8, 128], strides = [1, 1]} : vector<8x512xf32> to vector<8x128xf32>
    %232 = math.tanh %231 : vector<8x128xf32>
    %cst_69 = arith.constant 5.000000e-01 : f32
    %233 = vector.broadcast %cst_69 : f32 to vector<8x128xf32>
    %234 = arith.mulf %233, %232 : vector<8x128xf32>
    %cst_70 = arith.constant 5.000000e-01 : f32
    %235 = vector.broadcast %cst_70 : f32 to vector<8x128xf32>
    %236 = arith.addf %234, %235 : vector<8x128xf32>
    %237 = arith.mulf %228, %173 : vector<8x128xf32>
    %238 = arith.mulf %222, %230 : vector<8x128xf32>
    %239 = arith.addf %237, %238 : vector<8x128xf32>
    %240 = math.tanh %239 : vector<8x128xf32>
    %241 = arith.mulf %236, %240 : vector<8x128xf32>
    %242 = arith.truncf %241 : vector<8x128xf32> to vector<8x128xbf16>
    %cst_71 = arith.constant dense<0.000000e+00> : vector<8x512xf32>
    %243 = tpu.matmul %242, %3, %cst_71 {dimension_numbers = #tpu.dot_dimension_numbers<[1], [0], [0], [1], [0, 0, 1, 1], [], []>} : vector<8x128xbf16>, vector<128x512xbf16>, vector<8x512xf32> -> vector<8x512xf32>
    %244 = vector.broadcast %5 : vector<1x512xf32> to vector<8x512xf32>
    %245 = arith.addf %243, %244 : vector<8x512xf32>
    %246 = arith.truncf %207 : vector<8x64xf32> to vector<8x64xbf16>
    %cst_72 = arith.constant dense<0.000000e+00> : vector<8x512xf32>
    %247 = tpu.matmul %246, %4, %cst_72 {dimension_numbers = #tpu.dot_dimension_numbers<[1], [0], [0], [1], [0, 0, 1, 1], [], []>} : vector<8x64xbf16>, vector<64x512xbf16>, vector<8x512xf32> -> vector<8x512xf32>
    %248 = arith.addf %247, %245 : vector<8x512xf32>
    %249 = vector.extract_strided_slice %248 {offsets = [0, 0], sizes = [8, 64], strides = [1, 1]} : vector<8x512xf32> to vector<8x64xf32>
    %250 = math.tanh %249 : vector<8x64xf32>
    %cst_73 = arith.constant 5.000000e-01 : f32
    %251 = vector.broadcast %cst_73 : f32 to vector<8x64xf32>
    %252 = arith.mulf %251, %250 : vector<8x64xf32>
    %cst_74 = arith.constant 5.000000e-01 : f32
    %253 = vector.broadcast %cst_74 : f32 to vector<8x64xf32>
    %254 = arith.addf %252, %253 : vector<8x64xf32>
    %255 = vector.extract_strided_slice %248 {offsets = [0, 128], sizes = [8, 64], strides = [1, 1]} : vector<8x512xf32> to vector<8x64xf32>
    %256 = math.tanh %255 : vector<8x64xf32>
    %cst_75 = arith.constant 5.000000e-01 : f32
    %257 = vector.broadcast %cst_75 : f32 to vector<8x64xf32>
    %258 = arith.mulf %257, %256 : vector<8x64xf32>
    %cst_76 = arith.constant 5.000000e-01 : f32
    %259 = vector.broadcast %cst_76 : f32 to vector<8x64xf32>
    %260 = arith.addf %258, %259 : vector<8x64xf32>
    %261 = vector.extract_strided_slice %248 {offsets = [0, 256], sizes = [8, 64], strides = [1, 1]} : vector<8x512xf32> to vector<8x64xf32>
    %262 = math.tanh %261 : vector<8x64xf32>
    %263 = vector.extract_strided_slice %248 {offsets = [0, 384], sizes = [8, 64], strides = [1, 1]} : vector<8x512xf32> to vector<8x64xf32>
    %264 = math.tanh %263 : vector<8x64xf32>
    %cst_77 = arith.constant 5.000000e-01 : f32
    %265 = vector.broadcast %cst_77 : f32 to vector<8x64xf32>
    %266 = arith.mulf %265, %264 : vector<8x64xf32>
    %cst_78 = arith.constant 5.000000e-01 : f32
    %267 = vector.broadcast %cst_78 : f32 to vector<8x64xf32>
    %268 = arith.addf %266, %267 : vector<8x64xf32>
    %269 = arith.mulf %260, %205 : vector<8x64xf32>
    %270 = arith.mulf %254, %262 : vector<8x64xf32>
    %271 = arith.addf %269, %270 : vector<8x64xf32>
    %272 = math.tanh %271 : vector<8x64xf32>
    %273 = arith.mulf %268, %272 : vector<8x64xf32>
    %c0_79 = arith.constant 0 : index
    %c4 = arith.constant 4 : index
    %274 = vector.load %arg1[%c0_79, %c4] : memref<8x16xf32, #tpu.memory_space<vmem>>, vector<8x1xf32>
    %275 = vector.broadcast %274 : vector<8x1xf32> to vector<8x512xf32>
    %276 = vector.broadcast %0 : vector<1x512xf32> to vector<8x512xf32>
    %277 = arith.mulf %275, %276 : vector<8x512xf32>
    %278 = vector.broadcast %1 : vector<1x512xf32> to vector<8x512xf32>
    %279 = arith.addf %277, %278 : vector<8x512xf32>
    %280 = arith.truncf %241 : vector<8x128xf32> to vector<8x128xbf16>
    %cst_80 = arith.constant dense<0.000000e+00> : vector<8x512xf32>
    %281 = tpu.matmul %280, %2, %cst_80 {dimension_numbers = #tpu.dot_dimension_numbers<[1], [0], [0], [1], [0, 0, 1, 1], [], []>} : vector<8x128xbf16>, vector<128x512xbf16>, vector<8x512xf32> -> vector<8x512xf32>
    %282 = arith.addf %281, %279 : vector<8x512xf32>
    %283 = vector.extract_strided_slice %282 {offsets = [0, 0], sizes = [8, 128], strides = [1, 1]} : vector<8x512xf32> to vector<8x128xf32>
    %284 = math.tanh %283 : vector<8x128xf32>
    %cst_81 = arith.constant 5.000000e-01 : f32
    %285 = vector.broadcast %cst_81 : f32 to vector<8x128xf32>
    %286 = arith.mulf %285, %284 : vector<8x128xf32>
    %cst_82 = arith.constant 5.000000e-01 : f32
    %287 = vector.broadcast %cst_82 : f32 to vector<8x128xf32>
    %288 = arith.addf %286, %287 : vector<8x128xf32>
    %289 = vector.extract_strided_slice %282 {offsets = [0, 128], sizes = [8, 128], strides = [1, 1]} : vector<8x512xf32> to vector<8x128xf32>
    %290 = math.tanh %289 : vector<8x128xf32>
    %cst_83 = arith.constant 5.000000e-01 : f32
    %291 = vector.broadcast %cst_83 : f32 to vector<8x128xf32>
    %292 = arith.mulf %291, %290 : vector<8x128xf32>
    %cst_84 = arith.constant 5.000000e-01 : f32
    %293 = vector.broadcast %cst_84 : f32 to vector<8x128xf32>
    %294 = arith.addf %292, %293 : vector<8x128xf32>
    %295 = vector.extract_strided_slice %282 {offsets = [0, 256], sizes = [8, 128], strides = [1, 1]} : vector<8x512xf32> to vector<8x128xf32>
    %296 = math.tanh %295 : vector<8x128xf32>
    %297 = vector.extract_strided_slice %282 {offsets = [0, 384], sizes = [8, 128], strides = [1, 1]} : vector<8x512xf32> to vector<8x128xf32>
    %298 = math.tanh %297 : vector<8x128xf32>
    %cst_85 = arith.constant 5.000000e-01 : f32
    %299 = vector.broadcast %cst_85 : f32 to vector<8x128xf32>
    %300 = arith.mulf %299, %298 : vector<8x128xf32>
    %cst_86 = arith.constant 5.000000e-01 : f32
    %301 = vector.broadcast %cst_86 : f32 to vector<8x128xf32>
    %302 = arith.addf %300, %301 : vector<8x128xf32>
    %303 = arith.mulf %294, %239 : vector<8x128xf32>
    %304 = arith.mulf %288, %296 : vector<8x128xf32>
    %305 = arith.addf %303, %304 : vector<8x128xf32>
    %306 = math.tanh %305 : vector<8x128xf32>
    %307 = arith.mulf %302, %306 : vector<8x128xf32>
    %308 = arith.truncf %307 : vector<8x128xf32> to vector<8x128xbf16>
    %cst_87 = arith.constant dense<0.000000e+00> : vector<8x512xf32>
    %309 = tpu.matmul %308, %3, %cst_87 {dimension_numbers = #tpu.dot_dimension_numbers<[1], [0], [0], [1], [0, 0, 1, 1], [], []>} : vector<8x128xbf16>, vector<128x512xbf16>, vector<8x512xf32> -> vector<8x512xf32>
    %310 = vector.broadcast %5 : vector<1x512xf32> to vector<8x512xf32>
    %311 = arith.addf %309, %310 : vector<8x512xf32>
    %312 = arith.truncf %273 : vector<8x64xf32> to vector<8x64xbf16>
    %cst_88 = arith.constant dense<0.000000e+00> : vector<8x512xf32>
    %313 = tpu.matmul %312, %4, %cst_88 {dimension_numbers = #tpu.dot_dimension_numbers<[1], [0], [0], [1], [0, 0, 1, 1], [], []>} : vector<8x64xbf16>, vector<64x512xbf16>, vector<8x512xf32> -> vector<8x512xf32>
    %314 = arith.addf %313, %311 : vector<8x512xf32>
    %315 = vector.extract_strided_slice %314 {offsets = [0, 0], sizes = [8, 64], strides = [1, 1]} : vector<8x512xf32> to vector<8x64xf32>
    %316 = math.tanh %315 : vector<8x64xf32>
    %cst_89 = arith.constant 5.000000e-01 : f32
    %317 = vector.broadcast %cst_89 : f32 to vector<8x64xf32>
    %318 = arith.mulf %317, %316 : vector<8x64xf32>
    %cst_90 = arith.constant 5.000000e-01 : f32
    %319 = vector.broadcast %cst_90 : f32 to vector<8x64xf32>
    %320 = arith.addf %318, %319 : vector<8x64xf32>
    %321 = vector.extract_strided_slice %314 {offsets = [0, 128], sizes = [8, 64], strides = [1, 1]} : vector<8x512xf32> to vector<8x64xf32>
    %322 = math.tanh %321 : vector<8x64xf32>
    %cst_91 = arith.constant 5.000000e-01 : f32
    %323 = vector.broadcast %cst_91 : f32 to vector<8x64xf32>
    %324 = arith.mulf %323, %322 : vector<8x64xf32>
    %cst_92 = arith.constant 5.000000e-01 : f32
    %325 = vector.broadcast %cst_92 : f32 to vector<8x64xf32>
    %326 = arith.addf %324, %325 : vector<8x64xf32>
    %327 = vector.extract_strided_slice %314 {offsets = [0, 256], sizes = [8, 64], strides = [1, 1]} : vector<8x512xf32> to vector<8x64xf32>
    %328 = math.tanh %327 : vector<8x64xf32>
    %329 = vector.extract_strided_slice %314 {offsets = [0, 384], sizes = [8, 64], strides = [1, 1]} : vector<8x512xf32> to vector<8x64xf32>
    %330 = math.tanh %329 : vector<8x64xf32>
    %cst_93 = arith.constant 5.000000e-01 : f32
    %331 = vector.broadcast %cst_93 : f32 to vector<8x64xf32>
    %332 = arith.mulf %331, %330 : vector<8x64xf32>
    %cst_94 = arith.constant 5.000000e-01 : f32
    %333 = vector.broadcast %cst_94 : f32 to vector<8x64xf32>
    %334 = arith.addf %332, %333 : vector<8x64xf32>
    %335 = arith.mulf %326, %271 : vector<8x64xf32>
    %336 = arith.mulf %320, %328 : vector<8x64xf32>
    %337 = arith.addf %335, %336 : vector<8x64xf32>
    %338 = math.tanh %337 : vector<8x64xf32>
    %339 = arith.mulf %334, %338 : vector<8x64xf32>
    %c0_95 = arith.constant 0 : index
    %c5 = arith.constant 5 : index
    %340 = vector.load %arg1[%c0_95, %c5] : memref<8x16xf32, #tpu.memory_space<vmem>>, vector<8x1xf32>
    %341 = vector.broadcast %340 : vector<8x1xf32> to vector<8x512xf32>
    %342 = vector.broadcast %0 : vector<1x512xf32> to vector<8x512xf32>
    %343 = arith.mulf %341, %342 : vector<8x512xf32>
    %344 = vector.broadcast %1 : vector<1x512xf32> to vector<8x512xf32>
    %345 = arith.addf %343, %344 : vector<8x512xf32>
    %346 = arith.truncf %307 : vector<8x128xf32> to vector<8x128xbf16>
    %cst_96 = arith.constant dense<0.000000e+00> : vector<8x512xf32>
    %347 = tpu.matmul %346, %2, %cst_96 {dimension_numbers = #tpu.dot_dimension_numbers<[1], [0], [0], [1], [0, 0, 1, 1], [], []>} : vector<8x128xbf16>, vector<128x512xbf16>, vector<8x512xf32> -> vector<8x512xf32>
    %348 = arith.addf %347, %345 : vector<8x512xf32>
    %349 = vector.extract_strided_slice %348 {offsets = [0, 0], sizes = [8, 128], strides = [1, 1]} : vector<8x512xf32> to vector<8x128xf32>
    %350 = math.tanh %349 : vector<8x128xf32>
    %cst_97 = arith.constant 5.000000e-01 : f32
    %351 = vector.broadcast %cst_97 : f32 to vector<8x128xf32>
    %352 = arith.mulf %351, %350 : vector<8x128xf32>
    %cst_98 = arith.constant 5.000000e-01 : f32
    %353 = vector.broadcast %cst_98 : f32 to vector<8x128xf32>
    %354 = arith.addf %352, %353 : vector<8x128xf32>
    %355 = vector.extract_strided_slice %348 {offsets = [0, 128], sizes = [8, 128], strides = [1, 1]} : vector<8x512xf32> to vector<8x128xf32>
    %356 = math.tanh %355 : vector<8x128xf32>
    %cst_99 = arith.constant 5.000000e-01 : f32
    %357 = vector.broadcast %cst_99 : f32 to vector<8x128xf32>
    %358 = arith.mulf %357, %356 : vector<8x128xf32>
    %cst_100 = arith.constant 5.000000e-01 : f32
    %359 = vector.broadcast %cst_100 : f32 to vector<8x128xf32>
    %360 = arith.addf %358, %359 : vector<8x128xf32>
    %361 = vector.extract_strided_slice %348 {offsets = [0, 256], sizes = [8, 128], strides = [1, 1]} : vector<8x512xf32> to vector<8x128xf32>
    %362 = math.tanh %361 : vector<8x128xf32>
    %363 = vector.extract_strided_slice %348 {offsets = [0, 384], sizes = [8, 128], strides = [1, 1]} : vector<8x512xf32> to vector<8x128xf32>
    %364 = math.tanh %363 : vector<8x128xf32>
    %cst_101 = arith.constant 5.000000e-01 : f32
    %365 = vector.broadcast %cst_101 : f32 to vector<8x128xf32>
    %366 = arith.mulf %365, %364 : vector<8x128xf32>
    %cst_102 = arith.constant 5.000000e-01 : f32
    %367 = vector.broadcast %cst_102 : f32 to vector<8x128xf32>
    %368 = arith.addf %366, %367 : vector<8x128xf32>
    %369 = arith.mulf %360, %305 : vector<8x128xf32>
    %370 = arith.mulf %354, %362 : vector<8x128xf32>
    %371 = arith.addf %369, %370 : vector<8x128xf32>
    %372 = math.tanh %371 : vector<8x128xf32>
    %373 = arith.mulf %368, %372 : vector<8x128xf32>
    %374 = arith.truncf %373 : vector<8x128xf32> to vector<8x128xbf16>
    %cst_103 = arith.constant dense<0.000000e+00> : vector<8x512xf32>
    %375 = tpu.matmul %374, %3, %cst_103 {dimension_numbers = #tpu.dot_dimension_numbers<[1], [0], [0], [1], [0, 0, 1, 1], [], []>} : vector<8x128xbf16>, vector<128x512xbf16>, vector<8x512xf32> -> vector<8x512xf32>
    %376 = vector.broadcast %5 : vector<1x512xf32> to vector<8x512xf32>
    %377 = arith.addf %375, %376 : vector<8x512xf32>
    %378 = arith.truncf %339 : vector<8x64xf32> to vector<8x64xbf16>
    %cst_104 = arith.constant dense<0.000000e+00> : vector<8x512xf32>
    %379 = tpu.matmul %378, %4, %cst_104 {dimension_numbers = #tpu.dot_dimension_numbers<[1], [0], [0], [1], [0, 0, 1, 1], [], []>} : vector<8x64xbf16>, vector<64x512xbf16>, vector<8x512xf32> -> vector<8x512xf32>
    %380 = arith.addf %379, %377 : vector<8x512xf32>
    %381 = vector.extract_strided_slice %380 {offsets = [0, 0], sizes = [8, 64], strides = [1, 1]} : vector<8x512xf32> to vector<8x64xf32>
    %382 = math.tanh %381 : vector<8x64xf32>
    %cst_105 = arith.constant 5.000000e-01 : f32
    %383 = vector.broadcast %cst_105 : f32 to vector<8x64xf32>
    %384 = arith.mulf %383, %382 : vector<8x64xf32>
    %cst_106 = arith.constant 5.000000e-01 : f32
    %385 = vector.broadcast %cst_106 : f32 to vector<8x64xf32>
    %386 = arith.addf %384, %385 : vector<8x64xf32>
    %387 = vector.extract_strided_slice %380 {offsets = [0, 128], sizes = [8, 64], strides = [1, 1]} : vector<8x512xf32> to vector<8x64xf32>
    %388 = math.tanh %387 : vector<8x64xf32>
    %cst_107 = arith.constant 5.000000e-01 : f32
    %389 = vector.broadcast %cst_107 : f32 to vector<8x64xf32>
    %390 = arith.mulf %389, %388 : vector<8x64xf32>
    %cst_108 = arith.constant 5.000000e-01 : f32
    %391 = vector.broadcast %cst_108 : f32 to vector<8x64xf32>
    %392 = arith.addf %390, %391 : vector<8x64xf32>
    %393 = vector.extract_strided_slice %380 {offsets = [0, 256], sizes = [8, 64], strides = [1, 1]} : vector<8x512xf32> to vector<8x64xf32>
    %394 = math.tanh %393 : vector<8x64xf32>
    %395 = vector.extract_strided_slice %380 {offsets = [0, 384], sizes = [8, 64], strides = [1, 1]} : vector<8x512xf32> to vector<8x64xf32>
    %396 = math.tanh %395 : vector<8x64xf32>
    %cst_109 = arith.constant 5.000000e-01 : f32
    %397 = vector.broadcast %cst_109 : f32 to vector<8x64xf32>
    %398 = arith.mulf %397, %396 : vector<8x64xf32>
    %cst_110 = arith.constant 5.000000e-01 : f32
    %399 = vector.broadcast %cst_110 : f32 to vector<8x64xf32>
    %400 = arith.addf %398, %399 : vector<8x64xf32>
    %401 = arith.mulf %392, %337 : vector<8x64xf32>
    %402 = arith.mulf %386, %394 : vector<8x64xf32>
    %403 = arith.addf %401, %402 : vector<8x64xf32>
    %404 = math.tanh %403 : vector<8x64xf32>
    %405 = arith.mulf %400, %404 : vector<8x64xf32>
    %c0_111 = arith.constant 0 : index
    %c6 = arith.constant 6 : index
    %406 = vector.load %arg1[%c0_111, %c6] : memref<8x16xf32, #tpu.memory_space<vmem>>, vector<8x1xf32>
    %407 = vector.broadcast %406 : vector<8x1xf32> to vector<8x512xf32>
    %408 = vector.broadcast %0 : vector<1x512xf32> to vector<8x512xf32>
    %409 = arith.mulf %407, %408 : vector<8x512xf32>
    %410 = vector.broadcast %1 : vector<1x512xf32> to vector<8x512xf32>
    %411 = arith.addf %409, %410 : vector<8x512xf32>
    %412 = arith.truncf %373 : vector<8x128xf32> to vector<8x128xbf16>
    %cst_112 = arith.constant dense<0.000000e+00> : vector<8x512xf32>
    %413 = tpu.matmul %412, %2, %cst_112 {dimension_numbers = #tpu.dot_dimension_numbers<[1], [0], [0], [1], [0, 0, 1, 1], [], []>} : vector<8x128xbf16>, vector<128x512xbf16>, vector<8x512xf32> -> vector<8x512xf32>
    %414 = arith.addf %413, %411 : vector<8x512xf32>
    %415 = vector.extract_strided_slice %414 {offsets = [0, 0], sizes = [8, 128], strides = [1, 1]} : vector<8x512xf32> to vector<8x128xf32>
    %416 = math.tanh %415 : vector<8x128xf32>
    %cst_113 = arith.constant 5.000000e-01 : f32
    %417 = vector.broadcast %cst_113 : f32 to vector<8x128xf32>
    %418 = arith.mulf %417, %416 : vector<8x128xf32>
    %cst_114 = arith.constant 5.000000e-01 : f32
    %419 = vector.broadcast %cst_114 : f32 to vector<8x128xf32>
    %420 = arith.addf %418, %419 : vector<8x128xf32>
    %421 = vector.extract_strided_slice %414 {offsets = [0, 128], sizes = [8, 128], strides = [1, 1]} : vector<8x512xf32> to vector<8x128xf32>
    %422 = math.tanh %421 : vector<8x128xf32>
    %cst_115 = arith.constant 5.000000e-01 : f32
    %423 = vector.broadcast %cst_115 : f32 to vector<8x128xf32>
    %424 = arith.mulf %423, %422 : vector<8x128xf32>
    %cst_116 = arith.constant 5.000000e-01 : f32
    %425 = vector.broadcast %cst_116 : f32 to vector<8x128xf32>
    %426 = arith.addf %424, %425 : vector<8x128xf32>
    %427 = vector.extract_strided_slice %414 {offsets = [0, 256], sizes = [8, 128], strides = [1, 1]} : vector<8x512xf32> to vector<8x128xf32>
    %428 = math.tanh %427 : vector<8x128xf32>
    %429 = vector.extract_strided_slice %414 {offsets = [0, 384], sizes = [8, 128], strides = [1, 1]} : vector<8x512xf32> to vector<8x128xf32>
    %430 = math.tanh %429 : vector<8x128xf32>
    %cst_117 = arith.constant 5.000000e-01 : f32
    %431 = vector.broadcast %cst_117 : f32 to vector<8x128xf32>
    %432 = arith.mulf %431, %430 : vector<8x128xf32>
    %cst_118 = arith.constant 5.000000e-01 : f32
    %433 = vector.broadcast %cst_118 : f32 to vector<8x128xf32>
    %434 = arith.addf %432, %433 : vector<8x128xf32>
    %435 = arith.mulf %426, %371 : vector<8x128xf32>
    %436 = arith.mulf %420, %428 : vector<8x128xf32>
    %437 = arith.addf %435, %436 : vector<8x128xf32>
    %438 = math.tanh %437 : vector<8x128xf32>
    %439 = arith.mulf %434, %438 : vector<8x128xf32>
    %440 = arith.truncf %439 : vector<8x128xf32> to vector<8x128xbf16>
    %cst_119 = arith.constant dense<0.000000e+00> : vector<8x512xf32>
    %441 = tpu.matmul %440, %3, %cst_119 {dimension_numbers = #tpu.dot_dimension_numbers<[1], [0], [0], [1], [0, 0, 1, 1], [], []>} : vector<8x128xbf16>, vector<128x512xbf16>, vector<8x512xf32> -> vector<8x512xf32>
    %442 = vector.broadcast %5 : vector<1x512xf32> to vector<8x512xf32>
    %443 = arith.addf %441, %442 : vector<8x512xf32>
    %444 = arith.truncf %405 : vector<8x64xf32> to vector<8x64xbf16>
    %cst_120 = arith.constant dense<0.000000e+00> : vector<8x512xf32>
    %445 = tpu.matmul %444, %4, %cst_120 {dimension_numbers = #tpu.dot_dimension_numbers<[1], [0], [0], [1], [0, 0, 1, 1], [], []>} : vector<8x64xbf16>, vector<64x512xbf16>, vector<8x512xf32> -> vector<8x512xf32>
    %446 = arith.addf %445, %443 : vector<8x512xf32>
    %447 = vector.extract_strided_slice %446 {offsets = [0, 0], sizes = [8, 64], strides = [1, 1]} : vector<8x512xf32> to vector<8x64xf32>
    %448 = math.tanh %447 : vector<8x64xf32>
    %cst_121 = arith.constant 5.000000e-01 : f32
    %449 = vector.broadcast %cst_121 : f32 to vector<8x64xf32>
    %450 = arith.mulf %449, %448 : vector<8x64xf32>
    %cst_122 = arith.constant 5.000000e-01 : f32
    %451 = vector.broadcast %cst_122 : f32 to vector<8x64xf32>
    %452 = arith.addf %450, %451 : vector<8x64xf32>
    %453 = vector.extract_strided_slice %446 {offsets = [0, 128], sizes = [8, 64], strides = [1, 1]} : vector<8x512xf32> to vector<8x64xf32>
    %454 = math.tanh %453 : vector<8x64xf32>
    %cst_123 = arith.constant 5.000000e-01 : f32
    %455 = vector.broadcast %cst_123 : f32 to vector<8x64xf32>
    %456 = arith.mulf %455, %454 : vector<8x64xf32>
    %cst_124 = arith.constant 5.000000e-01 : f32
    %457 = vector.broadcast %cst_124 : f32 to vector<8x64xf32>
    %458 = arith.addf %456, %457 : vector<8x64xf32>
    %459 = vector.extract_strided_slice %446 {offsets = [0, 256], sizes = [8, 64], strides = [1, 1]} : vector<8x512xf32> to vector<8x64xf32>
    %460 = math.tanh %459 : vector<8x64xf32>
    %461 = vector.extract_strided_slice %446 {offsets = [0, 384], sizes = [8, 64], strides = [1, 1]} : vector<8x512xf32> to vector<8x64xf32>
    %462 = math.tanh %461 : vector<8x64xf32>
    %cst_125 = arith.constant 5.000000e-01 : f32
    %463 = vector.broadcast %cst_125 : f32 to vector<8x64xf32>
    %464 = arith.mulf %463, %462 : vector<8x64xf32>
    %cst_126 = arith.constant 5.000000e-01 : f32
    %465 = vector.broadcast %cst_126 : f32 to vector<8x64xf32>
    %466 = arith.addf %464, %465 : vector<8x64xf32>
    %467 = arith.mulf %458, %403 : vector<8x64xf32>
    %468 = arith.mulf %452, %460 : vector<8x64xf32>
    %469 = arith.addf %467, %468 : vector<8x64xf32>
    %470 = math.tanh %469 : vector<8x64xf32>
    %471 = arith.mulf %466, %470 : vector<8x64xf32>
    %c0_127 = arith.constant 0 : index
    %c7 = arith.constant 7 : index
    %472 = vector.load %arg1[%c0_127, %c7] : memref<8x16xf32, #tpu.memory_space<vmem>>, vector<8x1xf32>
    %473 = vector.broadcast %472 : vector<8x1xf32> to vector<8x512xf32>
    %474 = vector.broadcast %0 : vector<1x512xf32> to vector<8x512xf32>
    %475 = arith.mulf %473, %474 : vector<8x512xf32>
    %476 = vector.broadcast %1 : vector<1x512xf32> to vector<8x512xf32>
    %477 = arith.addf %475, %476 : vector<8x512xf32>
    %478 = arith.truncf %439 : vector<8x128xf32> to vector<8x128xbf16>
    %cst_128 = arith.constant dense<0.000000e+00> : vector<8x512xf32>
    %479 = tpu.matmul %478, %2, %cst_128 {dimension_numbers = #tpu.dot_dimension_numbers<[1], [0], [0], [1], [0, 0, 1, 1], [], []>} : vector<8x128xbf16>, vector<128x512xbf16>, vector<8x512xf32> -> vector<8x512xf32>
    %480 = arith.addf %479, %477 : vector<8x512xf32>
    %481 = vector.extract_strided_slice %480 {offsets = [0, 0], sizes = [8, 128], strides = [1, 1]} : vector<8x512xf32> to vector<8x128xf32>
    %482 = math.tanh %481 : vector<8x128xf32>
    %cst_129 = arith.constant 5.000000e-01 : f32
    %483 = vector.broadcast %cst_129 : f32 to vector<8x128xf32>
    %484 = arith.mulf %483, %482 : vector<8x128xf32>
    %cst_130 = arith.constant 5.000000e-01 : f32
    %485 = vector.broadcast %cst_130 : f32 to vector<8x128xf32>
    %486 = arith.addf %484, %485 : vector<8x128xf32>
    %487 = vector.extract_strided_slice %480 {offsets = [0, 128], sizes = [8, 128], strides = [1, 1]} : vector<8x512xf32> to vector<8x128xf32>
    %488 = math.tanh %487 : vector<8x128xf32>
    %cst_131 = arith.constant 5.000000e-01 : f32
    %489 = vector.broadcast %cst_131 : f32 to vector<8x128xf32>
    %490 = arith.mulf %489, %488 : vector<8x128xf32>
    %cst_132 = arith.constant 5.000000e-01 : f32
    %491 = vector.broadcast %cst_132 : f32 to vector<8x128xf32>
    %492 = arith.addf %490, %491 : vector<8x128xf32>
    %493 = vector.extract_strided_slice %480 {offsets = [0, 256], sizes = [8, 128], strides = [1, 1]} : vector<8x512xf32> to vector<8x128xf32>
    %494 = math.tanh %493 : vector<8x128xf32>
    %495 = vector.extract_strided_slice %480 {offsets = [0, 384], sizes = [8, 128], strides = [1, 1]} : vector<8x512xf32> to vector<8x128xf32>
    %496 = math.tanh %495 : vector<8x128xf32>
    %cst_133 = arith.constant 5.000000e-01 : f32
    %497 = vector.broadcast %cst_133 : f32 to vector<8x128xf32>
    %498 = arith.mulf %497, %496 : vector<8x128xf32>
    %cst_134 = arith.constant 5.000000e-01 : f32
    %499 = vector.broadcast %cst_134 : f32 to vector<8x128xf32>
    %500 = arith.addf %498, %499 : vector<8x128xf32>
    %501 = arith.mulf %492, %437 : vector<8x128xf32>
    %502 = arith.mulf %486, %494 : vector<8x128xf32>
    %503 = arith.addf %501, %502 : vector<8x128xf32>
    %504 = math.tanh %503 : vector<8x128xf32>
    %505 = arith.mulf %500, %504 : vector<8x128xf32>
    %506 = arith.truncf %505 : vector<8x128xf32> to vector<8x128xbf16>
    %cst_135 = arith.constant dense<0.000000e+00> : vector<8x512xf32>
    %507 = tpu.matmul %506, %3, %cst_135 {dimension_numbers = #tpu.dot_dimension_numbers<[1], [0], [0], [1], [0, 0, 1, 1], [], []>} : vector<8x128xbf16>, vector<128x512xbf16>, vector<8x512xf32> -> vector<8x512xf32>
    %508 = vector.broadcast %5 : vector<1x512xf32> to vector<8x512xf32>
    %509 = arith.addf %507, %508 : vector<8x512xf32>
    %510 = arith.truncf %471 : vector<8x64xf32> to vector<8x64xbf16>
    %cst_136 = arith.constant dense<0.000000e+00> : vector<8x512xf32>
    %511 = tpu.matmul %510, %4, %cst_136 {dimension_numbers = #tpu.dot_dimension_numbers<[1], [0], [0], [1], [0, 0, 1, 1], [], []>} : vector<8x64xbf16>, vector<64x512xbf16>, vector<8x512xf32> -> vector<8x512xf32>
    %512 = arith.addf %511, %509 : vector<8x512xf32>
    %513 = vector.extract_strided_slice %512 {offsets = [0, 0], sizes = [8, 64], strides = [1, 1]} : vector<8x512xf32> to vector<8x64xf32>
    %514 = math.tanh %513 : vector<8x64xf32>
    %cst_137 = arith.constant 5.000000e-01 : f32
    %515 = vector.broadcast %cst_137 : f32 to vector<8x64xf32>
    %516 = arith.mulf %515, %514 : vector<8x64xf32>
    %cst_138 = arith.constant 5.000000e-01 : f32
    %517 = vector.broadcast %cst_138 : f32 to vector<8x64xf32>
    %518 = arith.addf %516, %517 : vector<8x64xf32>
    %519 = vector.extract_strided_slice %512 {offsets = [0, 128], sizes = [8, 64], strides = [1, 1]} : vector<8x512xf32> to vector<8x64xf32>
    %520 = math.tanh %519 : vector<8x64xf32>
    %cst_139 = arith.constant 5.000000e-01 : f32
    %521 = vector.broadcast %cst_139 : f32 to vector<8x64xf32>
    %522 = arith.mulf %521, %520 : vector<8x64xf32>
    %cst_140 = arith.constant 5.000000e-01 : f32
    %523 = vector.broadcast %cst_140 : f32 to vector<8x64xf32>
    %524 = arith.addf %522, %523 : vector<8x64xf32>
    %525 = vector.extract_strided_slice %512 {offsets = [0, 256], sizes = [8, 64], strides = [1, 1]} : vector<8x512xf32> to vector<8x64xf32>
    %526 = math.tanh %525 : vector<8x64xf32>
    %527 = vector.extract_strided_slice %512 {offsets = [0, 384], sizes = [8, 64], strides = [1, 1]} : vector<8x512xf32> to vector<8x64xf32>
    %528 = math.tanh %527 : vector<8x64xf32>
    %cst_141 = arith.constant 5.000000e-01 : f32
    %529 = vector.broadcast %cst_141 : f32 to vector<8x64xf32>
    %530 = arith.mulf %529, %528 : vector<8x64xf32>
    %cst_142 = arith.constant 5.000000e-01 : f32
    %531 = vector.broadcast %cst_142 : f32 to vector<8x64xf32>
    %532 = arith.addf %530, %531 : vector<8x64xf32>
    %533 = arith.mulf %524, %469 : vector<8x64xf32>
    %534 = arith.mulf %518, %526 : vector<8x64xf32>
    %535 = arith.addf %533, %534 : vector<8x64xf32>
    %536 = math.tanh %535 : vector<8x64xf32>
    %537 = arith.mulf %532, %536 : vector<8x64xf32>
    %c0_143 = arith.constant 0 : index
    %c8 = arith.constant 8 : index
    %538 = vector.load %arg1[%c0_143, %c8] : memref<8x16xf32, #tpu.memory_space<vmem>>, vector<8x1xf32>
    %539 = vector.broadcast %538 : vector<8x1xf32> to vector<8x512xf32>
    %540 = vector.broadcast %0 : vector<1x512xf32> to vector<8x512xf32>
    %541 = arith.mulf %539, %540 : vector<8x512xf32>
    %542 = vector.broadcast %1 : vector<1x512xf32> to vector<8x512xf32>
    %543 = arith.addf %541, %542 : vector<8x512xf32>
    %544 = arith.truncf %505 : vector<8x128xf32> to vector<8x128xbf16>
    %cst_144 = arith.constant dense<0.000000e+00> : vector<8x512xf32>
    %545 = tpu.matmul %544, %2, %cst_144 {dimension_numbers = #tpu.dot_dimension_numbers<[1], [0], [0], [1], [0, 0, 1, 1], [], []>} : vector<8x128xbf16>, vector<128x512xbf16>, vector<8x512xf32> -> vector<8x512xf32>
    %546 = arith.addf %545, %543 : vector<8x512xf32>
    %547 = vector.extract_strided_slice %546 {offsets = [0, 0], sizes = [8, 128], strides = [1, 1]} : vector<8x512xf32> to vector<8x128xf32>
    %548 = math.tanh %547 : vector<8x128xf32>
    %cst_145 = arith.constant 5.000000e-01 : f32
    %549 = vector.broadcast %cst_145 : f32 to vector<8x128xf32>
    %550 = arith.mulf %549, %548 : vector<8x128xf32>
    %cst_146 = arith.constant 5.000000e-01 : f32
    %551 = vector.broadcast %cst_146 : f32 to vector<8x128xf32>
    %552 = arith.addf %550, %551 : vector<8x128xf32>
    %553 = vector.extract_strided_slice %546 {offsets = [0, 128], sizes = [8, 128], strides = [1, 1]} : vector<8x512xf32> to vector<8x128xf32>
    %554 = math.tanh %553 : vector<8x128xf32>
    %cst_147 = arith.constant 5.000000e-01 : f32
    %555 = vector.broadcast %cst_147 : f32 to vector<8x128xf32>
    %556 = arith.mulf %555, %554 : vector<8x128xf32>
    %cst_148 = arith.constant 5.000000e-01 : f32
    %557 = vector.broadcast %cst_148 : f32 to vector<8x128xf32>
    %558 = arith.addf %556, %557 : vector<8x128xf32>
    %559 = vector.extract_strided_slice %546 {offsets = [0, 256], sizes = [8, 128], strides = [1, 1]} : vector<8x512xf32> to vector<8x128xf32>
    %560 = math.tanh %559 : vector<8x128xf32>
    %561 = vector.extract_strided_slice %546 {offsets = [0, 384], sizes = [8, 128], strides = [1, 1]} : vector<8x512xf32> to vector<8x128xf32>
    %562 = math.tanh %561 : vector<8x128xf32>
    %cst_149 = arith.constant 5.000000e-01 : f32
    %563 = vector.broadcast %cst_149 : f32 to vector<8x128xf32>
    %564 = arith.mulf %563, %562 : vector<8x128xf32>
    %cst_150 = arith.constant 5.000000e-01 : f32
    %565 = vector.broadcast %cst_150 : f32 to vector<8x128xf32>
    %566 = arith.addf %564, %565 : vector<8x128xf32>
    %567 = arith.mulf %558, %503 : vector<8x128xf32>
    %568 = arith.mulf %552, %560 : vector<8x128xf32>
    %569 = arith.addf %567, %568 : vector<8x128xf32>
    %570 = math.tanh %569 : vector<8x128xf32>
    %571 = arith.mulf %566, %570 : vector<8x128xf32>
    %572 = arith.truncf %571 : vector<8x128xf32> to vector<8x128xbf16>
    %cst_151 = arith.constant dense<0.000000e+00> : vector<8x512xf32>
    %573 = tpu.matmul %572, %3, %cst_151 {dimension_numbers = #tpu.dot_dimension_numbers<[1], [0], [0], [1], [0, 0, 1, 1], [], []>} : vector<8x128xbf16>, vector<128x512xbf16>, vector<8x512xf32> -> vector<8x512xf32>
    %574 = vector.broadcast %5 : vector<1x512xf32> to vector<8x512xf32>
    %575 = arith.addf %573, %574 : vector<8x512xf32>
    %576 = arith.truncf %537 : vector<8x64xf32> to vector<8x64xbf16>
    %cst_152 = arith.constant dense<0.000000e+00> : vector<8x512xf32>
    %577 = tpu.matmul %576, %4, %cst_152 {dimension_numbers = #tpu.dot_dimension_numbers<[1], [0], [0], [1], [0, 0, 1, 1], [], []>} : vector<8x64xbf16>, vector<64x512xbf16>, vector<8x512xf32> -> vector<8x512xf32>
    %578 = arith.addf %577, %575 : vector<8x512xf32>
    %579 = vector.extract_strided_slice %578 {offsets = [0, 0], sizes = [8, 64], strides = [1, 1]} : vector<8x512xf32> to vector<8x64xf32>
    %580 = math.tanh %579 : vector<8x64xf32>
    %cst_153 = arith.constant 5.000000e-01 : f32
    %581 = vector.broadcast %cst_153 : f32 to vector<8x64xf32>
    %582 = arith.mulf %581, %580 : vector<8x64xf32>
    %cst_154 = arith.constant 5.000000e-01 : f32
    %583 = vector.broadcast %cst_154 : f32 to vector<8x64xf32>
    %584 = arith.addf %582, %583 : vector<8x64xf32>
    %585 = vector.extract_strided_slice %578 {offsets = [0, 128], sizes = [8, 64], strides = [1, 1]} : vector<8x512xf32> to vector<8x64xf32>
    %586 = math.tanh %585 : vector<8x64xf32>
    %cst_155 = arith.constant 5.000000e-01 : f32
    %587 = vector.broadcast %cst_155 : f32 to vector<8x64xf32>
    %588 = arith.mulf %587, %586 : vector<8x64xf32>
    %cst_156 = arith.constant 5.000000e-01 : f32
    %589 = vector.broadcast %cst_156 : f32 to vector<8x64xf32>
    %590 = arith.addf %588, %589 : vector<8x64xf32>
    %591 = vector.extract_strided_slice %578 {offsets = [0, 256], sizes = [8, 64], strides = [1, 1]} : vector<8x512xf32> to vector<8x64xf32>
    %592 = math.tanh %591 : vector<8x64xf32>
    %593 = vector.extract_strided_slice %578 {offsets = [0, 384], sizes = [8, 64], strides = [1, 1]} : vector<8x512xf32> to vector<8x64xf32>
    %594 = math.tanh %593 : vector<8x64xf32>
    %cst_157 = arith.constant 5.000000e-01 : f32
    %595 = vector.broadcast %cst_157 : f32 to vector<8x64xf32>
    %596 = arith.mulf %595, %594 : vector<8x64xf32>
    %cst_158 = arith.constant 5.000000e-01 : f32
    %597 = vector.broadcast %cst_158 : f32 to vector<8x64xf32>
    %598 = arith.addf %596, %597 : vector<8x64xf32>
    %599 = arith.mulf %590, %535 : vector<8x64xf32>
    %600 = arith.mulf %584, %592 : vector<8x64xf32>
    %601 = arith.addf %599, %600 : vector<8x64xf32>
    %602 = math.tanh %601 : vector<8x64xf32>
    %603 = arith.mulf %598, %602 : vector<8x64xf32>
    %c0_159 = arith.constant 0 : index
    %c9 = arith.constant 9 : index
    %604 = vector.load %arg1[%c0_159, %c9] : memref<8x16xf32, #tpu.memory_space<vmem>>, vector<8x1xf32>
    %605 = vector.broadcast %604 : vector<8x1xf32> to vector<8x512xf32>
    %606 = vector.broadcast %0 : vector<1x512xf32> to vector<8x512xf32>
    %607 = arith.mulf %605, %606 : vector<8x512xf32>
    %608 = vector.broadcast %1 : vector<1x512xf32> to vector<8x512xf32>
    %609 = arith.addf %607, %608 : vector<8x512xf32>
    %610 = arith.truncf %571 : vector<8x128xf32> to vector<8x128xbf16>
    %cst_160 = arith.constant dense<0.000000e+00> : vector<8x512xf32>
    %611 = tpu.matmul %610, %2, %cst_160 {dimension_numbers = #tpu.dot_dimension_numbers<[1], [0], [0], [1], [0, 0, 1, 1], [], []>} : vector<8x128xbf16>, vector<128x512xbf16>, vector<8x512xf32> -> vector<8x512xf32>
    %612 = arith.addf %611, %609 : vector<8x512xf32>
    %613 = vector.extract_strided_slice %612 {offsets = [0, 0], sizes = [8, 128], strides = [1, 1]} : vector<8x512xf32> to vector<8x128xf32>
    %614 = math.tanh %613 : vector<8x128xf32>
    %cst_161 = arith.constant 5.000000e-01 : f32
    %615 = vector.broadcast %cst_161 : f32 to vector<8x128xf32>
    %616 = arith.mulf %615, %614 : vector<8x128xf32>
    %cst_162 = arith.constant 5.000000e-01 : f32
    %617 = vector.broadcast %cst_162 : f32 to vector<8x128xf32>
    %618 = arith.addf %616, %617 : vector<8x128xf32>
    %619 = vector.extract_strided_slice %612 {offsets = [0, 128], sizes = [8, 128], strides = [1, 1]} : vector<8x512xf32> to vector<8x128xf32>
    %620 = math.tanh %619 : vector<8x128xf32>
    %cst_163 = arith.constant 5.000000e-01 : f32
    %621 = vector.broadcast %cst_163 : f32 to vector<8x128xf32>
    %622 = arith.mulf %621, %620 : vector<8x128xf32>
    %cst_164 = arith.constant 5.000000e-01 : f32
    %623 = vector.broadcast %cst_164 : f32 to vector<8x128xf32>
    %624 = arith.addf %622, %623 : vector<8x128xf32>
    %625 = vector.extract_strided_slice %612 {offsets = [0, 256], sizes = [8, 128], strides = [1, 1]} : vector<8x512xf32> to vector<8x128xf32>
    %626 = math.tanh %625 : vector<8x128xf32>
    %627 = vector.extract_strided_slice %612 {offsets = [0, 384], sizes = [8, 128], strides = [1, 1]} : vector<8x512xf32> to vector<8x128xf32>
    %628 = math.tanh %627 : vector<8x128xf32>
    %cst_165 = arith.constant 5.000000e-01 : f32
    %629 = vector.broadcast %cst_165 : f32 to vector<8x128xf32>
    %630 = arith.mulf %629, %628 : vector<8x128xf32>
    %cst_166 = arith.constant 5.000000e-01 : f32
    %631 = vector.broadcast %cst_166 : f32 to vector<8x128xf32>
    %632 = arith.addf %630, %631 : vector<8x128xf32>
    %633 = arith.mulf %624, %569 : vector<8x128xf32>
    %634 = arith.mulf %618, %626 : vector<8x128xf32>
    %635 = arith.addf %633, %634 : vector<8x128xf32>
    %636 = math.tanh %635 : vector<8x128xf32>
    %637 = arith.mulf %632, %636 : vector<8x128xf32>
    %638 = arith.truncf %637 : vector<8x128xf32> to vector<8x128xbf16>
    %cst_167 = arith.constant dense<0.000000e+00> : vector<8x512xf32>
    %639 = tpu.matmul %638, %3, %cst_167 {dimension_numbers = #tpu.dot_dimension_numbers<[1], [0], [0], [1], [0, 0, 1, 1], [], []>} : vector<8x128xbf16>, vector<128x512xbf16>, vector<8x512xf32> -> vector<8x512xf32>
    %640 = vector.broadcast %5 : vector<1x512xf32> to vector<8x512xf32>
    %641 = arith.addf %639, %640 : vector<8x512xf32>
    %642 = arith.truncf %603 : vector<8x64xf32> to vector<8x64xbf16>
    %cst_168 = arith.constant dense<0.000000e+00> : vector<8x512xf32>
    %643 = tpu.matmul %642, %4, %cst_168 {dimension_numbers = #tpu.dot_dimension_numbers<[1], [0], [0], [1], [0, 0, 1, 1], [], []>} : vector<8x64xbf16>, vector<64x512xbf16>, vector<8x512xf32> -> vector<8x512xf32>
    %644 = arith.addf %643, %641 : vector<8x512xf32>
    %645 = vector.extract_strided_slice %644 {offsets = [0, 0], sizes = [8, 64], strides = [1, 1]} : vector<8x512xf32> to vector<8x64xf32>
    %646 = math.tanh %645 : vector<8x64xf32>
    %cst_169 = arith.constant 5.000000e-01 : f32
    %647 = vector.broadcast %cst_169 : f32 to vector<8x64xf32>
    %648 = arith.mulf %647, %646 : vector<8x64xf32>
    %cst_170 = arith.constant 5.000000e-01 : f32
    %649 = vector.broadcast %cst_170 : f32 to vector<8x64xf32>
    %650 = arith.addf %648, %649 : vector<8x64xf32>
    %651 = vector.extract_strided_slice %644 {offsets = [0, 128], sizes = [8, 64], strides = [1, 1]} : vector<8x512xf32> to vector<8x64xf32>
    %652 = math.tanh %651 : vector<8x64xf32>
    %cst_171 = arith.constant 5.000000e-01 : f32
    %653 = vector.broadcast %cst_171 : f32 to vector<8x64xf32>
    %654 = arith.mulf %653, %652 : vector<8x64xf32>
    %cst_172 = arith.constant 5.000000e-01 : f32
    %655 = vector.broadcast %cst_172 : f32 to vector<8x64xf32>
    %656 = arith.addf %654, %655 : vector<8x64xf32>
    %657 = vector.extract_strided_slice %644 {offsets = [0, 256], sizes = [8, 64], strides = [1, 1]} : vector<8x512xf32> to vector<8x64xf32>
    %658 = math.tanh %657 : vector<8x64xf32>
    %659 = vector.extract_strided_slice %644 {offsets = [0, 384], sizes = [8, 64], strides = [1, 1]} : vector<8x512xf32> to vector<8x64xf32>
    %660 = math.tanh %659 : vector<8x64xf32>
    %cst_173 = arith.constant 5.000000e-01 : f32
    %661 = vector.broadcast %cst_173 : f32 to vector<8x64xf32>
    %662 = arith.mulf %661, %660 : vector<8x64xf32>
    %cst_174 = arith.constant 5.000000e-01 : f32
    %663 = vector.broadcast %cst_174 : f32 to vector<8x64xf32>
    %664 = arith.addf %662, %663 : vector<8x64xf32>
    %665 = arith.mulf %656, %601 : vector<8x64xf32>
    %666 = arith.mulf %650, %658 : vector<8x64xf32>
    %667 = arith.addf %665, %666 : vector<8x64xf32>
    %668 = math.tanh %667 : vector<8x64xf32>
    %669 = arith.mulf %664, %668 : vector<8x64xf32>
    %c0_175 = arith.constant 0 : index
    %c10 = arith.constant 10 : index
    %670 = vector.load %arg1[%c0_175, %c10] : memref<8x16xf32, #tpu.memory_space<vmem>>, vector<8x1xf32>
    %671 = vector.broadcast %670 : vector<8x1xf32> to vector<8x512xf32>
    %672 = vector.broadcast %0 : vector<1x512xf32> to vector<8x512xf32>
    %673 = arith.mulf %671, %672 : vector<8x512xf32>
    %674 = vector.broadcast %1 : vector<1x512xf32> to vector<8x512xf32>
    %675 = arith.addf %673, %674 : vector<8x512xf32>
    %676 = arith.truncf %637 : vector<8x128xf32> to vector<8x128xbf16>
    %cst_176 = arith.constant dense<0.000000e+00> : vector<8x512xf32>
    %677 = tpu.matmul %676, %2, %cst_176 {dimension_numbers = #tpu.dot_dimension_numbers<[1], [0], [0], [1], [0, 0, 1, 1], [], []>} : vector<8x128xbf16>, vector<128x512xbf16>, vector<8x512xf32> -> vector<8x512xf32>
    %678 = arith.addf %677, %675 : vector<8x512xf32>
    %679 = vector.extract_strided_slice %678 {offsets = [0, 0], sizes = [8, 128], strides = [1, 1]} : vector<8x512xf32> to vector<8x128xf32>
    %680 = math.tanh %679 : vector<8x128xf32>
    %cst_177 = arith.constant 5.000000e-01 : f32
    %681 = vector.broadcast %cst_177 : f32 to vector<8x128xf32>
    %682 = arith.mulf %681, %680 : vector<8x128xf32>
    %cst_178 = arith.constant 5.000000e-01 : f32
    %683 = vector.broadcast %cst_178 : f32 to vector<8x128xf32>
    %684 = arith.addf %682, %683 : vector<8x128xf32>
    %685 = vector.extract_strided_slice %678 {offsets = [0, 128], sizes = [8, 128], strides = [1, 1]} : vector<8x512xf32> to vector<8x128xf32>
    %686 = math.tanh %685 : vector<8x128xf32>
    %cst_179 = arith.constant 5.000000e-01 : f32
    %687 = vector.broadcast %cst_179 : f32 to vector<8x128xf32>
    %688 = arith.mulf %687, %686 : vector<8x128xf32>
    %cst_180 = arith.constant 5.000000e-01 : f32
    %689 = vector.broadcast %cst_180 : f32 to vector<8x128xf32>
    %690 = arith.addf %688, %689 : vector<8x128xf32>
    %691 = vector.extract_strided_slice %678 {offsets = [0, 256], sizes = [8, 128], strides = [1, 1]} : vector<8x512xf32> to vector<8x128xf32>
    %692 = math.tanh %691 : vector<8x128xf32>
    %693 = vector.extract_strided_slice %678 {offsets = [0, 384], sizes = [8, 128], strides = [1, 1]} : vector<8x512xf32> to vector<8x128xf32>
    %694 = math.tanh %693 : vector<8x128xf32>
    %cst_181 = arith.constant 5.000000e-01 : f32
    %695 = vector.broadcast %cst_181 : f32 to vector<8x128xf32>
    %696 = arith.mulf %695, %694 : vector<8x128xf32>
    %cst_182 = arith.constant 5.000000e-01 : f32
    %697 = vector.broadcast %cst_182 : f32 to vector<8x128xf32>
    %698 = arith.addf %696, %697 : vector<8x128xf32>
    %699 = arith.mulf %690, %635 : vector<8x128xf32>
    %700 = arith.mulf %684, %692 : vector<8x128xf32>
    %701 = arith.addf %699, %700 : vector<8x128xf32>
    %702 = math.tanh %701 : vector<8x128xf32>
    %703 = arith.mulf %698, %702 : vector<8x128xf32>
    %704 = arith.truncf %703 : vector<8x128xf32> to vector<8x128xbf16>
    %cst_183 = arith.constant dense<0.000000e+00> : vector<8x512xf32>
    %705 = tpu.matmul %704, %3, %cst_183 {dimension_numbers = #tpu.dot_dimension_numbers<[1], [0], [0], [1], [0, 0, 1, 1], [], []>} : vector<8x128xbf16>, vector<128x512xbf16>, vector<8x512xf32> -> vector<8x512xf32>
    %706 = vector.broadcast %5 : vector<1x512xf32> to vector<8x512xf32>
    %707 = arith.addf %705, %706 : vector<8x512xf32>
    %708 = arith.truncf %669 : vector<8x64xf32> to vector<8x64xbf16>
    %cst_184 = arith.constant dense<0.000000e+00> : vector<8x512xf32>
    %709 = tpu.matmul %708, %4, %cst_184 {dimension_numbers = #tpu.dot_dimension_numbers<[1], [0], [0], [1], [0, 0, 1, 1], [], []>} : vector<8x64xbf16>, vector<64x512xbf16>, vector<8x512xf32> -> vector<8x512xf32>
    %710 = arith.addf %709, %707 : vector<8x512xf32>
    %711 = vector.extract_strided_slice %710 {offsets = [0, 0], sizes = [8, 64], strides = [1, 1]} : vector<8x512xf32> to vector<8x64xf32>
    %712 = math.tanh %711 : vector<8x64xf32>
    %cst_185 = arith.constant 5.000000e-01 : f32
    %713 = vector.broadcast %cst_185 : f32 to vector<8x64xf32>
    %714 = arith.mulf %713, %712 : vector<8x64xf32>
    %cst_186 = arith.constant 5.000000e-01 : f32
    %715 = vector.broadcast %cst_186 : f32 to vector<8x64xf32>
    %716 = arith.addf %714, %715 : vector<8x64xf32>
    %717 = vector.extract_strided_slice %710 {offsets = [0, 128], sizes = [8, 64], strides = [1, 1]} : vector<8x512xf32> to vector<8x64xf32>
    %718 = math.tanh %717 : vector<8x64xf32>
    %cst_187 = arith.constant 5.000000e-01 : f32
    %719 = vector.broadcast %cst_187 : f32 to vector<8x64xf32>
    %720 = arith.mulf %719, %718 : vector<8x64xf32>
    %cst_188 = arith.constant 5.000000e-01 : f32
    %721 = vector.broadcast %cst_188 : f32 to vector<8x64xf32>
    %722 = arith.addf %720, %721 : vector<8x64xf32>
    %723 = vector.extract_strided_slice %710 {offsets = [0, 256], sizes = [8, 64], strides = [1, 1]} : vector<8x512xf32> to vector<8x64xf32>
    %724 = math.tanh %723 : vector<8x64xf32>
    %725 = vector.extract_strided_slice %710 {offsets = [0, 384], sizes = [8, 64], strides = [1, 1]} : vector<8x512xf32> to vector<8x64xf32>
    %726 = math.tanh %725 : vector<8x64xf32>
    %cst_189 = arith.constant 5.000000e-01 : f32
    %727 = vector.broadcast %cst_189 : f32 to vector<8x64xf32>
    %728 = arith.mulf %727, %726 : vector<8x64xf32>
    %cst_190 = arith.constant 5.000000e-01 : f32
    %729 = vector.broadcast %cst_190 : f32 to vector<8x64xf32>
    %730 = arith.addf %728, %729 : vector<8x64xf32>
    %731 = arith.mulf %722, %667 : vector<8x64xf32>
    %732 = arith.mulf %716, %724 : vector<8x64xf32>
    %733 = arith.addf %731, %732 : vector<8x64xf32>
    %734 = math.tanh %733 : vector<8x64xf32>
    %735 = arith.mulf %730, %734 : vector<8x64xf32>
    %c0_191 = arith.constant 0 : index
    %c11 = arith.constant 11 : index
    %736 = vector.load %arg1[%c0_191, %c11] : memref<8x16xf32, #tpu.memory_space<vmem>>, vector<8x1xf32>
    %737 = vector.broadcast %736 : vector<8x1xf32> to vector<8x512xf32>
    %738 = vector.broadcast %0 : vector<1x512xf32> to vector<8x512xf32>
    %739 = arith.mulf %737, %738 : vector<8x512xf32>
    %740 = vector.broadcast %1 : vector<1x512xf32> to vector<8x512xf32>
    %741 = arith.addf %739, %740 : vector<8x512xf32>
    %742 = arith.truncf %703 : vector<8x128xf32> to vector<8x128xbf16>
    %cst_192 = arith.constant dense<0.000000e+00> : vector<8x512xf32>
    %743 = tpu.matmul %742, %2, %cst_192 {dimension_numbers = #tpu.dot_dimension_numbers<[1], [0], [0], [1], [0, 0, 1, 1], [], []>} : vector<8x128xbf16>, vector<128x512xbf16>, vector<8x512xf32> -> vector<8x512xf32>
    %744 = arith.addf %743, %741 : vector<8x512xf32>
    %745 = vector.extract_strided_slice %744 {offsets = [0, 0], sizes = [8, 128], strides = [1, 1]} : vector<8x512xf32> to vector<8x128xf32>
    %746 = math.tanh %745 : vector<8x128xf32>
    %cst_193 = arith.constant 5.000000e-01 : f32
    %747 = vector.broadcast %cst_193 : f32 to vector<8x128xf32>
    %748 = arith.mulf %747, %746 : vector<8x128xf32>
    %cst_194 = arith.constant 5.000000e-01 : f32
    %749 = vector.broadcast %cst_194 : f32 to vector<8x128xf32>
    %750 = arith.addf %748, %749 : vector<8x128xf32>
    %751 = vector.extract_strided_slice %744 {offsets = [0, 128], sizes = [8, 128], strides = [1, 1]} : vector<8x512xf32> to vector<8x128xf32>
    %752 = math.tanh %751 : vector<8x128xf32>
    %cst_195 = arith.constant 5.000000e-01 : f32
    %753 = vector.broadcast %cst_195 : f32 to vector<8x128xf32>
    %754 = arith.mulf %753, %752 : vector<8x128xf32>
    %cst_196 = arith.constant 5.000000e-01 : f32
    %755 = vector.broadcast %cst_196 : f32 to vector<8x128xf32>
    %756 = arith.addf %754, %755 : vector<8x128xf32>
    %757 = vector.extract_strided_slice %744 {offsets = [0, 256], sizes = [8, 128], strides = [1, 1]} : vector<8x512xf32> to vector<8x128xf32>
    %758 = math.tanh %757 : vector<8x128xf32>
    %759 = vector.extract_strided_slice %744 {offsets = [0, 384], sizes = [8, 128], strides = [1, 1]} : vector<8x512xf32> to vector<8x128xf32>
    %760 = math.tanh %759 : vector<8x128xf32>
    %cst_197 = arith.constant 5.000000e-01 : f32
    %761 = vector.broadcast %cst_197 : f32 to vector<8x128xf32>
    %762 = arith.mulf %761, %760 : vector<8x128xf32>
    %cst_198 = arith.constant 5.000000e-01 : f32
    %763 = vector.broadcast %cst_198 : f32 to vector<8x128xf32>
    %764 = arith.addf %762, %763 : vector<8x128xf32>
    %765 = arith.mulf %756, %701 : vector<8x128xf32>
    %766 = arith.mulf %750, %758 : vector<8x128xf32>
    %767 = arith.addf %765, %766 : vector<8x128xf32>
    %768 = math.tanh %767 : vector<8x128xf32>
    %769 = arith.mulf %764, %768 : vector<8x128xf32>
    %770 = arith.truncf %769 : vector<8x128xf32> to vector<8x128xbf16>
    %cst_199 = arith.constant dense<0.000000e+00> : vector<8x512xf32>
    %771 = tpu.matmul %770, %3, %cst_199 {dimension_numbers = #tpu.dot_dimension_numbers<[1], [0], [0], [1], [0, 0, 1, 1], [], []>} : vector<8x128xbf16>, vector<128x512xbf16>, vector<8x512xf32> -> vector<8x512xf32>
    %772 = vector.broadcast %5 : vector<1x512xf32> to vector<8x512xf32>
    %773 = arith.addf %771, %772 : vector<8x512xf32>
    %774 = arith.truncf %735 : vector<8x64xf32> to vector<8x64xbf16>
    %cst_200 = arith.constant dense<0.000000e+00> : vector<8x512xf32>
    %775 = tpu.matmul %774, %4, %cst_200 {dimension_numbers = #tpu.dot_dimension_numbers<[1], [0], [0], [1], [0, 0, 1, 1], [], []>} : vector<8x64xbf16>, vector<64x512xbf16>, vector<8x512xf32> -> vector<8x512xf32>
    %776 = arith.addf %775, %773 : vector<8x512xf32>
    %777 = vector.extract_strided_slice %776 {offsets = [0, 0], sizes = [8, 64], strides = [1, 1]} : vector<8x512xf32> to vector<8x64xf32>
    %778 = math.tanh %777 : vector<8x64xf32>
    %cst_201 = arith.constant 5.000000e-01 : f32
    %779 = vector.broadcast %cst_201 : f32 to vector<8x64xf32>
    %780 = arith.mulf %779, %778 : vector<8x64xf32>
    %cst_202 = arith.constant 5.000000e-01 : f32
    %781 = vector.broadcast %cst_202 : f32 to vector<8x64xf32>
    %782 = arith.addf %780, %781 : vector<8x64xf32>
    %783 = vector.extract_strided_slice %776 {offsets = [0, 128], sizes = [8, 64], strides = [1, 1]} : vector<8x512xf32> to vector<8x64xf32>
    %784 = math.tanh %783 : vector<8x64xf32>
    %cst_203 = arith.constant 5.000000e-01 : f32
    %785 = vector.broadcast %cst_203 : f32 to vector<8x64xf32>
    %786 = arith.mulf %785, %784 : vector<8x64xf32>
    %cst_204 = arith.constant 5.000000e-01 : f32
    %787 = vector.broadcast %cst_204 : f32 to vector<8x64xf32>
    %788 = arith.addf %786, %787 : vector<8x64xf32>
    %789 = vector.extract_strided_slice %776 {offsets = [0, 256], sizes = [8, 64], strides = [1, 1]} : vector<8x512xf32> to vector<8x64xf32>
    %790 = math.tanh %789 : vector<8x64xf32>
    %791 = vector.extract_strided_slice %776 {offsets = [0, 384], sizes = [8, 64], strides = [1, 1]} : vector<8x512xf32> to vector<8x64xf32>
    %792 = math.tanh %791 : vector<8x64xf32>
    %cst_205 = arith.constant 5.000000e-01 : f32
    %793 = vector.broadcast %cst_205 : f32 to vector<8x64xf32>
    %794 = arith.mulf %793, %792 : vector<8x64xf32>
    %cst_206 = arith.constant 5.000000e-01 : f32
    %795 = vector.broadcast %cst_206 : f32 to vector<8x64xf32>
    %796 = arith.addf %794, %795 : vector<8x64xf32>
    %797 = arith.mulf %788, %733 : vector<8x64xf32>
    %798 = arith.mulf %782, %790 : vector<8x64xf32>
    %799 = arith.addf %797, %798 : vector<8x64xf32>
    %800 = math.tanh %799 : vector<8x64xf32>
    %801 = arith.mulf %796, %800 : vector<8x64xf32>
    %c0_207 = arith.constant 0 : index
    %c12 = arith.constant 12 : index
    %802 = vector.load %arg1[%c0_207, %c12] : memref<8x16xf32, #tpu.memory_space<vmem>>, vector<8x1xf32>
    %803 = vector.broadcast %802 : vector<8x1xf32> to vector<8x512xf32>
    %804 = vector.broadcast %0 : vector<1x512xf32> to vector<8x512xf32>
    %805 = arith.mulf %803, %804 : vector<8x512xf32>
    %806 = vector.broadcast %1 : vector<1x512xf32> to vector<8x512xf32>
    %807 = arith.addf %805, %806 : vector<8x512xf32>
    %808 = arith.truncf %769 : vector<8x128xf32> to vector<8x128xbf16>
    %cst_208 = arith.constant dense<0.000000e+00> : vector<8x512xf32>
    %809 = tpu.matmul %808, %2, %cst_208 {dimension_numbers = #tpu.dot_dimension_numbers<[1], [0], [0], [1], [0, 0, 1, 1], [], []>} : vector<8x128xbf16>, vector<128x512xbf16>, vector<8x512xf32> -> vector<8x512xf32>
    %810 = arith.addf %809, %807 : vector<8x512xf32>
    %811 = vector.extract_strided_slice %810 {offsets = [0, 0], sizes = [8, 128], strides = [1, 1]} : vector<8x512xf32> to vector<8x128xf32>
    %812 = math.tanh %811 : vector<8x128xf32>
    %cst_209 = arith.constant 5.000000e-01 : f32
    %813 = vector.broadcast %cst_209 : f32 to vector<8x128xf32>
    %814 = arith.mulf %813, %812 : vector<8x128xf32>
    %cst_210 = arith.constant 5.000000e-01 : f32
    %815 = vector.broadcast %cst_210 : f32 to vector<8x128xf32>
    %816 = arith.addf %814, %815 : vector<8x128xf32>
    %817 = vector.extract_strided_slice %810 {offsets = [0, 128], sizes = [8, 128], strides = [1, 1]} : vector<8x512xf32> to vector<8x128xf32>
    %818 = math.tanh %817 : vector<8x128xf32>
    %cst_211 = arith.constant 5.000000e-01 : f32
    %819 = vector.broadcast %cst_211 : f32 to vector<8x128xf32>
    %820 = arith.mulf %819, %818 : vector<8x128xf32>
    %cst_212 = arith.constant 5.000000e-01 : f32
    %821 = vector.broadcast %cst_212 : f32 to vector<8x128xf32>
    %822 = arith.addf %820, %821 : vector<8x128xf32>
    %823 = vector.extract_strided_slice %810 {offsets = [0, 256], sizes = [8, 128], strides = [1, 1]} : vector<8x512xf32> to vector<8x128xf32>
    %824 = math.tanh %823 : vector<8x128xf32>
    %825 = vector.extract_strided_slice %810 {offsets = [0, 384], sizes = [8, 128], strides = [1, 1]} : vector<8x512xf32> to vector<8x128xf32>
    %826 = math.tanh %825 : vector<8x128xf32>
    %cst_213 = arith.constant 5.000000e-01 : f32
    %827 = vector.broadcast %cst_213 : f32 to vector<8x128xf32>
    %828 = arith.mulf %827, %826 : vector<8x128xf32>
    %cst_214 = arith.constant 5.000000e-01 : f32
    %829 = vector.broadcast %cst_214 : f32 to vector<8x128xf32>
    %830 = arith.addf %828, %829 : vector<8x128xf32>
    %831 = arith.mulf %822, %767 : vector<8x128xf32>
    %832 = arith.mulf %816, %824 : vector<8x128xf32>
    %833 = arith.addf %831, %832 : vector<8x128xf32>
    %834 = math.tanh %833 : vector<8x128xf32>
    %835 = arith.mulf %830, %834 : vector<8x128xf32>
    %836 = arith.truncf %835 : vector<8x128xf32> to vector<8x128xbf16>
    %cst_215 = arith.constant dense<0.000000e+00> : vector<8x512xf32>
    %837 = tpu.matmul %836, %3, %cst_215 {dimension_numbers = #tpu.dot_dimension_numbers<[1], [0], [0], [1], [0, 0, 1, 1], [], []>} : vector<8x128xbf16>, vector<128x512xbf16>, vector<8x512xf32> -> vector<8x512xf32>
    %838 = vector.broadcast %5 : vector<1x512xf32> to vector<8x512xf32>
    %839 = arith.addf %837, %838 : vector<8x512xf32>
    %840 = arith.truncf %801 : vector<8x64xf32> to vector<8x64xbf16>
    %cst_216 = arith.constant dense<0.000000e+00> : vector<8x512xf32>
    %841 = tpu.matmul %840, %4, %cst_216 {dimension_numbers = #tpu.dot_dimension_numbers<[1], [0], [0], [1], [0, 0, 1, 1], [], []>} : vector<8x64xbf16>, vector<64x512xbf16>, vector<8x512xf32> -> vector<8x512xf32>
    %842 = arith.addf %841, %839 : vector<8x512xf32>
    %843 = vector.extract_strided_slice %842 {offsets = [0, 0], sizes = [8, 64], strides = [1, 1]} : vector<8x512xf32> to vector<8x64xf32>
    %844 = math.tanh %843 : vector<8x64xf32>
    %cst_217 = arith.constant 5.000000e-01 : f32
    %845 = vector.broadcast %cst_217 : f32 to vector<8x64xf32>
    %846 = arith.mulf %845, %844 : vector<8x64xf32>
    %cst_218 = arith.constant 5.000000e-01 : f32
    %847 = vector.broadcast %cst_218 : f32 to vector<8x64xf32>
    %848 = arith.addf %846, %847 : vector<8x64xf32>
    %849 = vector.extract_strided_slice %842 {offsets = [0, 128], sizes = [8, 64], strides = [1, 1]} : vector<8x512xf32> to vector<8x64xf32>
    %850 = math.tanh %849 : vector<8x64xf32>
    %cst_219 = arith.constant 5.000000e-01 : f32
    %851 = vector.broadcast %cst_219 : f32 to vector<8x64xf32>
    %852 = arith.mulf %851, %850 : vector<8x64xf32>
    %cst_220 = arith.constant 5.000000e-01 : f32
    %853 = vector.broadcast %cst_220 : f32 to vector<8x64xf32>
    %854 = arith.addf %852, %853 : vector<8x64xf32>
    %855 = vector.extract_strided_slice %842 {offsets = [0, 256], sizes = [8, 64], strides = [1, 1]} : vector<8x512xf32> to vector<8x64xf32>
    %856 = math.tanh %855 : vector<8x64xf32>
    %857 = vector.extract_strided_slice %842 {offsets = [0, 384], sizes = [8, 64], strides = [1, 1]} : vector<8x512xf32> to vector<8x64xf32>
    %858 = math.tanh %857 : vector<8x64xf32>
    %cst_221 = arith.constant 5.000000e-01 : f32
    %859 = vector.broadcast %cst_221 : f32 to vector<8x64xf32>
    %860 = arith.mulf %859, %858 : vector<8x64xf32>
    %cst_222 = arith.constant 5.000000e-01 : f32
    %861 = vector.broadcast %cst_222 : f32 to vector<8x64xf32>
    %862 = arith.addf %860, %861 : vector<8x64xf32>
    %863 = arith.mulf %854, %799 : vector<8x64xf32>
    %864 = arith.mulf %848, %856 : vector<8x64xf32>
    %865 = arith.addf %863, %864 : vector<8x64xf32>
    %866 = math.tanh %865 : vector<8x64xf32>
    %867 = arith.mulf %862, %866 : vector<8x64xf32>
    %c0_223 = arith.constant 0 : index
    %c13 = arith.constant 13 : index
    %868 = vector.load %arg1[%c0_223, %c13] : memref<8x16xf32, #tpu.memory_space<vmem>>, vector<8x1xf32>
    %869 = vector.broadcast %868 : vector<8x1xf32> to vector<8x512xf32>
    %870 = vector.broadcast %0 : vector<1x512xf32> to vector<8x512xf32>
    %871 = arith.mulf %869, %870 : vector<8x512xf32>
    %872 = vector.broadcast %1 : vector<1x512xf32> to vector<8x512xf32>
    %873 = arith.addf %871, %872 : vector<8x512xf32>
    %874 = arith.truncf %835 : vector<8x128xf32> to vector<8x128xbf16>
    %cst_224 = arith.constant dense<0.000000e+00> : vector<8x512xf32>
    %875 = tpu.matmul %874, %2, %cst_224 {dimension_numbers = #tpu.dot_dimension_numbers<[1], [0], [0], [1], [0, 0, 1, 1], [], []>} : vector<8x128xbf16>, vector<128x512xbf16>, vector<8x512xf32> -> vector<8x512xf32>
    %876 = arith.addf %875, %873 : vector<8x512xf32>
    %877 = vector.extract_strided_slice %876 {offsets = [0, 0], sizes = [8, 128], strides = [1, 1]} : vector<8x512xf32> to vector<8x128xf32>
    %878 = math.tanh %877 : vector<8x128xf32>
    %cst_225 = arith.constant 5.000000e-01 : f32
    %879 = vector.broadcast %cst_225 : f32 to vector<8x128xf32>
    %880 = arith.mulf %879, %878 : vector<8x128xf32>
    %cst_226 = arith.constant 5.000000e-01 : f32
    %881 = vector.broadcast %cst_226 : f32 to vector<8x128xf32>
    %882 = arith.addf %880, %881 : vector<8x128xf32>
    %883 = vector.extract_strided_slice %876 {offsets = [0, 128], sizes = [8, 128], strides = [1, 1]} : vector<8x512xf32> to vector<8x128xf32>
    %884 = math.tanh %883 : vector<8x128xf32>
    %cst_227 = arith.constant 5.000000e-01 : f32
    %885 = vector.broadcast %cst_227 : f32 to vector<8x128xf32>
    %886 = arith.mulf %885, %884 : vector<8x128xf32>
    %cst_228 = arith.constant 5.000000e-01 : f32
    %887 = vector.broadcast %cst_228 : f32 to vector<8x128xf32>
    %888 = arith.addf %886, %887 : vector<8x128xf32>
    %889 = vector.extract_strided_slice %876 {offsets = [0, 256], sizes = [8, 128], strides = [1, 1]} : vector<8x512xf32> to vector<8x128xf32>
    %890 = math.tanh %889 : vector<8x128xf32>
    %891 = vector.extract_strided_slice %876 {offsets = [0, 384], sizes = [8, 128], strides = [1, 1]} : vector<8x512xf32> to vector<8x128xf32>
    %892 = math.tanh %891 : vector<8x128xf32>
    %cst_229 = arith.constant 5.000000e-01 : f32
    %893 = vector.broadcast %cst_229 : f32 to vector<8x128xf32>
    %894 = arith.mulf %893, %892 : vector<8x128xf32>
    %cst_230 = arith.constant 5.000000e-01 : f32
    %895 = vector.broadcast %cst_230 : f32 to vector<8x128xf32>
    %896 = arith.addf %894, %895 : vector<8x128xf32>
    %897 = arith.mulf %888, %833 : vector<8x128xf32>
    %898 = arith.mulf %882, %890 : vector<8x128xf32>
    %899 = arith.addf %897, %898 : vector<8x128xf32>
    %900 = math.tanh %899 : vector<8x128xf32>
    %901 = arith.mulf %896, %900 : vector<8x128xf32>
    %902 = arith.truncf %901 : vector<8x128xf32> to vector<8x128xbf16>
    %cst_231 = arith.constant dense<0.000000e+00> : vector<8x512xf32>
    %903 = tpu.matmul %902, %3, %cst_231 {dimension_numbers = #tpu.dot_dimension_numbers<[1], [0], [0], [1], [0, 0, 1, 1], [], []>} : vector<8x128xbf16>, vector<128x512xbf16>, vector<8x512xf32> -> vector<8x512xf32>
    %904 = vector.broadcast %5 : vector<1x512xf32> to vector<8x512xf32>
    %905 = arith.addf %903, %904 : vector<8x512xf32>
    %906 = arith.truncf %867 : vector<8x64xf32> to vector<8x64xbf16>
    %cst_232 = arith.constant dense<0.000000e+00> : vector<8x512xf32>
    %907 = tpu.matmul %906, %4, %cst_232 {dimension_numbers = #tpu.dot_dimension_numbers<[1], [0], [0], [1], [0, 0, 1, 1], [], []>} : vector<8x64xbf16>, vector<64x512xbf16>, vector<8x512xf32> -> vector<8x512xf32>
    %908 = arith.addf %907, %905 : vector<8x512xf32>
    %909 = vector.extract_strided_slice %908 {offsets = [0, 0], sizes = [8, 64], strides = [1, 1]} : vector<8x512xf32> to vector<8x64xf32>
    %910 = math.tanh %909 : vector<8x64xf32>
    %cst_233 = arith.constant 5.000000e-01 : f32
    %911 = vector.broadcast %cst_233 : f32 to vector<8x64xf32>
    %912 = arith.mulf %911, %910 : vector<8x64xf32>
    %cst_234 = arith.constant 5.000000e-01 : f32
    %913 = vector.broadcast %cst_234 : f32 to vector<8x64xf32>
    %914 = arith.addf %912, %913 : vector<8x64xf32>
    %915 = vector.extract_strided_slice %908 {offsets = [0, 128], sizes = [8, 64], strides = [1, 1]} : vector<8x512xf32> to vector<8x64xf32>
    %916 = math.tanh %915 : vector<8x64xf32>
    %cst_235 = arith.constant 5.000000e-01 : f32
    %917 = vector.broadcast %cst_235 : f32 to vector<8x64xf32>
    %918 = arith.mulf %917, %916 : vector<8x64xf32>
    %cst_236 = arith.constant 5.000000e-01 : f32
    %919 = vector.broadcast %cst_236 : f32 to vector<8x64xf32>
    %920 = arith.addf %918, %919 : vector<8x64xf32>
    %921 = vector.extract_strided_slice %908 {offsets = [0, 256], sizes = [8, 64], strides = [1, 1]} : vector<8x512xf32> to vector<8x64xf32>
    %922 = math.tanh %921 : vector<8x64xf32>
    %923 = vector.extract_strided_slice %908 {offsets = [0, 384], sizes = [8, 64], strides = [1, 1]} : vector<8x512xf32> to vector<8x64xf32>
    %924 = math.tanh %923 : vector<8x64xf32>
    %cst_237 = arith.constant 5.000000e-01 : f32
    %925 = vector.broadcast %cst_237 : f32 to vector<8x64xf32>
    %926 = arith.mulf %925, %924 : vector<8x64xf32>
    %cst_238 = arith.constant 5.000000e-01 : f32
    %927 = vector.broadcast %cst_238 : f32 to vector<8x64xf32>
    %928 = arith.addf %926, %927 : vector<8x64xf32>
    %929 = arith.mulf %920, %865 : vector<8x64xf32>
    %930 = arith.mulf %914, %922 : vector<8x64xf32>
    %931 = arith.addf %929, %930 : vector<8x64xf32>
    %932 = math.tanh %931 : vector<8x64xf32>
    %933 = arith.mulf %928, %932 : vector<8x64xf32>
    %c0_239 = arith.constant 0 : index
    %c14 = arith.constant 14 : index
    %934 = vector.load %arg1[%c0_239, %c14] : memref<8x16xf32, #tpu.memory_space<vmem>>, vector<8x1xf32>
    %935 = vector.broadcast %934 : vector<8x1xf32> to vector<8x512xf32>
    %936 = vector.broadcast %0 : vector<1x512xf32> to vector<8x512xf32>
    %937 = arith.mulf %935, %936 : vector<8x512xf32>
    %938 = vector.broadcast %1 : vector<1x512xf32> to vector<8x512xf32>
    %939 = arith.addf %937, %938 : vector<8x512xf32>
    %940 = arith.truncf %901 : vector<8x128xf32> to vector<8x128xbf16>
    %cst_240 = arith.constant dense<0.000000e+00> : vector<8x512xf32>
    %941 = tpu.matmul %940, %2, %cst_240 {dimension_numbers = #tpu.dot_dimension_numbers<[1], [0], [0], [1], [0, 0, 1, 1], [], []>} : vector<8x128xbf16>, vector<128x512xbf16>, vector<8x512xf32> -> vector<8x512xf32>
    %942 = arith.addf %941, %939 : vector<8x512xf32>
    %943 = vector.extract_strided_slice %942 {offsets = [0, 0], sizes = [8, 128], strides = [1, 1]} : vector<8x512xf32> to vector<8x128xf32>
    %944 = math.tanh %943 : vector<8x128xf32>
    %cst_241 = arith.constant 5.000000e-01 : f32
    %945 = vector.broadcast %cst_241 : f32 to vector<8x128xf32>
    %946 = arith.mulf %945, %944 : vector<8x128xf32>
    %cst_242 = arith.constant 5.000000e-01 : f32
    %947 = vector.broadcast %cst_242 : f32 to vector<8x128xf32>
    %948 = arith.addf %946, %947 : vector<8x128xf32>
    %949 = vector.extract_strided_slice %942 {offsets = [0, 128], sizes = [8, 128], strides = [1, 1]} : vector<8x512xf32> to vector<8x128xf32>
    %950 = math.tanh %949 : vector<8x128xf32>
    %cst_243 = arith.constant 5.000000e-01 : f32
    %951 = vector.broadcast %cst_243 : f32 to vector<8x128xf32>
    %952 = arith.mulf %951, %950 : vector<8x128xf32>
    %cst_244 = arith.constant 5.000000e-01 : f32
    %953 = vector.broadcast %cst_244 : f32 to vector<8x128xf32>
    %954 = arith.addf %952, %953 : vector<8x128xf32>
    %955 = vector.extract_strided_slice %942 {offsets = [0, 256], sizes = [8, 128], strides = [1, 1]} : vector<8x512xf32> to vector<8x128xf32>
    %956 = math.tanh %955 : vector<8x128xf32>
    %957 = vector.extract_strided_slice %942 {offsets = [0, 384], sizes = [8, 128], strides = [1, 1]} : vector<8x512xf32> to vector<8x128xf32>
    %958 = math.tanh %957 : vector<8x128xf32>
    %cst_245 = arith.constant 5.000000e-01 : f32
    %959 = vector.broadcast %cst_245 : f32 to vector<8x128xf32>
    %960 = arith.mulf %959, %958 : vector<8x128xf32>
    %cst_246 = arith.constant 5.000000e-01 : f32
    %961 = vector.broadcast %cst_246 : f32 to vector<8x128xf32>
    %962 = arith.addf %960, %961 : vector<8x128xf32>
    %963 = arith.mulf %954, %899 : vector<8x128xf32>
    %964 = arith.mulf %948, %956 : vector<8x128xf32>
    %965 = arith.addf %963, %964 : vector<8x128xf32>
    %966 = math.tanh %965 : vector<8x128xf32>
    %967 = arith.mulf %962, %966 : vector<8x128xf32>
    %968 = arith.truncf %967 : vector<8x128xf32> to vector<8x128xbf16>
    %cst_247 = arith.constant dense<0.000000e+00> : vector<8x512xf32>
    %969 = tpu.matmul %968, %3, %cst_247 {dimension_numbers = #tpu.dot_dimension_numbers<[1], [0], [0], [1], [0, 0, 1, 1], [], []>} : vector<8x128xbf16>, vector<128x512xbf16>, vector<8x512xf32> -> vector<8x512xf32>
    %970 = vector.broadcast %5 : vector<1x512xf32> to vector<8x512xf32>
    %971 = arith.addf %969, %970 : vector<8x512xf32>
    %972 = arith.truncf %933 : vector<8x64xf32> to vector<8x64xbf16>
    %cst_248 = arith.constant dense<0.000000e+00> : vector<8x512xf32>
    %973 = tpu.matmul %972, %4, %cst_248 {dimension_numbers = #tpu.dot_dimension_numbers<[1], [0], [0], [1], [0, 0, 1, 1], [], []>} : vector<8x64xbf16>, vector<64x512xbf16>, vector<8x512xf32> -> vector<8x512xf32>
    %974 = arith.addf %973, %971 : vector<8x512xf32>
    %975 = vector.extract_strided_slice %974 {offsets = [0, 0], sizes = [8, 64], strides = [1, 1]} : vector<8x512xf32> to vector<8x64xf32>
    %976 = math.tanh %975 : vector<8x64xf32>
    %cst_249 = arith.constant 5.000000e-01 : f32
    %977 = vector.broadcast %cst_249 : f32 to vector<8x64xf32>
    %978 = arith.mulf %977, %976 : vector<8x64xf32>
    %cst_250 = arith.constant 5.000000e-01 : f32
    %979 = vector.broadcast %cst_250 : f32 to vector<8x64xf32>
    %980 = arith.addf %978, %979 : vector<8x64xf32>
    %981 = vector.extract_strided_slice %974 {offsets = [0, 128], sizes = [8, 64], strides = [1, 1]} : vector<8x512xf32> to vector<8x64xf32>
    %982 = math.tanh %981 : vector<8x64xf32>
    %cst_251 = arith.constant 5.000000e-01 : f32
    %983 = vector.broadcast %cst_251 : f32 to vector<8x64xf32>
    %984 = arith.mulf %983, %982 : vector<8x64xf32>
    %cst_252 = arith.constant 5.000000e-01 : f32
    %985 = vector.broadcast %cst_252 : f32 to vector<8x64xf32>
    %986 = arith.addf %984, %985 : vector<8x64xf32>
    %987 = vector.extract_strided_slice %974 {offsets = [0, 256], sizes = [8, 64], strides = [1, 1]} : vector<8x512xf32> to vector<8x64xf32>
    %988 = math.tanh %987 : vector<8x64xf32>
    %989 = vector.extract_strided_slice %974 {offsets = [0, 384], sizes = [8, 64], strides = [1, 1]} : vector<8x512xf32> to vector<8x64xf32>
    %990 = math.tanh %989 : vector<8x64xf32>
    %cst_253 = arith.constant 5.000000e-01 : f32
    %991 = vector.broadcast %cst_253 : f32 to vector<8x64xf32>
    %992 = arith.mulf %991, %990 : vector<8x64xf32>
    %cst_254 = arith.constant 5.000000e-01 : f32
    %993 = vector.broadcast %cst_254 : f32 to vector<8x64xf32>
    %994 = arith.addf %992, %993 : vector<8x64xf32>
    %995 = arith.mulf %986, %931 : vector<8x64xf32>
    %996 = arith.mulf %980, %988 : vector<8x64xf32>
    %997 = arith.addf %995, %996 : vector<8x64xf32>
    %998 = math.tanh %997 : vector<8x64xf32>
    %999 = arith.mulf %994, %998 : vector<8x64xf32>
    %c0_255 = arith.constant 0 : index
    %c15 = arith.constant 15 : index
    %1000 = vector.load %arg1[%c0_255, %c15] : memref<8x16xf32, #tpu.memory_space<vmem>>, vector<8x1xf32>
    %1001 = vector.broadcast %1000 : vector<8x1xf32> to vector<8x512xf32>
    %1002 = vector.broadcast %0 : vector<1x512xf32> to vector<8x512xf32>
    %1003 = arith.mulf %1001, %1002 : vector<8x512xf32>
    %1004 = vector.broadcast %1 : vector<1x512xf32> to vector<8x512xf32>
    %1005 = arith.addf %1003, %1004 : vector<8x512xf32>
    %1006 = arith.truncf %967 : vector<8x128xf32> to vector<8x128xbf16>
    %cst_256 = arith.constant dense<0.000000e+00> : vector<8x512xf32>
    %1007 = tpu.matmul %1006, %2, %cst_256 {dimension_numbers = #tpu.dot_dimension_numbers<[1], [0], [0], [1], [0, 0, 1, 1], [], []>} : vector<8x128xbf16>, vector<128x512xbf16>, vector<8x512xf32> -> vector<8x512xf32>
    %1008 = arith.addf %1007, %1005 : vector<8x512xf32>
    %1009 = vector.extract_strided_slice %1008 {offsets = [0, 0], sizes = [8, 128], strides = [1, 1]} : vector<8x512xf32> to vector<8x128xf32>
    %1010 = math.tanh %1009 : vector<8x128xf32>
    %cst_257 = arith.constant 5.000000e-01 : f32
    %1011 = vector.broadcast %cst_257 : f32 to vector<8x128xf32>
    %1012 = arith.mulf %1011, %1010 : vector<8x128xf32>
    %cst_258 = arith.constant 5.000000e-01 : f32
    %1013 = vector.broadcast %cst_258 : f32 to vector<8x128xf32>
    %1014 = arith.addf %1012, %1013 : vector<8x128xf32>
    %1015 = vector.extract_strided_slice %1008 {offsets = [0, 128], sizes = [8, 128], strides = [1, 1]} : vector<8x512xf32> to vector<8x128xf32>
    %1016 = math.tanh %1015 : vector<8x128xf32>
    %cst_259 = arith.constant 5.000000e-01 : f32
    %1017 = vector.broadcast %cst_259 : f32 to vector<8x128xf32>
    %1018 = arith.mulf %1017, %1016 : vector<8x128xf32>
    %cst_260 = arith.constant 5.000000e-01 : f32
    %1019 = vector.broadcast %cst_260 : f32 to vector<8x128xf32>
    %1020 = arith.addf %1018, %1019 : vector<8x128xf32>
    %1021 = vector.extract_strided_slice %1008 {offsets = [0, 256], sizes = [8, 128], strides = [1, 1]} : vector<8x512xf32> to vector<8x128xf32>
    %1022 = math.tanh %1021 : vector<8x128xf32>
    %1023 = vector.extract_strided_slice %1008 {offsets = [0, 384], sizes = [8, 128], strides = [1, 1]} : vector<8x512xf32> to vector<8x128xf32>
    %1024 = math.tanh %1023 : vector<8x128xf32>
    %cst_261 = arith.constant 5.000000e-01 : f32
    %1025 = vector.broadcast %cst_261 : f32 to vector<8x128xf32>
    %1026 = arith.mulf %1025, %1024 : vector<8x128xf32>
    %cst_262 = arith.constant 5.000000e-01 : f32
    %1027 = vector.broadcast %cst_262 : f32 to vector<8x128xf32>
    %1028 = arith.addf %1026, %1027 : vector<8x128xf32>
    %1029 = arith.mulf %1020, %965 : vector<8x128xf32>
    %1030 = arith.mulf %1014, %1022 : vector<8x128xf32>
    %1031 = arith.addf %1029, %1030 : vector<8x128xf32>
    %1032 = math.tanh %1031 : vector<8x128xf32>
    %1033 = arith.mulf %1028, %1032 : vector<8x128xf32>
    %1034 = arith.truncf %1033 : vector<8x128xf32> to vector<8x128xbf16>
    %cst_263 = arith.constant dense<0.000000e+00> : vector<8x512xf32>
    %1035 = tpu.matmul %1034, %3, %cst_263 {dimension_numbers = #tpu.dot_dimension_numbers<[1], [0], [0], [1], [0, 0, 1, 1], [], []>} : vector<8x128xbf16>, vector<128x512xbf16>, vector<8x512xf32> -> vector<8x512xf32>
    %1036 = vector.broadcast %5 : vector<1x512xf32> to vector<8x512xf32>
    %1037 = arith.addf %1035, %1036 : vector<8x512xf32>
    %1038 = arith.truncf %999 : vector<8x64xf32> to vector<8x64xbf16>
    %cst_264 = arith.constant dense<0.000000e+00> : vector<8x512xf32>
    %1039 = tpu.matmul %1038, %4, %cst_264 {dimension_numbers = #tpu.dot_dimension_numbers<[1], [0], [0], [1], [0, 0, 1, 1], [], []>} : vector<8x64xbf16>, vector<64x512xbf16>, vector<8x512xf32> -> vector<8x512xf32>
    %1040 = arith.addf %1039, %1037 : vector<8x512xf32>
    %1041 = vector.extract_strided_slice %1040 {offsets = [0, 0], sizes = [8, 64], strides = [1, 1]} : vector<8x512xf32> to vector<8x64xf32>
    %1042 = math.tanh %1041 : vector<8x64xf32>
    %cst_265 = arith.constant 5.000000e-01 : f32
    %1043 = vector.broadcast %cst_265 : f32 to vector<8x64xf32>
    %1044 = arith.mulf %1043, %1042 : vector<8x64xf32>
    %cst_266 = arith.constant 5.000000e-01 : f32
    %1045 = vector.broadcast %cst_266 : f32 to vector<8x64xf32>
    %1046 = arith.addf %1044, %1045 : vector<8x64xf32>
    %1047 = vector.extract_strided_slice %1040 {offsets = [0, 128], sizes = [8, 64], strides = [1, 1]} : vector<8x512xf32> to vector<8x64xf32>
    %1048 = math.tanh %1047 : vector<8x64xf32>
    %cst_267 = arith.constant 5.000000e-01 : f32
    %1049 = vector.broadcast %cst_267 : f32 to vector<8x64xf32>
    %1050 = arith.mulf %1049, %1048 : vector<8x64xf32>
    %cst_268 = arith.constant 5.000000e-01 : f32
    %1051 = vector.broadcast %cst_268 : f32 to vector<8x64xf32>
    %1052 = arith.addf %1050, %1051 : vector<8x64xf32>
    %1053 = vector.extract_strided_slice %1040 {offsets = [0, 256], sizes = [8, 64], strides = [1, 1]} : vector<8x512xf32> to vector<8x64xf32>
    %1054 = math.tanh %1053 : vector<8x64xf32>
    %1055 = vector.extract_strided_slice %1040 {offsets = [0, 384], sizes = [8, 64], strides = [1, 1]} : vector<8x512xf32> to vector<8x64xf32>
    %1056 = math.tanh %1055 : vector<8x64xf32>
    %cst_269 = arith.constant 5.000000e-01 : f32
    %1057 = vector.broadcast %cst_269 : f32 to vector<8x64xf32>
    %1058 = arith.mulf %1057, %1056 : vector<8x64xf32>
    %cst_270 = arith.constant 5.000000e-01 : f32
    %1059 = vector.broadcast %cst_270 : f32 to vector<8x64xf32>
    %1060 = arith.addf %1058, %1059 : vector<8x64xf32>
    %1061 = arith.mulf %1052, %997 : vector<8x64xf32>
    %1062 = arith.mulf %1046, %1054 : vector<8x64xf32>
    %1063 = arith.addf %1061, %1062 : vector<8x64xf32>
    %1064 = math.tanh %1063 : vector<8x64xf32>
    %1065 = arith.mulf %1060, %1064 : vector<8x64xf32>
    %1066 = arith.truncf %1065 : vector<8x64xf32> to vector<8x64xbf16>
    %c0_271 = arith.constant 0 : index
    %c0_272 = arith.constant 0 : index
    %1067 = vector.load %arg8[%c0_271, %c0_272] : memref<64x16xbf16, #tpu.memory_space<vmem>>, vector<64x16xbf16>
    %cst_273 = arith.constant dense<0.000000e+00> : vector<8x16xf32>
    %1068 = tpu.matmul %1066, %1067, %cst_273 {dimension_numbers = #tpu.dot_dimension_numbers<[1], [0], [0], [1], [0, 0, 1, 1], [], []>} : vector<8x64xbf16>, vector<64x16xbf16>, vector<8x16xf32> -> vector<8x16xf32>
    %c0_274 = arith.constant 0 : index
    %c0_275 = arith.constant 0 : index
    %1069 = vector.load %arg9[%c0_274, %c0_275] : memref<1x16xf32, #tpu.memory_space<vmem>>, vector<1x16xf32>
    %1070 = vector.broadcast %1069 : vector<1x16xf32> to vector<8x16xf32>
    %1071 = arith.addf %1068, %1070 : vector<8x16xf32>
    %cst_276 = arith.constant 0.000000e+00 : f32
    %1072 = vector.broadcast %cst_276 : f32 to vector<8x16xf32>
    %1073 = arith.maximumf %1071, %1072 : vector<8x16xf32>
    %c0_277 = arith.constant 0 : index
    %c0_278 = arith.constant 0 : index
    %1074 = vector.load %arg10[%c0_277, %c0_278] : memref<16x4xf32, #tpu.memory_space<vmem>>, vector<16x4xf32>
    %cst_279 = arith.constant dense<0.000000e+00> : vector<8x4xf32>
    %1075 = tpu.matmul %1073, %1074, %cst_279 {dimension_numbers = #tpu.dot_dimension_numbers<[1], [0], [0], [1], [0, 0, 1, 1], [], []>} : vector<8x16xf32>, vector<16x4xf32>, vector<8x4xf32> -> vector<8x4xf32>
    %c0_280 = arith.constant 0 : index
    %c0_281 = arith.constant 0 : index
    %1076 = vector.load %arg11[%c0_280, %c0_281] : memref<1x4xf32, #tpu.memory_space<vmem>>, vector<1x4xf32>
    %1077 = vector.broadcast %1076 : vector<1x4xf32> to vector<8x4xf32>
    %1078 = arith.addf %1075, %1077 : vector<8x4xf32>
    %c0_282 = arith.constant 0 : index
    %c0_283 = arith.constant 0 : index
    %1079 = vector.load %arg12[%c0_282, %c0_283] : memref<8x4xf32, #tpu.memory_space<vmem>>, vector<8x4xf32>
    tpu.vector_store %arg12[%c0_282, %c0_283], %1078 {strides = array<i32>} : memref<8x4xf32, #tpu.memory_space<vmem>>, vector<8x4xf32>,
    return
  }
  func.func @transform_0(%arg0: i32) -> (i32, i32) {
    %c0_i32 = arith.constant 0 : i32
    %c0_i32_0 = arith.constant 0 : i32
    return %arg0, %c0_i32 : i32, i32
  }
  func.func @transform_1(%arg0: i32) -> (i32, i32) {
    %c0_i32 = arith.constant 0 : i32
    %c0_i32_0 = arith.constant 0 : i32
    %c0_i32_1 = arith.constant 0 : i32
    return %c0_i32, %c0_i32_0 : i32, i32
  }
  func.func @transform_2(%arg0: i32) -> (i32, i32) {
    %c0_i32 = arith.constant 0 : i32
    %c0_i32_0 = arith.constant 0 : i32
    %c0_i32_1 = arith.constant 0 : i32
    return %c0_i32, %c0_i32_0 : i32, i32
  }
  func.func @transform_3(%arg0: i32) -> (i32, i32) {
    %c0_i32 = arith.constant 0 : i32
    %c0_i32_0 = arith.constant 0 : i32
    %c0_i32_1 = arith.constant 0 : i32
    return %c0_i32, %c0_i32_0 : i32, i32
  }
  func.func @transform_4(%arg0: i32) -> (i32, i32) {
    %c0_i32 = arith.constant 0 : i32
    %c0_i32_0 = arith.constant 0 : i32
    %c0_i32_1 = arith.constant 0 : i32
    return %c0_i32, %c0_i32_0 : i32, i32
  }
  func.func @transform_5(%arg0: i32) -> (i32, i32) {
    %c0_i32 = arith.constant 0 : i32
    %c0_i32_0 = arith.constant 0 : i32
    %c0_i32_1 = arith.constant 0 : i32
    return %c0_i32, %c0_i32_0 : i32, i32
  }
  func.func @transform_6(%arg0: i32) -> (i32, i32) {
    %c0_i32 = arith.constant 0 : i32
    %c0_i32_0 = arith.constant 0 : i32
    %c0_i32_1 = arith.constant 0 : i32
    return %c0_i32, %c0_i32_0 : i32, i32
  }
  func.func @transform_7(%arg0: i32) -> (i32, i32) {
    %c0_i32 = arith.constant 0 : i32
    %c0_i32_0 = arith.constant 0 : i32
    %c0_i32_1 = arith.constant 0 : i32
    return %c0_i32, %c0_i32_0 : i32, i32
  }
  func.func @transform_8(%arg0: i32) -> (i32, i32) {
    %c0_i32 = arith.constant 0 : i32
    %c0_i32_0 = arith.constant 0 : i32
    %c0_i32_1 = arith.constant 0 : i32
    return %c0_i32, %c0_i32_0 : i32, i32
  }
  func.func @transform_9(%arg0: i32) -> (i32, i32) {
    %c0_i32 = arith.constant 0 : i32
    %c0_i32_0 = arith.constant 0 : i32
    %c0_i32_1 = arith.constant 0 : i32
    return %c0_i32, %c0_i32_0 : i32, i32
  }
  func.func @transform_10(%arg0: i32) -> (i32, i32) {
    %c0_i32 = arith.constant 0 : i32
    %c0_i32_0 = arith.constant 0 : i32
    %c0_i32_1 = arith.constant 0 : i32
    return %c0_i32, %c0_i32_0 : i32, i32
  }
  func.func @transform_11(%arg0: i32) -> (i32, i32) {
    %c0_i32 = arith.constant 0 : i32
    %c0_i32_0 = arith.constant 0 : i32
    return %arg0, %c0_i32 : i32, i32
  }
}

</mosaic_0001>

<bundles_post_ra>
// kernel: lstm_model_forward.1
= control target key start
LH: loop header
LB: loop body
LE: loop exit
PB: predicated region body
PF: predicated region fallthrough
CT: control target
= control target key end

     0   :  { %vm683_vm0 = vcmask 523264   ;;  %vm3859_vm1 = vcmask 130048   ;;  %vm3883_vm2 = vcmask 31744   ;;  %s7236_s2 = inlined_call_operand.vmem [shape: bf16[128,512], index: 2, kind: input, shape index: {}]   ;;  %s7237_s0 = inlined_call_operand.vmem [shape: f32[8,16], index: 0, kind: input, shape index: {}]   ;;  %s7238_s4 = inlined_call_operand.vmem [shape: bf16[128,512], index: 4, kind: input, shape index: {}]   ;;  %s7239_s1 = inlined_call_operand.vmem [shape: f32[1,512], index: 1, kind: input, shape index: {}]   ;;  %s7240_s3 = inlined_call_operand.vmem [shape: f32[1,512], index: 3, kind: input, shape index: {}]   ;;  %s7241_s5 = inlined_call_operand.vmem [shape: bf16[64,512], index: 5, kind: input, shape index: {}]   ;;  %s7242_s6 = inlined_call_operand.vmem [shape: f32[1,512], index: 6, kind: input, shape index: {}]   ;;  %s7243_s8 = inlined_call_operand.vmem [shape: f32[1,16], index: 8, kind: input, shape index: {}]   ;;  %s7244_s7 = inlined_call_operand.vmem [shape: bf16[64,16], index: 7, kind: input, shape index: {}]   ;;  %s7245_s9 = inlined_call_operand.vmem [shape: f32[16,4], index: 9, kind: input, shape index: {}]   ;;  %s7246_s10 = inlined_call_operand.vmem [shape: f32[1,4], index: 10, kind: input, shape index: {}]   ;;  %s7247_s11 = inlined_call_operand.vmem [shape: f32[8,4], index: 11, kind: output, shape index: {}]  }
   0x1   :  { %v4003_v0 = vld [vmem:[%s7236_s2 + $0xe0] sm:$0xf]  ;;  %v4317_v1 = vld [vmem:[%s7236_s2 + $0xec] sm:$0xf0]  ;;  %v4315_v2 = vld [vmem:[%s7236_s2 + $0xe4] sm:$0xf] }
   0x2   :  { %v4816_v3 = vor.u32 %v4317_v1, %v4003_v0  ;;  %v4005_v4 = vld [vmem:[%s7236_s2 + $0xf0] sm:$0xf0]  ;;  %v4011_v5 = vld [vmem:[%s7236_s2 + $0xe8] sm:$0xf]  ;;  %v4318_v6 = vld [vmem:[%s7236_s2 + $0xf4] sm:$0xf0] }
   0x3   :  { %v4827_v7 = vor.u32 %v4315_v2, %v4005_v4  ;;  %v4829_v8 = vor.u32 %v4318_v6, %v4011_v5  ;;  %v4316_v9 = vld [vmem:[%s7236_s2 + $0xec] sm:$0xf]  ;;  %v4013_v10 = vld [vmem:[%s7236_s2 + $0xf8] sm:$0xf0]  ;;  %v3987_v11 = vld [vmem:[%s7236_s2 + $0xc0] sm:$0xf] }
   0x4   :  { %314 = vmatpush.bf16.msra.mxu0 %v4816_v3  ;;  %v4841_v12 = vor.u32 %v4316_v9, %v4013_v10  ;;  %v4313_v13 = vld [vmem:[%s7236_s2 + $0xcc] sm:$0xf0]  ;;  %v4311_v14 = vld [vmem:[%s7236_s2 + $0xc4] sm:$0xf]  ;;  %v3989_v15 = vld [vmem:[%s7236_s2 + $0xd0] sm:$0xf0] }
   0x5   :  { %327 = vmatpush.bf16.msra.mxu1 %v4827_v7  ;;  %340 = vmatpush.bf16.msra.mxu2 %v4829_v8  ;;  %v4854_v16 = vor.u32 %v4313_v13, %v3987_v11  ;;  %v4856_v17 = vor.u32 %v4311_v14, %v3989_v15  ;;  %v3995_v18 = vld [vmem:[%s7236_s2 + $0xc8] sm:$0xf]  ;;  %v4314_v19 = vld [vmem:[%s7236_s2 + $0xd4] sm:$0xf0]  ;;  %v4312_v20 = vld [vmem:[%s7236_s2 + $0xcc] sm:$0xf] }
   0x6   :  { %353 = vmatpush.bf16.msra.mxu3 %v4841_v12  ;;  %v4868_v21 = vor.u32 %v4314_v19, %v3995_v18  ;;  %v3997_v22 = vld [vmem:[%s7236_s2 + $0xd8] sm:$0xf0]  ;;  %v3971_v23 = vld [vmem:[%s7236_s2 + $0xa0] sm:$0xf]  ;;  %v4309_v24 = vld [vmem:[%s7236_s2 + $0xac] sm:$0xf0] }
   0x7   :  { %v4879_v25 = vor.u32 %v4312_v20, %v3997_v22  ;;  %v4307_v26 = vld [vmem:[%s7236_s2 + $0xa4] sm:$0xf]  ;;  %v3973_v27 = vld [vmem:[%s7236_s2 + $0xb0] sm:$0xf0]  ;;  %v3979_v28 = vld [vmem:[%s7236_s2 + $0xa8] sm:$0xf]  ;;  %v4891_v29 = vor.u32 %v4309_v24, %v3971_v23 }
   0x8   :  { %315 = vmatpush.bf16.msra.mxu0 %v4854_v16  ;;  %v4310_v30 = vld [vmem:[%s7236_s2 + $0xb4] sm:$0xf0]  ;;  %v4308_v31 = vld [vmem:[%s7236_s2 + $0xac] sm:$0xf]  ;;  %v3981_v32 = vld [vmem:[%s7236_s2 + $0xb8] sm:$0xf0]  ;;  %v4904_v33 = vor.u32 %v4307_v26, %v3973_v27 }
   0x9   :  { %328 = vmatpush.bf16.msra.mxu1 %v4856_v17  ;;  %341 = vmatpush.bf16.msra.mxu2 %v4868_v21  ;;  %v4906_v34 = vor.u32 %v4310_v30, %v3979_v28  ;;  %v3955_v35 = vld [vmem:[%s7236_s2 + $0x80] sm:$0xf]  ;;  %v4305_v36 = vld [vmem:[%s7236_s2 + $0x8c] sm:$0xf0]  ;;  %v4303_v37 = vld [vmem:[%s7236_s2 + $0x84] sm:$0xf]  ;;  %v4918_v38 = vor.u32 %v4308_v31, %v3981_v32 }
   0xa   :  { %354 = vmatpush.bf16.msra.mxu3 %v4879_v25  ;;  %v3957_v39 = vld [vmem:[%s7236_s2 + $0x90] sm:$0xf0]  ;;  %v3963_v40 = vld [vmem:[%s7236_s2 + $0x88] sm:$0xf]  ;;  %v4306_v41 = vld [vmem:[%s7236_s2 + $0x94] sm:$0xf0]  ;;  %v4936_v44 = vor.u32 %v4305_v36, %v3955_v35 }
   0xb   :  { %v4304_v42 = vld [vmem:[%s7236_s2 + $0x8c] sm:$0xf]  ;;  %v3965_v43 = vld [vmem:[%s7236_s2 + $0x98] sm:$0xf0]  ;;  %v4940_v45 = vor.u32 %v4303_v37, %v3957_v39  ;;  %v4942_v46 = vor.u32 %v4306_v41, %v3963_v40  ;;  %v3939_v47 = vld [vmem:[%s7236_s2 + $0x60] sm:$0xf] }
   0xc   :  { %316 = vmatpush.bf16.msra.mxu0 %v4891_v29  ;;  %v4301_v48 = vld [vmem:[%s7236_s2 + $0x6c] sm:$0xf0]  ;;  %v4299_v49 = vld [vmem:[%s7236_s2 + $0x64] sm:$0xf]  ;;  %v4954_v50 = vor.u32 %v4304_v42, %v3965_v43  ;;  %v3941_v51 = vld [vmem:[%s7236_s2 + $0x70] sm:$0xf0] }
   0xd   :  { %329 = vmatpush.bf16.msra.mxu1 %v4904_v33  ;;  %342 = vmatpush.bf16.msra.mxu2 %v4906_v34  ;;  %v3947_v52 = vld [vmem:[%s7236_s2 + $0x68] sm:$0xf]  ;;  %v4302_v53 = vld [vmem:[%s7236_s2 + $0x74] sm:$0xf0]  ;;  %v4300_v54 = vld [vmem:[%s7236_s2 + $0x6c] sm:$0xf]  ;;  %v4972_v56 = vor.u32 %v4301_v48, %v3939_v47  ;;  %v4976_v57 = vor.u32 %v4299_v49, %v3941_v51 }
   0xe   :  { %355 = vmatpush.bf16.msra.mxu3 %v4918_v38  ;;  %v3949_v55 = vld [vmem:[%s7236_s2 + $0x78] sm:$0xf0]  ;;  %v4978_v58 = vor.u32 %v4302_v53, %v3947_v52  ;;  %v3923_v59 = vld [vmem:[%s7236_s2 + $0x40] sm:$0xf]  ;;  %v4297_v60 = vld [vmem:[%s7236_s2 + $0x4c] sm:$0xf0] }
   0xf   :  { %v4295_v61 = vld [vmem:[%s7236_s2 + $0x44] sm:$0xf]  ;;  %v4990_v62 = vor.u32 %v4300_v54, %v3949_v55  ;;  %v3925_v63 = vld [vmem:[%s7236_s2 + $0x50] sm:$0xf0]  ;;  %v3931_v0 = vld [vmem:[%s7236_s2 + $0x48] sm:$0xf]  ;;  %v5008_v5 = vor.u32 %v4297_v60, %v3923_v59 }
  0x10   :  { %317 = vmatpush.bf16.msra.mxu0 %v4936_v44  ;;  %v4298_v1 = vld [vmem:[%s7236_s2 + $0x54] sm:$0xf0]  ;;  %v4296_v2 = vld [vmem:[%s7236_s2 + $0x4c] sm:$0xf]  ;;  %v3933_v4 = vld [vmem:[%s7236_s2 + $0x58] sm:$0xf0]  ;;  %v5015_v9 = vor.u32 %v4295_v61, %v3925_v63 }
  0x11   :  { %330 = vmatpush.bf16.msra.mxu1 %v4940_v45  ;;  %343 = vmatpush.bf16.msra.mxu2 %v4942_v46  ;;  %v3907_v6 = vld [vmem:[%s7236_s2 + $0x20] sm:$0xf]  ;;  %v5017_v10 = vor.u32 %v4298_v1, %v3931_v0  ;;  %v4293_v11 = vld [vmem:[%s7236_s2 + $0x2c] sm:$0xf0]  ;;  %v4291_v13 = vld [vmem:[%s7236_s2 + $0x24] sm:$0xf]  ;;  %v5029_v15 = vor.u32 %v4296_v2, %v3933_v4 }
  0x12   :  { %356 = vmatpush.bf16.msra.mxu3 %v4954_v50  ;;  %v3909_v14 = vld [vmem:[%s7236_s2 + $0x30] sm:$0xf0]  ;;  %v3915_v18 = vld [vmem:[%s7236_s2 + $0x28] sm:$0xf]  ;;  %v4294_v19 = vld [vmem:[%s7236_s2 + $0x34] sm:$0xf0]  ;;  %v5050_v26 = vor.u32 %v4293_v11, %v3907_v6 }
  0x13   :  { %v5040_v20 = vld [vmem:[%s7237_s0] sm:$0xff]  ;;  %v4292_v22 = vld [vmem:[%s7236_s2 + $0x2c] sm:$0xf]  ;;  %v3917_v23 = vld [vmem:[%s7236_s2 + $0x38] sm:$0xf0]  ;;  %v7248_v24 = vmov 0   ;;  %v5058_v28 = vor.u32 %v4291_v13, %v3909_v14  ;;  %v5060_v30 = vor.u32 %v4294_v19, %v3915_v18 }
  0x14   :  { %318 = vmatpush.bf16.msra.mxu0 %v4972_v56  ;;  %4387 = vset.pattern.permute.xlu0 %v7248_v24  ;;  %v3891_v27 = vld [vmem:[%s7236_s2] sm:$0xf]  ;;  %v4289_v31 = vld [vmem:[%s7236_s2 + $0xc] sm:$0xf0]  ;;  %v4287_v32 = vld [vmem:[%s7236_s2 + $0x4] sm:$0xf]  ;;  %v5072_v36 = vor.u32 %v4292_v22, %v3917_v23 }
  0x15   :  { %331 = vmatpush.bf16.msra.mxu1 %v4976_v57  ;;  %344 = vmatpush.bf16.msra.mxu2 %v4978_v58  ;;  %7377 = vst [vmem:[#allocation2_spill] sm:$0xff] %v5060_v30  ;;  %v3893_v35 = vld [vmem:[%s7236_s2 + $0x10] sm:$0xf0]  ;;  %v3899_v37 = vld [vmem:[%s7236_s2 + $0x8] sm:$0xf]  ;;  %v5093_v47 = vor.u32 %v4289_v31, %v3891_v27 }
  0x16   :  { %357 = vmatpush.bf16.msra.mxu3 %v4990_v62  ;;  %125 = vperm.xlu0 %4387, %v5040_v20   ;;  %7378 = vst [vmem:[#allocation3_spill] sm:$0xff] %v5072_v36  ;;  %v4290_v39 = vld [vmem:[%s7236_s2 + $0x14] sm:$0xf0]  ;;  %v4288_v40 = vld [vmem:[%s7236_s2 + $0xc] sm:$0xf]  ;;  %v5103_v51 = vor.u32 %v4287_v32, %v3893_v35 }
  0x17   :  { %v3901_v41 = vld [vmem:[%s7236_s2 + $0x18] sm:$0xf0]  ;;  %v4131_v42 = vld [vmem:[%s7238_s4 + $0xe0] sm:$0xf]  ;;  %v4349_v43 = vld [vmem:[%s7238_s4 + $0xec] sm:$0xf0]  ;;  %v5105_v52 = vor.u32 %v4290_v39, %v3899_v37 }
  0x18   :  { %319 = vmatpush.bf16.msra.mxu0 %v5008_v5  ;;  %7379 = vst [vmem:[#allocation4_spill] sm:$0xff] %v5093_v47  ;;  %v4347_v48 = vld [vmem:[%s7238_s4 + $0xe4] sm:$0xf]  ;;  %v4133_v49 = vld [vmem:[%s7238_s4 + $0xf0] sm:$0xf0]  ;;  %v5108_v53 = vor.u32 %v4288_v40, %v3901_v41  ;;  %v5110_v54 = vor.u32 %v4349_v43, %v4131_v42 }
  0x19   :  { %332 = vmatpush.bf16.msra.mxu1 %v5015_v9  ;;  %345 = vmatpush.bf16.msra.mxu2 %v5017_v10  ;;  %7380 = vst [vmem:[#allocation5_spill] sm:$0xff] %v5103_v51  ;;  %v4139_v55 = vld [vmem:[%s7238_s4 + $0xe8] sm:$0xf]  ;;  %v4350_v59 = vld [vmem:[%s7238_s4 + $0xf4] sm:$0xf0]  ;;  %v5121_v61 = vor.u32 %v4347_v48, %v4133_v49 }
  0x1a   :  { %358 = vmatpush.bf16.msra.mxu3 %v5029_v15  ;;  %7381 = vst [vmem:[#allocation6_spill] sm:$0xff] %v5105_v52  ;;  %v4348_v60 = vld [vmem:[%s7238_s4 + $0xec] sm:$0xf]  ;;  %v4141_v63 = vld [vmem:[%s7238_s4 + $0xf8] sm:$0xf0]  ;;  %v5141_v6 = vor.u32 %v4350_v59, %v4139_v55 }
  0x1b   :  { %7382 = vst [vmem:[#allocation7_spill] sm:$0xff] %v5108_v53  ;;  %v4115_v0 = vld [vmem:[%s7238_s4 + $0xc0] sm:$0xf]  ;;  %v4345_v1 = vld [vmem:[%s7238_s4 + $0xcc] sm:$0xf0]  ;;  %v5145_v11 = vor.u32 %v4348_v60, %v4141_v63 }
  0x1c   :  { %320 = vmatpush.bf16.msra.mxu0 %v5050_v26  ;;  %7383 = vst [vmem:[#allocation8_spill] sm:$0xff] %v5110_v54  ;;  %v4343_v2 = vld [vmem:[%s7238_s4 + $0xc4] sm:$0xf]  ;;  %v4117_v4 = vld [vmem:[%s7238_s4 + $0xd0] sm:$0xf0]  ;;  %v5147_v13 = vor.u32 %v4345_v1, %v4115_v0 }
  0x1d   :  { %333 = vmatpush.bf16.msra.mxu1 %v5058_v28  ;;  %346 = vmatpush.bf16.msra.mxu2 %v5060_v30  ;;  %7384 = vst [vmem:[#allocation9_spill] sm:$0xff] %v5121_v61  ;;  %v4123_v14 = vld [vmem:[%s7238_s4 + $0xc8] sm:$0xf]  ;;  %v4346_v18 = vld [vmem:[%s7238_s4 + $0xd4] sm:$0xf0]  ;;  %v5160_v22 = vor.u32 %v4343_v2, %v4117_v4 }
  0x1e   :  { %359 = vmatpush.bf16.msra.mxu3 %v5072_v36  ;;  %7385 = vst [vmem:[#allocation10_spill] sm:$0xff] %v5141_v6  ;;  %v4344_v19 = vld [vmem:[%s7238_s4 + $0xcc] sm:$0xf]  ;;  %v4125_v23 = vld [vmem:[%s7238_s4 + $0xd8] sm:$0xf0]  ;;  %v5181_v37 = vor.u32 %v4346_v18, %v4123_v14 }
  0x1f   :  { %7386 = vst [vmem:[#allocation11_spill] sm:$0xff] %v5145_v11  ;;  %v4099_v27 = vld [vmem:[%s7238_s4 + $0xa0] sm:$0xf]  ;;  %v4341_v31 = vld [vmem:[%s7238_s4 + $0xac] sm:$0xf0]  ;;  %v5185_v39 = vor.u32 %v4344_v19, %v4125_v23 }
  0x20   :  { %321 = vmatpush.bf16.msra.mxu0 %v5093_v47  ;;  %7387 = vst [vmem:[#allocation12_spill] sm:$0xff] %v5147_v13  ;;  %v4339_v32 = vld [vmem:[%s7238_s4 + $0xa4] sm:$0xf]  ;;  %v4101_v35 = vld [vmem:[%s7238_s4 + $0xb0] sm:$0xf0]  ;;  %v5187_v40 = vor.u32 %v4341_v31, %v4099_v27 }
  0x21   :  { %334 = vmatpush.bf16.msra.mxu1 %v5103_v51  ;;  %347 = vmatpush.bf16.msra.mxu2 %v5105_v52  ;;  %7388 = vst [vmem:[#allocation13_spill] sm:$0xff] %v5160_v22  ;;  %v4107_v41 = vld [vmem:[%s7238_s4 + $0xa8] sm:$0xf]  ;;  %v4342_v42 = vld [vmem:[%s7238_s4 + $0xb4] sm:$0xf0]  ;;  %v5196_v43 = vor.u32 %v4339_v32, %v4101_v35 }
  0x22   :  { %360 = vmatpush.bf16.msra.mxu3 %v5108_v53  ;;  %7389 = vst [vmem:[#allocation14_spill] sm:$0xff] %v5181_v37  ;;  %v4340_v48 = vld [vmem:[%s7238_s4 + $0xac] sm:$0xf]  ;;  %v4109_v49 = vld [vmem:[%s7238_s4 + $0xb8] sm:$0xf0]  ;;  %v5205_v55 = vor.u32 %v4342_v42, %v4107_v41 }
  0x23   :  { %322 = vmatmul.bf16.vlgmr.msra.gmra.mxu0 %v7248_v24  ;;  %7390 = vst [vmem:[#allocation15_spill] sm:$0xff] %v5185_v39  ;;  %v5209_v59 = vor.u32 %v4340_v48, %v4109_v49  ;;  %v4083_v60 = vld [vmem:[%s7238_s4 + $0x80] sm:$0xf]  ;;  %v4337_v63 = vld [vmem:[%s7238_s4 + $0x8c] sm:$0xf0] }
  0x24   :  { %551 = vmatpush.bf16.msrb.mxu0 %v5110_v54  ;;  %335 = vmatmul.bf16.vlgmr.msra.gmra.mxu1 %v7248_v24  ;;  %7391 = vst [vmem:[#allocation16_spill] sm:$0xff] %v5187_v40  ;;  %v5220_v0 = vor.u32 %v4337_v63, %v4083_v60  ;;  %v4335_v1 = vld [vmem:[%s7238_s4 + $0x84] sm:$0xf]  ;;  %v4085_v2 = vld [vmem:[%s7238_s4 + $0x90] sm:$0xf0] }
  0x25   :  { %564 = vmatpush.bf16.msrb.mxu1 %v5121_v61  ;;  %348 = vmatmul.bf16.vlgmr.msra.gmra.mxu2 %v7248_v24  ;;  %7392 = vst [vmem:[#allocation17_spill] sm:$0xff] %v5196_v43  ;;  %v4091_v4 = vld [vmem:[%s7238_s4 + $0x88] sm:$0xf]  ;;  %v5231_v14 = vor.u32 %v4335_v1, %v4085_v2  ;;  %v4338_v18 = vld [vmem:[%s7238_s4 + $0x94] sm:$0xf0] }
  0x26   :  { %361 = vmatmul.bf16.vlgmr.msra.gmra.mxu3 %v7248_v24  ;;  %577 = vmatpush.bf16.msrb.mxu2 %v5141_v6  ;;  %7393 = vst [vmem:[#allocation18_spill] sm:$0xff] %v5205_v55  ;;  %v4336_v19 = vld [vmem:[%s7238_s4 + $0x8c] sm:$0xf]  ;;  %v4093_v23 = vld [vmem:[%s7238_s4 + $0x98] sm:$0xf0]  ;;  %v5243_v27 = vor.u32 %v4338_v18, %v4091_v4 }
  0x27   :  { %590 = vmatpush.bf16.msrb.mxu3 %v5145_v11  ;;  %7394 = vst [vmem:[#allocation19_spill] sm:$0xff] %v5209_v59  ;;  %v5245_v31 = vor.u32 %v4336_v19, %v4093_v23  ;;  %v4067_v32 = vld [vmem:[%s7238_s4 + $0x60] sm:$0xf]  ;;  %v4333_v35 = vld [vmem:[%s7238_s4 + $0x6c] sm:$0xf0] }
  0x28   :  { %552 = vmatpush.bf16.msrb.mxu0 %v5147_v13  ;;  %7395 = vst [vmem:[#allocation20_spill] sm:$0xff] %v5220_v0  ;;  %v4331_v41 = vld [vmem:[%s7238_s4 + $0x64] sm:$0xf]  ;;  %v5259_v42 = vor.u32 %v4333_v35, %v4067_v32  ;;  %v4069_v48 = vld [vmem:[%s7238_s4 + $0x70] sm:$0xf0] }
  0x29   :  { %565 = vmatpush.bf16.msrb.mxu1 %v5160_v22  ;;  %7396 = vst [vmem:[#allocation21_spill] sm:$0xff] %v5231_v14  ;;  %v4075_v49 = vld [vmem:[%s7238_s4 + $0x68] sm:$0xf]  ;;  %v4334_v60 = vld [vmem:[%s7238_s4 + $0x74] sm:$0xf0]  ;;  %v5270_v63 = vor.u32 %v4331_v41, %v4069_v48 }
  0x2a   :  { %578 = vmatpush.bf16.msrb.mxu2 %v5181_v37  ;;  %7397 = vst [vmem:[#allocation22_spill] sm:$0xff] %v5243_v27  ;;  %v5272_v1 = vor.u32 %v4334_v60, %v4075_v49  ;;  %v4332_v2 = vld [vmem:[%s7238_s4 + $0x6c] sm:$0xf]  ;;  %v4077_v4 = vld [vmem:[%s7238_s4 + $0x78] sm:$0xf0] }
  0x2b   :  { %591 = vmatpush.bf16.msrb.mxu3 %v5185_v39  ;;  %7398 = vst [vmem:[#allocation23_spill] sm:$0xff] %v5245_v31  ;;  %v5281_v18 = vor.u32 %v4332_v2, %v4077_v4  ;;  %v4051_v19 = vld [vmem:[%s7238_s4 + $0x40] sm:$0xf]  ;;  %v4329_v23 = vld [vmem:[%s7238_s4 + $0x4c] sm:$0xf0] }
  0x2c   :  { %553 = vmatpush.bf16.msrb.mxu0 %v5187_v40  ;;  %7399 = vst [vmem:[#allocation24_spill] sm:$0xff] %v5259_v42  ;;  %v4327_v32 = vld [vmem:[%s7238_s4 + $0x44] sm:$0xf]  ;;  %v5295_v35 = vor.u32 %v4329_v23, %v4051_v19  ;;  %v4053_v41 = vld [vmem:[%s7238_s4 + $0x50] sm:$0xf0] }
  0x2d   :  { %566 = vmatpush.bf16.msrb.mxu1 %v5196_v43  ;;  %7400 = vst [vmem:[#allocation25_spill] sm:$0xff] %v5270_v63  ;;  %v4059_v48 = vld [vmem:[%s7238_s4 + $0x48] sm:$0xf]  ;;  %v4330_v49 = vld [vmem:[%s7238_s4 + $0x54] sm:$0xf0]  ;;  %v5323_v23 = vor.u32 %v4327_v32, %v4053_v41 }
  0x2e   :  { %579 = vmatpush.bf16.msrb.mxu2 %v5205_v55  ;;  %7401 = vst [vmem:[#allocation26_spill] sm:$0xff] %v5272_v1  ;;  %v4328_v60 = vld [vmem:[%s7238_s4 + $0x4c] sm:$0xf]  ;;  %v4061_v2 = vld [vmem:[%s7238_s4 + $0x58] sm:$0xf0]  ;;  %v5325_v24 = vor.u32 %v4330_v49, %v4059_v48 }
  0x2f   :  { %592 = vmatpush.bf16.msrb.mxu3 %v5209_v59  ;;  %7402 = vst [vmem:[#allocation27_spill] sm:$0xff] %v5281_v18  ;;  %v5315_v4 = vld [vmem:[%s7239_s1] sm:$0xf]  ;;  %v4037_v41 = vld [vmem:[%s7238_s4 + $0x30] sm:$0xf0] }
  0x30   :  { %554 = vmatpush.bf16.msrb.mxu0 %v5220_v0  ;;  %7403 = vst [vmem:[#allocation28_spill] sm:$0xff] %v5295_v35  ;;  %v5320_v19 = vld [vmem:[%s7240_s3] sm:$0xf]  ;;  %v4043_v48 = vld [vmem:[%s7238_s4 + $0x28] sm:$0xf]  ;;  %v5525_v55 = vperm.slane %v5315_v4, 2 }
  0x31   :  { %567 = vmatpush.bf16.msrb.mxu1 %v5231_v14  ;;  %7404 = vst [vmem:[#allocation29_spill] sm:$0xff] %v5323_v23  ;;  %v4326_v49 = vld [vmem:[%s7238_s4 + $0x34] sm:$0xf0]  ;;  %v4187_v0 = vld [vmem:[%s7241_s5 + $0x48] sm:$0xf] }
  0x32   :  { %580 = vmatpush.bf16.msrb.mxu2 %v5243_v27  ;;  %7405 = vst [vmem:[#allocation30_spill] sm:$0xff] %v5325_v24  ;;  %v4355_v59 = vld [vmem:[%s7241_s5 + $0x24] sm:$0xf] }
  0x33   :  { %593 = vmatpush.bf16.msrb.mxu3 %v5245_v31  ;;  %7430 = vst [vmem:[#allocation55_spill] sm:$0xff] %v5525_v55 }
  0x34   :  { %555 = vmatpush.bf16.msrb.mxu0 %v5259_v42  ;;  %v4323_v42 = vld [vmem:[%s7238_s4 + $0x24] sm:$0xf] }
  0x35   :  { %568 = vmatpush.bf16.msrb.mxu1 %v5270_v63  ;;  %v4325_v63 = vld [vmem:[%s7238_s4 + $0x2c] sm:$0xf0] }
  0x36   :  { %581 = vmatpush.bf16.msrb.mxu2 %v5272_v1  ;;  %v4035_v1 = vld [vmem:[%s7238_s4 + $0x20] sm:$0xf] }
  0x37   :  { %594 = vmatpush.bf16.msrb.mxu3 %v5281_v18  ;;  %v5327_v18 = vor.u32 %v4328_v60, %v4061_v2  ;;  %v5340_v32 = vor.u32 %v4325_v63, %v4035_v1  ;;  %v5352_v60 = vor.u32 %v4323_v42, %v4037_v41  ;;  %v5354_v2 = vor.u32 %v4326_v49, %v4043_v48  ;;  %v4324_v63 = vld [vmem:[%s7238_s4 + $0x2c] sm:$0xf]  ;;  %v4045_v1 = vld [vmem:[%s7238_s4 + $0x38] sm:$0xf0]  ;;  %v4019_v41 = vld [vmem:[%s7238_s4] sm:$0xf] }
  0x38   :  { %556 = vmatpush.bf16.msrb.mxu0 %v5295_v35  ;;  %v5372_v42 = vor.u32 %v4324_v63, %v4045_v1  ;;  %v4321_v48 = vld [vmem:[%s7238_s4 + $0xc] sm:$0xf0]  ;;  %v4319_v49 = vld [vmem:[%s7238_s4 + $0x4] sm:$0xf]  ;;  %v4021_v63 = vld [vmem:[%s7238_s4 + $0x10] sm:$0xf0] }
  0x39   :  { %7406 = vst [vmem:[#allocation31_spill] sm:$0xff] %v5327_v18  ;;  %569 = vmatpush.bf16.msrb.mxu1 %v5323_v23  ;;  %v5366_v23 = vperm.slane %v5320_v19, 0  ;;  %v5385_v35 = vor.u32 %v4321_v48, %v4019_v41  ;;  %v4027_v1 = vld [vmem:[%s7238_s4 + $0x8] sm:$0xf]  ;;  %v5397_v31 = vor.u32 %v4319_v49, %v4021_v63  ;;  %v4320_v41 = vld [vmem:[%s7238_s4 + $0xc] sm:$0xf] }
  0x3a   :  { %582 = vmatpush.bf16.msrb.mxu2 %v5325_v24  ;;  %7407 = vst [vmem:[#allocation32_spill] sm:$0xff] %v5340_v32  ;;  %v5363_v24 = vperm.slane %v5315_v4, 0  ;;  %v4029_v48 = vld [vmem:[%s7238_s4 + $0x18] sm:$0xf0]  ;;  %v4363_v49 = vld [vmem:[%s7241_s5 + $0x64] sm:$0xf] }
  0x3b   :  { %595 = vmatpush.bf16.msrb.mxu3 %v5327_v18  ;;  %7408 = vst [vmem:[#allocation33_spill] sm:$0xff] %v5352_v60  ;;  %v5369_v18 = vperm.slane %v5315_v4, 1  ;;  %v5411_v27 = vor.u32 %v4320_v41, %v4029_v48  ;;  %v4197_v63 = vld [vmem:[%s7241_s5 + $0x70] sm:$0xf0]  ;;  %v4203_v41 = vld [vmem:[%s7241_s5 + $0x68] sm:$0xf] }
  0x3c   :  { %7409 = vst [vmem:[#allocation34_spill] sm:$0xff] %v5354_v2  ;;  %557 = vmatpush.bf16.msrb.mxu0 %v5340_v32  ;;  %v4322_v32 = vld [vmem:[%s7238_s4 + $0x14] sm:$0xf0] }
  0x3d   :  { %7410 = vst [vmem:[#allocation35_spill] sm:$0xff] %v5363_v24  ;;  %570 = vmatpush.bf16.msrb.mxu1 %v5352_v60  ;;  %v5399_v60 = vor.u32 %v4322_v32, %v4027_v1  ;;  %v4365_v32 = vld [vmem:[%s7241_s5 + $0x6c] sm:$0xf0]  ;;  %v4366_v48 = vld [vmem:[%s7241_s5 + $0x74] sm:$0xf0] }
  0x3e   :  { %7411 = vst [vmem:[#allocation36_spill] sm:$0xff] %v5366_v23  ;;  %583 = vmatpush.bf16.msrb.mxu2 %v5354_v2  ;;  %v4195_v2 = vld [vmem:[%s7241_s5 + $0x60] sm:$0xf] }
  0x3f   :  { %7412 = vst [vmem:[#allocation37_spill] sm:$0xff] %v5369_v18  ;;  %596 = vmatpush.bf16.msrb.mxu3 %v5372_v42  ;;  %v5422_v1 = vor.u32 %v4365_v32, %v4195_v2  ;;  %v5439_v2 = vor.u32 %v4366_v48, %v4203_v41  ;;  %v4205_v32 = vld [vmem:[%s7241_s5 + $0x78] sm:$0xf0]  ;;  %v4359_v48 = vld [vmem:[%s7241_s5 + $0x44] sm:$0xf] }
  0x40   :  { %7413 = vst [vmem:[#allocation38_spill] sm:$0xff] %v5372_v42  ;;  %558 = vmatpush.bf16.msrb.mxu0 %v5385_v35  ;;  %v5424_v42 = vor.u32 %v4363_v49, %v4197_v63  ;;  %v4179_v49 = vld [vmem:[%s7241_s5 + $0x40] sm:$0xf]  ;;  %v4361_v63 = vld [vmem:[%s7241_s5 + $0x4c] sm:$0xf0] }
  0x41   :  { %7414 = vst [vmem:[#allocation39_spill] sm:$0xff] %v5385_v35  ;;  %v4364_v35 = vld [vmem:[%s7241_s5 + $0x6c] sm:$0xf]  ;;  %571 = vmatpush.bf16.msrb.mxu1 %v5397_v31  ;;  %v5454_v41 = vor.u32 %v4361_v63, %v4179_v49  ;;  %v4189_v63 = vld [vmem:[%s7241_s5 + $0x58] sm:$0xf0] }
  0x42   :  { %7415 = vst [vmem:[#allocation40_spill] sm:$0xff] %v5397_v31  ;;  %584 = vmatpush.bf16.msrb.mxu2 %v5399_v60  ;;  %v5452_v31 = vor.u32 %v4364_v35, %v4205_v32  ;;  %v4362_v32 = vld [vmem:[%s7241_s5 + $0x54] sm:$0xf0]  ;;  %v4360_v49 = vld [vmem:[%s7241_s5 + $0x4c] sm:$0xf] }
  0x43   :  { %7416 = vst [vmem:[#allocation41_spill] sm:$0xff] %v5399_v60  ;;  %597 = vmatpush.bf16.msrb.mxu3 %v5411_v27  ;;  %v4181_v60 = vld [vmem:[%s7241_s5 + $0x50] sm:$0xf0] }
  0x44   :  { %7417 = vst [vmem:[#allocation42_spill] sm:$0xff] %v5411_v27  ;;  %691 = vmatpush.bf16.msra.mxu0 %v5422_v1  ;;  %v5467_v35 = vor.u32 %v4359_v48, %v4181_v60  ;;  %v5484_v60 = vor.u32 %v4362_v32, %v4187_v0  ;;  %v5486_v48 = vor.u32 %v4360_v49, %v4189_v63  ;;  %v4165_v32 = vld [vmem:[%s7241_s5 + $0x30] sm:$0xf0]  ;;  %v4171_v49 = vld [vmem:[%s7241_s5 + $0x28] sm:$0xf] }
  0x45   :  { %7418 = vst [vmem:[#allocation43_spill] sm:$0xff] %v5422_v1  ;;  %704 = vmatpush.bf16.msra.mxu1 %v5424_v42  ;;  %v4163_v1 = vld [vmem:[%s7241_s5 + $0x20] sm:$0xf]  ;;  %v4358_v63 = vld [vmem:[%s7241_s5 + $0x34] sm:$0xf0] }
  0x46   :  { %7419 = vst [vmem:[#allocation44_spill] sm:$0xff] %v5424_v42  ;;  %717 = vmatpush.bf16.msra.mxu2 %v5439_v2  ;;  %v5481_v42 = vperm.slane %v5320_v19, 1 }
  0x47   :  { %7420 = vst [vmem:[#allocation45_spill] sm:$0xff] %v5439_v2  ;;  %730 = vmatpush.bf16.msra.mxu3 %v5452_v31 }
  0x48   :  { %7421 = vst [vmem:[#allocation46_spill] sm:$0xff] %v5452_v31  ;;  %692 = vmatpush.bf16.msra.mxu0 %v5454_v41 }
  0x49   :  { %7422 = vst [vmem:[#allocation47_spill] sm:$0xff] %v5454_v41  ;;  %705 = vmatpush.bf16.msra.mxu1 %v5467_v35  ;;  %v4173_v41 = vld [vmem:[%s7241_s5 + $0x38] sm:$0xf0] }
  0x4a   :  { %7423 = vst [vmem:[#allocation48_spill] sm:$0xff] %v5467_v35  ;;  %718 = vmatpush.bf16.msra.mxu2 %v5484_v60  ;;  %v5528_v35 = vperm.slane %v5315_v4, 3 }
  0x4b   :  { %7424 = vst [vmem:[#allocation49_spill] sm:$0xff] %v5481_v42  ;;  %731 = vmatpush.bf16.msra.mxu3 %v5486_v48 }
  0x4c   :  { %7425 = vst [vmem:[#allocation50_spill] sm:$0xff] %v5484_v60 }
  0x4d   :  { %7426 = vst [vmem:[#allocation51_spill] sm:$0xff] %v5486_v48 }
  0x4e   :  { %7431 = vst [vmem:[#allocation56_spill] sm:$0xff] %v5528_v35 }
  0x88   :  { %v5435_v14 = vpop.permute.xlu0 %125 }
  0x89   :  { %v137_v27 = vmul.f32 %v5363_v24, %v5435_v14  ;;  %v138_v2 = vmul.f32 %v5369_v18, %v5435_v14  ;;  %v4357_v24 = vld [vmem:[%s7241_s5 + $0x2c] sm:$0xf0]  ;;  %v5513_v18 = vor.u32 %v4355_v59, %v4165_v32 }
  0x8a   :  { %v5500_v0 = vor.u32 %v4357_v24, %v4163_v1  ;;  %v5515_v24 = vor.u32 %v4358_v63, %v4171_v49  ;;  %v4356_v1 = vld [vmem:[%s7241_s5 + $0x2c] sm:$0xf]  ;;  %v4147_v49 = vld [vmem:[%s7241_s5] sm:$0xf]  ;;  %v4351_v63 = vld [vmem:[%s7241_s5 + $0x4] sm:$0xf] }
  0x8b   :  { %7428 = vst [vmem:[#allocation53_spill] sm:$0xff] %v5513_v18  ;;  %v150_v31 = vadd.f32 %v5366_v23, %v137_v27  ;;  %v5531_v59 = vor.u32 %v4356_v1, %v4173_v41  ;;  %v151_v32 = vadd.f32 %v5481_v42, %v138_v2  ;;  %v4353_v27 = vld [vmem:[%s7241_s5 + $0xc] sm:$0xf0]  ;;  %v4149_v2 = vld [vmem:[%s7241_s5 + $0x10] sm:$0xf0]  ;;  %706 = vmatpush.bf16.msra.mxu1 %v5513_v18 }
  0x8c   :  { %7427 = vst [vmem:[#allocation52_spill] sm:$0xff] %v5500_v0  ;;  %693 = vmatpush.bf16.msra.mxu0 %v5500_v0  ;;  %v5544_v4 = vor.u32 %v4353_v27, %v4147_v49  ;;  %v4155_v41 = vld [vmem:[%s7241_s5 + $0x8] sm:$0xf]  ;;  %v4354_v1 = vld [vmem:[%s7241_s5 + $0x14] sm:$0xf0]  ;;  %719 = vmatpush.bf16.msra.mxu2 %v5515_v24  ;;  %v5557_v23 = vor.u32 %v4351_v63, %v4149_v2  ;;  %v5573_v2 = vperm.slane %v5320_v19, 2 }
  0x8d   :  { %7429 = vst [vmem:[#allocation54_spill] sm:$0xff] %v5515_v24  ;;  %v5559_v49 = vor.u32 %v4354_v1, %v4155_v41  ;;  %v4352_v27 = vld [vmem:[%s7241_s5 + $0xc] sm:$0xf]  ;;  %v4157_v0 = vld [vmem:[%s7241_s5 + $0x18] sm:$0xf0]  ;;  %732 = vmatpush.bf16.msra.mxu3 %v5531_v59  ;;  %v139_v63 = vmul.f32 %v5525_v55, %v5435_v14  ;;  %v140_v41 = vmul.f32 %v5528_v35, %v5435_v14  ;;  %v5578_v1 = vperm.slane %v5320_v19, 3 }
  0x8e   :  { %7432 = vst [vmem:[#allocation57_spill] sm:$0xff] %v5531_v59  ;;  %v5568_v43 = vor.u32 %v4352_v27, %v4157_v0 }
  0x8f   :  { %7433 = vst [vmem:[#allocation58_spill] sm:$0xff] %v5544_v4  ;;  %707 = vmatpush.bf16.msra.mxu1 %v5557_v23 }
  0x90   :  { %7434 = vst [vmem:[#allocation59_spill] sm:$0xff] %v5557_v23  ;;  %694 = vmatpush.bf16.msra.mxu0 %v5544_v4  ;;  %720 = vmatpush.bf16.msra.mxu2 %v5559_v49 }
  0x91   :  { %7435 = vst [vmem:[#allocation60_spill] sm:$0xff] %v5559_v49  ;;  %733 = vmatpush.bf16.msra.mxu3 %v5568_v43 }
  0x92   :  { %7436 = vst [vmem:[#allocation61_spill] sm:$0xff] %v5568_v43 }
  0x93   :  { %7437 = vst [vmem:[#allocation62_spill] sm:$0xff] %v5573_v2 }
  0x94   :  { %7438 = vst [vmem:[#allocation63_spill] sm:$0xff] %v5578_v1 }
  0xa0   :  { %v323_v42 = vpop.f32.mrf.mxu0 }
  0xa1   :  { %v324_v48 = vadd.f32 %v323_v42, %v150_v31  ;;  %v336_v60 = vpop.f32.mrf.mxu1  ;;  %v152_v31 = vadd.f32 %v5573_v2, %v139_v63 }
  0xa2   :  { %v337_v18 = vadd.f32 %v336_v60, %v151_v32  ;;  %v153_v60 = vadd.f32 %v5578_v1, %v140_v41 }
  0xa3   :  { %4406 = vtanh.f32 %v324_v48 }
  0xa4   :  { %4408 = vtanh.f32 %v337_v18 }
  0xa8   :  { %v349_v42 = vpop.f32.mrf.mxu2  ;;  %v325_v14 = vpop.f32.mrf.mxu0 }
  0xa9   :  { %v350_v48 = vadd.f32 %v349_v42, %v152_v31  ;;  %v362_v0 = vpop.f32.mrf.mxu3  ;;  %v4407_v32 = vpop.eup %4406 }
  0xaa   :  { %v363_v19 = vadd.f32 %v362_v0, %v153_v60  ;;  %v338_v27 = vpop.f32.mrf.mxu1  ;;  %v4409_v35 = vpop.eup %4408  ;;  %v367_v55 = vmul.f32 0.5, %v4407_v32  ;;  %v7448_v32 = vld [vmem:[#allocation25_spill] sm:$0xff] }
  0xab   :  { %4410 = vtanh.f32 %v350_v48  ;;  %v370_v18 = vmul.f32 0.5, %v4409_v35  ;;  %v7441_v35 = vld [vmem:[#allocation18_spill] sm:$0xff]  ;;  %v7447_v48 = vld [vmem:[#allocation24_spill] sm:$0xff]  ;;  %v7450_v27 = vld [vmem:[#allocation27_spill] sm:$0xff] }
  0xac   :  { %v368_v23 = vadd.f32 0.5, %v367_v55  ;;  %4412 = vtanh.f32 %v363_v19  ;;  %v7439_v55 = vmov 0   ;;  %v7449_v19 = vld [vmem:[#allocation26_spill] sm:$0xff] }
  0xad   :  { %v371_v4 = vadd.f32 0.5, %v370_v18  ;;  %v7451_v18 = vld [vmem:[#allocation28_spill] sm:$0xff] }
  0xaf   :  { %v376_v49 = vmul.f32 0.0, %v371_v4  ;;  %v7444_v4 = vld [vmem:[#allocation21_spill] sm:$0xff] }
  0xb0   :  { %v351_v43 = vpop.f32.mrf.mxu2 }
  0xb1   :  { %v4411_v59 = vpop.eup %4410  ;;  %v364_v63 = vpop.f32.mrf.mxu3  ;;  %v4732_v43 = vmov 1  }
  0xb2   :  { %v377_v2 = vmul.f32 %v4411_v59, %v368_v23  ;;  %v4413_v24 = vpop.eup %4412  ;;  %4388 = vset.pattern.permute.xlu0 %v4732_v43  ;;  %v7440_v23 = vld [vmem:[#allocation17_spill] sm:$0xff]  ;;  %v7443_v59 = vld [vmem:[#allocation20_spill] sm:$0xff]  ;;  %v7458_v43 = vld [vmem:[#allocation38_spill] sm:$0xff] }
  0xb3   :  { %v374_v31 = vmul.f32 0.5, %v4413_v24  ;;  %755 = vperm.xlu0 %4388, %v5040_v20   ;;  %v7442_v24 = vld [vmem:[#allocation19_spill] sm:$0xff]  ;;  %v7452_v63 = vld [vmem:[#allocation29_spill] sm:$0xff] }
  0xb4   :  { %v5586_v41 = vadd.f32 %v377_v2, %v376_v49  ;;  %v7445_v49 = vld [vmem:[#allocation22_spill] sm:$0xff]  ;;  %v7446_v2 = vld [vmem:[#allocation23_spill] sm:$0xff] }
  0xb5   :  { %v375_v42 = vadd.f32 0.5, %v374_v31  ;;  %v7453_v31 = vld [vmem:[#allocation30_spill] sm:$0xff] }
  0xb6   :  { %4414 = vtanh.f32 %v5586_v41 }
  0xbc   :  { %v4415_v60 = vpop.eup %4414 }
  0xbd   :  { %v380_v0 = vmul.f32 %v4415_v60, %v375_v42  ;;  %v7454_v42 = vld [vmem:[#allocation31_spill] sm:$0xff]  ;;  %v7455_v60 = vld [vmem:[#allocation32_spill] sm:$0xff] }
  0xbf   :  { %v381_v14 = vpack.c.bf16 %v380_v0, %v380_v0  ;;  %v7456_v0 = vld [vmem:[#allocation33_spill] sm:$0xff] }
  0xc1   :  { %559 = vmatmul.bf16.vlgmr.msrb.gmra.mxu0 %v381_v14  ;;  %572 = vmatmul.bf16.vlgmr.msrb.gmra.mxu1 %v381_v14 }
  0xc2   :  { %585 = vmatmul.bf16.vlgmr.msrb.gmra.mxu2 %v381_v14  ;;  %598 = vmatmul.bf16.vlgmr.msrb.gmra.mxu3 %v381_v14 }
  0xc3   :  { %766 = vmatpush.bf16.msrb.mxu0 %v4816_v3  ;;  %779 = vmatpush.bf16.msrb.mxu1 %v4827_v7 }
  0xc4   :  { %792 = vmatpush.bf16.msrb.mxu2 %v4829_v8  ;;  %805 = vmatpush.bf16.msrb.mxu3 %v4841_v12 }
  0xc7   :  { %767 = vmatpush.bf16.msrb.mxu0 %v4854_v16  ;;  %780 = vmatpush.bf16.msrb.mxu1 %v4856_v17 }
  0xc8   :  { %793 = vmatpush.bf16.msrb.mxu2 %v4868_v21  ;;  %806 = vmatpush.bf16.msrb.mxu3 %v4879_v25 }
  0xcb   :  { %768 = vmatpush.bf16.msrb.mxu0 %v4891_v29  ;;  %781 = vmatpush.bf16.msrb.mxu1 %v4904_v33 }
  0xcc   :  { %794 = vmatpush.bf16.msrb.mxu2 %v4906_v34  ;;  %807 = vmatpush.bf16.msrb.mxu3 %v4918_v38 }
  0xcf   :  { %769 = vmatpush.bf16.msrb.mxu0 %v4936_v44  ;;  %782 = vmatpush.bf16.msrb.mxu1 %v4940_v45 }
  0xd0   :  { %795 = vmatpush.bf16.msrb.mxu2 %v4942_v46  ;;  %808 = vmatpush.bf16.msrb.mxu3 %v4954_v50 }
  0xd1   :  { %695 = vmatmul.bf16.vlgmr.msra.gmra.mxu0 %v7439_v55  ;;  %708 = vmatmul.bf16.vlgmr.msra.gmra.mxu1 %v7439_v55 }
  0xd2   :  { %721 = vmatmul.bf16.vlgmr.msra.gmra.mxu2 %v7439_v55  ;;  %734 = vmatmul.bf16.vlgmr.msra.gmra.mxu3 %v7439_v55  ;;  %v7459_v55 = vld [vmem:[#allocation39_spill] sm:$0xff] }
  0xd3   :  { %770 = vmatpush.bf16.msrb.mxu0 %v4972_v56  ;;  %783 = vmatpush.bf16.msrb.mxu1 %v4976_v57 }
  0xd4   :  { %796 = vmatpush.bf16.msrb.mxu2 %v4978_v58  ;;  %809 = vmatpush.bf16.msrb.mxu3 %v4990_v62 }
  0xd7   :  { %771 = vmatpush.bf16.msrb.mxu0 %v5008_v5  ;;  %784 = vmatpush.bf16.msrb.mxu1 %v5015_v9 }
  0xd8   :  { %797 = vmatpush.bf16.msrb.mxu2 %v5017_v10  ;;  %810 = vmatpush.bf16.msrb.mxu3 %v5029_v15 }
  0xdb   :  { %772 = vmatpush.bf16.msrb.mxu0 %v5050_v26  ;;  %785 = vmatpush.bf16.msrb.mxu1 %v5058_v28 }
  0xdc   :  { %798 = vmatpush.bf16.msrb.mxu2 %v5060_v30  ;;  %811 = vmatpush.bf16.msrb.mxu3 %v5072_v36 }
  0xdf   :  { %773 = vmatpush.bf16.msrb.mxu0 %v5093_v47  ;;  %786 = vmatpush.bf16.msrb.mxu1 %v5103_v51 }
  0xe0   :  { %799 = vmatpush.bf16.msrb.mxu2 %v5105_v52  ;;  %812 = vmatpush.bf16.msrb.mxu3 %v5108_v53 }
  0xe2   :  { %774 = vmatmul.bf16.vlgmr.msrb.gmra.mxu0 %v381_v14  ;;  %787 = vmatmul.bf16.vlgmr.msrb.gmra.mxu1 %v381_v14 }
  0xe3   :  { %834 = vmatpush.bf16.msra.mxu0 %v5110_v54  ;;  %847 = vmatpush.bf16.msra.mxu1 %v5121_v61 }
  0xe4   :  { %800 = vmatmul.bf16.vlgmr.msrb.gmra.mxu2 %v381_v14  ;;  %813 = vmatmul.bf16.vlgmr.msrb.gmra.mxu3 %v381_v14  ;;  %v7457_v14 = vld [vmem:[#allocation34_spill] sm:$0xff] }
  0xe5   :  { %860 = vmatpush.bf16.msra.mxu2 %v5141_v6  ;;  %873 = vmatpush.bf16.msra.mxu3 %v5145_v11  ;;  %v7483_v11 = vld [vmem:[#allocation55_spill] sm:$0xff] }
  0xe7   :  { %835 = vmatpush.bf16.msra.mxu0 %v5147_v13  ;;  %848 = vmatpush.bf16.msra.mxu1 %v5160_v22 }
  0xe9   :  { %861 = vmatpush.bf16.msra.mxu2 %v5181_v37  ;;  %874 = vmatpush.bf16.msra.mxu3 %v5185_v39 }
  0xeb   :  { %836 = vmatpush.bf16.msra.mxu0 %v5187_v40  ;;  %849 = vmatpush.bf16.msra.mxu1 %v7440_v23  ;;  %v121_v23 = vld [vmem:[%s7242_s6] sm:$0xf] }
  0xec   :  { %v5685_v40 = vperm.slane %v121_v23, 0  ;;  %v5687_v22 = vperm.slane %v121_v23, 1 }
  0xed   :  { %862 = vmatpush.bf16.msra.mxu2 %v7441_v35  ;;  %875 = vmatpush.bf16.msra.mxu3 %v7442_v24 }
  0xef   :  { %837 = vmatpush.bf16.msra.mxu0 %v7443_v59  ;;  %850 = vmatpush.bf16.msra.mxu1 %v7444_v4 }
  0xf1   :  { %863 = vmatpush.bf16.msra.mxu2 %v7445_v49  ;;  %876 = vmatpush.bf16.msra.mxu3 %v7446_v2 }
  0xf3   :  { %838 = vmatpush.bf16.msra.mxu0 %v7447_v48  ;;  %851 = vmatpush.bf16.msra.mxu1 %v7448_v32 }
  0xf5   :  { %864 = vmatpush.bf16.msra.mxu2 %v7449_v19  ;;  %877 = vmatpush.bf16.msra.mxu3 %v7450_v27  ;;  %v7460_v19 = vld [vmem:[#allocation40_spill] sm:$0xff]  ;;  %v7461_v27 = vld [vmem:[#allocation43_spill] sm:$0xff] }
  0xf7   :  { %839 = vmatpush.bf16.msra.mxu0 %v7451_v18  ;;  %852 = vmatpush.bf16.msra.mxu1 %v7452_v63  ;;  %v7462_v18 = vld [vmem:[#allocation44_spill] sm:$0xff]  ;;  %v7463_v63 = vld [vmem:[#allocation41_spill] sm:$0xff] }
  0xf9   :  { %865 = vmatpush.bf16.msra.mxu2 %v7453_v31  ;;  %878 = vmatpush.bf16.msra.mxu3 %v7454_v42  ;;  %v7464_v31 = vld [vmem:[#allocation42_spill] sm:$0xff]  ;;  %v7465_v42 = vld [vmem:[#allocation45_spill] sm:$0xff] }
  0xfb   :  { %840 = vmatpush.bf16.msra.mxu0 %v7455_v60  ;;  %853 = vmatpush.bf16.msra.mxu1 %v7456_v0  ;;  %v7466_v60 = vld [vmem:[#allocation46_spill] sm:$0xff]  ;;  %v7467_v0 = vld [vmem:[#allocation47_spill] sm:$0xff] }
  0xfd   :  { %866 = vmatpush.bf16.msra.mxu2 %v7457_v14  ;;  %879 = vmatpush.bf16.msra.mxu3 %v7458_v43  ;;  %v7468_v14 = vld [vmem:[#allocation48_spill] sm:$0xff]  ;;  %v7469_v43 = vld [vmem:[#allocation50_spill] sm:$0xff] }
  0xff   :  { %841 = vmatpush.bf16.msra.mxu0 %v7459_v55  ;;  %854 = vmatpush.bf16.msra.mxu1 %v7460_v19  ;;  %v7470_v55 = vld [vmem:[#allocation51_spill] sm:$0xff]  ;;  %v7471_v19 = vld [vmem:[#allocation52_spill] sm:$0xff] }
 0x101   :  { %867 = vmatpush.bf16.msra.mxu2 %v7463_v63  ;;  %880 = vmatpush.bf16.msra.mxu3 %v7464_v31  ;;  %v7474_v63 = vld [vmem:[#allocation57_spill] sm:$0xff]  ;;  %v7475_v31 = vld [vmem:[#allocation58_spill] sm:$0xff] }
 0x103   :  { %894 = vmatpush.bf16.msrb.mxu0 %v7461_v27  ;;  %907 = vmatpush.bf16.msrb.mxu1 %v7462_v18  ;;  %v7472_v27 = vld [vmem:[#allocation53_spill] sm:$0xff]  ;;  %v7473_v18 = vld [vmem:[#allocation54_spill] sm:$0xff] }
 0x105   :  { %920 = vmatpush.bf16.msrb.mxu2 %v7465_v42  ;;  %933 = vmatpush.bf16.msrb.mxu3 %v7466_v60  ;;  %v7476_v42 = vld [vmem:[#allocation59_spill] sm:$0xff]  ;;  %v7477_v60 = vld [vmem:[#allocation60_spill] sm:$0xff] }
 0x107   :  { %895 = vmatpush.bf16.msrb.mxu0 %v7467_v0  ;;  %908 = vmatpush.bf16.msrb.mxu1 %v7468_v14  ;;  %v7478_v0 = vld [vmem:[#allocation61_spill] sm:$0xff] }
 0x109   :  { %921 = vmatpush.bf16.msrb.mxu2 %v7469_v43  ;;  %934 = vmatpush.bf16.msrb.mxu3 %v7470_v55 }
 0x10b   :  { %896 = vmatpush.bf16.msrb.mxu0 %v7471_v19  ;;  %909 = vmatpush.bf16.msrb.mxu1 %v7472_v27 }
 0x10d   :  { %922 = vmatpush.bf16.msrb.mxu2 %v7473_v18  ;;  %935 = vmatpush.bf16.msrb.mxu3 %v7474_v63 }
 0x10f   :  { %897 = vmatpush.bf16.msrb.mxu0 %v7475_v31  ;;  %910 = vmatpush.bf16.msrb.mxu1 %v7476_v42 }
 0x111   :  { %923 = vmatpush.bf16.msrb.mxu2 %v7477_v60  ;;  %936 = vmatpush.bf16.msrb.mxu3 %v7478_v0  ;;  %v7479_v60 = vld [vmem:[#allocation35_spill] sm:$0xff]  ;;  %v7480_v0 = vld [vmem:[#allocation37_spill] sm:$0xff] }
 0x125   :  { %v756_v63 = vpop.permute.xlu0 %755 }
 0x126   :  { %v758_v24 = vmul.f32 %v756_v63, %v7479_v60  ;;  %v759_v35 = vmul.f32 %v756_v63, %v7480_v0  ;;  %v760_v6 = vmul.f32 %v756_v63, %v7483_v11 }
 0x13e   :  { %v560_v14 = vpop.f32.mrf.mxu0  ;;  %v573_v43 = vpop.f32.mrf.mxu1 }
 0x13f   :  { %v561_v0 = vadd.f32 %v560_v14, %v5685_v40  ;;  %v574_v61 = vadd.f32 %v573_v43, %v5687_v22 }
 0x145   :  { %v586_v32 = vpop.f32.mrf.mxu2  ;;  %v5674_v55 = vpop.f32.mrf.mxu3 }
 0x146   :  { %v562_v19 = vpop.f32.mrf.mxu0  ;;  %v575_v48 = vpop.f32.mrf.mxu1 }
 0x147   :  { %v7481_v19 = vld [vmem:[#allocation36_spill] sm:$0xff] }
 0x148   :  { %v762_v48 = vadd.f32 %v758_v24, %v7481_v19  ;;  %v7484_v24 = vld [vmem:[#allocation56_spill] sm:$0xff] }
 0x149   :  { %v761_v19 = vmul.f32 %v756_v63, %v7484_v24 }
 0x14d   :  { %v588_v27 = vpop.f32.mrf.mxu2  ;;  %v601_v2 = vpop.f32.mrf.mxu3 }
 0x14e   :  { %v696_v18 = vpop.f32.mrf.mxu0  ;;  %v709_v49 = vpop.f32.mrf.mxu1  ;;  %v7482_v27 = vld [vmem:[#allocation49_spill] sm:$0xff] }
 0x14f   :  { %v763_v2 = vadd.f32 %v759_v35, %v7482_v27  ;;  %v697_v35 = vadd.f32 %v696_v18, %v561_v0  ;;  %v710_v27 = vadd.f32 %v709_v49, %v574_v61 }
 0x155   :  { %v722_v4 = vpop.f32.mrf.mxu2  ;;  %v5676_v31 = vpop.f32.mrf.mxu3 }
 0x156   :  { %v698_v42 = vpop.f32.mrf.mxu0  ;;  %v711_v59 = vpop.f32.mrf.mxu1 }
 0x15d   :  { %v724_v39 = vpop.f32.mrf.mxu2  ;;  %v737_v37 = vpop.f32.mrf.mxu3 }
 0x15e   :  { %v5693_v39 = vperm.slane %v121_v23, 2  ;;  %v7485_v37 = vld [vmem:[#allocation62_spill] sm:$0xff] }
 0x15f   :  { %v775_v42 = vpop.f32.mrf.mxu0  ;;  %v788_v59 = vpop.f32.mrf.mxu1  ;;  %v764_v54 = vadd.f32 %v760_v6, %v7485_v37 }
 0x160   :  { %v776_v13 = vadd.f32 %v775_v42, %v762_v48  ;;  %v789_v60 = vadd.f32 %v788_v59, %v763_v2  ;;  %v765_v48 = vadd.f32 %v761_v19, %v5578_v1  ;;  %v587_v63 = vadd.f32 %v586_v32, %v5693_v39 }
 0x162   :  { %4416 = vtanh.f32 %v776_v13  ;;  %v723_v18 = vadd.f32 %v722_v4, %v587_v63 }
 0x163   :  { %4418 = vtanh.f32 %v789_v60 }
 0x164   :  { %4420 = vtanh.f32 %v697_v35 }
 0x165   :  { %4422 = vtanh.f32 %v710_v27 }
 0x167   :  { %v801_v53 = vpop.f32.mrf.mxu2  ;;  %v814_v2 = vpop.f32.mrf.mxu3 }
 0x168   :  { %v802_v14 = vadd.f32 %v801_v53, %v764_v54  ;;  %v777_v42 = vpop.f32.mrf.mxu0  ;;  %v790_v59 = vpop.f32.mrf.mxu1  ;;  %v815_v13 = vadd.f32 %v814_v2, %v765_v48  ;;  %v5698_v54 = vperm.slane %v121_v23, 3 }
 0x169   :  { %v4417_v11 = vpop.eup %4416 }
 0x16a   :  { %4424 = vtanh.f32 %v802_v14  ;;  %v4419_v61 = vpop.eup %4418  ;;  %v819_v49 = vmul.f32 0.5, %v4417_v11  ;;  %v600_v4 = vadd.f32 %v5674_v55, %v5698_v54 }
 0x16b   :  { %v822_v60 = vmul.f32 0.5, %v4419_v61  ;;  %4426 = vtanh.f32 %v815_v13  ;;  %v4421_v6 = vpop.eup %4420 }
 0x16c   :  { %v4423_v43 = vpop.eup %4422  ;;  %v820_v19 = vadd.f32 0.5, %v819_v49  ;;  %4428 = vtanh.f32 %v723_v18  ;;  %v740_v2 = vmul.f32 0.5, %v4421_v6  ;;  %v736_v23 = vadd.f32 %v5676_v31, %v600_v4  ;;  %v7492_v4 = vld [vmem:[#allocation13_spill] sm:$0xff] }
 0x16d   :  { %v823_v0 = vadd.f32 0.5, %v822_v60  ;;  %v743_v14 = vmul.f32 0.5, %v4423_v43 }
 0x16e   :  { %v741_v59 = vadd.f32 0.5, %v740_v2  ;;  %v7490_v2 = vld [vmem:[#allocation11_spill] sm:$0xff] }
 0x16f   :  { %v803_v1 = vpop.f32.mrf.mxu2  ;;  %v816_v35 = vpop.f32.mrf.mxu3  ;;  %v828_v27 = vmul.f32 %v823_v0, %v5586_v41  ;;  %v744_v13 = vadd.f32 0.5, %v743_v14  ;;  %v4733_v0 = vmov 2   ;;  %v7491_v14 = vld [vmem:[#allocation12_spill] sm:$0xff] }
 0x170   :  { %v4425_v53 = vpop.eup %4424  ;;  %4389 = vset.pattern.permute.xlu1 %v4733_v0  ;;  %v7506_v0 = vld [vmem:[#allocation27_spill] sm:$0xff] }
 0x171   :  { %v829_v48 = vmul.f32 %v4425_v53, %v820_v19  ;;  %v4427_v32 = vpop.eup %4426  ;;  %v749_v49 = vmul.f32 0.0, %v744_v13  ;;  %958 = vperm.xlu1 %4389, %v5040_v20   ;;  %v7486_v53 = vld [vmem:[#allocation7_spill] sm:$0xff]  ;;  %v7496_v13 = vld [vmem:[#allocation17_spill] sm:$0xff] }
 0x172   :  { %v4429_v42 = vpop.eup %4428  ;;  %v826_v1 = vmul.f32 0.5, %v4427_v32  ;;  %v7489_v32 = vld [vmem:[#allocation10_spill] sm:$0xff] }
 0x173   :  { %v5701_v11 = vadd.f32 %v829_v48, %v828_v27  ;;  %v750_v63 = vmul.f32 %v4429_v42, %v741_v59  ;;  %v7487_v27 = vld [vmem:[#allocation8_spill] sm:$0xff]  ;;  %v7488_v48 = vld [vmem:[#allocation9_spill] sm:$0xff]  ;;  %v7493_v42 = vld [vmem:[#allocation14_spill] sm:$0xff] }
 0x174   :  { %v827_v61 = vadd.f32 0.5, %v826_v1  ;;  %v7494_v1 = vld [vmem:[#allocation15_spill] sm:$0xff]  ;;  %v7495_v59 = vld [vmem:[#allocation16_spill] sm:$0xff] }
 0x175   :  { %4430 = vtanh.f32 %v5701_v11  ;;  %v5707_v60 = vadd.f32 %v750_v63, %v749_v49  ;;  %v7498_v63 = vld [vmem:[#allocation19_spill] sm:$0xff]  ;;  %v7501_v49 = vld [vmem:[#allocation22_spill] sm:$0xff] }
 0x176   :  { %4432 = vtanh.f32 %v736_v23  ;;  %v7497_v23 = vld [vmem:[#allocation18_spill] sm:$0xff] }
 0x177   :  { %4434 = vtanh.f32 %v5707_v60 }
 0x17b   :  { %v4431_v41 = vpop.eup %4430 }
 0x17c   :  { %v832_v18 = vmul.f32 %v4431_v41, %v827_v61  ;;  %v4433_v55 = vpop.eup %4432  ;;  %v7499_v61 = vld [vmem:[#allocation20_spill] sm:$0xff]  ;;  %v7500_v41 = vld [vmem:[#allocation21_spill] sm:$0xff] }
 0x17d   :  { %v747_v31 = vmul.f32 0.5, %v4433_v55  ;;  %v4435_v43 = vpop.eup %4434  ;;  %v7504_v55 = vld [vmem:[#allocation25_spill] sm:$0xff] }
 0x17e   :  { %v833_v6 = vpack.c.bf16 %v832_v18, %v832_v18  ;;  %v7502_v18 = vld [vmem:[#allocation23_spill] sm:$0xff] }
 0x17f   :  { %v748_v19 = vadd.f32 0.5, %v747_v31  ;;  %v7505_v31 = vld [vmem:[#allocation26_spill] sm:$0xff] }
 0x180   :  { %842 = vmatmul.bf16.vlgmr.msra.gmra.mxu0 %v833_v6  ;;  %855 = vmatmul.bf16.vlgmr.msra.gmra.mxu1 %v833_v6 }
 0x181   :  { %868 = vmatmul.bf16.vlgmr.msra.gmra.mxu2 %v833_v6  ;;  %881 = vmatmul.bf16.vlgmr.msra.gmra.mxu3 %v833_v6  ;;  %v753_v35 = vmul.f32 %v4435_v43, %v748_v19  ;;  %v7507_v43 = vld [vmem:[#allocation28_spill] sm:$0xff]  ;;  %v7508_v19 = vld [vmem:[#allocation29_spill] sm:$0xff] }
 0x182   :  { %969 = vmatpush.bf16.msra.mxu0 %v4816_v3  ;;  %982 = vmatpush.bf16.msra.mxu1 %v4827_v7 }
 0x183   :  { %995 = vmatpush.bf16.msra.mxu2 %v4829_v8  ;;  %1008 = vmatpush.bf16.msra.mxu3 %v4841_v12  ;;  %v886_v20 = vpack.c.bf16 %v753_v35, %v753_v35  ;;  %v7509_v35 = vld [vmem:[#allocation30_spill] sm:$0xff] }
 0x186   :  { %970 = vmatpush.bf16.msra.mxu0 %v4854_v16  ;;  %983 = vmatpush.bf16.msra.mxu1 %v4856_v17 }
 0x187   :  { %996 = vmatpush.bf16.msra.mxu2 %v4868_v21  ;;  %1009 = vmatpush.bf16.msra.mxu3 %v4879_v25 }
 0x18a   :  { %971 = vmatpush.bf16.msra.mxu0 %v4891_v29  ;;  %984 = vmatpush.bf16.msra.mxu1 %v4904_v33 }
 0x18b   :  { %997 = vmatpush.bf16.msra.mxu2 %v4906_v34  ;;  %1010 = vmatpush.bf16.msra.mxu3 %v4918_v38 }
 0x18e   :  { %972 = vmatpush.bf16.msra.mxu0 %v4936_v44  ;;  %985 = vmatpush.bf16.msra.mxu1 %v4940_v45 }
 0x18f   :  { %998 = vmatpush.bf16.msra.mxu2 %v4942_v46  ;;  %1011 = vmatpush.bf16.msra.mxu3 %v4954_v50 }
 0x190   :  { %4209 = vmatmul.msk.bf16.vlgmr.msrb.gmra.mxu0 %vm683_vm0, %v886_v20  ;;  %4210 = vmatmul.msk.bf16.vlgmr.msrb.gmra.mxu1 %vm683_vm0, %v886_v20 }
 0x191   :  { %4211 = vmatmul.msk.bf16.vlgmr.msrb.gmra.mxu2 %vm683_vm0, %v886_v20  ;;  %4212 = vmatmul.msk.bf16.vlgmr.msrb.gmra.mxu3 %vm683_vm0, %v886_v20  ;;  %v7510_v20 = vld [vmem:[#allocation31_spill] sm:$0xff] }
 0x192   :  { %973 = vmatpush.bf16.msra.mxu0 %v4972_v56  ;;  %986 = vmatpush.bf16.msra.mxu1 %v4976_v57 }
 0x193   :  { %999 = vmatpush.bf16.msra.mxu2 %v4978_v58  ;;  %1012 = vmatpush.bf16.msra.mxu3 %v4990_v62 }
 0x196   :  { %974 = vmatpush.bf16.msra.mxu0 %v5008_v5  ;;  %987 = vmatpush.bf16.msra.mxu1 %v5015_v9 }
 0x197   :  { %1000 = vmatpush.bf16.msra.mxu2 %v5017_v10  ;;  %1013 = vmatpush.bf16.msra.mxu3 %v5029_v15 }
 0x19a   :  { %975 = vmatpush.bf16.msra.mxu0 %v5050_v26  ;;  %988 = vmatpush.bf16.msra.mxu1 %v5058_v28 }
 0x19b   :  { %1001 = vmatpush.bf16.msra.mxu2 %v5060_v30  ;;  %1014 = vmatpush.bf16.msra.mxu3 %v5072_v36 }
 0x19e   :  { %976 = vmatpush.bf16.msra.mxu0 %v5093_v47  ;;  %989 = vmatpush.bf16.msra.mxu1 %v5103_v51  ;;  %v7539_v51 = vld [vmem:[#allocation55_spill] sm:$0xff] }
 0x19f   :  { %1002 = vmatpush.bf16.msra.mxu2 %v5105_v52  ;;  %1015 = vmatpush.bf16.msra.mxu3 %v7486_v53 }
 0x1a1   :  { %977 = vmatmul.bf16.vlgmr.msra.gmra.mxu0 %v833_v6  ;;  %990 = vmatmul.bf16.vlgmr.msra.gmra.mxu1 %v833_v6 }
 0x1a2   :  { %1037 = vmatpush.bf16.msrb.mxu0 %v7487_v27  ;;  %1050 = vmatpush.bf16.msrb.mxu1 %v7488_v48 }
 0x1a3   :  { %1003 = vmatmul.bf16.vlgmr.msra.gmra.mxu2 %v833_v6  ;;  %1016 = vmatmul.bf16.vlgmr.msra.gmra.mxu3 %v833_v6  ;;  %v7503_v6 = vld [vmem:[#allocation24_spill] sm:$0xff] }
 0x1a4   :  { %1063 = vmatpush.bf16.msrb.mxu2 %v7489_v32  ;;  %1076 = vmatpush.bf16.msrb.mxu3 %v7490_v2  ;;  %v7538_v32 = vld [vmem:[#allocation49_spill] sm:$0xff] }
 0x1a6   :  { %1038 = vmatpush.bf16.msrb.mxu0 %v7491_v14  ;;  %1051 = vmatpush.bf16.msrb.mxu1 %v7492_v4 }
 0x1a8   :  { %1064 = vmatpush.bf16.msrb.mxu2 %v7493_v42  ;;  %1077 = vmatpush.bf16.msrb.mxu3 %v7494_v1 }
 0x1aa   :  { %1039 = vmatpush.bf16.msrb.mxu0 %v7495_v59  ;;  %1052 = vmatpush.bf16.msrb.mxu1 %v7496_v13 }
 0x1ac   :  { %1065 = vmatpush.bf16.msrb.mxu2 %v7497_v23  ;;  %1078 = vmatpush.bf16.msrb.mxu3 %v7498_v63 }
 0x1ae   :  { %1040 = vmatpush.bf16.msrb.mxu0 %v7499_v61  ;;  %1053 = vmatpush.bf16.msrb.mxu1 %v7500_v41  ;;  %v7511_v41 = vld [vmem:[#allocation32_spill] sm:$0xff] }
 0x1b0   :  { %1066 = vmatpush.bf16.msrb.mxu2 %v7501_v49  ;;  %1079 = vmatpush.bf16.msrb.mxu3 %v7502_v18  ;;  %v7512_v49 = vld [vmem:[#allocation33_spill] sm:$0xff]  ;;  %v7513_v18 = vld [vmem:[#allocation34_spill] sm:$0xff] }
 0x1b2   :  { %1041 = vmatpush.bf16.msrb.mxu0 %v7503_v6  ;;  %1054 = vmatpush.bf16.msrb.mxu1 %v7504_v55  ;;  %v7514_v6 = vld [vmem:[#allocation38_spill] sm:$0xff]  ;;  %v7515_v55 = vld [vmem:[#allocation39_spill] sm:$0xff] }
 0x1b4   :  { %1067 = vmatpush.bf16.msrb.mxu2 %v7505_v31  ;;  %1080 = vmatpush.bf16.msrb.mxu3 %v7506_v0  ;;  %v7516_v31 = vld [vmem:[#allocation40_spill] sm:$0xff]  ;;  %v7517_v0 = vld [vmem:[#allocation43_spill] sm:$0xff] }
 0x1b6   :  { %1042 = vmatpush.bf16.msrb.mxu0 %v7507_v43  ;;  %1055 = vmatpush.bf16.msrb.mxu1 %v7508_v19  ;;  %v7518_v43 = vld [vmem:[#allocation44_spill] sm:$0xff]  ;;  %v7519_v19 = vld [vmem:[#allocation41_spill] sm:$0xff] }
 0x1b8   :  { %1068 = vmatpush.bf16.msrb.mxu2 %v7509_v35  ;;  %1081 = vmatpush.bf16.msrb.mxu3 %v7510_v20  ;;  %v7520_v35 = vld [vmem:[#allocation42_spill] sm:$0xff]  ;;  %v7521_v20 = vld [vmem:[#allocation45_spill] sm:$0xff] }
 0x1ba   :  { %1043 = vmatpush.bf16.msrb.mxu0 %v7511_v41  ;;  %1056 = vmatpush.bf16.msrb.mxu1 %v7512_v49  ;;  %v7522_v41 = vld [vmem:[#allocation46_spill] sm:$0xff]  ;;  %v7523_v49 = vld [vmem:[#allocation47_spill] sm:$0xff] }
 0x1bc   :  { %1069 = vmatpush.bf16.msrb.mxu2 %v7513_v18  ;;  %1082 = vmatpush.bf16.msrb.mxu3 %v7514_v6  ;;  %v7524_v18 = vld [vmem:[#allocation48_spill] sm:$0xff]  ;;  %v7525_v6 = vld [vmem:[#allocation50_spill] sm:$0xff] }
 0x1be   :  { %1044 = vmatpush.bf16.msrb.mxu0 %v7515_v55  ;;  %1057 = vmatpush.bf16.msrb.mxu1 %v7516_v31  ;;  %v7526_v55 = vld [vmem:[#allocation51_spill] sm:$0xff]  ;;  %v7527_v31 = vld [vmem:[#allocation52_spill] sm:$0xff] }
 0x1c0   :  { %1070 = vmatpush.bf16.msrb.mxu2 %v7519_v19  ;;  %1083 = vmatpush.bf16.msrb.mxu3 %v7520_v35  ;;  %v7530_v19 = vld [vmem:[#allocation57_spill] sm:$0xff]  ;;  %v7531_v35 = vld [vmem:[#allocation58_spill] sm:$0xff] }
 0x1c2   :  { %1097 = vmatpush.bf16.msra.mxu0 %v7517_v0  ;;  %1110 = vmatpush.bf16.msra.mxu1 %v7518_v43  ;;  %v7528_v0 = vld [vmem:[#allocation53_spill] sm:$0xff]  ;;  %v7529_v43 = vld [vmem:[#allocation54_spill] sm:$0xff] }
 0x1c4   :  { %1123 = vmatpush.bf16.msra.mxu2 %v7521_v20  ;;  %1136 = vmatpush.bf16.msra.mxu3 %v7522_v41  ;;  %v7532_v20 = vld [vmem:[#allocation59_spill] sm:$0xff]  ;;  %v7533_v41 = vld [vmem:[#allocation60_spill] sm:$0xff] }
 0x1c6   :  { %1098 = vmatpush.bf16.msra.mxu0 %v7523_v49  ;;  %1111 = vmatpush.bf16.msra.mxu1 %v7524_v18  ;;  %v7534_v49 = vld [vmem:[#allocation61_spill] sm:$0xff] }
 0x1c8   :  { %1124 = vmatpush.bf16.msra.mxu2 %v7525_v6  ;;  %1137 = vmatpush.bf16.msra.mxu3 %v7526_v55 }
 0x1ca   :  { %1099 = vmatpush.bf16.msra.mxu0 %v7527_v31  ;;  %1112 = vmatpush.bf16.msra.mxu1 %v7528_v0 }
 0x1cc   :  { %1125 = vmatpush.bf16.msra.mxu2 %v7529_v43  ;;  %1138 = vmatpush.bf16.msra.mxu3 %v7530_v19 }
 0x1ce   :  { %1100 = vmatpush.bf16.msra.mxu0 %v7531_v35  ;;  %1113 = vmatpush.bf16.msra.mxu1 %v7532_v20  ;;  %v7535_v20 = vld [vmem:[#allocation35_spill] sm:$0xff] }
 0x1d0   :  { %1126 = vmatpush.bf16.msra.mxu2 %v7533_v41  ;;  %1139 = vmatpush.bf16.msra.mxu3 %v7534_v49  ;;  %v7536_v41 = vld [vmem:[#allocation37_spill] sm:$0xff]  ;;  %v7537_v49 = vld [vmem:[#allocation36_spill] sm:$0xff] }
 0x1e3   :  { %v959_v59 = vpop.permute.xlu1 %958 }
 0x1e4   :  { %v961_v4 = vmul.f32 %v959_v59, %v7535_v20  ;;  %v962_v14 = vmul.f32 %v959_v59, %v7536_v41  ;;  %v963_v47 = vmul.f32 %v959_v59, %v7539_v51 }
 0x1e6   :  { %v965_v2 = vadd.f32 %v961_v4, %v7537_v49  ;;  %v966_v48 = vadd.f32 %v962_v14, %v7538_v32  ;;  %v967_v14 = vadd.f32 %v963_v47, %v7485_v37  ;;  %v7540_v4 = vld [vmem:[#allocation63_spill] sm:$0xff] }
 0x1fd   :  { %v843_v18 = vpop.f32.mrf.mxu0  ;;  %v856_v6 = vpop.f32.mrf.mxu1 }
 0x1fe   :  { %v844_v52 = vadd.f32 %v843_v18, %v5685_v40 }
 0x204   :  { %v869_v61 = vpop.f32.mrf.mxu2  ;;  %v882_v55 = vpop.f32.mrf.mxu3 }
 0x205   :  { %v845_v63 = vpop.f32.mrf.mxu0  ;;  %v858_v31 = vpop.f32.mrf.mxu1 }
 0x20c   :  { %v871_v23 = vpop.f32.mrf.mxu2  ;;  %v884_v0 = vpop.f32.mrf.mxu3 }
 0x20d   :  { %v899_v13 = vpop.f32.mrf.mxu0  ;;  %v912_v43 = vpop.f32.mrf.mxu1 }
 0x20e   :  { %v900_v41 = vadd.f32 %v899_v13, %v844_v52 }
 0x214   :  { %v925_v19 = vpop.f32.mrf.mxu2  ;;  %v938_v1 = vpop.f32.mrf.mxu3 }
 0x215   :  { %v901_v35 = vpop.f32.mrf.mxu0  ;;  %v914_v42 = vpop.f32.mrf.mxu1 }
 0x216   :  { %v857_v42 = vadd.f32 %v856_v6, %v5687_v22  ;;  %v964_v35 = vmul.f32 %v959_v59, %v7484_v24  ;;  %v870_v6 = vadd.f32 %v869_v61, %v5693_v39 }
 0x218   :  { %v913_v20 = vadd.f32 %v912_v43, %v857_v42  ;;  %v926_v13 = vadd.f32 %v925_v19, %v870_v6  ;;  %v883_v19 = vadd.f32 %v882_v55, %v5698_v54 }
 0x21a   :  { %v939_v6 = vadd.f32 %v938_v1, %v883_v19  ;;  %v4734_v1 = vmov 3   ;;  %v7546_v19 = vld [vmem:[#allocation9_spill] sm:$0xff] }
 0x21b   :  { %4390 = vset.pattern.permute.xlu1 %v4734_v1  ;;  %v7560_v1 = vld [vmem:[#allocation23_spill] sm:$0xff] }
 0x21c   :  { %v927_v27 = vpop.f32.mrf.mxu2  ;;  %v940_v63 = vpop.f32.mrf.mxu3 }
 0x21d   :  { %v968_v63 = vadd.f32 %v964_v35, %v7540_v4 }
 0x21e   :  { %v978_v31 = vpop.f32.mrf.mxu0  ;;  %v991_v23 = vpop.f32.mrf.mxu1 }
 0x21f   :  { %v979_v0 = vadd.f32 %v978_v31, %v965_v2  ;;  %v992_v53 = vadd.f32 %v991_v23, %v966_v48 }
 0x221   :  { %4436 = vtanh.f32 %v979_v0 }
 0x222   :  { %4438 = vtanh.f32 %v992_v53 }
 0x223   :  { %4440 = vtanh.f32 %v900_v41 }
 0x224   :  { %4442 = vtanh.f32 %v913_v20 }
 0x226   :  { %v1004_v27 = vpop.f32.mrf.mxu2  ;;  %v1017_v32 = vpop.f32.mrf.mxu3 }
 0x227   :  { %v1005_v48 = vadd.f32 %v1004_v27, %v967_v14  ;;  %v980_v2 = vpop.f32.mrf.mxu0  ;;  %v993_v18 = vpop.f32.mrf.mxu1  ;;  %v1018_v23 = vadd.f32 %v1017_v32, %v968_v63 }
 0x228   :  { %v4437_v31 = vpop.eup %4436 }
 0x229   :  { %4444 = vtanh.f32 %v1005_v48  ;;  %v4439_v59 = vpop.eup %4438  ;;  %v1022_v52 = vmul.f32 0.5, %v4437_v31 }
 0x22a   :  { %v1025_v53 = vmul.f32 0.5, %v4439_v59  ;;  %4446 = vtanh.f32 %v1018_v23  ;;  %v4441_v47 = vpop.eup %4440 }
 0x22b   :  { %v4443_v0 = vpop.eup %4442  ;;  %v1023_v42 = vadd.f32 0.5, %v1022_v52  ;;  %4448 = vtanh.f32 %v926_v13  ;;  %v943_v63 = vmul.f32 0.5, %v4441_v47 }
 0x22c   :  { %v1026_v43 = vadd.f32 0.5, %v1025_v53  ;;  %v946_v61 = vmul.f32 0.5, %v4443_v0  ;;  %v5822_v0 = vld [vmem:[%s7237_s0] sm:$0xff] }
 0x22d   :  { %v944_v31 = vadd.f32 0.5, %v943_v63  ;;  %1161 = vperm.xlu1 %4390, %v5822_v0   ;;  %v7544_v63 = vld [vmem:[#allocation7_spill] sm:$0xff] }
 0x22e   :  { %v1006_v35 = vpop.f32.mrf.mxu2  ;;  %v1019_v41 = vpop.f32.mrf.mxu3  ;;  %v1031_v27 = vmul.f32 %v1026_v43, %v5701_v11  ;;  %v947_v23 = vadd.f32 0.5, %v946_v61  ;;  %v7545_v61 = vld [vmem:[#allocation8_spill] sm:$0xff] }
 0x22f   :  { %v4445_v14 = vpop.eup %4444 }
 0x230   :  { %v1032_v20 = vmul.f32 %v4445_v14, %v1023_v42  ;;  %v4447_v32 = vpop.eup %4446  ;;  %v952_v11 = vmul.f32 %v947_v23, %v5707_v60  ;;  %v7550_v23 = vld [vmem:[#allocation13_spill] sm:$0xff] }
 0x231   :  { %v4449_v2 = vpop.eup %4448  ;;  %v1029_v18 = vmul.f32 0.5, %v4447_v32  ;;  %v7543_v32 = vld [vmem:[#allocation6_spill] sm:$0xff] }
 0x232   :  { %v5807_v48 = vadd.f32 %v1032_v20, %v1031_v27  ;;  %v953_v59 = vmul.f32 %v4449_v2, %v944_v31  ;;  %v7541_v27 = vld [vmem:[#allocation4_spill] sm:$0xff]  ;;  %v7542_v20 = vld [vmem:[#allocation5_spill] sm:$0xff]  ;;  %v7547_v2 = vld [vmem:[#allocation10_spill] sm:$0xff] }
 0x233   :  { %v1030_v52 = vadd.f32 0.5, %v1029_v18  ;;  %v7548_v18 = vld [vmem:[#allocation11_spill] sm:$0xff]  ;;  %v7549_v31 = vld [vmem:[#allocation12_spill] sm:$0xff] }
 0x234   :  { %4450 = vtanh.f32 %v5807_v48  ;;  %v5812_v47 = vadd.f32 %v953_v59, %v952_v11  ;;  %v7552_v59 = vld [vmem:[#allocation15_spill] sm:$0xff]  ;;  %v7555_v11 = vld [vmem:[#allocation18_spill] sm:$0xff] }
 0x235   :  { %4452 = vtanh.f32 %v939_v6  ;;  %v7551_v6 = vld [vmem:[#allocation14_spill] sm:$0xff] }
 0x236   :  { %4454 = vtanh.f32 %v5812_v47 }
 0x23a   :  { %v4451_v13 = vpop.eup %4450 }
 0x23b   :  { %v1035_v53 = vmul.f32 %v4451_v13, %v1030_v52  ;;  %v4453_v55 = vpop.eup %4452  ;;  %v7553_v52 = vld [vmem:[#allocation16_spill] sm:$0xff]  ;;  %v7554_v13 = vld [vmem:[#allocation17_spill] sm:$0xff] }
 0x23c   :  { %v950_v60 = vmul.f32 0.5, %v4453_v55  ;;  %v4455_v42 = vpop.eup %4454  ;;  %v7558_v55 = vld [vmem:[#allocation21_spill] sm:$0xff] }
 0x23d   :  { %v1036_v43 = vpack.c.bf16 %v1035_v53, %v1035_v53  ;;  %v7556_v53 = vld [vmem:[#allocation19_spill] sm:$0xff] }
 0x23e   :  { %v951_v35 = vadd.f32 0.5, %v950_v60  ;;  %v7559_v60 = vld [vmem:[#allocation22_spill] sm:$0xff] }
 0x23f   :  { %1045 = vmatmul.bf16.vlgmr.msrb.gmra.mxu0 %v1036_v43  ;;  %1058 = vmatmul.bf16.vlgmr.msrb.gmra.mxu1 %v1036_v43 }
 0x240   :  { %1071 = vmatmul.bf16.vlgmr.msrb.gmra.mxu2 %v1036_v43  ;;  %1084 = vmatmul.bf16.vlgmr.msrb.gmra.mxu3 %v1036_v43  ;;  %v956_v41 = vmul.f32 %v4455_v42, %v951_v35  ;;  %v7561_v42 = vld [vmem:[#allocation24_spill] sm:$0xff]  ;;  %v7562_v35 = vld [vmem:[#allocation25_spill] sm:$0xff] }
 0x241   :  { %1172 = vmatpush.bf16.msrb.mxu0 %v4816_v3  ;;  %1185 = vmatpush.bf16.msrb.mxu1 %v4827_v7 }
 0x242   :  { %1198 = vmatpush.bf16.msrb.mxu2 %v4829_v8  ;;  %1211 = vmatpush.bf16.msrb.mxu3 %v4841_v12  ;;  %v1089_v14 = vpack.c.bf16 %v956_v41, %v956_v41  ;;  %v7563_v41 = vld [vmem:[#allocation26_spill] sm:$0xff] }
 0x245   :  { %1173 = vmatpush.bf16.msrb.mxu0 %v4854_v16  ;;  %1186 = vmatpush.bf16.msrb.mxu1 %v4856_v17 }
 0x246   :  { %1199 = vmatpush.bf16.msrb.mxu2 %v4868_v21  ;;  %1212 = vmatpush.bf16.msrb.mxu3 %v4879_v25 }
 0x249   :  { %1174 = vmatpush.bf16.msrb.mxu0 %v4891_v29  ;;  %1187 = vmatpush.bf16.msrb.mxu1 %v4904_v33 }
 0x24a   :  { %1200 = vmatpush.bf16.msrb.mxu2 %v4906_v34  ;;  %1213 = vmatpush.bf16.msrb.mxu3 %v4918_v38 }
 0x24d   :  { %1175 = vmatpush.bf16.msrb.mxu0 %v4936_v44  ;;  %1188 = vmatpush.bf16.msrb.mxu1 %v4940_v45 }
 0x24e   :  { %1201 = vmatpush.bf16.msrb.mxu2 %v4942_v46  ;;  %1214 = vmatpush.bf16.msrb.mxu3 %v4954_v50 }
 0x24f   :  { %4213 = vmatmul.msk.bf16.vlgmr.msra.gmra.mxu0 %vm683_vm0, %v1089_v14  ;;  %4214 = vmatmul.msk.bf16.vlgmr.msra.gmra.mxu1 %vm683_vm0, %v1089_v14 }
 0x250   :  { %4215 = vmatmul.msk.bf16.vlgmr.msra.gmra.mxu2 %vm683_vm0, %v1089_v14  ;;  %4216 = vmatmul.msk.bf16.vlgmr.msra.gmra.mxu3 %vm683_vm0, %v1089_v14  ;;  %v7564_v14 = vld [vmem:[#allocation27_spill] sm:$0xff] }
 0x251   :  { %1176 = vmatpush.bf16.msrb.mxu0 %v4972_v56  ;;  %1189 = vmatpush.bf16.msrb.mxu1 %v4976_v57 }
 0x252   :  { %1202 = vmatpush.bf16.msrb.mxu2 %v4978_v58  ;;  %1215 = vmatpush.bf16.msrb.mxu3 %v4990_v62 }
 0x255   :  { %1177 = vmatpush.bf16.msrb.mxu0 %v5008_v5  ;;  %1190 = vmatpush.bf16.msrb.mxu1 %v5015_v9 }
 0x256   :  { %1203 = vmatpush.bf16.msrb.mxu2 %v5017_v10  ;;  %1216 = vmatpush.bf16.msrb.mxu3 %v5029_v15 }
 0x259   :  { %1178 = vmatpush.bf16.msrb.mxu0 %v5050_v26  ;;  %1191 = vmatpush.bf16.msrb.mxu1 %v5058_v28 }
 0x25a   :  { %1204 = vmatpush.bf16.msrb.mxu2 %v5060_v30  ;;  %1217 = vmatpush.bf16.msrb.mxu3 %v5072_v36 }
 0x25d   :  { %1179 = vmatpush.bf16.msrb.mxu0 %v7541_v27  ;;  %1192 = vmatpush.bf16.msrb.mxu1 %v7542_v20 }
 0x25e   :  { %1205 = vmatpush.bf16.msrb.mxu2 %v7543_v32  ;;  %1218 = vmatpush.bf16.msrb.mxu3 %v7544_v63  ;;  %v7595_v63 = vld [vmem:[#allocation49_spill] sm:$0xff] }
 0x260   :  { %1180 = vmatmul.bf16.vlgmr.msrb.gmra.mxu0 %v1036_v43  ;;  %1193 = vmatmul.bf16.vlgmr.msrb.gmra.mxu1 %v1036_v43 }
 0x261   :  { %1240 = vmatpush.bf16.msra.mxu0 %v7545_v61  ;;  %1253 = vmatpush.bf16.msra.mxu1 %v7546_v19 }
 0x262   :  { %1206 = vmatmul.bf16.vlgmr.msrb.gmra.mxu2 %v1036_v43  ;;  %1219 = vmatmul.bf16.vlgmr.msrb.gmra.mxu3 %v1036_v43  ;;  %v7557_v43 = vld [vmem:[#allocation20_spill] sm:$0xff] }
 0x263   :  { %1266 = vmatpush.bf16.msra.mxu2 %v7547_v2  ;;  %1279 = vmatpush.bf16.msra.mxu3 %v7548_v18 }
 0x265   :  { %1241 = vmatpush.bf16.msra.mxu0 %v7549_v31  ;;  %1254 = vmatpush.bf16.msra.mxu1 %v7550_v23 }
 0x267   :  { %1267 = vmatpush.bf16.msra.mxu2 %v7551_v6  ;;  %1280 = vmatpush.bf16.msra.mxu3 %v7552_v59 }
 0x269   :  { %1242 = vmatpush.bf16.msra.mxu0 %v7553_v52  ;;  %1255 = vmatpush.bf16.msra.mxu1 %v7554_v13  ;;  %v7565_v13 = vld [vmem:[#allocation28_spill] sm:$0xff] }
 0x26b   :  { %1268 = vmatpush.bf16.msra.mxu2 %v7555_v11  ;;  %1281 = vmatpush.bf16.msra.mxu3 %v7556_v53  ;;  %v7566_v11 = vld [vmem:[#allocation29_spill] sm:$0xff]  ;;  %v7567_v53 = vld [vmem:[#allocation30_spill] sm:$0xff] }
 0x26d   :  { %1243 = vmatpush.bf16.msra.mxu0 %v7557_v43  ;;  %1256 = vmatpush.bf16.msra.mxu1 %v7558_v55  ;;  %v7568_v43 = vld [vmem:[#allocation31_spill] sm:$0xff]  ;;  %v7569_v55 = vld [vmem:[#allocation32_spill] sm:$0xff] }
 0x26f   :  { %1269 = vmatpush.bf16.msra.mxu2 %v7559_v60  ;;  %1282 = vmatpush.bf16.msra.mxu3 %v7560_v1  ;;  %v7570_v60 = vld [vmem:[#allocation33_spill] sm:$0xff]  ;;  %v7571_v1 = vld [vmem:[#allocation34_spill] sm:$0xff] }
 0x271   :  { %1244 = vmatpush.bf16.msra.mxu0 %v7561_v42  ;;  %1257 = vmatpush.bf16.msra.mxu1 %v7562_v35  ;;  %v7572_v42 = vld [vmem:[#allocation38_spill] sm:$0xff]  ;;  %v7573_v35 = vld [vmem:[#allocation39_spill] sm:$0xff] }
 0x273   :  { %1270 = vmatpush.bf16.msra.mxu2 %v7563_v41  ;;  %1283 = vmatpush.bf16.msra.mxu3 %v7564_v14  ;;  %v7574_v41 = vld [vmem:[#allocation40_spill] sm:$0xff]  ;;  %v7575_v14 = vld [vmem:[#allocation43_spill] sm:$0xff] }
 0x275   :  { %1245 = vmatpush.bf16.msra.mxu0 %v7565_v13  ;;  %1258 = vmatpush.bf16.msra.mxu1 %v7566_v11  ;;  %v7576_v13 = vld [vmem:[#allocation44_spill] sm:$0xff]  ;;  %v7577_v11 = vld [vmem:[#allocation41_spill] sm:$0xff] }
 0x277   :  { %1271 = vmatpush.bf16.msra.mxu2 %v7567_v53  ;;  %1284 = vmatpush.bf16.msra.mxu3 %v7568_v43  ;;  %v7578_v53 = vld [vmem:[#allocation42_spill] sm:$0xff]  ;;  %v7579_v43 = vld [vmem:[#allocation45_spill] sm:$0xff] }
 0x279   :  { %1246 = vmatpush.bf16.msra.mxu0 %v7569_v55  ;;  %1259 = vmatpush.bf16.msra.mxu1 %v7570_v60  ;;  %v7580_v55 = vld [vmem:[#allocation46_spill] sm:$0xff]  ;;  %v7581_v60 = vld [vmem:[#allocation47_spill] sm:$0xff] }
 0x27b   :  { %1272 = vmatpush.bf16.msra.mxu2 %v7571_v1  ;;  %1285 = vmatpush.bf16.msra.mxu3 %v7572_v42  ;;  %v7582_v1 = vld [vmem:[#allocation48_spill] sm:$0xff]  ;;  %v7583_v42 = vld [vmem:[#allocation50_spill] sm:$0xff] }
 0x27d   :  { %1247 = vmatpush.bf16.msra.mxu0 %v7573_v35  ;;  %1260 = vmatpush.bf16.msra.mxu1 %v7574_v41  ;;  %v7584_v35 = vld [vmem:[#allocation51_spill] sm:$0xff]  ;;  %v7585_v41 = vld [vmem:[#allocation52_spill] sm:$0xff] }
 0x27f   :  { %1273 = vmatpush.bf16.msra.mxu2 %v7577_v11  ;;  %1286 = vmatpush.bf16.msra.mxu3 %v7578_v53  ;;  %v7588_v11 = vld [vmem:[#allocation57_spill] sm:$0xff]  ;;  %v7589_v53 = vld [vmem:[#allocation58_spill] sm:$0xff] }
 0x281   :  { %1300 = vmatpush.bf16.msrb.mxu0 %v7575_v14  ;;  %1313 = vmatpush.bf16.msrb.mxu1 %v7576_v13  ;;  %v7586_v14 = vld [vmem:[#allocation53_spill] sm:$0xff]  ;;  %v7587_v13 = vld [vmem:[#allocation54_spill] sm:$0xff] }
 0x283   :  { %1326 = vmatpush.bf16.msrb.mxu2 %v7579_v43  ;;  %1339 = vmatpush.bf16.msrb.mxu3 %v7580_v55  ;;  %v7590_v43 = vld [vmem:[#allocation59_spill] sm:$0xff]  ;;  %v7591_v55 = vld [vmem:[#allocation60_spill] sm:$0xff] }
 0x285   :  { %1301 = vmatpush.bf16.msrb.mxu0 %v7581_v60  ;;  %1314 = vmatpush.bf16.msrb.mxu1 %v7582_v1  ;;  %v7592_v60 = vld [vmem:[#allocation61_spill] sm:$0xff] }
 0x287   :  { %1327 = vmatpush.bf16.msrb.mxu2 %v7583_v42  ;;  %1340 = vmatpush.bf16.msrb.mxu3 %v7584_v35 }
 0x289   :  { %1302 = vmatpush.bf16.msrb.mxu0 %v7585_v41  ;;  %1315 = vmatpush.bf16.msrb.mxu1 %v7586_v14 }
 0x28b   :  { %1328 = vmatpush.bf16.msrb.mxu2 %v7587_v13  ;;  %1341 = vmatpush.bf16.msrb.mxu3 %v7588_v11 }
 0x28d   :  { %1303 = vmatpush.bf16.msrb.mxu0 %v7589_v53  ;;  %1316 = vmatpush.bf16.msrb.mxu1 %v7590_v43  ;;  %v7593_v43 = vld [vmem:[#allocation35_spill] sm:$0xff] }
 0x28f   :  { %1329 = vmatpush.bf16.msrb.mxu2 %v7591_v55  ;;  %1342 = vmatpush.bf16.msrb.mxu3 %v7592_v60  ;;  %v7594_v55 = vld [vmem:[#allocation37_spill] sm:$0xff] }
 0x29f   :  { %v1162_v31 = vpop.permute.xlu1 %1161 }
 0x2a0   :  { %v1164_v19 = vmul.f32 %v1162_v31, %v7593_v43  ;;  %v1165_v61 = vmul.f32 %v1162_v31, %v7594_v55  ;;  %v1166_v30 = vmul.f32 %v1162_v31, %v7539_v51 }
 0x2a2   :  { %v1168_v60 = vadd.f32 %v1164_v19, %v7537_v49  ;;  %v1169_v32 = vadd.f32 %v1165_v61, %v7595_v63  ;;  %v1170_v61 = vadd.f32 %v1166_v30, %v7485_v37 }
 0x2bc   :  { %v1046_v1 = vpop.f32.mrf.mxu0  ;;  %v1059_v42 = vpop.f32.mrf.mxu1 }
 0x2bd   :  { %v1047_v36 = vadd.f32 %v1046_v1, %v5685_v40 }
 0x2c3   :  { %v1072_v52 = vpop.f32.mrf.mxu2  ;;  %v1085_v35 = vpop.f32.mrf.mxu3 }
 0x2c4   :  { %v1048_v59 = vpop.f32.mrf.mxu0  ;;  %v1061_v41 = vpop.f32.mrf.mxu1 }
 0x2cb   :  { %v1074_v6 = vpop.f32.mrf.mxu2  ;;  %v1087_v14 = vpop.f32.mrf.mxu3 }
 0x2cc   :  { %v1102_v23 = vpop.f32.mrf.mxu0  ;;  %v1115_v13 = vpop.f32.mrf.mxu1 }
 0x2cd   :  { %v1103_v55 = vadd.f32 %v1102_v23, %v1047_v36 }
 0x2d3   :  { %v1128_v11 = vpop.f32.mrf.mxu2  ;;  %v1141_v18 = vpop.f32.mrf.mxu3 }
 0x2d4   :  { %v1104_v53 = vpop.f32.mrf.mxu0  ;;  %v1117_v2 = vpop.f32.mrf.mxu1 }
 0x2d5   :  { %v1060_v2 = vadd.f32 %v1059_v42, %v5687_v22  ;;  %v1167_v53 = vmul.f32 %v1162_v31, %v7484_v24  ;;  %v1073_v42 = vadd.f32 %v1072_v52, %v5693_v39 }
 0x2d7   :  { %v1116_v43 = vadd.f32 %v1115_v13, %v1060_v2  ;;  %v1171_v19 = vadd.f32 %v1167_v53, %v7540_v4  ;;  %v1129_v23 = vadd.f32 %v1128_v11, %v1073_v42  ;;  %v1086_v11 = vadd.f32 %v1085_v35, %v5698_v54 }
 0x2d9   :  { %v1142_v42 = vadd.f32 %v1141_v18, %v1086_v11  ;;  %v4735_v18 = vmov 4   ;;  %v7602_v11 = vld [vmem:[#allocation8_spill] sm:$0xff] }
 0x2da   :  { %4391 = vset.pattern.permute.xlu2 %v4735_v18  ;;  %v7616_v18 = vld [vmem:[#allocation22_spill] sm:$0xff] }
 0x2db   :  { %v1130_v20 = vpop.f32.mrf.mxu2  ;;  %v1143_v59 = vpop.f32.mrf.mxu3  ;;  %1364 = vperm.xlu2 %4391, %v5822_v0  }
 0x2dd   :  { %v1181_v41 = vpop.f32.mrf.mxu0  ;;  %v1194_v6 = vpop.f32.mrf.mxu1 }
 0x2de   :  { %v1182_v14 = vadd.f32 %v1181_v41, %v1168_v60  ;;  %v1195_v27 = vadd.f32 %v1194_v6, %v1169_v32 }
 0x2e0   :  { %4456 = vtanh.f32 %v1182_v14 }
 0x2e1   :  { %4458 = vtanh.f32 %v1195_v27 }
 0x2e2   :  { %4460 = vtanh.f32 %v1103_v55 }
 0x2e3   :  { %4462 = vtanh.f32 %v1116_v43 }
 0x2e5   :  { %v1207_v20 = vpop.f32.mrf.mxu2  ;;  %v1220_v59 = vpop.f32.mrf.mxu3 }
 0x2e6   :  { %v1208_v32 = vadd.f32 %v1207_v20, %v1170_v61  ;;  %v1183_v60 = vpop.f32.mrf.mxu0  ;;  %v1196_v1 = vpop.f32.mrf.mxu1  ;;  %v1221_v6 = vadd.f32 %v1220_v59, %v1171_v19 }
 0x2e7   :  { %v4457_v41 = vpop.eup %4456 }
 0x2e8   :  { %4464 = vtanh.f32 %v1208_v32  ;;  %v4459_v31 = vpop.eup %4458  ;;  %v1225_v36 = vmul.f32 0.5, %v4457_v41 }
 0x2e9   :  { %v1228_v27 = vmul.f32 0.5, %v4459_v31  ;;  %4466 = vtanh.f32 %v1221_v6  ;;  %v4461_v30 = vpop.eup %4460 }
 0x2ea   :  { %v4463_v14 = vpop.eup %4462  ;;  %v1226_v2 = vadd.f32 0.5, %v1225_v36  ;;  %4468 = vtanh.f32 %v1129_v23  ;;  %v1146_v59 = vmul.f32 0.5, %v4461_v30 }
 0x2eb   :  { %v1229_v13 = vadd.f32 0.5, %v1228_v27  ;;  %v1149_v52 = vmul.f32 0.5, %v4463_v14 }
 0x2ec   :  { %v1147_v41 = vadd.f32 0.5, %v1146_v59  ;;  %v7600_v59 = vld [vmem:[#allocation6_spill] sm:$0xff] }
 0x2ed   :  { %v1209_v53 = vpop.f32.mrf.mxu2  ;;  %v1222_v55 = vpop.f32.mrf.mxu3  ;;  %v1234_v20 = vmul.f32 %v1229_v13, %v5807_v48  ;;  %v1150_v6 = vadd.f32 0.5, %v1149_v52  ;;  %v7601_v52 = vld [vmem:[#allocation7_spill] sm:$0xff] }
 0x2ee   :  { %v4465_v61 = vpop.eup %4464 }
 0x2ef   :  { %v1235_v43 = vmul.f32 %v4465_v61, %v1226_v2  ;;  %v4467_v19 = vpop.eup %4466  ;;  %v1155_v48 = vmul.f32 %v1150_v6, %v5812_v47  ;;  %v7596_v61 = vld [vmem:[#allocation2_spill] sm:$0xff]  ;;  %v7606_v6 = vld [vmem:[#allocation12_spill] sm:$0xff] }
 0x2f0   :  { %v4469_v60 = vpop.eup %4468  ;;  %v1232_v1 = vmul.f32 0.5, %v4467_v19  ;;  %v7599_v19 = vld [vmem:[#allocation5_spill] sm:$0xff] }
 0x2f1   :  { %v5917_v32 = vadd.f32 %v1235_v43, %v1234_v20  ;;  %v1156_v31 = vmul.f32 %v4469_v60, %v1147_v41  ;;  %v7597_v20 = vld [vmem:[#allocation3_spill] sm:$0xff]  ;;  %v7598_v43 = vld [vmem:[#allocation4_spill] sm:$0xff]  ;;  %v7603_v60 = vld [vmem:[#allocation9_spill] sm:$0xff] }
 0x2f2   :  { %v1233_v36 = vadd.f32 0.5, %v1232_v1  ;;  %v7604_v1 = vld [vmem:[#allocation10_spill] sm:$0xff]  ;;  %v7605_v41 = vld [vmem:[#allocation11_spill] sm:$0xff] }
 0x2f3   :  { %4470 = vtanh.f32 %v5917_v32  ;;  %v5922_v30 = vadd.f32 %v1156_v31, %v1155_v48  ;;  %v7608_v31 = vld [vmem:[#allocation14_spill] sm:$0xff]  ;;  %v7611_v48 = vld [vmem:[#allocation17_spill] sm:$0xff] }
 0x2f4   :  { %4472 = vtanh.f32 %v1142_v42  ;;  %v7607_v42 = vld [vmem:[#allocation13_spill] sm:$0xff] }
 0x2f5   :  { %4474 = vtanh.f32 %v5922_v30 }
 0x2f9   :  { %v4471_v23 = vpop.eup %4470 }
 0x2fa   :  { %v1238_v27 = vmul.f32 %v4471_v23, %v1233_v36  ;;  %v4473_v35 = vpop.eup %4472  ;;  %v7609_v36 = vld [vmem:[#allocation15_spill] sm:$0xff]  ;;  %v7610_v23 = vld [vmem:[#allocation16_spill] sm:$0xff] }
 0x2fb   :  { %v1153_v47 = vmul.f32 0.5, %v4473_v35  ;;  %v4475_v14 = vpop.eup %4474  ;;  %v7613_v35 = vld [vmem:[#allocation19_spill] sm:$0xff] }
 0x2fc   :  { %v1239_v13 = vpack.c.bf16 %v1238_v27, %v1238_v27  ;;  %v7612_v27 = vld [vmem:[#allocation18_spill] sm:$0xff] }
 0x2fd   :  { %v1154_v2 = vadd.f32 0.5, %v1153_v47  ;;  %v7615_v47 = vld [vmem:[#allocation21_spill] sm:$0xff] }
 0x2fe   :  { %1248 = vmatmul.bf16.vlgmr.msra.gmra.mxu0 %v1239_v13  ;;  %1261 = vmatmul.bf16.vlgmr.msra.gmra.mxu1 %v1239_v13 }
 0x2ff   :  { %1274 = vmatmul.bf16.vlgmr.msra.gmra.mxu2 %v1239_v13  ;;  %1287 = vmatmul.bf16.vlgmr.msra.gmra.mxu3 %v1239_v13  ;;  %v1159_v53 = vmul.f32 %v4475_v14, %v1154_v2  ;;  %v7617_v14 = vld [vmem:[#allocation23_spill] sm:$0xff]  ;;  %v7618_v2 = vld [vmem:[#allocation24_spill] sm:$0xff] }
 0x300   :  { %1375 = vmatpush.bf16.msra.mxu0 %v4816_v3  ;;  %1388 = vmatpush.bf16.msra.mxu1 %v4827_v7 }
 0x301   :  { %1401 = vmatpush.bf16.msra.mxu2 %v4829_v8  ;;  %1414 = vmatpush.bf16.msra.mxu3 %v4841_v12  ;;  %v1292_v55 = vpack.c.bf16 %v1159_v53, %v1159_v53  ;;  %v7619_v53 = vld [vmem:[#allocation25_spill] sm:$0xff] }
 0x304   :  { %1376 = vmatpush.bf16.msra.mxu0 %v4854_v16  ;;  %1389 = vmatpush.bf16.msra.mxu1 %v4856_v17 }
 0x305   :  { %1402 = vmatpush.bf16.msra.mxu2 %v4868_v21  ;;  %1415 = vmatpush.bf16.msra.mxu3 %v4879_v25 }
 0x308   :  { %1377 = vmatpush.bf16.msra.mxu0 %v4891_v29  ;;  %1390 = vmatpush.bf16.msra.mxu1 %v4904_v33 }
 0x309   :  { %1403 = vmatpush.bf16.msra.mxu2 %v4906_v34  ;;  %1416 = vmatpush.bf16.msra.mxu3 %v4918_v38 }
 0x30c   :  { %1378 = vmatpush.bf16.msra.mxu0 %v4936_v44  ;;  %1391 = vmatpush.bf16.msra.mxu1 %v4940_v45 }
 0x30d   :  { %1404 = vmatpush.bf16.msra.mxu2 %v4942_v46  ;;  %1417 = vmatpush.bf16.msra.mxu3 %v4954_v50 }
 0x30e   :  { %4217 = vmatmul.msk.bf16.vlgmr.msrb.gmra.mxu0 %vm683_vm0, %v1292_v55  ;;  %4218 = vmatmul.msk.bf16.vlgmr.msrb.gmra.mxu1 %vm683_vm0, %v1292_v55 }
 0x30f   :  { %4219 = vmatmul.msk.bf16.vlgmr.msrb.gmra.mxu2 %vm683_vm0, %v1292_v55  ;;  %4220 = vmatmul.msk.bf16.vlgmr.msrb.gmra.mxu3 %vm683_vm0, %v1292_v55  ;;  %v7620_v55 = vld [vmem:[#allocation26_spill] sm:$0xff] }
 0x310   :  { %1379 = vmatpush.bf16.msra.mxu0 %v4972_v56  ;;  %1392 = vmatpush.bf16.msra.mxu1 %v4976_v57 }
 0x311   :  { %1405 = vmatpush.bf16.msra.mxu2 %v4978_v58  ;;  %1418 = vmatpush.bf16.msra.mxu3 %v4990_v62 }
 0x314   :  { %1380 = vmatpush.bf16.msra.mxu0 %v5008_v5  ;;  %1393 = vmatpush.bf16.msra.mxu1 %v5015_v9 }
 0x315   :  { %1406 = vmatpush.bf16.msra.mxu2 %v5017_v10  ;;  %1419 = vmatpush.bf16.msra.mxu3 %v5029_v15 }
 0x318   :  { %1381 = vmatpush.bf16.msra.mxu0 %v5050_v26  ;;  %1394 = vmatpush.bf16.msra.mxu1 %v5058_v28 }
 0x319   :  { %1407 = vmatpush.bf16.msra.mxu2 %v7596_v61  ;;  %1420 = vmatpush.bf16.msra.mxu3 %v7597_v20 }
 0x31c   :  { %1382 = vmatpush.bf16.msra.mxu0 %v7598_v43  ;;  %1395 = vmatpush.bf16.msra.mxu1 %v7599_v19 }
 0x31d   :  { %1408 = vmatpush.bf16.msra.mxu2 %v7600_v59  ;;  %1421 = vmatpush.bf16.msra.mxu3 %v7601_v52 }
 0x31f   :  { %1383 = vmatmul.bf16.vlgmr.msra.gmra.mxu0 %v1239_v13  ;;  %1396 = vmatmul.bf16.vlgmr.msra.gmra.mxu1 %v1239_v13 }
 0x320   :  { %1443 = vmatpush.bf16.msrb.mxu0 %v7602_v11  ;;  %1456 = vmatpush.bf16.msrb.mxu1 %v7603_v60 }
 0x321   :  { %1409 = vmatmul.bf16.vlgmr.msra.gmra.mxu2 %v1239_v13  ;;  %1422 = vmatmul.bf16.vlgmr.msra.gmra.mxu3 %v1239_v13  ;;  %v7614_v13 = vld [vmem:[#allocation20_spill] sm:$0xff] }
 0x322   :  { %1469 = vmatpush.bf16.msrb.mxu2 %v7604_v1  ;;  %1482 = vmatpush.bf16.msrb.mxu3 %v7605_v41 }
 0x324   :  { %1444 = vmatpush.bf16.msrb.mxu0 %v7606_v6  ;;  %1457 = vmatpush.bf16.msrb.mxu1 %v7607_v42 }
 0x326   :  { %1470 = vmatpush.bf16.msrb.mxu2 %v7608_v31  ;;  %1483 = vmatpush.bf16.msrb.mxu3 %v7609_v36 }
 0x328   :  { %1445 = vmatpush.bf16.msrb.mxu0 %v7610_v23  ;;  %1458 = vmatpush.bf16.msrb.mxu1 %v7611_v48  ;;  %v7621_v23 = vld [vmem:[#allocation27_spill] sm:$0xff]  ;;  %v7622_v48 = vld [vmem:[#allocation28_spill] sm:$0xff] }
 0x32a   :  { %1471 = vmatpush.bf16.msrb.mxu2 %v7612_v27  ;;  %1484 = vmatpush.bf16.msrb.mxu3 %v7613_v35  ;;  %v7623_v27 = vld [vmem:[#allocation29_spill] sm:$0xff]  ;;  %v7624_v35 = vld [vmem:[#allocation30_spill] sm:$0xff] }
 0x32c   :  { %1446 = vmatpush.bf16.msrb.mxu0 %v7614_v13  ;;  %1459 = vmatpush.bf16.msrb.mxu1 %v7615_v47  ;;  %v7625_v13 = vld [vmem:[#allocation31_spill] sm:$0xff]  ;;  %v7626_v47 = vld [vmem:[#allocation32_spill] sm:$0xff] }
 0x32e   :  { %1472 = vmatpush.bf16.msrb.mxu2 %v7616_v18  ;;  %1485 = vmatpush.bf16.msrb.mxu3 %v7617_v14  ;;  %v7627_v18 = vld [vmem:[#allocation33_spill] sm:$0xff]  ;;  %v7628_v14 = vld [vmem:[#allocation34_spill] sm:$0xff] }
 0x330   :  { %1447 = vmatpush.bf16.msrb.mxu0 %v7618_v2  ;;  %1460 = vmatpush.bf16.msrb.mxu1 %v7619_v53  ;;  %v7629_v2 = vld [vmem:[#allocation38_spill] sm:$0xff]  ;;  %v7630_v53 = vld [vmem:[#allocation39_spill] sm:$0xff] }
 0x332   :  { %1473 = vmatpush.bf16.msrb.mxu2 %v7620_v55  ;;  %1486 = vmatpush.bf16.msrb.mxu3 %v7621_v23  ;;  %v7631_v55 = vld [vmem:[#allocation40_spill] sm:$0xff]  ;;  %v7632_v23 = vld [vmem:[#allocation43_spill] sm:$0xff] }
 0x334   :  { %1448 = vmatpush.bf16.msrb.mxu0 %v7622_v48  ;;  %1461 = vmatpush.bf16.msrb.mxu1 %v7623_v27  ;;  %v7633_v48 = vld [vmem:[#allocation44_spill] sm:$0xff]  ;;  %v7634_v27 = vld [vmem:[#allocation41_spill] sm:$0xff] }
 0x335   :  { %v1365_v41 = vpop.permute.xlu2 %1364 }
 0x336   :  { %1474 = vmatpush.bf16.msrb.mxu2 %v7624_v35  ;;  %1487 = vmatpush.bf16.msrb.mxu3 %v7625_v13  ;;  %v7635_v35 = vld [vmem:[#allocation42_spill] sm:$0xff]  ;;  %v7636_v13 = vld [vmem:[#allocation45_spill] sm:$0xff]  ;;  %v1369_v61 = vmul.f32 %v1365_v41, %v7539_v51 }
 0x338   :  { %1449 = vmatpush.bf16.msrb.mxu0 %v7626_v47  ;;  %1462 = vmatpush.bf16.msrb.mxu1 %v7627_v18  ;;  %v7637_v47 = vld [vmem:[#allocation46_spill] sm:$0xff]  ;;  %v7638_v18 = vld [vmem:[#allocation47_spill] sm:$0xff] }
 0x33a   :  { %1475 = vmatpush.bf16.msrb.mxu2 %v7628_v14  ;;  %1488 = vmatpush.bf16.msrb.mxu3 %v7629_v2  ;;  %v7639_v14 = vld [vmem:[#allocation48_spill] sm:$0xff]  ;;  %v7640_v2 = vld [vmem:[#allocation50_spill] sm:$0xff] }
 0x33c   :  { %1450 = vmatpush.bf16.msrb.mxu0 %v7630_v53  ;;  %1463 = vmatpush.bf16.msrb.mxu1 %v7631_v55  ;;  %v7641_v53 = vld [vmem:[#allocation51_spill] sm:$0xff]  ;;  %v7642_v55 = vld [vmem:[#allocation52_spill] sm:$0xff] }
 0x33e   :  { %1476 = vmatpush.bf16.msrb.mxu2 %v7634_v27  ;;  %1489 = vmatpush.bf16.msrb.mxu3 %v7635_v35  ;;  %v7645_v27 = vld [vmem:[#allocation57_spill] sm:$0xff]  ;;  %v7646_v35 = vld [vmem:[#allocation58_spill] sm:$0xff] }
 0x340   :  { %1503 = vmatpush.bf16.msra.mxu0 %v7632_v23  ;;  %1516 = vmatpush.bf16.msra.mxu1 %v7633_v48  ;;  %v7643_v23 = vld [vmem:[#allocation53_spill] sm:$0xff]  ;;  %v7644_v48 = vld [vmem:[#allocation54_spill] sm:$0xff] }
 0x342   :  { %1529 = vmatpush.bf16.msra.mxu2 %v7636_v13  ;;  %1542 = vmatpush.bf16.msra.mxu3 %v7637_v47  ;;  %v7647_v13 = vld [vmem:[#allocation59_spill] sm:$0xff]  ;;  %v7648_v47 = vld [vmem:[#allocation60_spill] sm:$0xff] }
 0x344   :  { %1504 = vmatpush.bf16.msra.mxu0 %v7638_v18  ;;  %1517 = vmatpush.bf16.msra.mxu1 %v7639_v14  ;;  %v7649_v18 = vld [vmem:[#allocation61_spill] sm:$0xff] }
 0x346   :  { %1530 = vmatpush.bf16.msra.mxu2 %v7640_v2  ;;  %1543 = vmatpush.bf16.msra.mxu3 %v7641_v53 }
 0x348   :  { %1505 = vmatpush.bf16.msra.mxu0 %v7642_v55  ;;  %1518 = vmatpush.bf16.msra.mxu1 %v7643_v23 }
 0x34a   :  { %1531 = vmatpush.bf16.msra.mxu2 %v7644_v48  ;;  %1544 = vmatpush.bf16.msra.mxu3 %v7645_v27 }
 0x34c   :  { %1506 = vmatpush.bf16.msra.mxu0 %v7646_v35  ;;  %1519 = vmatpush.bf16.msra.mxu1 %v7647_v13  ;;  %v7650_v13 = vld [vmem:[#allocation35_spill] sm:$0xff] }
 0x34d   :  { %v1367_v11 = vmul.f32 %v1365_v41, %v7650_v13 }
 0x34e   :  { %1532 = vmatpush.bf16.msra.mxu2 %v7648_v47  ;;  %1545 = vmatpush.bf16.msra.mxu3 %v7649_v18  ;;  %v7651_v47 = vld [vmem:[#allocation37_spill] sm:$0xff] }
 0x34f   :  { %v1368_v52 = vmul.f32 %v1365_v41, %v7651_v47  ;;  %v1371_v18 = vadd.f32 %v1367_v11, %v7537_v49 }
 0x351   :  { %v1372_v59 = vadd.f32 %v1368_v52, %v7595_v63  ;;  %v1373_v52 = vadd.f32 %v1369_v61, %v7485_v37 }
 0x37b   :  { %v1249_v14 = vpop.f32.mrf.mxu0  ;;  %v1262_v2 = vpop.f32.mrf.mxu1 }
 0x37c   :  { %v1250_v20 = vadd.f32 %v1249_v14, %v5685_v40 }
 0x382   :  { %v1275_v36 = vpop.f32.mrf.mxu2  ;;  %v1288_v53 = vpop.f32.mrf.mxu3 }
 0x383   :  { %v1251_v31 = vpop.f32.mrf.mxu0  ;;  %v1264_v55 = vpop.f32.mrf.mxu1 }
 0x38a   :  { %v1277_v42 = vpop.f32.mrf.mxu2  ;;  %v1290_v23 = vpop.f32.mrf.mxu3 }
 0x38b   :  { %v1305_v6 = vpop.f32.mrf.mxu0  ;;  %v1318_v48 = vpop.f32.mrf.mxu1 }
 0x38c   :  { %v1306_v47 = vadd.f32 %v1305_v6, %v1250_v20 }
 0x392   :  { %v1331_v27 = vpop.f32.mrf.mxu2  ;;  %v1344_v1 = vpop.f32.mrf.mxu3 }
 0x393   :  { %v1307_v35 = vpop.f32.mrf.mxu0  ;;  %v1320_v60 = vpop.f32.mrf.mxu1 }
 0x394   :  { %v1263_v60 = vadd.f32 %v1262_v2, %v5687_v22  ;;  %v1370_v35 = vmul.f32 %v1365_v41, %v7484_v24  ;;  %v1276_v2 = vadd.f32 %v1275_v36, %v5693_v39 }
 0x396   :  { %v1319_v13 = vadd.f32 %v1318_v48, %v1263_v60  ;;  %v1374_v11 = vadd.f32 %v1370_v35, %v7540_v4  ;;  %v1332_v6 = vadd.f32 %v1331_v27, %v1276_v2  ;;  %v1289_v27 = vadd.f32 %v1288_v53, %v5698_v54 }
 0x398   :  { %v1345_v2 = vadd.f32 %v1344_v1, %v1289_v27  ;;  %v4736_v1 = vmov 5   ;;  %v7659_v27 = vld [vmem:[#allocation9_spill] sm:$0xff] }
 0x399   :  { %4392 = vset.pattern.permute.xlu2 %v4736_v1  ;;  %v7673_v1 = vld [vmem:[#allocation23_spill] sm:$0xff] }
 0x39a   :  { %v1333_v19 = vpop.f32.mrf.mxu2  ;;  %v1346_v31 = vpop.f32.mrf.mxu3  ;;  %1567 = vperm.xlu2 %4392, %v5822_v0  }
 0x39c   :  { %v1384_v55 = vpop.f32.mrf.mxu0  ;;  %v1397_v42 = vpop.f32.mrf.mxu1 }
 0x39d   :  { %v1385_v23 = vadd.f32 %v1384_v55, %v1371_v18  ;;  %v1398_v43 = vadd.f32 %v1397_v42, %v1372_v59 }
 0x39f   :  { %4476 = vtanh.f32 %v1385_v23 }
 0x3a0   :  { %4478 = vtanh.f32 %v1398_v43 }
 0x3a1   :  { %4480 = vtanh.f32 %v1306_v47 }
 0x3a2   :  { %4482 = vtanh.f32 %v1319_v13 }
 0x3a4   :  { %v1410_v19 = vpop.f32.mrf.mxu2  ;;  %v1423_v31 = vpop.f32.mrf.mxu3 }
 0x3a5   :  { %v1411_v59 = vadd.f32 %v1410_v19, %v1373_v52  ;;  %v1386_v18 = vpop.f32.mrf.mxu0  ;;  %v1399_v14 = vpop.f32.mrf.mxu1  ;;  %v1424_v42 = vadd.f32 %v1423_v31, %v1374_v11 }
 0x3a6   :  { %v4477_v55 = vpop.eup %4476 }
 0x3a7   :  { %4484 = vtanh.f32 %v1411_v59  ;;  %v4479_v41 = vpop.eup %4478  ;;  %v1428_v20 = vmul.f32 0.5, %v4477_v55 }
 0x3a8   :  { %v1431_v43 = vmul.f32 0.5, %v4479_v41  ;;  %4486 = vtanh.f32 %v1424_v42  ;;  %v4481_v61 = vpop.eup %4480 }
 0x3a9   :  { %v4483_v23 = vpop.eup %4482  ;;  %v1429_v60 = vadd.f32 0.5, %v1428_v20  ;;  %4488 = vtanh.f32 %v1332_v6  ;;  %v1349_v31 = vmul.f32 0.5, %v4481_v61 }
 0x3aa   :  { %v1432_v48 = vadd.f32 0.5, %v1431_v43  ;;  %v1352_v36 = vmul.f32 0.5, %v4483_v23 }
 0x3ab   :  { %v1350_v55 = vadd.f32 0.5, %v1349_v31  ;;  %v7657_v31 = vld [vmem:[#allocation7_spill] sm:$0xff] }
 0x3ac   :  { %v1412_v35 = vpop.f32.mrf.mxu2  ;;  %v1425_v47 = vpop.f32.mrf.mxu3  ;;  %v1437_v19 = vmul.f32 %v1432_v48, %v5917_v32  ;;  %v1353_v42 = vadd.f32 0.5, %v1352_v36  ;;  %v7658_v36 = vld [vmem:[#allocation8_spill] sm:$0xff] }
 0x3ad   :  { %v4485_v52 = vpop.eup %4484  ;;  %v7652_v47 = vld [vmem:[#allocation2_spill] sm:$0xff] }
 0x3ae   :  { %v1438_v13 = vmul.f32 %v4485_v52, %v1429_v60  ;;  %v4487_v11 = vpop.eup %4486  ;;  %v1358_v32 = vmul.f32 %v1353_v42, %v5922_v30  ;;  %v7653_v52 = vld [vmem:[#allocation3_spill] sm:$0xff]  ;;  %v7663_v42 = vld [vmem:[#allocation13_spill] sm:$0xff] }
 0x3af   :  { %v4489_v18 = vpop.eup %4488  ;;  %v1435_v14 = vmul.f32 0.5, %v4487_v11  ;;  %v7656_v11 = vld [vmem:[#allocation6_spill] sm:$0xff] }
 0x3b0   :  { %v6022_v59 = vadd.f32 %v1438_v13, %v1437_v19  ;;  %v1359_v41 = vmul.f32 %v4489_v18, %v1350_v55  ;;  %v7654_v19 = vld [vmem:[#allocation4_spill] sm:$0xff]  ;;  %v7655_v13 = vld [vmem:[#allocation5_spill] sm:$0xff]  ;;  %v7660_v18 = vld [vmem:[#allocation10_spill] sm:$0xff] }
 0x3b1   :  { %v1436_v20 = vadd.f32 0.5, %v1435_v14  ;;  %v7661_v14 = vld [vmem:[#allocation11_spill] sm:$0xff]  ;;  %v7662_v55 = vld [vmem:[#allocation12_spill] sm:$0xff] }
 0x3b2   :  { %4490 = vtanh.f32 %v6022_v59  ;;  %v6027_v61 = vadd.f32 %v1359_v41, %v1358_v32  ;;  %v7665_v41 = vld [vmem:[#allocation15_spill] sm:$0xff]  ;;  %v7668_v32 = vld [vmem:[#allocation18_spill] sm:$0xff] }
 0x3b3   :  { %4492 = vtanh.f32 %v1345_v2  ;;  %v7664_v2 = vld [vmem:[#allocation14_spill] sm:$0xff] }
 0x3b4   :  { %4494 = vtanh.f32 %v6027_v61 }
 0x3b8   :  { %v4491_v6 = vpop.eup %4490 }
 0x3b9   :  { %v1441_v43 = vmul.f32 %v4491_v6, %v1436_v20  ;;  %v4493_v53 = vpop.eup %4492  ;;  %v7666_v20 = vld [vmem:[#allocation16_spill] sm:$0xff]  ;;  %v7667_v6 = vld [vmem:[#allocation17_spill] sm:$0xff] }
 0x3ba   :  { %v1356_v30 = vmul.f32 0.5, %v4493_v53  ;;  %v4495_v23 = vpop.eup %4494  ;;  %v7671_v53 = vld [vmem:[#allocation21_spill] sm:$0xff] }
 0x3bb   :  { %v1442_v48 = vpack.c.bf16 %v1441_v43, %v1441_v43  ;;  %v7669_v43 = vld [vmem:[#allocation19_spill] sm:$0xff] }
 0x3bc   :  { %v1357_v60 = vadd.f32 0.5, %v1356_v30  ;;  %v7672_v30 = vld [vmem:[#allocation22_spill] sm:$0xff] }
 0x3bd   :  { %1451 = vmatmul.bf16.vlgmr.msrb.gmra.mxu0 %v1442_v48  ;;  %1464 = vmatmul.bf16.vlgmr.msrb.gmra.mxu1 %v1442_v48 }
 0x3be   :  { %1477 = vmatmul.bf16.vlgmr.msrb.gmra.mxu2 %v1442_v48  ;;  %1490 = vmatmul.bf16.vlgmr.msrb.gmra.mxu3 %v1442_v48  ;;  %v1362_v35 = vmul.f32 %v4495_v23, %v1357_v60  ;;  %v7674_v23 = vld [vmem:[#allocation24_spill] sm:$0xff]  ;;  %v7675_v60 = vld [vmem:[#allocation25_spill] sm:$0xff] }
 0x3bf   :  { %1578 = vmatpush.bf16.msrb.mxu0 %v4816_v3  ;;  %1591 = vmatpush.bf16.msrb.mxu1 %v4827_v7 }
 0x3c0   :  { %1604 = vmatpush.bf16.msrb.mxu2 %v4829_v8  ;;  %1617 = vmatpush.bf16.msrb.mxu3 %v4841_v12  ;;  %v1495_v0 = vpack.c.bf16 %v1362_v35, %v1362_v35  ;;  %v7676_v35 = vld [vmem:[#allocation26_spill] sm:$0xff] }
 0x3c3   :  { %1579 = vmatpush.bf16.msrb.mxu0 %v4854_v16  ;;  %1592 = vmatpush.bf16.msrb.mxu1 %v4856_v17 }
 0x3c4   :  { %1605 = vmatpush.bf16.msrb.mxu2 %v4868_v21  ;;  %1618 = vmatpush.bf16.msrb.mxu3 %v4879_v25 }
 0x3c7   :  { %1580 = vmatpush.bf16.msrb.mxu0 %v4891_v29  ;;  %1593 = vmatpush.bf16.msrb.mxu1 %v4904_v33 }
 0x3c8   :  { %1606 = vmatpush.bf16.msrb.mxu2 %v4906_v34  ;;  %1619 = vmatpush.bf16.msrb.mxu3 %v4918_v38 }
 0x3cb   :  { %1581 = vmatpush.bf16.msrb.mxu0 %v4936_v44  ;;  %1594 = vmatpush.bf16.msrb.mxu1 %v4940_v45 }
 0x3cc   :  { %1607 = vmatpush.bf16.msrb.mxu2 %v4942_v46  ;;  %1620 = vmatpush.bf16.msrb.mxu3 %v4954_v50 }
 0x3cd   :  { %4221 = vmatmul.msk.bf16.vlgmr.msra.gmra.mxu0 %vm683_vm0, %v1495_v0  ;;  %4222 = vmatmul.msk.bf16.vlgmr.msra.gmra.mxu1 %vm683_vm0, %v1495_v0 }
 0x3ce   :  { %4223 = vmatmul.msk.bf16.vlgmr.msra.gmra.mxu2 %vm683_vm0, %v1495_v0  ;;  %4224 = vmatmul.msk.bf16.vlgmr.msra.gmra.mxu3 %vm683_vm0, %v1495_v0  ;;  %v7677_v0 = vld [vmem:[#allocation27_spill] sm:$0xff] }
 0x3cf   :  { %1582 = vmatpush.bf16.msrb.mxu0 %v4972_v56  ;;  %1595 = vmatpush.bf16.msrb.mxu1 %v4976_v57 }
 0x3d0   :  { %1608 = vmatpush.bf16.msrb.mxu2 %v4978_v58  ;;  %1621 = vmatpush.bf16.msrb.mxu3 %v4990_v62 }
 0x3d3   :  { %1583 = vmatpush.bf16.msrb.mxu0 %v5008_v5  ;;  %1596 = vmatpush.bf16.msrb.mxu1 %v5015_v9 }
 0x3d4   :  { %1609 = vmatpush.bf16.msrb.mxu2 %v5017_v10  ;;  %1622 = vmatpush.bf16.msrb.mxu3 %v5029_v15 }
 0x3d7   :  { %1584 = vmatpush.bf16.msrb.mxu0 %v5050_v26  ;;  %1597 = vmatpush.bf16.msrb.mxu1 %v5058_v28 }
 0x3d8   :  { %1610 = vmatpush.bf16.msrb.mxu2 %v7652_v47  ;;  %1623 = vmatpush.bf16.msrb.mxu3 %v7653_v52 }
 0x3db   :  { %1585 = vmatpush.bf16.msrb.mxu0 %v7654_v19  ;;  %1598 = vmatpush.bf16.msrb.mxu1 %v7655_v13 }
 0x3dc   :  { %1611 = vmatpush.bf16.msrb.mxu2 %v7656_v11  ;;  %1624 = vmatpush.bf16.msrb.mxu3 %v7657_v31 }
 0x3de   :  { %1586 = vmatmul.bf16.vlgmr.msrb.gmra.mxu0 %v1442_v48  ;;  %1599 = vmatmul.bf16.vlgmr.msrb.gmra.mxu1 %v1442_v48 }
 0x3df   :  { %1646 = vmatpush.bf16.msra.mxu0 %v7658_v36  ;;  %1659 = vmatpush.bf16.msra.mxu1 %v7659_v27 }
 0x3e0   :  { %1612 = vmatmul.bf16.vlgmr.msrb.gmra.mxu2 %v1442_v48  ;;  %1625 = vmatmul.bf16.vlgmr.msrb.gmra.mxu3 %v1442_v48  ;;  %v7670_v48 = vld [vmem:[#allocation20_spill] sm:$0xff] }
 0x3e1   :  { %1672 = vmatpush.bf16.msra.mxu2 %v7660_v18  ;;  %1685 = vmatpush.bf16.msra.mxu3 %v7661_v14 }
 0x3e3   :  { %1647 = vmatpush.bf16.msra.mxu0 %v7662_v55  ;;  %1660 = vmatpush.bf16.msra.mxu1 %v7663_v42 }
 0x3e5   :  { %1673 = vmatpush.bf16.msra.mxu2 %v7664_v2  ;;  %1686 = vmatpush.bf16.msra.mxu3 %v7665_v41 }
 0x3e7   :  { %1648 = vmatpush.bf16.msra.mxu0 %v7666_v20  ;;  %1661 = vmatpush.bf16.msra.mxu1 %v7667_v6  ;;  %v7678_v6 = vld [vmem:[#allocation28_spill] sm:$0xff] }
 0x3e9   :  { %1674 = vmatpush.bf16.msra.mxu2 %v7668_v32  ;;  %1687 = vmatpush.bf16.msra.mxu3 %v7669_v43  ;;  %v7679_v32 = vld [vmem:[#allocation29_spill] sm:$0xff]  ;;  %v7680_v43 = vld [vmem:[#allocation30_spill] sm:$0xff] }
 0x3eb   :  { %1649 = vmatpush.bf16.msra.mxu0 %v7670_v48  ;;  %1662 = vmatpush.bf16.msra.mxu1 %v7671_v53  ;;  %v7681_v48 = vld [vmem:[#allocation31_spill] sm:$0xff]  ;;  %v7682_v53 = vld [vmem:[#allocation32_spill] sm:$0xff] }
 0x3ed   :  { %1675 = vmatpush.bf16.msra.mxu2 %v7672_v30  ;;  %1688 = vmatpush.bf16.msra.mxu3 %v7673_v1  ;;  %v7683_v30 = vld [vmem:[#allocation33_spill] sm:$0xff]  ;;  %v7684_v1 = vld [vmem:[#allocation34_spill] sm:$0xff] }
 0x3ef   :  { %1650 = vmatpush.bf16.msra.mxu0 %v7674_v23  ;;  %1663 = vmatpush.bf16.msra.mxu1 %v7675_v60  ;;  %v7685_v23 = vld [vmem:[#allocation38_spill] sm:$0xff]  ;;  %v7686_v60 = vld [vmem:[#allocation39_spill] sm:$0xff] }
 0x3f1   :  { %1676 = vmatpush.bf16.msra.mxu2 %v7676_v35  ;;  %1689 = vmatpush.bf16.msra.mxu3 %v7677_v0  ;;  %v7687_v35 = vld [vmem:[#allocation40_spill] sm:$0xff]  ;;  %v7688_v0 = vld [vmem:[#allocation43_spill] sm:$0xff] }
 0x3f3   :  { %1651 = vmatpush.bf16.msra.mxu0 %v7678_v6  ;;  %1664 = vmatpush.bf16.msra.mxu1 %v7679_v32  ;;  %v7689_v6 = vld [vmem:[#allocation44_spill] sm:$0xff]  ;;  %v7690_v32 = vld [vmem:[#allocation41_spill] sm:$0xff] }
 0x3f4   :  { %v1568_v55 = vpop.permute.xlu2 %1567 }
 0x3f5   :  { %1677 = vmatpush.bf16.msra.mxu2 %v7680_v43  ;;  %1690 = vmatpush.bf16.msra.mxu3 %v7681_v48  ;;  %v7691_v43 = vld [vmem:[#allocation42_spill] sm:$0xff]  ;;  %v7692_v48 = vld [vmem:[#allocation45_spill] sm:$0xff]  ;;  %v1572_v52 = vmul.f32 %v1568_v55, %v7539_v51 }
 0x3f7   :  { %1652 = vmatpush.bf16.msra.mxu0 %v7682_v53  ;;  %1665 = vmatpush.bf16.msra.mxu1 %v7683_v30  ;;  %v7693_v53 = vld [vmem:[#allocation46_spill] sm:$0xff]  ;;  %v7694_v30 = vld [vmem:[#allocation47_spill] sm:$0xff] }
 0x3f9   :  { %1678 = vmatpush.bf16.msra.mxu2 %v7684_v1  ;;  %1691 = vmatpush.bf16.msra.mxu3 %v7685_v23  ;;  %v7695_v1 = vld [vmem:[#allocation48_spill] sm:$0xff]  ;;  %v7696_v23 = vld [vmem:[#allocation50_spill] sm:$0xff] }
 0x3fb   :  { %1653 = vmatpush.bf16.msra.mxu0 %v7686_v60  ;;  %1666 = vmatpush.bf16.msra.mxu1 %v7687_v35  ;;  %v7697_v60 = vld [vmem:[#allocation51_spill] sm:$0xff]  ;;  %v7698_v35 = vld [vmem:[#allocation52_spill] sm:$0xff] }
 0x3fd   :  { %1679 = vmatpush.bf16.msra.mxu2 %v7690_v32  ;;  %1692 = vmatpush.bf16.msra.mxu3 %v7691_v43  ;;  %v7701_v32 = vld [vmem:[#allocation57_spill] sm:$0xff]  ;;  %v7702_v43 = vld [vmem:[#allocation58_spill] sm:$0xff] }
 0x3ff   :  { %1706 = vmatpush.bf16.msrb.mxu0 %v7688_v0  ;;  %1719 = vmatpush.bf16.msrb.mxu1 %v7689_v6  ;;  %v7699_v0 = vld [vmem:[#allocation53_spill] sm:$0xff]  ;;  %v7700_v6 = vld [vmem:[#allocation54_spill] sm:$0xff] }
 0x401   :  { %1732 = vmatpush.bf16.msrb.mxu2 %v7692_v48  ;;  %1745 = vmatpush.bf16.msrb.mxu3 %v7693_v53  ;;  %v7703_v48 = vld [vmem:[#allocation59_spill] sm:$0xff]  ;;  %v7704_v53 = vld [vmem:[#allocation60_spill] sm:$0xff] }
 0x403   :  { %1707 = vmatpush.bf16.msrb.mxu0 %v7694_v30  ;;  %1720 = vmatpush.bf16.msrb.mxu1 %v7695_v1  ;;  %v7705_v30 = vld [vmem:[#allocation61_spill] sm:$0xff] }
 0x405   :  { %1733 = vmatpush.bf16.msrb.mxu2 %v7696_v23  ;;  %1746 = vmatpush.bf16.msrb.mxu3 %v7697_v60 }
 0x407   :  { %1708 = vmatpush.bf16.msrb.mxu0 %v7698_v35  ;;  %1721 = vmatpush.bf16.msrb.mxu1 %v7699_v0 }
 0x409   :  { %1734 = vmatpush.bf16.msrb.mxu2 %v7700_v6  ;;  %1747 = vmatpush.bf16.msrb.mxu3 %v7701_v32 }
 0x40b   :  { %1709 = vmatpush.bf16.msrb.mxu0 %v7702_v43  ;;  %1722 = vmatpush.bf16.msrb.mxu1 %v7703_v48  ;;  %v7706_v48 = vld [vmem:[#allocation35_spill] sm:$0xff] }
 0x40c   :  { %v1570_v27 = vmul.f32 %v1568_v55, %v7706_v48 }
 0x40d   :  { %1735 = vmatpush.bf16.msrb.mxu2 %v7704_v53  ;;  %1748 = vmatpush.bf16.msrb.mxu3 %v7705_v30  ;;  %v7707_v53 = vld [vmem:[#allocation37_spill] sm:$0xff] }
 0x40e   :  { %v1571_v36 = vmul.f32 %v1568_v55, %v7707_v53  ;;  %v1574_v30 = vadd.f32 %v1570_v27, %v7537_v49 }
 0x410   :  { %v1575_v31 = vadd.f32 %v1571_v36, %v7595_v63  ;;  %v1576_v36 = vadd.f32 %v1572_v52, %v7485_v37 }
 0x43a   :  { %v1452_v1 = vpop.f32.mrf.mxu0  ;;  %v1465_v23 = vpop.f32.mrf.mxu1 }
 0x43b   :  { %v1453_v19 = vadd.f32 %v1452_v1, %v5685_v40 }
 0x441   :  { %v1478_v20 = vpop.f32.mrf.mxu2  ;;  %v1491_v60 = vpop.f32.mrf.mxu3 }
 0x442   :  { %v1454_v41 = vpop.f32.mrf.mxu0  ;;  %v1467_v35 = vpop.f32.mrf.mxu1 }
 0x449   :  { %v1480_v2 = vpop.f32.mrf.mxu2  ;;  %v1493_v0 = vpop.f32.mrf.mxu3 }
 0x44a   :  { %v1508_v42 = vpop.f32.mrf.mxu0  ;;  %v1521_v6 = vpop.f32.mrf.mxu1 }
 0x44b   :  { %v1509_v53 = vadd.f32 %v1508_v42, %v1453_v19 }
 0x451   :  { %v1534_v32 = vpop.f32.mrf.mxu2  ;;  %v1547_v14 = vpop.f32.mrf.mxu3 }
 0x452   :  { %v1510_v43 = vpop.f32.mrf.mxu0  ;;  %v1523_v18 = vpop.f32.mrf.mxu1 }
 0x453   :  { %v1466_v18 = vadd.f32 %v1465_v23, %v5687_v22  ;;  %v1573_v43 = vmul.f32 %v1568_v55, %v7484_v24  ;;  %v1479_v23 = vadd.f32 %v1478_v20, %v5693_v39 }
 0x455   :  { %v1522_v48 = vadd.f32 %v1521_v6, %v1466_v18  ;;  %v1577_v27 = vadd.f32 %v1573_v43, %v7540_v4  ;;  %v1535_v42 = vadd.f32 %v1534_v32, %v1479_v23  ;;  %v1492_v32 = vadd.f32 %v1491_v60, %v5698_v54 }
 0x457   :  { %v1548_v23 = vadd.f32 %v1547_v14, %v1492_v32  ;;  %v4737_v14 = vmov 6   ;;  %v7713_v32 = vld [vmem:[#allocation8_spill] sm:$0xff] }
 0x458   :  { %4393 = vset.pattern.permute.xlu1 %v4737_v14  ;;  %v7727_v14 = vld [vmem:[#allocation22_spill] sm:$0xff] }
 0x459   :  { %v1536_v11 = vpop.f32.mrf.mxu2  ;;  %v1549_v41 = vpop.f32.mrf.mxu3 }
 0x45b   :  { %v1587_v35 = vpop.f32.mrf.mxu0  ;;  %v1600_v2 = vpop.f32.mrf.mxu1 }
 0x45c   :  { %v1588_v0 = vadd.f32 %v1587_v35, %v1574_v30  ;;  %v1601_v13 = vadd.f32 %v1600_v2, %v1575_v31 }
 0x45e   :  { %4496 = vtanh.f32 %v1588_v0 }
 0x45f   :  { %4498 = vtanh.f32 %v1601_v13 }
 0x460   :  { %4500 = vtanh.f32 %v1509_v53 }
 0x461   :  { %4502 = vtanh.f32 %v1522_v48 }
 0x463   :  { %v1613_v11 = vpop.f32.mrf.mxu2  ;;  %v1626_v41 = vpop.f32.mrf.mxu3 }
 0x464   :  { %v1614_v31 = vadd.f32 %v1613_v11, %v1576_v36  ;;  %v1589_v30 = vpop.f32.mrf.mxu0  ;;  %v1602_v1 = vpop.f32.mrf.mxu1  ;;  %v1627_v2 = vadd.f32 %v1626_v41, %v1577_v27 }
 0x465   :  { %v4497_v35 = vpop.eup %4496 }
 0x466   :  { %4504 = vtanh.f32 %v1614_v31  ;;  %v4499_v55 = vpop.eup %4498  ;;  %v1631_v19 = vmul.f32 0.5, %v4497_v35 }
 0x467   :  { %v1634_v13 = vmul.f32 0.5, %v4499_v55  ;;  %4506 = vtanh.f32 %v1627_v2  ;;  %v4501_v52 = vpop.eup %4500 }
 0x468   :  { %v4503_v0 = vpop.eup %4502  ;;  %v1632_v18 = vadd.f32 0.5, %v1631_v19  ;;  %4508 = vtanh.f32 %v1535_v42  ;;  %v1552_v41 = vmul.f32 0.5, %v4501_v52 }
 0x469   :  { %v1635_v6 = vadd.f32 0.5, %v1634_v13  ;;  %v1555_v20 = vmul.f32 0.5, %v4503_v0  ;;  %v6142_v0 = vld [vmem:[%s7237_s0] sm:$0xff] }
 0x46a   :  { %v1553_v35 = vadd.f32 0.5, %v1552_v41  ;;  %1770 = vperm.xlu1 %4393, %v6142_v0   ;;  %v7711_v41 = vld [vmem:[#allocation6_spill] sm:$0xff] }
 0x46b   :  { %v1615_v43 = vpop.f32.mrf.mxu2  ;;  %v1628_v53 = vpop.f32.mrf.mxu3  ;;  %v1640_v11 = vmul.f32 %v1635_v6, %v6022_v59  ;;  %v1556_v2 = vadd.f32 0.5, %v1555_v20  ;;  %v7712_v20 = vld [vmem:[#allocation7_spill] sm:$0xff] }
 0x46c   :  { %v4505_v36 = vpop.eup %4504 }
 0x46d   :  { %v1641_v48 = vmul.f32 %v4505_v36, %v1632_v18  ;;  %v4507_v27 = vpop.eup %4506  ;;  %v1561_v59 = vmul.f32 %v1556_v2, %v6027_v61  ;;  %v7717_v2 = vld [vmem:[#allocation12_spill] sm:$0xff] }
 0x46e   :  { %v4509_v30 = vpop.eup %4508  ;;  %v1638_v1 = vmul.f32 0.5, %v4507_v27  ;;  %v7710_v27 = vld [vmem:[#allocation5_spill] sm:$0xff] }
 0x46f   :  { %v6127_v31 = vadd.f32 %v1641_v48, %v1640_v11  ;;  %v1562_v55 = vmul.f32 %v4509_v30, %v1553_v35  ;;  %v7708_v11 = vld [vmem:[#allocation3_spill] sm:$0xff]  ;;  %v7709_v48 = vld [vmem:[#allocation4_spill] sm:$0xff]  ;;  %v7714_v30 = vld [vmem:[#allocation9_spill] sm:$0xff] }
 0x470   :  { %v1639_v19 = vadd.f32 0.5, %v1638_v1  ;;  %v7715_v1 = vld [vmem:[#allocation10_spill] sm:$0xff]  ;;  %v7716_v35 = vld [vmem:[#allocation11_spill] sm:$0xff] }
 0x471   :  { %4510 = vtanh.f32 %v6127_v31  ;;  %v6132_v52 = vadd.f32 %v1562_v55, %v1561_v59  ;;  %v7719_v55 = vld [vmem:[#allocation14_spill] sm:$0xff]  ;;  %v7722_v59 = vld [vmem:[#allocation17_spill] sm:$0xff] }
 0x472   :  { %4512 = vtanh.f32 %v1548_v23  ;;  %v7718_v23 = vld [vmem:[#allocation13_spill] sm:$0xff] }
 0x473   :  { %4514 = vtanh.f32 %v6132_v52 }
 0x477   :  { %v4511_v42 = vpop.eup %4510 }
 0x478   :  { %v1644_v13 = vmul.f32 %v4511_v42, %v1639_v19  ;;  %v4513_v60 = vpop.eup %4512  ;;  %v7720_v19 = vld [vmem:[#allocation15_spill] sm:$0xff]  ;;  %v7721_v42 = vld [vmem:[#allocation16_spill] sm:$0xff] }
 0x479   :  { %v1559_v61 = vmul.f32 0.5, %v4513_v60  ;;  %v4515_v18 = vpop.eup %4514  ;;  %v7724_v60 = vld [vmem:[#allocation19_spill] sm:$0xff] }
 0x47a   :  { %v1645_v6 = vpack.c.bf16 %v1644_v13, %v1644_v13  ;;  %v7723_v13 = vld [vmem:[#allocation18_spill] sm:$0xff] }
 0x47b   :  { %v1560_v43 = vadd.f32 0.5, %v1559_v61  ;;  %v7726_v61 = vld [vmem:[#allocation21_spill] sm:$0xff] }
 0x47c   :  { %1654 = vmatmul.bf16.vlgmr.msra.gmra.mxu0 %v1645_v6  ;;  %1667 = vmatmul.bf16.vlgmr.msra.gmra.mxu1 %v1645_v6 }
 0x47d   :  { %1680 = vmatmul.bf16.vlgmr.msra.gmra.mxu2 %v1645_v6  ;;  %1693 = vmatmul.bf16.vlgmr.msra.gmra.mxu3 %v1645_v6  ;;  %v1565_v53 = vmul.f32 %v4515_v18, %v1560_v43  ;;  %v7728_v18 = vld [vmem:[#allocation23_spill] sm:$0xff]  ;;  %v7729_v43 = vld [vmem:[#allocation24_spill] sm:$0xff] }
 0x47e   :  { %1781 = vmatpush.bf16.msra.mxu0 %v4816_v3  ;;  %1794 = vmatpush.bf16.msra.mxu1 %v4827_v7 }
 0x47f   :  { %1807 = vmatpush.bf16.msra.mxu2 %v4829_v8  ;;  %1820 = vmatpush.bf16.msra.mxu3 %v4841_v12  ;;  %v1698_v36 = vpack.c.bf16 %v1565_v53, %v1565_v53  ;;  %v7730_v53 = vld [vmem:[#allocation25_spill] sm:$0xff] }
 0x482   :  { %1782 = vmatpush.bf16.msra.mxu0 %v4854_v16  ;;  %1795 = vmatpush.bf16.msra.mxu1 %v4856_v17 }
 0x483   :  { %1808 = vmatpush.bf16.msra.mxu2 %v4868_v21  ;;  %1821 = vmatpush.bf16.msra.mxu3 %v4879_v25 }
 0x486   :  { %1783 = vmatpush.bf16.msra.mxu0 %v4891_v29  ;;  %1796 = vmatpush.bf16.msra.mxu1 %v4904_v33 }
 0x487   :  { %1809 = vmatpush.bf16.msra.mxu2 %v4906_v34  ;;  %1822 = vmatpush.bf16.msra.mxu3 %v4918_v38 }
 0x48a   :  { %1784 = vmatpush.bf16.msra.mxu0 %v4936_v44  ;;  %1797 = vmatpush.bf16.msra.mxu1 %v4940_v45 }
 0x48b   :  { %1810 = vmatpush.bf16.msra.mxu2 %v4942_v46  ;;  %1823 = vmatpush.bf16.msra.mxu3 %v4954_v50 }
 0x48c   :  { %4225 = vmatmul.msk.bf16.vlgmr.msrb.gmra.mxu0 %vm683_vm0, %v1698_v36  ;;  %4226 = vmatmul.msk.bf16.vlgmr.msrb.gmra.mxu1 %vm683_vm0, %v1698_v36 }
 0x48d   :  { %4227 = vmatmul.msk.bf16.vlgmr.msrb.gmra.mxu2 %vm683_vm0, %v1698_v36  ;;  %4228 = vmatmul.msk.bf16.vlgmr.msrb.gmra.mxu3 %vm683_vm0, %v1698_v36  ;;  %v7731_v36 = vld [vmem:[#allocation26_spill] sm:$0xff] }
 0x48e   :  { %1785 = vmatpush.bf16.msra.mxu0 %v4972_v56  ;;  %1798 = vmatpush.bf16.msra.mxu1 %v4976_v57 }
 0x48f   :  { %1811 = vmatpush.bf16.msra.mxu2 %v4978_v58  ;;  %1824 = vmatpush.bf16.msra.mxu3 %v4990_v62 }
 0x492   :  { %1786 = vmatpush.bf16.msra.mxu0 %v5008_v5  ;;  %1799 = vmatpush.bf16.msra.mxu1 %v5015_v9 }
 0x493   :  { %1812 = vmatpush.bf16.msra.mxu2 %v5017_v10  ;;  %1825 = vmatpush.bf16.msra.mxu3 %v5029_v15 }
 0x496   :  { %1787 = vmatpush.bf16.msra.mxu0 %v5050_v26  ;;  %1800 = vmatpush.bf16.msra.mxu1 %v5058_v28 }
 0x497   :  { %1813 = vmatpush.bf16.msra.mxu2 %v7652_v47  ;;  %1826 = vmatpush.bf16.msra.mxu3 %v7708_v11 }
 0x49a   :  { %1788 = vmatpush.bf16.msra.mxu0 %v7709_v48  ;;  %1801 = vmatpush.bf16.msra.mxu1 %v7710_v27 }
 0x49b   :  { %1814 = vmatpush.bf16.msra.mxu2 %v7711_v41  ;;  %1827 = vmatpush.bf16.msra.mxu3 %v7712_v20 }
 0x49d   :  { %1789 = vmatmul.bf16.vlgmr.msra.gmra.mxu0 %v1645_v6  ;;  %1802 = vmatmul.bf16.vlgmr.msra.gmra.mxu1 %v1645_v6 }
 0x49e   :  { %1849 = vmatpush.bf16.msrb.mxu0 %v7713_v32  ;;  %1862 = vmatpush.bf16.msrb.mxu1 %v7714_v30 }
 0x49f   :  { %1815 = vmatmul.bf16.vlgmr.msra.gmra.mxu2 %v1645_v6  ;;  %1828 = vmatmul.bf16.vlgmr.msra.gmra.mxu3 %v1645_v6  ;;  %v7725_v6 = vld [vmem:[#allocation20_spill] sm:$0xff] }
 0x4a0   :  { %1875 = vmatpush.bf16.msrb.mxu2 %v7715_v1  ;;  %1888 = vmatpush.bf16.msrb.mxu3 %v7716_v35 }
 0x4a2   :  { %1850 = vmatpush.bf16.msrb.mxu0 %v7717_v2  ;;  %1863 = vmatpush.bf16.msrb.mxu1 %v7718_v23 }
 0x4a4   :  { %1876 = vmatpush.bf16.msrb.mxu2 %v7719_v55  ;;  %1889 = vmatpush.bf16.msrb.mxu3 %v7720_v19 }
 0x4a6   :  { %1851 = vmatpush.bf16.msrb.mxu0 %v7721_v42  ;;  %1864 = vmatpush.bf16.msrb.mxu1 %v7722_v59  ;;  %v7732_v42 = vld [vmem:[#allocation27_spill] sm:$0xff]  ;;  %v7733_v59 = vld [vmem:[#allocation28_spill] sm:$0xff] }
 0x4a8   :  { %1877 = vmatpush.bf16.msrb.mxu2 %v7723_v13  ;;  %1890 = vmatpush.bf16.msrb.mxu3 %v7724_v60  ;;  %v7734_v13 = vld [vmem:[#allocation29_spill] sm:$0xff]  ;;  %v7735_v60 = vld [vmem:[#allocation30_spill] sm:$0xff] }
 0x4aa   :  { %1852 = vmatpush.bf16.msrb.mxu0 %v7725_v6  ;;  %1865 = vmatpush.bf16.msrb.mxu1 %v7726_v61  ;;  %v7736_v6 = vld [vmem:[#allocation31_spill] sm:$0xff]  ;;  %v7737_v61 = vld [vmem:[#allocation32_spill] sm:$0xff] }
 0x4ac   :  { %1878 = vmatpush.bf16.msrb.mxu2 %v7727_v14  ;;  %1891 = vmatpush.bf16.msrb.mxu3 %v7728_v18  ;;  %v7738_v14 = vld [vmem:[#allocation33_spill] sm:$0xff]  ;;  %v7739_v18 = vld [vmem:[#allocation34_spill] sm:$0xff] }
 0x4ae   :  { %1853 = vmatpush.bf16.msrb.mxu0 %v7729_v43  ;;  %1866 = vmatpush.bf16.msrb.mxu1 %v7730_v53  ;;  %v7740_v43 = vld [vmem:[#allocation38_spill] sm:$0xff]  ;;  %v7741_v53 = vld [vmem:[#allocation39_spill] sm:$0xff] }
 0x4b0   :  { %1879 = vmatpush.bf16.msrb.mxu2 %v7731_v36  ;;  %1892 = vmatpush.bf16.msrb.mxu3 %v7732_v42  ;;  %v7742_v36 = vld [vmem:[#allocation40_spill] sm:$0xff]  ;;  %v7743_v42 = vld [vmem:[#allocation43_spill] sm:$0xff] }
 0x4b2   :  { %1854 = vmatpush.bf16.msrb.mxu0 %v7733_v59  ;;  %1867 = vmatpush.bf16.msrb.mxu1 %v7734_v13  ;;  %v7744_v59 = vld [vmem:[#allocation44_spill] sm:$0xff]  ;;  %v7745_v13 = vld [vmem:[#allocation41_spill] sm:$0xff] }
 0x4b4   :  { %1880 = vmatpush.bf16.msrb.mxu2 %v7735_v60  ;;  %1893 = vmatpush.bf16.msrb.mxu3 %v7736_v6  ;;  %v7746_v60 = vld [vmem:[#allocation42_spill] sm:$0xff]  ;;  %v7747_v6 = vld [vmem:[#allocation45_spill] sm:$0xff] }
 0x4b6   :  { %1855 = vmatpush.bf16.msrb.mxu0 %v7737_v61  ;;  %1868 = vmatpush.bf16.msrb.mxu1 %v7738_v14  ;;  %v7748_v61 = vld [vmem:[#allocation46_spill] sm:$0xff]  ;;  %v7749_v14 = vld [vmem:[#allocation47_spill] sm:$0xff] }
 0x4b8   :  { %1881 = vmatpush.bf16.msrb.mxu2 %v7739_v18  ;;  %1894 = vmatpush.bf16.msrb.mxu3 %v7740_v43  ;;  %v7750_v18 = vld [vmem:[#allocation48_spill] sm:$0xff]  ;;  %v7751_v43 = vld [vmem:[#allocation50_spill] sm:$0xff] }
 0x4ba   :  { %1856 = vmatpush.bf16.msrb.mxu0 %v7741_v53  ;;  %1869 = vmatpush.bf16.msrb.mxu1 %v7742_v36  ;;  %v7752_v53 = vld [vmem:[#allocation51_spill] sm:$0xff]  ;;  %v7753_v36 = vld [vmem:[#allocation52_spill] sm:$0xff] }
 0x4bc   :  { %1882 = vmatpush.bf16.msrb.mxu2 %v7745_v13  ;;  %1895 = vmatpush.bf16.msrb.mxu3 %v7746_v60  ;;  %v7756_v13 = vld [vmem:[#allocation57_spill] sm:$0xff]  ;;  %v7757_v60 = vld [vmem:[#allocation58_spill] sm:$0xff] }
 0x4be   :  { %1909 = vmatpush.bf16.msra.mxu0 %v7743_v42  ;;  %1922 = vmatpush.bf16.msra.mxu1 %v7744_v59  ;;  %v7754_v42 = vld [vmem:[#allocation53_spill] sm:$0xff]  ;;  %v7755_v59 = vld [vmem:[#allocation54_spill] sm:$0xff] }
 0x4c0   :  { %1935 = vmatpush.bf16.msra.mxu2 %v7747_v6  ;;  %1948 = vmatpush.bf16.msra.mxu3 %v7748_v61  ;;  %v7758_v6 = vld [vmem:[#allocation59_spill] sm:$0xff]  ;;  %v7759_v61 = vld [vmem:[#allocation60_spill] sm:$0xff] }
 0x4c2   :  { %1910 = vmatpush.bf16.msra.mxu0 %v7749_v14  ;;  %1923 = vmatpush.bf16.msra.mxu1 %v7750_v18  ;;  %v7760_v14 = vld [vmem:[#allocation61_spill] sm:$0xff] }
 0x4c4   :  { %1936 = vmatpush.bf16.msra.mxu2 %v7751_v43  ;;  %1949 = vmatpush.bf16.msra.mxu3 %v7752_v53 }
 0x4c6   :  { %1911 = vmatpush.bf16.msra.mxu0 %v7753_v36  ;;  %1924 = vmatpush.bf16.msra.mxu1 %v7754_v42 }
 0x4c8   :  { %1937 = vmatpush.bf16.msra.mxu2 %v7755_v59  ;;  %1950 = vmatpush.bf16.msra.mxu3 %v7756_v13 }
 0x4ca   :  { %1912 = vmatpush.bf16.msra.mxu0 %v7757_v60  ;;  %1925 = vmatpush.bf16.msra.mxu1 %v7758_v6  ;;  %v7761_v6 = vld [vmem:[#allocation35_spill] sm:$0xff] }
 0x4cc   :  { %1938 = vmatpush.bf16.msra.mxu2 %v7759_v61  ;;  %1951 = vmatpush.bf16.msra.mxu3 %v7760_v14  ;;  %v7762_v61 = vld [vmem:[#allocation37_spill] sm:$0xff] }
 0x4dc   :  { %v1771_v35 = vpop.permute.xlu1 %1770 }
 0x4dd   :  { %v1773_v32 = vmul.f32 %v1771_v35, %v7761_v6  ;;  %v1774_v20 = vmul.f32 %v1771_v35, %v7762_v61  ;;  %v1775_v47 = vmul.f32 %v1771_v35, %v7539_v51 }
 0x4df   :  { %v1777_v14 = vadd.f32 %v1773_v32, %v7537_v49  ;;  %v1778_v41 = vadd.f32 %v1774_v20, %v7595_v63  ;;  %v1779_v20 = vadd.f32 %v1775_v47, %v7485_v37 }
 0x4f9   :  { %v1655_v18 = vpop.f32.mrf.mxu0  ;;  %v1668_v43 = vpop.f32.mrf.mxu1 }
 0x4fa   :  { %v1656_v11 = vadd.f32 %v1655_v18, %v5685_v40 }
 0x500   :  { %v1681_v19 = vpop.f32.mrf.mxu2  ;;  %v1694_v53 = vpop.f32.mrf.mxu3 }
 0x501   :  { %v1657_v55 = vpop.f32.mrf.mxu0  ;;  %v1670_v36 = vpop.f32.mrf.mxu1 }
 0x508   :  { %v1683_v23 = vpop.f32.mrf.mxu2  ;;  %v1696_v42 = vpop.f32.mrf.mxu3 }
 0x509   :  { %v1711_v2 = vpop.f32.mrf.mxu0  ;;  %v1724_v59 = vpop.f32.mrf.mxu1 }
 0x50a   :  { %v1712_v61 = vadd.f32 %v1711_v2, %v1656_v11 }
 0x510   :  { %v1737_v13 = vpop.f32.mrf.mxu2  ;;  %v1750_v1 = vpop.f32.mrf.mxu3 }
 0x511   :  { %v1713_v60 = vpop.f32.mrf.mxu0  ;;  %v1726_v30 = vpop.f32.mrf.mxu1 }
 0x512   :  { %v1669_v30 = vadd.f32 %v1668_v43, %v5687_v22  ;;  %v1776_v60 = vmul.f32 %v1771_v35, %v7484_v24  ;;  %v1682_v43 = vadd.f32 %v1681_v19, %v5693_v39 }
 0x514   :  { %v1725_v6 = vadd.f32 %v1724_v59, %v1669_v30  ;;  %v1780_v32 = vadd.f32 %v1776_v60, %v7540_v4  ;;  %v1738_v2 = vadd.f32 %v1737_v13, %v1682_v43  ;;  %v1695_v13 = vadd.f32 %v1694_v53, %v5698_v54 }
 0x516   :  { %v1751_v43 = vadd.f32 %v1750_v1, %v1695_v13  ;;  %v4738_v1 = vmov 7   ;;  %v7769_v13 = vld [vmem:[#allocation8_spill] sm:$0xff] }
 0x517   :  { %4394 = vset.pattern.permute.xlu2 %v4738_v1  ;;  %v7783_v1 = vld [vmem:[#allocation22_spill] sm:$0xff] }
 0x518   :  { %v1739_v27 = vpop.f32.mrf.mxu2  ;;  %v1752_v55 = vpop.f32.mrf.mxu3  ;;  %1973 = vperm.xlu2 %4394, %v6142_v0  }
 0x51a   :  { %v1790_v36 = vpop.f32.mrf.mxu0  ;;  %v1803_v23 = vpop.f32.mrf.mxu1 }
 0x51b   :  { %v1791_v42 = vadd.f32 %v1790_v36, %v1777_v14  ;;  %v1804_v48 = vadd.f32 %v1803_v23, %v1778_v41 }
 0x51d   :  { %4516 = vtanh.f32 %v1791_v42 }
 0x51e   :  { %4518 = vtanh.f32 %v1804_v48 }
 0x51f   :  { %4520 = vtanh.f32 %v1712_v61 }
 0x520   :  { %4522 = vtanh.f32 %v1725_v6 }
 0x522   :  { %v1816_v27 = vpop.f32.mrf.mxu2  ;;  %v1829_v55 = vpop.f32.mrf.mxu3 }
 0x523   :  { %v1817_v41 = vadd.f32 %v1816_v27, %v1779_v20  ;;  %v1792_v14 = vpop.f32.mrf.mxu0  ;;  %v1805_v18 = vpop.f32.mrf.mxu1  ;;  %v1830_v23 = vadd.f32 %v1829_v55, %v1780_v32 }
 0x524   :  { %v4517_v36 = vpop.eup %4516 }
 0x525   :  { %4524 = vtanh.f32 %v1817_v41  ;;  %v4519_v35 = vpop.eup %4518  ;;  %v1834_v11 = vmul.f32 0.5, %v4517_v36 }
 0x526   :  { %v1837_v48 = vmul.f32 0.5, %v4519_v35  ;;  %4526 = vtanh.f32 %v1830_v23  ;;  %v4521_v47 = vpop.eup %4520 }
 0x527   :  { %v4523_v42 = vpop.eup %4522  ;;  %v1835_v30 = vadd.f32 0.5, %v1834_v11  ;;  %4528 = vtanh.f32 %v1738_v2  ;;  %v1755_v55 = vmul.f32 0.5, %v4521_v47 }
 0x528   :  { %v1838_v59 = vadd.f32 0.5, %v1837_v48  ;;  %v1758_v19 = vmul.f32 0.5, %v4523_v42 }
 0x529   :  { %v1756_v36 = vadd.f32 0.5, %v1755_v55  ;;  %v7767_v55 = vld [vmem:[#allocation6_spill] sm:$0xff] }
 0x52a   :  { %v1818_v60 = vpop.f32.mrf.mxu2  ;;  %v1831_v61 = vpop.f32.mrf.mxu3  ;;  %v1843_v27 = vmul.f32 %v1838_v59, %v6127_v31  ;;  %v1759_v23 = vadd.f32 0.5, %v1758_v19  ;;  %v7768_v19 = vld [vmem:[#allocation7_spill] sm:$0xff] }
 0x52b   :  { %v4525_v20 = vpop.eup %4524 }
 0x52c   :  { %v1844_v6 = vmul.f32 %v4525_v20, %v1835_v30  ;;  %v4527_v32 = vpop.eup %4526  ;;  %v1764_v31 = vmul.f32 %v1759_v23, %v6132_v52  ;;  %v7763_v20 = vld [vmem:[#allocation2_spill] sm:$0xff]  ;;  %v7773_v23 = vld [vmem:[#allocation12_spill] sm:$0xff] }
 0x52d   :  { %v4529_v14 = vpop.eup %4528  ;;  %v1841_v18 = vmul.f32 0.5, %v4527_v32  ;;  %v7766_v32 = vld [vmem:[#allocation5_spill] sm:$0xff] }
 0x52e   :  { %v6237_v41 = vadd.f32 %v1844_v6, %v1843_v27  ;;  %v1765_v35 = vmul.f32 %v4529_v14, %v1756_v36  ;;  %v7764_v27 = vld [vmem:[#allocation3_spill] sm:$0xff]  ;;  %v7765_v6 = vld [vmem:[#allocation4_spill] sm:$0xff]  ;;  %v7770_v14 = vld [vmem:[#allocation9_spill] sm:$0xff] }
 0x52f   :  { %v1842_v11 = vadd.f32 0.5, %v1841_v18  ;;  %v7771_v18 = vld [vmem:[#allocation10_spill] sm:$0xff]  ;;  %v7772_v36 = vld [vmem:[#allocation11_spill] sm:$0xff] }
 0x530   :  { %4530 = vtanh.f32 %v6237_v41  ;;  %v6242_v47 = vadd.f32 %v1765_v35, %v1764_v31  ;;  %v7775_v35 = vld [vmem:[#allocation14_spill] sm:$0xff]  ;;  %v7778_v31 = vld [vmem:[#allocation17_spill] sm:$0xff] }
 0x531   :  { %4532 = vtanh.f32 %v1751_v43  ;;  %v7774_v43 = vld [vmem:[#allocation13_spill] sm:$0xff] }
 0x532   :  { %4534 = vtanh.f32 %v6242_v47 }
 0x536   :  { %v4531_v2 = vpop.eup %4530 }
 0x537   :  { %v1847_v48 = vmul.f32 %v4531_v2, %v1842_v11  ;;  %v4533_v53 = vpop.eup %4532  ;;  %v7776_v11 = vld [vmem:[#allocation15_spill] sm:$0xff]  ;;  %v7777_v2 = vld [vmem:[#allocation16_spill] sm:$0xff] }
 0x538   :  { %v1762_v52 = vmul.f32 0.5, %v4533_v53  ;;  %v4535_v42 = vpop.eup %4534  ;;  %v7780_v53 = vld [vmem:[#allocation19_spill] sm:$0xff] }
 0x539   :  { %v1848_v59 = vpack.c.bf16 %v1847_v48, %v1847_v48  ;;  %v7779_v48 = vld [vmem:[#allocation18_spill] sm:$0xff] }
 0x53a   :  { %v1763_v30 = vadd.f32 0.5, %v1762_v52  ;;  %v7782_v52 = vld [vmem:[#allocation21_spill] sm:$0xff] }
 0x53b   :  { %1857 = vmatmul.bf16.vlgmr.msrb.gmra.mxu0 %v1848_v59  ;;  %1870 = vmatmul.bf16.vlgmr.msrb.gmra.mxu1 %v1848_v59 }
 0x53c   :  { %1883 = vmatmul.bf16.vlgmr.msrb.gmra.mxu2 %v1848_v59  ;;  %1896 = vmatmul.bf16.vlgmr.msrb.gmra.mxu3 %v1848_v59  ;;  %v1768_v60 = vmul.f32 %v4535_v42, %v1763_v30  ;;  %v7784_v42 = vld [vmem:[#allocation23_spill] sm:$0xff]  ;;  %v7785_v30 = vld [vmem:[#allocation24_spill] sm:$0xff] }
 0x53d   :  { %1984 = vmatpush.bf16.msrb.mxu0 %v4816_v3  ;;  %1997 = vmatpush.bf16.msrb.mxu1 %v4827_v7 }
 0x53e   :  { %2010 = vmatpush.bf16.msrb.mxu2 %v4829_v8  ;;  %2023 = vmatpush.bf16.msrb.mxu3 %v4841_v12  ;;  %v1901_v61 = vpack.c.bf16 %v1768_v60, %v1768_v60  ;;  %v7786_v60 = vld [vmem:[#allocation25_spill] sm:$0xff] }
 0x541   :  { %1985 = vmatpush.bf16.msrb.mxu0 %v4854_v16  ;;  %1998 = vmatpush.bf16.msrb.mxu1 %v4856_v17 }
 0x542   :  { %2011 = vmatpush.bf16.msrb.mxu2 %v4868_v21  ;;  %2024 = vmatpush.bf16.msrb.mxu3 %v4879_v25 }
 0x545   :  { %1986 = vmatpush.bf16.msrb.mxu0 %v4891_v29  ;;  %1999 = vmatpush.bf16.msrb.mxu1 %v4904_v33 }
 0x546   :  { %2012 = vmatpush.bf16.msrb.mxu2 %v4906_v34  ;;  %2025 = vmatpush.bf16.msrb.mxu3 %v4918_v38 }
 0x549   :  { %1987 = vmatpush.bf16.msrb.mxu0 %v4936_v44  ;;  %2000 = vmatpush.bf16.msrb.mxu1 %v4940_v45 }
 0x54a   :  { %2013 = vmatpush.bf16.msrb.mxu2 %v4942_v46  ;;  %2026 = vmatpush.bf16.msrb.mxu3 %v4954_v50 }
 0x54b   :  { %4229 = vmatmul.msk.bf16.vlgmr.msra.gmra.mxu0 %vm683_vm0, %v1901_v61  ;;  %4230 = vmatmul.msk.bf16.vlgmr.msra.gmra.mxu1 %vm683_vm0, %v1901_v61 }
 0x54c   :  { %4231 = vmatmul.msk.bf16.vlgmr.msra.gmra.mxu2 %vm683_vm0, %v1901_v61  ;;  %4232 = vmatmul.msk.bf16.vlgmr.msra.gmra.mxu3 %vm683_vm0, %v1901_v61  ;;  %v7787_v61 = vld [vmem:[#allocation26_spill] sm:$0xff] }
 0x54d   :  { %1988 = vmatpush.bf16.msrb.mxu0 %v4972_v56  ;;  %2001 = vmatpush.bf16.msrb.mxu1 %v4976_v57 }
 0x54e   :  { %2014 = vmatpush.bf16.msrb.mxu2 %v4978_v58  ;;  %2027 = vmatpush.bf16.msrb.mxu3 %v4990_v62 }
 0x551   :  { %1989 = vmatpush.bf16.msrb.mxu0 %v5008_v5  ;;  %2002 = vmatpush.bf16.msrb.mxu1 %v5015_v9 }
 0x552   :  { %2015 = vmatpush.bf16.msrb.mxu2 %v5017_v10  ;;  %2028 = vmatpush.bf16.msrb.mxu3 %v5029_v15 }
 0x555   :  { %1990 = vmatpush.bf16.msrb.mxu0 %v5050_v26  ;;  %2003 = vmatpush.bf16.msrb.mxu1 %v5058_v28 }
 0x556   :  { %2016 = vmatpush.bf16.msrb.mxu2 %v7763_v20  ;;  %2029 = vmatpush.bf16.msrb.mxu3 %v7764_v27 }
 0x559   :  { %1991 = vmatpush.bf16.msrb.mxu0 %v7765_v6  ;;  %2004 = vmatpush.bf16.msrb.mxu1 %v7766_v32 }
 0x55a   :  { %2017 = vmatpush.bf16.msrb.mxu2 %v7767_v55  ;;  %2030 = vmatpush.bf16.msrb.mxu3 %v7768_v19 }
 0x55c   :  { %1992 = vmatmul.bf16.vlgmr.msrb.gmra.mxu0 %v1848_v59  ;;  %2005 = vmatmul.bf16.vlgmr.msrb.gmra.mxu1 %v1848_v59 }
 0x55d   :  { %2052 = vmatpush.bf16.msra.mxu0 %v7769_v13  ;;  %2065 = vmatpush.bf16.msra.mxu1 %v7770_v14 }
 0x55e   :  { %2018 = vmatmul.bf16.vlgmr.msrb.gmra.mxu2 %v1848_v59  ;;  %2031 = vmatmul.bf16.vlgmr.msrb.gmra.mxu3 %v1848_v59  ;;  %v7781_v59 = vld [vmem:[#allocation20_spill] sm:$0xff] }
 0x55f   :  { %2078 = vmatpush.bf16.msra.mxu2 %v7771_v18  ;;  %2091 = vmatpush.bf16.msra.mxu3 %v7772_v36 }
 0x561   :  { %2053 = vmatpush.bf16.msra.mxu0 %v7773_v23  ;;  %2066 = vmatpush.bf16.msra.mxu1 %v7774_v43 }
 0x563   :  { %2079 = vmatpush.bf16.msra.mxu2 %v7775_v35  ;;  %2092 = vmatpush.bf16.msra.mxu3 %v7776_v11 }
 0x565   :  { %2054 = vmatpush.bf16.msra.mxu0 %v7777_v2  ;;  %2067 = vmatpush.bf16.msra.mxu1 %v7778_v31  ;;  %v7788_v2 = vld [vmem:[#allocation27_spill] sm:$0xff]  ;;  %v7789_v31 = vld [vmem:[#allocation28_spill] sm:$0xff] }
 0x567   :  { %2080 = vmatpush.bf16.msra.mxu2 %v7779_v48  ;;  %2093 = vmatpush.bf16.msra.mxu3 %v7780_v53  ;;  %v7790_v48 = vld [vmem:[#allocation29_spill] sm:$0xff]  ;;  %v7791_v53 = vld [vmem:[#allocation30_spill] sm:$0xff] }
 0x569   :  { %2055 = vmatpush.bf16.msra.mxu0 %v7781_v59  ;;  %2068 = vmatpush.bf16.msra.mxu1 %v7782_v52  ;;  %v7792_v59 = vld [vmem:[#allocation31_spill] sm:$0xff]  ;;  %v7793_v52 = vld [vmem:[#allocation32_spill] sm:$0xff] }
 0x56b   :  { %2081 = vmatpush.bf16.msra.mxu2 %v7783_v1  ;;  %2094 = vmatpush.bf16.msra.mxu3 %v7784_v42  ;;  %v7794_v1 = vld [vmem:[#allocation33_spill] sm:$0xff]  ;;  %v7795_v42 = vld [vmem:[#allocation34_spill] sm:$0xff] }
 0x56d   :  { %2056 = vmatpush.bf16.msra.mxu0 %v7785_v30  ;;  %2069 = vmatpush.bf16.msra.mxu1 %v7786_v60  ;;  %v7796_v30 = vld [vmem:[#allocation38_spill] sm:$0xff]  ;;  %v7797_v60 = vld [vmem:[#allocation39_spill] sm:$0xff] }
 0x56f   :  { %2082 = vmatpush.bf16.msra.mxu2 %v7787_v61  ;;  %2095 = vmatpush.bf16.msra.mxu3 %v7788_v2  ;;  %v7798_v61 = vld [vmem:[#allocation40_spill] sm:$0xff]  ;;  %v7799_v2 = vld [vmem:[#allocation43_spill] sm:$0xff] }
 0x571   :  { %2057 = vmatpush.bf16.msra.mxu0 %v7789_v31  ;;  %2070 = vmatpush.bf16.msra.mxu1 %v7790_v48  ;;  %v7800_v31 = vld [vmem:[#allocation44_spill] sm:$0xff]  ;;  %v7801_v48 = vld [vmem:[#allocation41_spill] sm:$0xff] }
 0x572   :  { %v1974_v36 = vpop.permute.xlu2 %1973 }
 0x573   :  { %2083 = vmatpush.bf16.msra.mxu2 %v7791_v53  ;;  %2096 = vmatpush.bf16.msra.mxu3 %v7792_v59  ;;  %v7802_v53 = vld [vmem:[#allocation42_spill] sm:$0xff]  ;;  %v7803_v59 = vld [vmem:[#allocation45_spill] sm:$0xff]  ;;  %v1978_v20 = vmul.f32 %v1974_v36, %v7539_v51 }
 0x575   :  { %2058 = vmatpush.bf16.msra.mxu0 %v7793_v52  ;;  %2071 = vmatpush.bf16.msra.mxu1 %v7794_v1  ;;  %v7804_v52 = vld [vmem:[#allocation46_spill] sm:$0xff]  ;;  %v7805_v1 = vld [vmem:[#allocation47_spill] sm:$0xff] }
 0x577   :  { %2084 = vmatpush.bf16.msra.mxu2 %v7795_v42  ;;  %2097 = vmatpush.bf16.msra.mxu3 %v7796_v30  ;;  %v7806_v42 = vld [vmem:[#allocation48_spill] sm:$0xff]  ;;  %v7807_v30 = vld [vmem:[#allocation50_spill] sm:$0xff] }
 0x579   :  { %2059 = vmatpush.bf16.msra.mxu0 %v7797_v60  ;;  %2072 = vmatpush.bf16.msra.mxu1 %v7798_v61  ;;  %v7808_v60 = vld [vmem:[#allocation51_spill] sm:$0xff]  ;;  %v7809_v61 = vld [vmem:[#allocation52_spill] sm:$0xff] }
 0x57b   :  { %2085 = vmatpush.bf16.msra.mxu2 %v7801_v48  ;;  %2098 = vmatpush.bf16.msra.mxu3 %v7802_v53  ;;  %v7812_v48 = vld [vmem:[#allocation57_spill] sm:$0xff]  ;;  %v7813_v53 = vld [vmem:[#allocation58_spill] sm:$0xff] }
 0x57d   :  { %2112 = vmatpush.bf16.msrb.mxu0 %v7799_v2  ;;  %2125 = vmatpush.bf16.msrb.mxu1 %v7800_v31  ;;  %v7810_v2 = vld [vmem:[#allocation53_spill] sm:$0xff]  ;;  %v7811_v31 = vld [vmem:[#allocation54_spill] sm:$0xff] }
 0x57f   :  { %2138 = vmatpush.bf16.msrb.mxu2 %v7803_v59  ;;  %2151 = vmatpush.bf16.msrb.mxu3 %v7804_v52  ;;  %v7814_v59 = vld [vmem:[#allocation59_spill] sm:$0xff]  ;;  %v7815_v52 = vld [vmem:[#allocation60_spill] sm:$0xff] }
 0x581   :  { %2113 = vmatpush.bf16.msrb.mxu0 %v7805_v1  ;;  %2126 = vmatpush.bf16.msrb.mxu1 %v7806_v42  ;;  %v7816_v1 = vld [vmem:[#allocation61_spill] sm:$0xff] }
 0x583   :  { %2139 = vmatpush.bf16.msrb.mxu2 %v7807_v30  ;;  %2152 = vmatpush.bf16.msrb.mxu3 %v7808_v60 }
 0x585   :  { %2114 = vmatpush.bf16.msrb.mxu0 %v7809_v61  ;;  %2127 = vmatpush.bf16.msrb.mxu1 %v7810_v2 }
 0x587   :  { %2140 = vmatpush.bf16.msrb.mxu2 %v7811_v31  ;;  %2153 = vmatpush.bf16.msrb.mxu3 %v7812_v48 }
 0x589   :  { %2115 = vmatpush.bf16.msrb.mxu0 %v7813_v53  ;;  %2128 = vmatpush.bf16.msrb.mxu1 %v7814_v59  ;;  %v7817_v59 = vld [vmem:[#allocation35_spill] sm:$0xff] }
 0x58a   :  { %v1976_v13 = vmul.f32 %v1974_v36, %v7817_v59 }
 0x58b   :  { %2141 = vmatpush.bf16.msrb.mxu2 %v7815_v52  ;;  %2154 = vmatpush.bf16.msrb.mxu3 %v7816_v1  ;;  %v7818_v52 = vld [vmem:[#allocation37_spill] sm:$0xff] }
 0x58c   :  { %v1977_v19 = vmul.f32 %v1974_v36, %v7818_v52  ;;  %v1980_v1 = vadd.f32 %v1976_v13, %v7537_v49 }
 0x58e   :  { %v1981_v55 = vadd.f32 %v1977_v19, %v7595_v63  ;;  %v1982_v19 = vadd.f32 %v1978_v20, %v7485_v37 }
 0x5b8   :  { %v1858_v42 = vpop.f32.mrf.mxu0  ;;  %v1871_v30 = vpop.f32.mrf.mxu1 }
 0x5b9   :  { %v1859_v27 = vadd.f32 %v1858_v42, %v5685_v40 }
 0x5bf   :  { %v1884_v11 = vpop.f32.mrf.mxu2  ;;  %v1897_v60 = vpop.f32.mrf.mxu3 }
 0x5c0   :  { %v1860_v35 = vpop.f32.mrf.mxu0  ;;  %v1873_v61 = vpop.f32.mrf.mxu1 }
 0x5c7   :  { %v1886_v43 = vpop.f32.mrf.mxu2  ;;  %v1899_v2 = vpop.f32.mrf.mxu3 }
 0x5c8   :  { %v1914_v23 = vpop.f32.mrf.mxu0  ;;  %v1927_v31 = vpop.f32.mrf.mxu1 }
 0x5c9   :  { %v1915_v52 = vadd.f32 %v1914_v23, %v1859_v27 }
 0x5cf   :  { %v1940_v48 = vpop.f32.mrf.mxu2  ;;  %v1953_v18 = vpop.f32.mrf.mxu3 }
 0x5d0   :  { %v1916_v53 = vpop.f32.mrf.mxu0  ;;  %v1929_v14 = vpop.f32.mrf.mxu1 }
 0x5d1   :  { %v1872_v14 = vadd.f32 %v1871_v30, %v5687_v22  ;;  %v1979_v53 = vmul.f32 %v1974_v36, %v7484_v24  ;;  %v1885_v30 = vadd.f32 %v1884_v11, %v5693_v39 }
 0x5d3   :  { %v1928_v59 = vadd.f32 %v1927_v31, %v1872_v14  ;;  %v1983_v13 = vadd.f32 %v1979_v53, %v7540_v4  ;;  %v1941_v23 = vadd.f32 %v1940_v48, %v1885_v30  ;;  %v1898_v48 = vadd.f32 %v1897_v60, %v5698_v54 }
 0x5d5   :  { %v1954_v30 = vadd.f32 %v1953_v18, %v1898_v48  ;;  %v4739_v18 = vmov 8   ;;  %v7826_v48 = vld [vmem:[#allocation9_spill] sm:$0xff] }
 0x5d6   :  { %4395 = vset.pattern.permute.xlu0 %v4739_v18  ;;  %v7840_v18 = vld [vmem:[#allocation23_spill] sm:$0xff] }
 0x5d7   :  { %v1942_v32 = vpop.f32.mrf.mxu2  ;;  %v1955_v35 = vpop.f32.mrf.mxu3  ;;  %2176 = vperm.xlu0 %4395, %v6142_v0  }
 0x5d9   :  { %v1993_v61 = vpop.f32.mrf.mxu0  ;;  %v2006_v43 = vpop.f32.mrf.mxu1 }
 0x5da   :  { %v1994_v2 = vadd.f32 %v1993_v61, %v1980_v1  ;;  %v2007_v6 = vadd.f32 %v2006_v43, %v1981_v55 }
 0x5dc   :  { %4536 = vtanh.f32 %v1994_v2 }
 0x5dd   :  { %4538 = vtanh.f32 %v2007_v6 }
 0x5de   :  { %4540 = vtanh.f32 %v1915_v52 }
 0x5df   :  { %4542 = vtanh.f32 %v1928_v59 }
 0x5e1   :  { %v2019_v32 = vpop.f32.mrf.mxu2  ;;  %v2032_v35 = vpop.f32.mrf.mxu3 }
 0x5e2   :  { %v2020_v55 = vadd.f32 %v2019_v32, %v1982_v19  ;;  %v1995_v1 = vpop.f32.mrf.mxu0  ;;  %v2008_v42 = vpop.f32.mrf.mxu1  ;;  %v2033_v43 = vadd.f32 %v2032_v35, %v1983_v13 }
 0x5e3   :  { %v4537_v61 = vpop.eup %4536 }
 0x5e4   :  { %4544 = vtanh.f32 %v2020_v55  ;;  %v4539_v36 = vpop.eup %4538  ;;  %v2037_v27 = vmul.f32 0.5, %v4537_v61 }
 0x5e5   :  { %v2040_v6 = vmul.f32 0.5, %v4539_v36  ;;  %4546 = vtanh.f32 %v2033_v43  ;;  %v4541_v20 = vpop.eup %4540 }
 0x5e6   :  { %v4543_v2 = vpop.eup %4542  ;;  %v2038_v14 = vadd.f32 0.5, %v2037_v27  ;;  %4548 = vtanh.f32 %v1941_v23  ;;  %v1958_v35 = vmul.f32 0.5, %v4541_v20 }
 0x5e7   :  { %v2041_v31 = vadd.f32 0.5, %v2040_v6  ;;  %v1961_v11 = vmul.f32 0.5, %v4543_v2 }
 0x5e8   :  { %v1959_v61 = vadd.f32 0.5, %v1958_v35  ;;  %v7824_v35 = vld [vmem:[#allocation7_spill] sm:$0xff] }
 0x5e9   :  { %v2021_v53 = vpop.f32.mrf.mxu2  ;;  %v2034_v52 = vpop.f32.mrf.mxu3  ;;  %v2046_v32 = vmul.f32 %v2041_v31, %v6237_v41  ;;  %v1962_v43 = vadd.f32 0.5, %v1961_v11  ;;  %v7825_v11 = vld [vmem:[#allocation8_spill] sm:$0xff] }
 0x5ea   :  { %v4545_v19 = vpop.eup %4544  ;;  %v7819_v52 = vld [vmem:[#allocation2_spill] sm:$0xff] }
 0x5eb   :  { %v2047_v59 = vmul.f32 %v4545_v19, %v2038_v14  ;;  %v4547_v13 = vpop.eup %4546  ;;  %v1967_v41 = vmul.f32 %v1962_v43, %v6242_v47  ;;  %v7820_v19 = vld [vmem:[#allocation3_spill] sm:$0xff]  ;;  %v7830_v43 = vld [vmem:[#allocation13_spill] sm:$0xff] }
 0x5ec   :  { %v4549_v1 = vpop.eup %4548  ;;  %v2044_v42 = vmul.f32 0.5, %v4547_v13  ;;  %v7823_v13 = vld [vmem:[#allocation6_spill] sm:$0xff] }
 0x5ed   :  { %v6342_v55 = vadd.f32 %v2047_v59, %v2046_v32  ;;  %v1968_v36 = vmul.f32 %v4549_v1, %v1959_v61  ;;  %v7821_v32 = vld [vmem:[#allocation4_spill] sm:$0xff]  ;;  %v7822_v59 = vld [vmem:[#allocation5_spill] sm:$0xff]  ;;  %v7827_v1 = vld [vmem:[#allocation10_spill] sm:$0xff] }
 0x5ee   :  { %v2045_v27 = vadd.f32 0.5, %v2044_v42  ;;  %v7828_v42 = vld [vmem:[#allocation11_spill] sm:$0xff]  ;;  %v7829_v61 = vld [vmem:[#allocation12_spill] sm:$0xff] }
 0x5ef   :  { %4550 = vtanh.f32 %v6342_v55  ;;  %v6347_v20 = vadd.f32 %v1968_v36, %v1967_v41  ;;  %v7832_v36 = vld [vmem:[#allocation15_spill] sm:$0xff]  ;;  %v7835_v41 = vld [vmem:[#allocation18_spill] sm:$0xff] }
 0x5f0   :  { %4552 = vtanh.f32 %v1954_v30  ;;  %v7831_v30 = vld [vmem:[#allocation14_spill] sm:$0xff] }
 0x5f1   :  { %4554 = vtanh.f32 %v6347_v20 }
 0x5f5   :  { %v4551_v23 = vpop.eup %4550 }
 0x5f6   :  { %v2050_v6 = vmul.f32 %v4551_v23, %v2045_v27  ;;  %v4553_v60 = vpop.eup %4552  ;;  %v7833_v27 = vld [vmem:[#allocation16_spill] sm:$0xff]  ;;  %v7834_v23 = vld [vmem:[#allocation17_spill] sm:$0xff] }
 0x5f7   :  { %v1965_v47 = vmul.f32 0.5, %v4553_v60  ;;  %v4555_v2 = vpop.eup %4554  ;;  %v7838_v60 = vld [vmem:[#allocation21_spill] sm:$0xff] }
 0x5f8   :  { %v2051_v31 = vpack.c.bf16 %v2050_v6, %v2050_v6  ;;  %v7836_v6 = vld [vmem:[#allocation19_spill] sm:$0xff] }
 0x5f9   :  { %v1966_v14 = vadd.f32 0.5, %v1965_v47  ;;  %v7839_v47 = vld [vmem:[#allocation22_spill] sm:$0xff] }
 0x5fa   :  { %2060 = vmatmul.bf16.vlgmr.msra.gmra.mxu0 %v2051_v31  ;;  %2073 = vmatmul.bf16.vlgmr.msra.gmra.mxu1 %v2051_v31 }
 0x5fb   :  { %2086 = vmatmul.bf16.vlgmr.msra.gmra.mxu2 %v2051_v31  ;;  %2099 = vmatmul.bf16.vlgmr.msra.gmra.mxu3 %v2051_v31  ;;  %v1971_v53 = vmul.f32 %v4555_v2, %v1966_v14  ;;  %v7841_v2 = vld [vmem:[#allocation24_spill] sm:$0xff]  ;;  %v7842_v14 = vld [vmem:[#allocation25_spill] sm:$0xff] }
 0x5fc   :  { %2187 = vmatpush.bf16.msra.mxu0 %v4816_v3  ;;  %2200 = vmatpush.bf16.msra.mxu1 %v4827_v7 }
 0x5fd   :  { %2213 = vmatpush.bf16.msra.mxu2 %v4829_v8  ;;  %2226 = vmatpush.bf16.msra.mxu3 %v4841_v12  ;;  %v2104_v0 = vpack.c.bf16 %v1971_v53, %v1971_v53  ;;  %v7843_v53 = vld [vmem:[#allocation26_spill] sm:$0xff] }
 0x600   :  { %2188 = vmatpush.bf16.msra.mxu0 %v4854_v16  ;;  %2201 = vmatpush.bf16.msra.mxu1 %v4856_v17 }
 0x601   :  { %2214 = vmatpush.bf16.msra.mxu2 %v4868_v21  ;;  %2227 = vmatpush.bf16.msra.mxu3 %v4879_v25 }
 0x604   :  { %2189 = vmatpush.bf16.msra.mxu0 %v4891_v29  ;;  %2202 = vmatpush.bf16.msra.mxu1 %v4904_v33 }
 0x605   :  { %2215 = vmatpush.bf16.msra.mxu2 %v4906_v34  ;;  %2228 = vmatpush.bf16.msra.mxu3 %v4918_v38 }
 0x608   :  { %2190 = vmatpush.bf16.msra.mxu0 %v4936_v44  ;;  %2203 = vmatpush.bf16.msra.mxu1 %v4940_v45 }
 0x609   :  { %2216 = vmatpush.bf16.msra.mxu2 %v4942_v46  ;;  %2229 = vmatpush.bf16.msra.mxu3 %v4954_v50 }
 0x60a   :  { %4233 = vmatmul.msk.bf16.vlgmr.msrb.gmra.mxu0 %vm683_vm0, %v2104_v0  ;;  %4234 = vmatmul.msk.bf16.vlgmr.msrb.gmra.mxu1 %vm683_vm0, %v2104_v0 }
 0x60b   :  { %4235 = vmatmul.msk.bf16.vlgmr.msrb.gmra.mxu2 %vm683_vm0, %v2104_v0  ;;  %4236 = vmatmul.msk.bf16.vlgmr.msrb.gmra.mxu3 %vm683_vm0, %v2104_v0  ;;  %v7844_v0 = vld [vmem:[#allocation27_spill] sm:$0xff] }
 0x60c   :  { %2191 = vmatpush.bf16.msra.mxu0 %v4972_v56  ;;  %2204 = vmatpush.bf16.msra.mxu1 %v4976_v57 }
 0x60d   :  { %2217 = vmatpush.bf16.msra.mxu2 %v4978_v58  ;;  %2230 = vmatpush.bf16.msra.mxu3 %v4990_v62 }
 0x610   :  { %2192 = vmatpush.bf16.msra.mxu0 %v5008_v5  ;;  %2205 = vmatpush.bf16.msra.mxu1 %v5015_v9 }
 0x611   :  { %2218 = vmatpush.bf16.msra.mxu2 %v5017_v10  ;;  %2231 = vmatpush.bf16.msra.mxu3 %v5029_v15 }
 0x614   :  { %2193 = vmatpush.bf16.msra.mxu0 %v5050_v26  ;;  %2206 = vmatpush.bf16.msra.mxu1 %v5058_v28 }
 0x615   :  { %2219 = vmatpush.bf16.msra.mxu2 %v7819_v52  ;;  %2232 = vmatpush.bf16.msra.mxu3 %v7820_v19 }
 0x618   :  { %2194 = vmatpush.bf16.msra.mxu0 %v7821_v32  ;;  %2207 = vmatpush.bf16.msra.mxu1 %v7822_v59 }
 0x619   :  { %2220 = vmatpush.bf16.msra.mxu2 %v7823_v13  ;;  %2233 = vmatpush.bf16.msra.mxu3 %v7824_v35 }
 0x61b   :  { %2195 = vmatmul.bf16.vlgmr.msra.gmra.mxu0 %v2051_v31  ;;  %2208 = vmatmul.bf16.vlgmr.msra.gmra.mxu1 %v2051_v31 }
 0x61c   :  { %2255 = vmatpush.bf16.msrb.mxu0 %v7825_v11  ;;  %2268 = vmatpush.bf16.msrb.mxu1 %v7826_v48 }
 0x61d   :  { %2221 = vmatmul.bf16.vlgmr.msra.gmra.mxu2 %v2051_v31  ;;  %2234 = vmatmul.bf16.vlgmr.msra.gmra.mxu3 %v2051_v31  ;;  %v7837_v31 = vld [vmem:[#allocation20_spill] sm:$0xff] }
 0x61e   :  { %2281 = vmatpush.bf16.msrb.mxu2 %v7827_v1  ;;  %2294 = vmatpush.bf16.msrb.mxu3 %v7828_v42 }
 0x620   :  { %2256 = vmatpush.bf16.msrb.mxu0 %v7829_v61  ;;  %2269 = vmatpush.bf16.msrb.mxu1 %v7830_v43 }
 0x622   :  { %2282 = vmatpush.bf16.msrb.mxu2 %v7831_v30  ;;  %2295 = vmatpush.bf16.msrb.mxu3 %v7832_v36 }
 0x624   :  { %2257 = vmatpush.bf16.msrb.mxu0 %v7833_v27  ;;  %2270 = vmatpush.bf16.msrb.mxu1 %v7834_v23  ;;  %v7845_v23 = vld [vmem:[#allocation28_spill] sm:$0xff] }
 0x626   :  { %2283 = vmatpush.bf16.msrb.mxu2 %v7835_v41  ;;  %2296 = vmatpush.bf16.msrb.mxu3 %v7836_v6  ;;  %v7846_v41 = vld [vmem:[#allocation29_spill] sm:$0xff]  ;;  %v7847_v6 = vld [vmem:[#allocation30_spill] sm:$0xff] }
 0x628   :  { %2258 = vmatpush.bf16.msrb.mxu0 %v7837_v31  ;;  %2271 = vmatpush.bf16.msrb.mxu1 %v7838_v60  ;;  %v7848_v31 = vld [vmem:[#allocation31_spill] sm:$0xff]  ;;  %v7849_v60 = vld [vmem:[#allocation32_spill] sm:$0xff] }
 0x62a   :  { %2284 = vmatpush.bf16.msrb.mxu2 %v7839_v47  ;;  %2297 = vmatpush.bf16.msrb.mxu3 %v7840_v18  ;;  %v7850_v47 = vld [vmem:[#allocation33_spill] sm:$0xff]  ;;  %v7851_v18 = vld [vmem:[#allocation34_spill] sm:$0xff] }
 0x62c   :  { %2259 = vmatpush.bf16.msrb.mxu0 %v7841_v2  ;;  %2272 = vmatpush.bf16.msrb.mxu1 %v7842_v14  ;;  %v7852_v2 = vld [vmem:[#allocation38_spill] sm:$0xff]  ;;  %v7853_v14 = vld [vmem:[#allocation39_spill] sm:$0xff] }
 0x62e   :  { %2285 = vmatpush.bf16.msrb.mxu2 %v7843_v53  ;;  %2298 = vmatpush.bf16.msrb.mxu3 %v7844_v0  ;;  %v7854_v53 = vld [vmem:[#allocation40_spill] sm:$0xff]  ;;  %v7855_v0 = vld [vmem:[#allocation43_spill] sm:$0xff] }
 0x630   :  { %2260 = vmatpush.bf16.msrb.mxu0 %v7845_v23  ;;  %2273 = vmatpush.bf16.msrb.mxu1 %v7846_v41  ;;  %v7856_v23 = vld [vmem:[#allocation44_spill] sm:$0xff]  ;;  %v7857_v41 = vld [vmem:[#allocation41_spill] sm:$0xff] }
 0x632   :  { %2286 = vmatpush.bf16.msrb.mxu2 %v7847_v6  ;;  %2299 = vmatpush.bf16.msrb.mxu3 %v7848_v31  ;;  %v7858_v6 = vld [vmem:[#allocation42_spill] sm:$0xff]  ;;  %v7859_v31 = vld [vmem:[#allocation45_spill] sm:$0xff] }
 0x634   :  { %2261 = vmatpush.bf16.msrb.mxu0 %v7849_v60  ;;  %2274 = vmatpush.bf16.msrb.mxu1 %v7850_v47  ;;  %v7860_v60 = vld [vmem:[#allocation46_spill] sm:$0xff]  ;;  %v7861_v47 = vld [vmem:[#allocation47_spill] sm:$0xff] }
 0x636   :  { %2287 = vmatpush.bf16.msrb.mxu2 %v7851_v18  ;;  %2300 = vmatpush.bf16.msrb.mxu3 %v7852_v2  ;;  %v7862_v18 = vld [vmem:[#allocation48_spill] sm:$0xff]  ;;  %v7863_v2 = vld [vmem:[#allocation50_spill] sm:$0xff] }
 0x638   :  { %2262 = vmatpush.bf16.msrb.mxu0 %v7853_v14  ;;  %2275 = vmatpush.bf16.msrb.mxu1 %v7854_v53  ;;  %v7864_v14 = vld [vmem:[#allocation51_spill] sm:$0xff]  ;;  %v7865_v53 = vld [vmem:[#allocation52_spill] sm:$0xff] }
 0x63a   :  { %2288 = vmatpush.bf16.msrb.mxu2 %v7857_v41  ;;  %2301 = vmatpush.bf16.msrb.mxu3 %v7858_v6  ;;  %v7868_v41 = vld [vmem:[#allocation57_spill] sm:$0xff]  ;;  %v7869_v6 = vld [vmem:[#allocation58_spill] sm:$0xff] }
 0x63c   :  { %2315 = vmatpush.bf16.msra.mxu0 %v7855_v0  ;;  %2328 = vmatpush.bf16.msra.mxu1 %v7856_v23  ;;  %v7866_v0 = vld [vmem:[#allocation53_spill] sm:$0xff]  ;;  %v7867_v23 = vld [vmem:[#allocation54_spill] sm:$0xff] }
 0x63e   :  { %2341 = vmatpush.bf16.msra.mxu2 %v7859_v31  ;;  %2354 = vmatpush.bf16.msra.mxu3 %v7860_v60  ;;  %v7870_v31 = vld [vmem:[#allocation59_spill] sm:$0xff]  ;;  %v7871_v60 = vld [vmem:[#allocation60_spill] sm:$0xff] }
 0x640   :  { %2316 = vmatpush.bf16.msra.mxu0 %v7861_v47  ;;  %2329 = vmatpush.bf16.msra.mxu1 %v7862_v18  ;;  %v7872_v47 = vld [vmem:[#allocation61_spill] sm:$0xff] }
 0x642   :  { %2342 = vmatpush.bf16.msra.mxu2 %v7863_v2  ;;  %2355 = vmatpush.bf16.msra.mxu3 %v7864_v14 }
 0x644   :  { %2317 = vmatpush.bf16.msra.mxu0 %v7865_v53  ;;  %2330 = vmatpush.bf16.msra.mxu1 %v7866_v0 }
 0x646   :  { %2343 = vmatpush.bf16.msra.mxu2 %v7867_v23  ;;  %2356 = vmatpush.bf16.msra.mxu3 %v7868_v41 }
 0x648   :  { %2318 = vmatpush.bf16.msra.mxu0 %v7869_v6  ;;  %2331 = vmatpush.bf16.msra.mxu1 %v7870_v31  ;;  %v7873_v31 = vld [vmem:[#allocation35_spill] sm:$0xff] }
 0x649   :  { %v2177_v61 = vpop.permute.xlu0 %2176 }
 0x64a   :  { %2344 = vmatpush.bf16.msra.mxu2 %v7871_v60  ;;  %2357 = vmatpush.bf16.msra.mxu3 %v7872_v47  ;;  %v2179_v48 = vmul.f32 %v2177_v61, %v7873_v31  ;;  %v7874_v60 = vld [vmem:[#allocation37_spill] sm:$0xff]  ;;  %v2181_v19 = vmul.f32 %v2177_v61, %v7539_v51 }
 0x64b   :  { %v2180_v11 = vmul.f32 %v2177_v61, %v7874_v60 }
 0x64c   :  { %v2183_v47 = vadd.f32 %v2179_v48, %v7537_v49 }
 0x64d   :  { %v2184_v35 = vadd.f32 %v2180_v11, %v7595_v63  ;;  %v2185_v11 = vadd.f32 %v2181_v19, %v7485_v37 }
 0x677   :  { %v2061_v18 = vpop.f32.mrf.mxu0  ;;  %v2074_v2 = vpop.f32.mrf.mxu1 }
 0x678   :  { %v2062_v32 = vadd.f32 %v2061_v18, %v5685_v40 }
 0x67e   :  { %v2087_v27 = vpop.f32.mrf.mxu2  ;;  %v2100_v14 = vpop.f32.mrf.mxu3 }
 0x67f   :  { %v2063_v36 = vpop.f32.mrf.mxu0  ;;  %v2076_v53 = vpop.f32.mrf.mxu1 }
 0x686   :  { %v2089_v30 = vpop.f32.mrf.mxu2  ;;  %v2102_v0 = vpop.f32.mrf.mxu3 }
 0x687   :  { %v2117_v43 = vpop.f32.mrf.mxu0  ;;  %v2130_v23 = vpop.f32.mrf.mxu1 }
 0x688   :  { %v2118_v60 = vadd.f32 %v2117_v43, %v2062_v32 }
 0x68e   :  { %v2143_v41 = vpop.f32.mrf.mxu2  ;;  %v2156_v42 = vpop.f32.mrf.mxu3 }
 0x68f   :  { %v2119_v6 = vpop.f32.mrf.mxu0  ;;  %v2132_v1 = vpop.f32.mrf.mxu1 }
 0x690   :  { %v2075_v1 = vadd.f32 %v2074_v2, %v5687_v22  ;;  %v2182_v6 = vmul.f32 %v2177_v61, %v7484_v24  ;;  %v2088_v2 = vadd.f32 %v2087_v27, %v5693_v39 }
 0x692   :  { %v2131_v31 = vadd.f32 %v2130_v23, %v2075_v1  ;;  %v2186_v48 = vadd.f32 %v2182_v6, %v7540_v4  ;;  %v2144_v43 = vadd.f32 %v2143_v41, %v2088_v2  ;;  %v2101_v41 = vadd.f32 %v2100_v14, %v5698_v54 }
 0x694   :  { %v2157_v2 = vadd.f32 %v2156_v42, %v2101_v41  ;;  %v4740_v42 = vmov 9   ;;  %v7880_v41 = vld [vmem:[#allocation8_spill] sm:$0xff] }
 0x695   :  { %4396 = vset.pattern.permute.xlu1 %v4740_v42  ;;  %v7894_v42 = vld [vmem:[#allocation22_spill] sm:$0xff] }
 0x696   :  { %v2145_v13 = vpop.f32.mrf.mxu2  ;;  %v2158_v36 = vpop.f32.mrf.mxu3 }
 0x698   :  { %v2196_v53 = vpop.f32.mrf.mxu0  ;;  %v2209_v30 = vpop.f32.mrf.mxu1 }
 0x699   :  { %v2197_v0 = vadd.f32 %v2196_v53, %v2183_v47  ;;  %v2210_v59 = vadd.f32 %v2209_v30, %v2184_v35 }
 0x69b   :  { %4556 = vtanh.f32 %v2197_v0 }
 0x69c   :  { %4558 = vtanh.f32 %v2210_v59 }
 0x69d   :  { %4560 = vtanh.f32 %v2118_v60 }
 0x69e   :  { %4562 = vtanh.f32 %v2131_v31 }
 0x6a0   :  { %v2222_v13 = vpop.f32.mrf.mxu2  ;;  %v2235_v36 = vpop.f32.mrf.mxu3 }
 0x6a1   :  { %v2223_v35 = vadd.f32 %v2222_v13, %v2185_v11  ;;  %v2198_v47 = vpop.f32.mrf.mxu0  ;;  %v2211_v18 = vpop.f32.mrf.mxu1  ;;  %v2236_v30 = vadd.f32 %v2235_v36, %v2186_v48 }
 0x6a2   :  { %v4557_v53 = vpop.eup %4556 }
 0x6a3   :  { %4564 = vtanh.f32 %v2223_v35  ;;  %v4559_v61 = vpop.eup %4558  ;;  %v2240_v32 = vmul.f32 0.5, %v4557_v53 }
 0x6a4   :  { %v2243_v59 = vmul.f32 0.5, %v4559_v61  ;;  %4566 = vtanh.f32 %v2236_v30  ;;  %v4561_v19 = vpop.eup %4560 }
 0x6a5   :  { %v4563_v0 = vpop.eup %4562  ;;  %v2241_v1 = vadd.f32 0.5, %v2240_v32  ;;  %4568 = vtanh.f32 %v2144_v43  ;;  %v2161_v36 = vmul.f32 0.5, %v4561_v19 }
 0x6a6   :  { %v2244_v23 = vadd.f32 0.5, %v2243_v59  ;;  %v2164_v27 = vmul.f32 0.5, %v4563_v0  ;;  %v6462_v0 = vld [vmem:[%s7237_s0] sm:$0xff] }
 0x6a7   :  { %v2162_v53 = vadd.f32 0.5, %v2161_v36  ;;  %2379 = vperm.xlu1 %4396, %v6462_v0   ;;  %v7878_v36 = vld [vmem:[#allocation6_spill] sm:$0xff] }
 0x6a8   :  { %v2224_v6 = vpop.f32.mrf.mxu2  ;;  %v2237_v60 = vpop.f32.mrf.mxu3  ;;  %v2249_v13 = vmul.f32 %v2244_v23, %v6342_v55  ;;  %v2165_v30 = vadd.f32 0.5, %v2164_v27  ;;  %v7879_v27 = vld [vmem:[#allocation7_spill] sm:$0xff] }
 0x6a9   :  { %v4565_v11 = vpop.eup %4564 }
 0x6aa   :  { %v2250_v31 = vmul.f32 %v4565_v11, %v2241_v1  ;;  %v4567_v48 = vpop.eup %4566  ;;  %v2170_v55 = vmul.f32 %v2165_v30, %v6347_v20  ;;  %v7884_v30 = vld [vmem:[#allocation12_spill] sm:$0xff] }
 0x6ab   :  { %v4569_v47 = vpop.eup %4568  ;;  %v2247_v18 = vmul.f32 0.5, %v4567_v48  ;;  %v7877_v48 = vld [vmem:[#allocation5_spill] sm:$0xff] }
 0x6ac   :  { %v6447_v35 = vadd.f32 %v2250_v31, %v2249_v13  ;;  %v2171_v61 = vmul.f32 %v4569_v47, %v2162_v53  ;;  %v7875_v13 = vld [vmem:[#allocation3_spill] sm:$0xff]  ;;  %v7876_v31 = vld [vmem:[#allocation4_spill] sm:$0xff]  ;;  %v7881_v47 = vld [vmem:[#allocation9_spill] sm:$0xff] }
 0x6ad   :  { %v2248_v32 = vadd.f32 0.5, %v2247_v18  ;;  %v7882_v18 = vld [vmem:[#allocation10_spill] sm:$0xff]  ;;  %v7883_v53 = vld [vmem:[#allocation11_spill] sm:$0xff] }
 0x6ae   :  { %4570 = vtanh.f32 %v6447_v35  ;;  %v6452_v19 = vadd.f32 %v2171_v61, %v2170_v55  ;;  %v7886_v61 = vld [vmem:[#allocation14_spill] sm:$0xff]  ;;  %v7889_v55 = vld [vmem:[#allocation17_spill] sm:$0xff] }
 0x6af   :  { %4572 = vtanh.f32 %v2157_v2  ;;  %v7885_v2 = vld [vmem:[#allocation13_spill] sm:$0xff] }
 0x6b0   :  { %4574 = vtanh.f32 %v6452_v19 }
 0x6b4   :  { %v4571_v43 = vpop.eup %4570 }
 0x6b5   :  { %v2253_v59 = vmul.f32 %v4571_v43, %v2248_v32  ;;  %v4573_v14 = vpop.eup %4572  ;;  %v7887_v32 = vld [vmem:[#allocation15_spill] sm:$0xff]  ;;  %v7888_v43 = vld [vmem:[#allocation16_spill] sm:$0xff] }
 0x6b6   :  { %v2168_v20 = vmul.f32 0.5, %v4573_v14  ;;  %v4575_v1 = vpop.eup %4574  ;;  %v7891_v14 = vld [vmem:[#allocation19_spill] sm:$0xff] }
 0x6b7   :  { %v2254_v23 = vpack.c.bf16 %v2253_v59, %v2253_v59  ;;  %v7890_v59 = vld [vmem:[#allocation18_spill] sm:$0xff] }
 0x6b8   :  { %v2169_v6 = vadd.f32 0.5, %v2168_v20  ;;  %v7893_v20 = vld [vmem:[#allocation21_spill] sm:$0xff] }
 0x6b9   :  { %2263 = vmatmul.bf16.vlgmr.msrb.gmra.mxu0 %v2254_v23  ;;  %2276 = vmatmul.bf16.vlgmr.msrb.gmra.mxu1 %v2254_v23 }
 0x6ba   :  { %2289 = vmatmul.bf16.vlgmr.msrb.gmra.mxu2 %v2254_v23  ;;  %2302 = vmatmul.bf16.vlgmr.msrb.gmra.mxu3 %v2254_v23  ;;  %v2174_v60 = vmul.f32 %v4575_v1, %v2169_v6  ;;  %v7895_v1 = vld [vmem:[#allocation23_spill] sm:$0xff]  ;;  %v7896_v6 = vld [vmem:[#allocation24_spill] sm:$0xff] }
 0x6bb   :  { %2390 = vmatpush.bf16.msrb.mxu0 %v4816_v3  ;;  %2403 = vmatpush.bf16.msrb.mxu1 %v4827_v7 }
 0x6bc   :  { %2416 = vmatpush.bf16.msrb.mxu2 %v4829_v8  ;;  %2429 = vmatpush.bf16.msrb.mxu3 %v4841_v12  ;;  %v2307_v11 = vpack.c.bf16 %v2174_v60, %v2174_v60  ;;  %v7897_v60 = vld [vmem:[#allocation25_spill] sm:$0xff] }
 0x6bf   :  { %2391 = vmatpush.bf16.msrb.mxu0 %v4854_v16  ;;  %2404 = vmatpush.bf16.msrb.mxu1 %v4856_v17 }
 0x6c0   :  { %2417 = vmatpush.bf16.msrb.mxu2 %v4868_v21  ;;  %2430 = vmatpush.bf16.msrb.mxu3 %v4879_v25 }
 0x6c3   :  { %2392 = vmatpush.bf16.msrb.mxu0 %v4891_v29  ;;  %2405 = vmatpush.bf16.msrb.mxu1 %v4904_v33 }
 0x6c4   :  { %2418 = vmatpush.bf16.msrb.mxu2 %v4906_v34  ;;  %2431 = vmatpush.bf16.msrb.mxu3 %v4918_v38 }
 0x6c7   :  { %2393 = vmatpush.bf16.msrb.mxu0 %v4936_v44  ;;  %2406 = vmatpush.bf16.msrb.mxu1 %v4940_v45 }
 0x6c8   :  { %2419 = vmatpush.bf16.msrb.mxu2 %v4942_v46  ;;  %2432 = vmatpush.bf16.msrb.mxu3 %v4954_v50 }
 0x6c9   :  { %4237 = vmatmul.msk.bf16.vlgmr.msra.gmra.mxu0 %vm683_vm0, %v2307_v11  ;;  %4238 = vmatmul.msk.bf16.vlgmr.msra.gmra.mxu1 %vm683_vm0, %v2307_v11 }
 0x6ca   :  { %4239 = vmatmul.msk.bf16.vlgmr.msra.gmra.mxu2 %vm683_vm0, %v2307_v11  ;;  %4240 = vmatmul.msk.bf16.vlgmr.msra.gmra.mxu3 %vm683_vm0, %v2307_v11  ;;  %v7898_v11 = vld [vmem:[#allocation26_spill] sm:$0xff] }
 0x6cb   :  { %2394 = vmatpush.bf16.msrb.mxu0 %v4972_v56  ;;  %2407 = vmatpush.bf16.msrb.mxu1 %v4976_v57 }
 0x6cc   :  { %2420 = vmatpush.bf16.msrb.mxu2 %v4978_v58  ;;  %2433 = vmatpush.bf16.msrb.mxu3 %v4990_v62 }
 0x6cf   :  { %2395 = vmatpush.bf16.msrb.mxu0 %v5008_v5  ;;  %2408 = vmatpush.bf16.msrb.mxu1 %v5015_v9 }
 0x6d0   :  { %2421 = vmatpush.bf16.msrb.mxu2 %v5017_v10  ;;  %2434 = vmatpush.bf16.msrb.mxu3 %v5029_v15 }
 0x6d3   :  { %2396 = vmatpush.bf16.msrb.mxu0 %v5050_v26  ;;  %2409 = vmatpush.bf16.msrb.mxu1 %v5058_v28 }
 0x6d4   :  { %2422 = vmatpush.bf16.msrb.mxu2 %v7819_v52  ;;  %2435 = vmatpush.bf16.msrb.mxu3 %v7875_v13 }
 0x6d7   :  { %2397 = vmatpush.bf16.msrb.mxu0 %v7876_v31  ;;  %2410 = vmatpush.bf16.msrb.mxu1 %v7877_v48 }
 0x6d8   :  { %2423 = vmatpush.bf16.msrb.mxu2 %v7878_v36  ;;  %2436 = vmatpush.bf16.msrb.mxu3 %v7879_v27 }
 0x6da   :  { %2398 = vmatmul.bf16.vlgmr.msrb.gmra.mxu0 %v2254_v23  ;;  %2411 = vmatmul.bf16.vlgmr.msrb.gmra.mxu1 %v2254_v23 }
 0x6db   :  { %2458 = vmatpush.bf16.msra.mxu0 %v7880_v41  ;;  %2471 = vmatpush.bf16.msra.mxu1 %v7881_v47 }
 0x6dc   :  { %2424 = vmatmul.bf16.vlgmr.msrb.gmra.mxu2 %v2254_v23  ;;  %2437 = vmatmul.bf16.vlgmr.msrb.gmra.mxu3 %v2254_v23  ;;  %v7892_v23 = vld [vmem:[#allocation20_spill] sm:$0xff] }
 0x6dd   :  { %2484 = vmatpush.bf16.msra.mxu2 %v7882_v18  ;;  %2497 = vmatpush.bf16.msra.mxu3 %v7883_v53 }
 0x6df   :  { %2459 = vmatpush.bf16.msra.mxu0 %v7884_v30  ;;  %2472 = vmatpush.bf16.msra.mxu1 %v7885_v2 }
 0x6e1   :  { %2485 = vmatpush.bf16.msra.mxu2 %v7886_v61  ;;  %2498 = vmatpush.bf16.msra.mxu3 %v7887_v32 }
 0x6e3   :  { %2460 = vmatpush.bf16.msra.mxu0 %v7888_v43  ;;  %2473 = vmatpush.bf16.msra.mxu1 %v7889_v55  ;;  %v7899_v43 = vld [vmem:[#allocation27_spill] sm:$0xff]  ;;  %v7900_v55 = vld [vmem:[#allocation28_spill] sm:$0xff] }
 0x6e5   :  { %2486 = vmatpush.bf16.msra.mxu2 %v7890_v59  ;;  %2499 = vmatpush.bf16.msra.mxu3 %v7891_v14  ;;  %v7901_v59 = vld [vmem:[#allocation29_spill] sm:$0xff]  ;;  %v7902_v14 = vld [vmem:[#allocation30_spill] sm:$0xff] }
 0x6e7   :  { %2461 = vmatpush.bf16.msra.mxu0 %v7892_v23  ;;  %2474 = vmatpush.bf16.msra.mxu1 %v7893_v20  ;;  %v7903_v23 = vld [vmem:[#allocation31_spill] sm:$0xff]  ;;  %v7904_v20 = vld [vmem:[#allocation32_spill] sm:$0xff] }
 0x6e9   :  { %2487 = vmatpush.bf16.msra.mxu2 %v7894_v42  ;;  %2500 = vmatpush.bf16.msra.mxu3 %v7895_v1  ;;  %v7905_v42 = vld [vmem:[#allocation33_spill] sm:$0xff]  ;;  %v7906_v1 = vld [vmem:[#allocation34_spill] sm:$0xff] }
 0x6eb   :  { %2462 = vmatpush.bf16.msra.mxu0 %v7896_v6  ;;  %2475 = vmatpush.bf16.msra.mxu1 %v7897_v60  ;;  %v7907_v6 = vld [vmem:[#allocation38_spill] sm:$0xff]  ;;  %v7908_v60 = vld [vmem:[#allocation39_spill] sm:$0xff] }
 0x6ed   :  { %2488 = vmatpush.bf16.msra.mxu2 %v7898_v11  ;;  %2501 = vmatpush.bf16.msra.mxu3 %v7899_v43  ;;  %v7909_v11 = vld [vmem:[#allocation40_spill] sm:$0xff]  ;;  %v7910_v43 = vld [vmem:[#allocation43_spill] sm:$0xff] }
 0x6ef   :  { %2463 = vmatpush.bf16.msra.mxu0 %v7900_v55  ;;  %2476 = vmatpush.bf16.msra.mxu1 %v7901_v59  ;;  %v7911_v55 = vld [vmem:[#allocation44_spill] sm:$0xff]  ;;  %v7912_v59 = vld [vmem:[#allocation41_spill] sm:$0xff] }
 0x6f1   :  { %2489 = vmatpush.bf16.msra.mxu2 %v7902_v14  ;;  %2502 = vmatpush.bf16.msra.mxu3 %v7903_v23  ;;  %v7913_v14 = vld [vmem:[#allocation42_spill] sm:$0xff]  ;;  %v7914_v23 = vld [vmem:[#allocation45_spill] sm:$0xff] }
 0x6f3   :  { %2464 = vmatpush.bf16.msra.mxu0 %v7904_v20  ;;  %2477 = vmatpush.bf16.msra.mxu1 %v7905_v42  ;;  %v7915_v20 = vld [vmem:[#allocation46_spill] sm:$0xff]  ;;  %v7916_v42 = vld [vmem:[#allocation47_spill] sm:$0xff] }
 0x6f5   :  { %2490 = vmatpush.bf16.msra.mxu2 %v7906_v1  ;;  %2503 = vmatpush.bf16.msra.mxu3 %v7907_v6  ;;  %v7917_v1 = vld [vmem:[#allocation48_spill] sm:$0xff]  ;;  %v7918_v6 = vld [vmem:[#allocation50_spill] sm:$0xff] }
 0x6f7   :  { %2465 = vmatpush.bf16.msra.mxu0 %v7908_v60  ;;  %2478 = vmatpush.bf16.msra.mxu1 %v7909_v11  ;;  %v7919_v60 = vld [vmem:[#allocation51_spill] sm:$0xff]  ;;  %v7920_v11 = vld [vmem:[#allocation52_spill] sm:$0xff] }
 0x6f9   :  { %2491 = vmatpush.bf16.msra.mxu2 %v7912_v59  ;;  %2504 = vmatpush.bf16.msra.mxu3 %v7913_v14  ;;  %v7923_v59 = vld [vmem:[#allocation57_spill] sm:$0xff]  ;;  %v7924_v14 = vld [vmem:[#allocation58_spill] sm:$0xff] }
 0x6fb   :  { %2518 = vmatpush.bf16.msrb.mxu0 %v7910_v43  ;;  %2531 = vmatpush.bf16.msrb.mxu1 %v7911_v55  ;;  %v7921_v43 = vld [vmem:[#allocation53_spill] sm:$0xff]  ;;  %v7922_v55 = vld [vmem:[#allocation54_spill] sm:$0xff] }
 0x6fd   :  { %2544 = vmatpush.bf16.msrb.mxu2 %v7914_v23  ;;  %2557 = vmatpush.bf16.msrb.mxu3 %v7915_v20  ;;  %v7925_v23 = vld [vmem:[#allocation59_spill] sm:$0xff]  ;;  %v7926_v20 = vld [vmem:[#allocation60_spill] sm:$0xff] }
 0x6ff   :  { %2519 = vmatpush.bf16.msrb.mxu0 %v7916_v42  ;;  %2532 = vmatpush.bf16.msrb.mxu1 %v7917_v1  ;;  %v7927_v42 = vld [vmem:[#allocation61_spill] sm:$0xff] }
 0x701   :  { %2545 = vmatpush.bf16.msrb.mxu2 %v7918_v6  ;;  %2558 = vmatpush.bf16.msrb.mxu3 %v7919_v60 }
 0x703   :  { %2520 = vmatpush.bf16.msrb.mxu0 %v7920_v11  ;;  %2533 = vmatpush.bf16.msrb.mxu1 %v7921_v43 }
 0x705   :  { %2546 = vmatpush.bf16.msrb.mxu2 %v7922_v55  ;;  %2559 = vmatpush.bf16.msrb.mxu3 %v7923_v59 }
 0x707   :  { %2521 = vmatpush.bf16.msrb.mxu0 %v7924_v14  ;;  %2534 = vmatpush.bf16.msrb.mxu1 %v7925_v23  ;;  %v7928_v23 = vld [vmem:[#allocation35_spill] sm:$0xff] }
 0x709   :  { %2547 = vmatpush.bf16.msrb.mxu2 %v7926_v20  ;;  %2560 = vmatpush.bf16.msrb.mxu3 %v7927_v42  ;;  %v7929_v20 = vld [vmem:[#allocation37_spill] sm:$0xff] }
 0x719   :  { %v2380_v53 = vpop.permute.xlu1 %2379 }
 0x71a   :  { %v2382_v41 = vmul.f32 %v2380_v53, %v7928_v23  ;;  %v2383_v27 = vmul.f32 %v2380_v53, %v7929_v20  ;;  %v2384_v52 = vmul.f32 %v2380_v53, %v7539_v51 }
 0x71c   :  { %v2386_v42 = vadd.f32 %v2382_v41, %v7537_v49  ;;  %v2387_v36 = vadd.f32 %v2383_v27, %v7595_v63  ;;  %v2388_v27 = vadd.f32 %v2384_v52, %v7485_v37 }
 0x736   :  { %v2264_v1 = vpop.f32.mrf.mxu0  ;;  %v2277_v6 = vpop.f32.mrf.mxu1 }
 0x737   :  { %v2265_v13 = vadd.f32 %v2264_v1, %v5685_v40 }
 0x73d   :  { %v2290_v32 = vpop.f32.mrf.mxu2  ;;  %v2303_v60 = vpop.f32.mrf.mxu3 }
 0x73e   :  { %v2266_v61 = vpop.f32.mrf.mxu0  ;;  %v2279_v11 = vpop.f32.mrf.mxu1 }
 0x745   :  { %v2292_v2 = vpop.f32.mrf.mxu2  ;;  %v2305_v43 = vpop.f32.mrf.mxu3 }
 0x746   :  { %v2320_v30 = vpop.f32.mrf.mxu0  ;;  %v2333_v55 = vpop.f32.mrf.mxu1 }
 0x747   :  { %v2321_v20 = vadd.f32 %v2320_v30, %v2265_v13 }
 0x74d   :  { %v2346_v59 = vpop.f32.mrf.mxu2  ;;  %v2359_v18 = vpop.f32.mrf.mxu3 }
 0x74e   :  { %v2322_v14 = vpop.f32.mrf.mxu0  ;;  %v2335_v47 = vpop.f32.mrf.mxu1 }
 0x74f   :  { %v2278_v47 = vadd.f32 %v2277_v6, %v5687_v22  ;;  %v2385_v14 = vmul.f32 %v2380_v53, %v7484_v24  ;;  %v2291_v6 = vadd.f32 %v2290_v32, %v5693_v39 }
 0x751   :  { %v2334_v23 = vadd.f32 %v2333_v55, %v2278_v47  ;;  %v2389_v41 = vadd.f32 %v2385_v14, %v7540_v4  ;;  %v2347_v30 = vadd.f32 %v2346_v59, %v2291_v6  ;;  %v2304_v59 = vadd.f32 %v2303_v60, %v5698_v54 }
 0x753   :  { %v2360_v6 = vadd.f32 %v2359_v18, %v2304_v59  ;;  %v4741_v18 = vmov 10   ;;  %v7936_v59 = vld [vmem:[#allocation8_spill] sm:$0xff] }
 0x754   :  { %4397 = vset.pattern.permute.xlu2 %v4741_v18  ;;  %v7950_v18 = vld [vmem:[#allocation22_spill] sm:$0xff] }
 0x755   :  { %v2348_v48 = vpop.f32.mrf.mxu2  ;;  %v2361_v61 = vpop.f32.mrf.mxu3  ;;  %2582 = vperm.xlu2 %4397, %v6462_v0  }
 0x757   :  { %v2399_v11 = vpop.f32.mrf.mxu0  ;;  %v2412_v2 = vpop.f32.mrf.mxu1 }
 0x758   :  { %v2400_v43 = vadd.f32 %v2399_v11, %v2386_v42  ;;  %v2413_v31 = vadd.f32 %v2412_v2, %v2387_v36 }
 0x75a   :  { %4576 = vtanh.f32 %v2400_v43 }
 0x75b   :  { %4578 = vtanh.f32 %v2413_v31 }
 0x75c   :  { %4580 = vtanh.f32 %v2321_v20 }
 0x75d   :  { %4582 = vtanh.f32 %v2334_v23 }
 0x75f   :  { %v2425_v48 = vpop.f32.mrf.mxu2  ;;  %v2438_v61 = vpop.f32.mrf.mxu3 }
 0x760   :  { %v2426_v36 = vadd.f32 %v2425_v48, %v2388_v27  ;;  %v2401_v42 = vpop.f32.mrf.mxu0  ;;  %v2414_v1 = vpop.f32.mrf.mxu1  ;;  %v2439_v2 = vadd.f32 %v2438_v61, %v2389_v41 }
 0x761   :  { %v4577_v11 = vpop.eup %4576 }
 0x762   :  { %4584 = vtanh.f32 %v2426_v36  ;;  %v4579_v53 = vpop.eup %4578  ;;  %v2443_v13 = vmul.f32 0.5, %v4577_v11 }
 0x763   :  { %v2446_v31 = vmul.f32 0.5, %v4579_v53  ;;  %4586 = vtanh.f32 %v2439_v2  ;;  %v4581_v52 = vpop.eup %4580 }
 0x764   :  { %v4583_v43 = vpop.eup %4582  ;;  %v2444_v47 = vadd.f32 0.5, %v2443_v13  ;;  %4588 = vtanh.f32 %v2347_v30  ;;  %v2364_v61 = vmul.f32 0.5, %v4581_v52 }
 0x765   :  { %v2447_v55 = vadd.f32 0.5, %v2446_v31  ;;  %v2367_v32 = vmul.f32 0.5, %v4583_v43 }
 0x766   :  { %v2365_v11 = vadd.f32 0.5, %v2364_v61  ;;  %v7934_v61 = vld [vmem:[#allocation6_spill] sm:$0xff] }
 0x767   :  { %v2427_v14 = vpop.f32.mrf.mxu2  ;;  %v2440_v20 = vpop.f32.mrf.mxu3  ;;  %v2452_v48 = vmul.f32 %v2447_v55, %v6447_v35  ;;  %v2368_v2 = vadd.f32 0.5, %v2367_v32  ;;  %v7935_v32 = vld [vmem:[#allocation7_spill] sm:$0xff] }
 0x768   :  { %v4585_v27 = vpop.eup %4584 }
 0x769   :  { %v2453_v23 = vmul.f32 %v4585_v27, %v2444_v47  ;;  %v4587_v41 = vpop.eup %4586  ;;  %v2373_v35 = vmul.f32 %v2368_v2, %v6452_v19  ;;  %v7930_v27 = vld [vmem:[#allocation2_spill] sm:$0xff]  ;;  %v7940_v2 = vld [vmem:[#allocation12_spill] sm:$0xff] }
 0x76a   :  { %v4589_v42 = vpop.eup %4588  ;;  %v2450_v1 = vmul.f32 0.5, %v4587_v41  ;;  %v7933_v41 = vld [vmem:[#allocation5_spill] sm:$0xff] }
 0x76b   :  { %v6557_v36 = vadd.f32 %v2453_v23, %v2452_v48  ;;  %v2374_v53 = vmul.f32 %v4589_v42, %v2365_v11  ;;  %v7931_v48 = vld [vmem:[#allocation3_spill] sm:$0xff]  ;;  %v7932_v23 = vld [vmem:[#allocation4_spill] sm:$0xff]  ;;  %v7937_v42 = vld [vmem:[#allocation9_spill] sm:$0xff] }
 0x76c   :  { %v2451_v13 = vadd.f32 0.5, %v2450_v1  ;;  %v7938_v1 = vld [vmem:[#allocation10_spill] sm:$0xff]  ;;  %v7939_v11 = vld [vmem:[#allocation11_spill] sm:$0xff] }
 0x76d   :  { %4590 = vtanh.f32 %v6557_v36  ;;  %v6562_v52 = vadd.f32 %v2374_v53, %v2373_v35  ;;  %v7942_v53 = vld [vmem:[#allocation14_spill] sm:$0xff]  ;;  %v7945_v35 = vld [vmem:[#allocation17_spill] sm:$0xff] }
 0x76e   :  { %4592 = vtanh.f32 %v2360_v6  ;;  %v7941_v6 = vld [vmem:[#allocation13_spill] sm:$0xff] }
 0x76f   :  { %4594 = vtanh.f32 %v6562_v52 }
 0x773   :  { %v4591_v30 = vpop.eup %4590 }
 0x774   :  { %v2456_v31 = vmul.f32 %v4591_v30, %v2451_v13  ;;  %v4593_v60 = vpop.eup %4592  ;;  %v7943_v13 = vld [vmem:[#allocation15_spill] sm:$0xff]  ;;  %v7944_v30 = vld [vmem:[#allocation16_spill] sm:$0xff] }
 0x775   :  { %v2371_v19 = vmul.f32 0.5, %v4593_v60  ;;  %v4595_v43 = vpop.eup %4594  ;;  %v7947_v60 = vld [vmem:[#allocation19_spill] sm:$0xff] }
 0x776   :  { %v2457_v55 = vpack.c.bf16 %v2456_v31, %v2456_v31  ;;  %v7946_v31 = vld [vmem:[#allocation18_spill] sm:$0xff] }
 0x777   :  { %v2372_v47 = vadd.f32 0.5, %v2371_v19  ;;  %v7949_v19 = vld [vmem:[#allocation21_spill] sm:$0xff] }
 0x778   :  { %2466 = vmatmul.bf16.vlgmr.msra.gmra.mxu0 %v2457_v55  ;;  %2479 = vmatmul.bf16.vlgmr.msra.gmra.mxu1 %v2457_v55 }
 0x779   :  { %2492 = vmatmul.bf16.vlgmr.msra.gmra.mxu2 %v2457_v55  ;;  %2505 = vmatmul.bf16.vlgmr.msra.gmra.mxu3 %v2457_v55  ;;  %v2377_v14 = vmul.f32 %v4595_v43, %v2372_v47  ;;  %v7951_v43 = vld [vmem:[#allocation23_spill] sm:$0xff]  ;;  %v7952_v47 = vld [vmem:[#allocation24_spill] sm:$0xff] }
 0x77a   :  { %2593 = vmatpush.bf16.msra.mxu0 %v4816_v3  ;;  %2606 = vmatpush.bf16.msra.mxu1 %v4827_v7 }
 0x77b   :  { %2619 = vmatpush.bf16.msra.mxu2 %v4829_v8  ;;  %2632 = vmatpush.bf16.msra.mxu3 %v4841_v12  ;;  %v2510_v20 = vpack.c.bf16 %v2377_v14, %v2377_v14  ;;  %v7953_v14 = vld [vmem:[#allocation25_spill] sm:$0xff] }
 0x77e   :  { %2594 = vmatpush.bf16.msra.mxu0 %v4854_v16  ;;  %2607 = vmatpush.bf16.msra.mxu1 %v4856_v17 }
 0x77f   :  { %2620 = vmatpush.bf16.msra.mxu2 %v4868_v21  ;;  %2633 = vmatpush.bf16.msra.mxu3 %v4879_v25 }
 0x782   :  { %2595 = vmatpush.bf16.msra.mxu0 %v4891_v29  ;;  %2608 = vmatpush.bf16.msra.mxu1 %v4904_v33 }
 0x783   :  { %2621 = vmatpush.bf16.msra.mxu2 %v4906_v34  ;;  %2634 = vmatpush.bf16.msra.mxu3 %v4918_v38 }
 0x786   :  { %2596 = vmatpush.bf16.msra.mxu0 %v4936_v44  ;;  %2609 = vmatpush.bf16.msra.mxu1 %v4940_v45 }
 0x787   :  { %2622 = vmatpush.bf16.msra.mxu2 %v4942_v46  ;;  %2635 = vmatpush.bf16.msra.mxu3 %v4954_v50 }
 0x788   :  { %4241 = vmatmul.msk.bf16.vlgmr.msrb.gmra.mxu0 %vm683_vm0, %v2510_v20  ;;  %4242 = vmatmul.msk.bf16.vlgmr.msrb.gmra.mxu1 %vm683_vm0, %v2510_v20 }
 0x789   :  { %4243 = vmatmul.msk.bf16.vlgmr.msrb.gmra.mxu2 %vm683_vm0, %v2510_v20  ;;  %4244 = vmatmul.msk.bf16.vlgmr.msrb.gmra.mxu3 %vm683_vm0, %v2510_v20  ;;  %v7954_v20 = vld [vmem:[#allocation26_spill] sm:$0xff] }
 0x78a   :  { %2597 = vmatpush.bf16.msra.mxu0 %v4972_v56  ;;  %2610 = vmatpush.bf16.msra.mxu1 %v4976_v57 }
 0x78b   :  { %2623 = vmatpush.bf16.msra.mxu2 %v4978_v58  ;;  %2636 = vmatpush.bf16.msra.mxu3 %v4990_v62 }
 0x78e   :  { %2598 = vmatpush.bf16.msra.mxu0 %v5008_v5  ;;  %2611 = vmatpush.bf16.msra.mxu1 %v5015_v9 }
 0x78f   :  { %2624 = vmatpush.bf16.msra.mxu2 %v5017_v10  ;;  %2637 = vmatpush.bf16.msra.mxu3 %v5029_v15 }
 0x792   :  { %2599 = vmatpush.bf16.msra.mxu0 %v5050_v26  ;;  %2612 = vmatpush.bf16.msra.mxu1 %v5058_v28 }
 0x793   :  { %2625 = vmatpush.bf16.msra.mxu2 %v7930_v27  ;;  %2638 = vmatpush.bf16.msra.mxu3 %v7931_v48 }
 0x796   :  { %2600 = vmatpush.bf16.msra.mxu0 %v7932_v23  ;;  %2613 = vmatpush.bf16.msra.mxu1 %v7933_v41 }
 0x797   :  { %2626 = vmatpush.bf16.msra.mxu2 %v7934_v61  ;;  %2639 = vmatpush.bf16.msra.mxu3 %v7935_v32 }
 0x799   :  { %2601 = vmatmul.bf16.vlgmr.msra.gmra.mxu0 %v2457_v55  ;;  %2614 = vmatmul.bf16.vlgmr.msra.gmra.mxu1 %v2457_v55 }
 0x79a   :  { %2661 = vmatpush.bf16.msrb.mxu0 %v7936_v59  ;;  %2674 = vmatpush.bf16.msrb.mxu1 %v7937_v42 }
 0x79b   :  { %2627 = vmatmul.bf16.vlgmr.msra.gmra.mxu2 %v2457_v55  ;;  %2640 = vmatmul.bf16.vlgmr.msra.gmra.mxu3 %v2457_v55  ;;  %v7948_v55 = vld [vmem:[#allocation20_spill] sm:$0xff] }
 0x79c   :  { %2687 = vmatpush.bf16.msrb.mxu2 %v7938_v1  ;;  %2700 = vmatpush.bf16.msrb.mxu3 %v7939_v11 }
 0x79e   :  { %2662 = vmatpush.bf16.msrb.mxu0 %v7940_v2  ;;  %2675 = vmatpush.bf16.msrb.mxu1 %v7941_v6 }
 0x7a0   :  { %2688 = vmatpush.bf16.msrb.mxu2 %v7942_v53  ;;  %2701 = vmatpush.bf16.msrb.mxu3 %v7943_v13 }
 0x7a2   :  { %2663 = vmatpush.bf16.msrb.mxu0 %v7944_v30  ;;  %2676 = vmatpush.bf16.msrb.mxu1 %v7945_v35  ;;  %v7955_v30 = vld [vmem:[#allocation27_spill] sm:$0xff]  ;;  %v7956_v35 = vld [vmem:[#allocation28_spill] sm:$0xff] }
 0x7a4   :  { %2689 = vmatpush.bf16.msrb.mxu2 %v7946_v31  ;;  %2702 = vmatpush.bf16.msrb.mxu3 %v7947_v60  ;;  %v7957_v31 = vld [vmem:[#allocation29_spill] sm:$0xff]  ;;  %v7958_v60 = vld [vmem:[#allocation30_spill] sm:$0xff] }
 0x7a6   :  { %2664 = vmatpush.bf16.msrb.mxu0 %v7948_v55  ;;  %2677 = vmatpush.bf16.msrb.mxu1 %v7949_v19  ;;  %v7959_v55 = vld [vmem:[#allocation31_spill] sm:$0xff]  ;;  %v7960_v19 = vld [vmem:[#allocation32_spill] sm:$0xff] }
 0x7a8   :  { %2690 = vmatpush.bf16.msrb.mxu2 %v7950_v18  ;;  %2703 = vmatpush.bf16.msrb.mxu3 %v7951_v43  ;;  %v7961_v18 = vld [vmem:[#allocation33_spill] sm:$0xff]  ;;  %v7962_v43 = vld [vmem:[#allocation34_spill] sm:$0xff] }
 0x7aa   :  { %2665 = vmatpush.bf16.msrb.mxu0 %v7952_v47  ;;  %2678 = vmatpush.bf16.msrb.mxu1 %v7953_v14  ;;  %v7963_v47 = vld [vmem:[#allocation38_spill] sm:$0xff]  ;;  %v7964_v14 = vld [vmem:[#allocation39_spill] sm:$0xff] }
 0x7ac   :  { %2691 = vmatpush.bf16.msrb.mxu2 %v7954_v20  ;;  %2704 = vmatpush.bf16.msrb.mxu3 %v7955_v30  ;;  %v7965_v20 = vld [vmem:[#allocation40_spill] sm:$0xff]  ;;  %v7966_v30 = vld [vmem:[#allocation43_spill] sm:$0xff] }
 0x7ae   :  { %2666 = vmatpush.bf16.msrb.mxu0 %v7956_v35  ;;  %2679 = vmatpush.bf16.msrb.mxu1 %v7957_v31  ;;  %v7967_v35 = vld [vmem:[#allocation44_spill] sm:$0xff]  ;;  %v7968_v31 = vld [vmem:[#allocation41_spill] sm:$0xff] }
 0x7af   :  { %v2583_v11 = vpop.permute.xlu2 %2582 }
 0x7b0   :  { %2692 = vmatpush.bf16.msrb.mxu2 %v7958_v60  ;;  %2705 = vmatpush.bf16.msrb.mxu3 %v7959_v55  ;;  %v7969_v60 = vld [vmem:[#allocation42_spill] sm:$0xff]  ;;  %v7970_v55 = vld [vmem:[#allocation45_spill] sm:$0xff]  ;;  %v2587_v27 = vmul.f32 %v2583_v11, %v7539_v51 }
 0x7b2   :  { %2667 = vmatpush.bf16.msrb.mxu0 %v7960_v19  ;;  %2680 = vmatpush.bf16.msrb.mxu1 %v7961_v18  ;;  %v7971_v19 = vld [vmem:[#allocation46_spill] sm:$0xff]  ;;  %v7972_v18 = vld [vmem:[#allocation47_spill] sm:$0xff] }
 0x7b4   :  { %2693 = vmatpush.bf16.msrb.mxu2 %v7962_v43  ;;  %2706 = vmatpush.bf16.msrb.mxu3 %v7963_v47  ;;  %v7973_v43 = vld [vmem:[#allocation48_spill] sm:$0xff]  ;;  %v7974_v47 = vld [vmem:[#allocation50_spill] sm:$0xff] }
 0x7b6   :  { %2668 = vmatpush.bf16.msrb.mxu0 %v7964_v14  ;;  %2681 = vmatpush.bf16.msrb.mxu1 %v7965_v20  ;;  %v7975_v14 = vld [vmem:[#allocation51_spill] sm:$0xff]  ;;  %v7976_v20 = vld [vmem:[#allocation52_spill] sm:$0xff] }
 0x7b8   :  { %2694 = vmatpush.bf16.msrb.mxu2 %v7968_v31  ;;  %2707 = vmatpush.bf16.msrb.mxu3 %v7969_v60  ;;  %v7979_v31 = vld [vmem:[#allocation57_spill] sm:$0xff]  ;;  %v7980_v60 = vld [vmem:[#allocation58_spill] sm:$0xff] }
 0x7ba   :  { %2721 = vmatpush.bf16.msra.mxu0 %v7966_v30  ;;  %2734 = vmatpush.bf16.msra.mxu1 %v7967_v35  ;;  %v7977_v30 = vld [vmem:[#allocation53_spill] sm:$0xff]  ;;  %v7978_v35 = vld [vmem:[#allocation54_spill] sm:$0xff] }
 0x7bc   :  { %2747 = vmatpush.bf16.msra.mxu2 %v7970_v55  ;;  %2760 = vmatpush.bf16.msra.mxu3 %v7971_v19  ;;  %v7981_v55 = vld [vmem:[#allocation59_spill] sm:$0xff]  ;;  %v7982_v19 = vld [vmem:[#allocation60_spill] sm:$0xff] }
 0x7be   :  { %2722 = vmatpush.bf16.msra.mxu0 %v7972_v18  ;;  %2735 = vmatpush.bf16.msra.mxu1 %v7973_v43  ;;  %v7983_v18 = vld [vmem:[#allocation61_spill] sm:$0xff] }
 0x7c0   :  { %2748 = vmatpush.bf16.msra.mxu2 %v7974_v47  ;;  %2761 = vmatpush.bf16.msra.mxu3 %v7975_v14 }
 0x7c2   :  { %2723 = vmatpush.bf16.msra.mxu0 %v7976_v20  ;;  %2736 = vmatpush.bf16.msra.mxu1 %v7977_v30 }
 0x7c4   :  { %2749 = vmatpush.bf16.msra.mxu2 %v7978_v35  ;;  %2762 = vmatpush.bf16.msra.mxu3 %v7979_v31 }
 0x7c6   :  { %2724 = vmatpush.bf16.msra.mxu0 %v7980_v60  ;;  %2737 = vmatpush.bf16.msra.mxu1 %v7981_v55  ;;  %v7984_v55 = vld [vmem:[#allocation35_spill] sm:$0xff] }
 0x7c7   :  { %v2585_v59 = vmul.f32 %v2583_v11, %v7984_v55 }
 0x7c8   :  { %2750 = vmatpush.bf16.msra.mxu2 %v7982_v19  ;;  %2763 = vmatpush.bf16.msra.mxu3 %v7983_v18  ;;  %v7985_v19 = vld [vmem:[#allocation37_spill] sm:$0xff] }
 0x7c9   :  { %v2586_v32 = vmul.f32 %v2583_v11, %v7985_v19  ;;  %v2589_v18 = vadd.f32 %v2585_v59, %v7537_v49 }
 0x7cb   :  { %v2590_v61 = vadd.f32 %v2586_v32, %v7595_v63  ;;  %v2591_v32 = vadd.f32 %v2587_v27, %v7485_v37 }
 0x7f5   :  { %v2467_v43 = vpop.f32.mrf.mxu0  ;;  %v2480_v47 = vpop.f32.mrf.mxu1 }
 0x7f6   :  { %v2468_v48 = vadd.f32 %v2467_v43, %v5685_v40 }
 0x7fc   :  { %v2493_v13 = vpop.f32.mrf.mxu2  ;;  %v2506_v14 = vpop.f32.mrf.mxu3 }
 0x7fd   :  { %v2469_v53 = vpop.f32.mrf.mxu0  ;;  %v2482_v20 = vpop.f32.mrf.mxu1 }
 0x804   :  { %v2495_v6 = vpop.f32.mrf.mxu2  ;;  %v2508_v30 = vpop.f32.mrf.mxu3 }
 0x805   :  { %v2523_v2 = vpop.f32.mrf.mxu0  ;;  %v2536_v35 = vpop.f32.mrf.mxu1 }
 0x806   :  { %v2524_v19 = vadd.f32 %v2523_v2, %v2468_v48 }
 0x80c   :  { %v2549_v31 = vpop.f32.mrf.mxu2  ;;  %v2562_v1 = vpop.f32.mrf.mxu3 }
 0x80d   :  { %v2525_v60 = vpop.f32.mrf.mxu0  ;;  %v2538_v42 = vpop.f32.mrf.mxu1 }
 0x80e   :  { %v2481_v42 = vadd.f32 %v2480_v47, %v5687_v22  ;;  %v2588_v60 = vmul.f32 %v2583_v11, %v7484_v24  ;;  %v2494_v47 = vadd.f32 %v2493_v13, %v5693_v39 }
 0x810   :  { %v2537_v55 = vadd.f32 %v2536_v35, %v2481_v42  ;;  %v2592_v59 = vadd.f32 %v2588_v60, %v7540_v4  ;;  %v2550_v2 = vadd.f32 %v2549_v31, %v2494_v47  ;;  %v2507_v31 = vadd.f32 %v2506_v14, %v5698_v54 }
 0x812   :  { %v2563_v47 = vadd.f32 %v2562_v1, %v2507_v31  ;;  %v4742_v1 = vmov 11   ;;  %v7993_v31 = vld [vmem:[#allocation9_spill] sm:$0xff] }
 0x813   :  { %4398 = vset.pattern.permute.xlu1 %v4742_v1  ;;  %v8007_v1 = vld [vmem:[#allocation23_spill] sm:$0xff] }
 0x814   :  { %v2551_v41 = vpop.f32.mrf.mxu2  ;;  %v2564_v53 = vpop.f32.mrf.mxu3  ;;  %2785 = vperm.xlu1 %4398, %v6462_v0  }
 0x816   :  { %v2602_v20 = vpop.f32.mrf.mxu0  ;;  %v2615_v6 = vpop.f32.mrf.mxu1 }
 0x817   :  { %v2603_v30 = vadd.f32 %v2602_v20, %v2589_v18  ;;  %v2616_v23 = vadd.f32 %v2615_v6, %v2590_v61 }
 0x819   :  { %4596 = vtanh.f32 %v2603_v30 }
 0x81a   :  { %4598 = vtanh.f32 %v2616_v23 }
 0x81b   :  { %4600 = vtanh.f32 %v2524_v19 }
 0x81c   :  { %4602 = vtanh.f32 %v2537_v55 }
 0x81e   :  { %v2628_v41 = vpop.f32.mrf.mxu2  ;;  %v2641_v53 = vpop.f32.mrf.mxu3 }
 0x81f   :  { %v2629_v61 = vadd.f32 %v2628_v41, %v2591_v32  ;;  %v2604_v18 = vpop.f32.mrf.mxu0  ;;  %v2617_v43 = vpop.f32.mrf.mxu1  ;;  %v2642_v6 = vadd.f32 %v2641_v53, %v2592_v59 }
 0x820   :  { %v4597_v20 = vpop.eup %4596 }
 0x821   :  { %4604 = vtanh.f32 %v2629_v61  ;;  %v4599_v11 = vpop.eup %4598  ;;  %v2646_v48 = vmul.f32 0.5, %v4597_v20 }
 0x822   :  { %v2649_v23 = vmul.f32 0.5, %v4599_v11  ;;  %4606 = vtanh.f32 %v2642_v6  ;;  %v4601_v27 = vpop.eup %4600 }
 0x823   :  { %v4603_v30 = vpop.eup %4602  ;;  %v2647_v42 = vadd.f32 0.5, %v2646_v48  ;;  %4608 = vtanh.f32 %v2550_v2  ;;  %v2567_v53 = vmul.f32 0.5, %v4601_v27 }
 0x824   :  { %v2650_v35 = vadd.f32 0.5, %v2649_v23  ;;  %v2570_v13 = vmul.f32 0.5, %v4603_v30 }
 0x825   :  { %v2568_v20 = vadd.f32 0.5, %v2567_v53  ;;  %v7991_v53 = vld [vmem:[#allocation7_spill] sm:$0xff] }
 0x826   :  { %v2630_v60 = vpop.f32.mrf.mxu2  ;;  %v2643_v19 = vpop.f32.mrf.mxu3  ;;  %v2655_v41 = vmul.f32 %v2650_v35, %v6557_v36  ;;  %v2571_v6 = vadd.f32 0.5, %v2570_v13  ;;  %v7992_v13 = vld [vmem:[#allocation8_spill] sm:$0xff] }
 0x827   :  { %v4605_v32 = vpop.eup %4604  ;;  %v7986_v19 = vld [vmem:[#allocation2_spill] sm:$0xff] }
 0x828   :  { %v2656_v55 = vmul.f32 %v4605_v32, %v2647_v42  ;;  %v4607_v59 = vpop.eup %4606  ;;  %v2576_v36 = vmul.f32 %v2571_v6, %v6562_v52  ;;  %v7987_v32 = vld [vmem:[#allocation3_spill] sm:$0xff]  ;;  %v7997_v6 = vld [vmem:[#allocation13_spill] sm:$0xff] }
 0x829   :  { %v4609_v18 = vpop.eup %4608  ;;  %v2653_v43 = vmul.f32 0.5, %v4607_v59  ;;  %v7990_v59 = vld [vmem:[#allocation6_spill] sm:$0xff] }
 0x82a   :  { %v6662_v61 = vadd.f32 %v2656_v55, %v2655_v41  ;;  %v2577_v11 = vmul.f32 %v4609_v18, %v2568_v20  ;;  %v7988_v41 = vld [vmem:[#allocation4_spill] sm:$0xff]  ;;  %v7989_v55 = vld [vmem:[#allocation5_spill] sm:$0xff]  ;;  %v7994_v18 = vld [vmem:[#allocation10_spill] sm:$0xff] }
 0x82b   :  { %v2654_v48 = vadd.f32 0.5, %v2653_v43  ;;  %v7995_v43 = vld [vmem:[#allocation11_spill] sm:$0xff]  ;;  %v7996_v20 = vld [vmem:[#allocation12_spill] sm:$0xff] }
 0x82c   :  { %4610 = vtanh.f32 %v6662_v61  ;;  %v6667_v27 = vadd.f32 %v2577_v11, %v2576_v36  ;;  %v7999_v11 = vld [vmem:[#allocation15_spill] sm:$0xff]  ;;  %v8002_v36 = vld [vmem:[#allocation18_spill] sm:$0xff] }
 0x82d   :  { %4612 = vtanh.f32 %v2563_v47  ;;  %v7998_v47 = vld [vmem:[#allocation14_spill] sm:$0xff] }
 0x82e   :  { %4614 = vtanh.f32 %v6667_v27 }
 0x832   :  { %v4611_v2 = vpop.eup %4610 }
 0x833   :  { %v2659_v23 = vmul.f32 %v4611_v2, %v2654_v48  ;;  %v4613_v14 = vpop.eup %4612  ;;  %v8000_v48 = vld [vmem:[#allocation16_spill] sm:$0xff]  ;;  %v8001_v2 = vld [vmem:[#allocation17_spill] sm:$0xff] }
 0x834   :  { %v2574_v52 = vmul.f32 0.5, %v4613_v14  ;;  %v4615_v30 = vpop.eup %4614  ;;  %v8005_v14 = vld [vmem:[#allocation21_spill] sm:$0xff] }
 0x835   :  { %v2660_v35 = vpack.c.bf16 %v2659_v23, %v2659_v23  ;;  %v8003_v23 = vld [vmem:[#allocation19_spill] sm:$0xff] }
 0x836   :  { %v2575_v42 = vadd.f32 0.5, %v2574_v52  ;;  %v8006_v52 = vld [vmem:[#allocation22_spill] sm:$0xff] }
 0x837   :  { %2669 = vmatmul.bf16.vlgmr.msrb.gmra.mxu0 %v2660_v35  ;;  %2682 = vmatmul.bf16.vlgmr.msrb.gmra.mxu1 %v2660_v35 }
 0x838   :  { %2695 = vmatmul.bf16.vlgmr.msrb.gmra.mxu2 %v2660_v35  ;;  %2708 = vmatmul.bf16.vlgmr.msrb.gmra.mxu3 %v2660_v35  ;;  %v2580_v60 = vmul.f32 %v4615_v30, %v2575_v42  ;;  %v8008_v30 = vld [vmem:[#allocation24_spill] sm:$0xff]  ;;  %v8009_v42 = vld [vmem:[#allocation25_spill] sm:$0xff] }
 0x839   :  { %2796 = vmatpush.bf16.msrb.mxu0 %v4816_v3  ;;  %2809 = vmatpush.bf16.msrb.mxu1 %v4827_v7 }
 0x83a   :  { %2822 = vmatpush.bf16.msrb.mxu2 %v4829_v8  ;;  %2835 = vmatpush.bf16.msrb.mxu3 %v4841_v12  ;;  %v2713_v0 = vpack.c.bf16 %v2580_v60, %v2580_v60  ;;  %v8010_v60 = vld [vmem:[#allocation26_spill] sm:$0xff] }
 0x83d   :  { %2797 = vmatpush.bf16.msrb.mxu0 %v4854_v16  ;;  %2810 = vmatpush.bf16.msrb.mxu1 %v4856_v17 }
 0x83e   :  { %2823 = vmatpush.bf16.msrb.mxu2 %v4868_v21  ;;  %2836 = vmatpush.bf16.msrb.mxu3 %v4879_v25 }
 0x841   :  { %2798 = vmatpush.bf16.msrb.mxu0 %v4891_v29  ;;  %2811 = vmatpush.bf16.msrb.mxu1 %v4904_v33 }
 0x842   :  { %2824 = vmatpush.bf16.msrb.mxu2 %v4906_v34  ;;  %2837 = vmatpush.bf16.msrb.mxu3 %v4918_v38 }
 0x845   :  { %2799 = vmatpush.bf16.msrb.mxu0 %v4936_v44  ;;  %2812 = vmatpush.bf16.msrb.mxu1 %v4940_v45 }
 0x846   :  { %2825 = vmatpush.bf16.msrb.mxu2 %v4942_v46  ;;  %2838 = vmatpush.bf16.msrb.mxu3 %v4954_v50 }
 0x847   :  { %4245 = vmatmul.msk.bf16.vlgmr.msra.gmra.mxu0 %vm683_vm0, %v2713_v0  ;;  %4246 = vmatmul.msk.bf16.vlgmr.msra.gmra.mxu1 %vm683_vm0, %v2713_v0 }
 0x848   :  { %4247 = vmatmul.msk.bf16.vlgmr.msra.gmra.mxu2 %vm683_vm0, %v2713_v0  ;;  %4248 = vmatmul.msk.bf16.vlgmr.msra.gmra.mxu3 %vm683_vm0, %v2713_v0  ;;  %v8011_v0 = vld [vmem:[#allocation27_spill] sm:$0xff] }
 0x849   :  { %2800 = vmatpush.bf16.msrb.mxu0 %v4972_v56  ;;  %2813 = vmatpush.bf16.msrb.mxu1 %v4976_v57 }
 0x84a   :  { %2826 = vmatpush.bf16.msrb.mxu2 %v4978_v58  ;;  %2839 = vmatpush.bf16.msrb.mxu3 %v4990_v62 }
 0x84d   :  { %2801 = vmatpush.bf16.msrb.mxu0 %v5008_v5  ;;  %2814 = vmatpush.bf16.msrb.mxu1 %v5015_v9 }
 0x84e   :  { %2827 = vmatpush.bf16.msrb.mxu2 %v5017_v10  ;;  %2840 = vmatpush.bf16.msrb.mxu3 %v5029_v15 }
 0x851   :  { %2802 = vmatpush.bf16.msrb.mxu0 %v5050_v26  ;;  %2815 = vmatpush.bf16.msrb.mxu1 %v5058_v28 }
 0x852   :  { %2828 = vmatpush.bf16.msrb.mxu2 %v7986_v19  ;;  %2841 = vmatpush.bf16.msrb.mxu3 %v7987_v32 }
 0x855   :  { %2803 = vmatpush.bf16.msrb.mxu0 %v7988_v41  ;;  %2816 = vmatpush.bf16.msrb.mxu1 %v7989_v55 }
 0x856   :  { %2829 = vmatpush.bf16.msrb.mxu2 %v7990_v59  ;;  %2842 = vmatpush.bf16.msrb.mxu3 %v7991_v53 }
 0x858   :  { %2804 = vmatmul.bf16.vlgmr.msrb.gmra.mxu0 %v2660_v35  ;;  %2817 = vmatmul.bf16.vlgmr.msrb.gmra.mxu1 %v2660_v35 }
 0x859   :  { %2864 = vmatpush.bf16.msra.mxu0 %v7992_v13  ;;  %2877 = vmatpush.bf16.msra.mxu1 %v7993_v31 }
 0x85a   :  { %2830 = vmatmul.bf16.vlgmr.msrb.gmra.mxu2 %v2660_v35  ;;  %2843 = vmatmul.bf16.vlgmr.msrb.gmra.mxu3 %v2660_v35  ;;  %v8004_v35 = vld [vmem:[#allocation20_spill] sm:$0xff] }
 0x85b   :  { %2890 = vmatpush.bf16.msra.mxu2 %v7994_v18  ;;  %2903 = vmatpush.bf16.msra.mxu3 %v7995_v43 }
 0x85d   :  { %2865 = vmatpush.bf16.msra.mxu0 %v7996_v20  ;;  %2878 = vmatpush.bf16.msra.mxu1 %v7997_v6 }
 0x85f   :  { %2891 = vmatpush.bf16.msra.mxu2 %v7998_v47  ;;  %2904 = vmatpush.bf16.msra.mxu3 %v7999_v11 }
 0x861   :  { %2866 = vmatpush.bf16.msra.mxu0 %v8000_v48  ;;  %2879 = vmatpush.bf16.msra.mxu1 %v8001_v2  ;;  %v8012_v2 = vld [vmem:[#allocation28_spill] sm:$0xff] }
 0x863   :  { %2892 = vmatpush.bf16.msra.mxu2 %v8002_v36  ;;  %2905 = vmatpush.bf16.msra.mxu3 %v8003_v23  ;;  %v8013_v36 = vld [vmem:[#allocation29_spill] sm:$0xff]  ;;  %v8014_v23 = vld [vmem:[#allocation30_spill] sm:$0xff] }
 0x865   :  { %2867 = vmatpush.bf16.msra.mxu0 %v8004_v35  ;;  %2880 = vmatpush.bf16.msra.mxu1 %v8005_v14  ;;  %v8015_v35 = vld [vmem:[#allocation31_spill] sm:$0xff]  ;;  %v8016_v14 = vld [vmem:[#allocation32_spill] sm:$0xff] }
 0x867   :  { %2893 = vmatpush.bf16.msra.mxu2 %v8006_v52  ;;  %2906 = vmatpush.bf16.msra.mxu3 %v8007_v1  ;;  %v8017_v52 = vld [vmem:[#allocation33_spill] sm:$0xff]  ;;  %v8018_v1 = vld [vmem:[#allocation34_spill] sm:$0xff] }
 0x869   :  { %2868 = vmatpush.bf16.msra.mxu0 %v8008_v30  ;;  %2881 = vmatpush.bf16.msra.mxu1 %v8009_v42  ;;  %v8019_v30 = vld [vmem:[#allocation38_spill] sm:$0xff]  ;;  %v8020_v42 = vld [vmem:[#allocation39_spill] sm:$0xff] }
 0x86b   :  { %2894 = vmatpush.bf16.msra.mxu2 %v8010_v60  ;;  %2907 = vmatpush.bf16.msra.mxu3 %v8011_v0  ;;  %v8021_v60 = vld [vmem:[#allocation40_spill] sm:$0xff]  ;;  %v8022_v0 = vld [vmem:[#allocation43_spill] sm:$0xff] }
 0x86d   :  { %2869 = vmatpush.bf16.msra.mxu0 %v8012_v2  ;;  %2882 = vmatpush.bf16.msra.mxu1 %v8013_v36  ;;  %v8023_v2 = vld [vmem:[#allocation44_spill] sm:$0xff]  ;;  %v8024_v36 = vld [vmem:[#allocation41_spill] sm:$0xff] }
 0x86f   :  { %2895 = vmatpush.bf16.msra.mxu2 %v8014_v23  ;;  %2908 = vmatpush.bf16.msra.mxu3 %v8015_v35  ;;  %v8025_v23 = vld [vmem:[#allocation42_spill] sm:$0xff]  ;;  %v8026_v35 = vld [vmem:[#allocation45_spill] sm:$0xff] }
 0x871   :  { %2870 = vmatpush.bf16.msra.mxu0 %v8016_v14  ;;  %2883 = vmatpush.bf16.msra.mxu1 %v8017_v52  ;;  %v8027_v14 = vld [vmem:[#allocation46_spill] sm:$0xff]  ;;  %v8028_v52 = vld [vmem:[#allocation47_spill] sm:$0xff] }
 0x873   :  { %2896 = vmatpush.bf16.msra.mxu2 %v8018_v1  ;;  %2909 = vmatpush.bf16.msra.mxu3 %v8019_v30  ;;  %v8029_v1 = vld [vmem:[#allocation48_spill] sm:$0xff]  ;;  %v8030_v30 = vld [vmem:[#allocation50_spill] sm:$0xff] }
 0x875   :  { %2871 = vmatpush.bf16.msra.mxu0 %v8020_v42  ;;  %2884 = vmatpush.bf16.msra.mxu1 %v8021_v60  ;;  %v8031_v42 = vld [vmem:[#allocation51_spill] sm:$0xff]  ;;  %v8032_v60 = vld [vmem:[#allocation52_spill] sm:$0xff] }
 0x877   :  { %2897 = vmatpush.bf16.msra.mxu2 %v8024_v36  ;;  %2910 = vmatpush.bf16.msra.mxu3 %v8025_v23  ;;  %v8035_v36 = vld [vmem:[#allocation57_spill] sm:$0xff]  ;;  %v8036_v23 = vld [vmem:[#allocation58_spill] sm:$0xff] }
 0x879   :  { %2924 = vmatpush.bf16.msrb.mxu0 %v8022_v0  ;;  %2937 = vmatpush.bf16.msrb.mxu1 %v8023_v2  ;;  %v8033_v0 = vld [vmem:[#allocation53_spill] sm:$0xff]  ;;  %v8034_v2 = vld [vmem:[#allocation54_spill] sm:$0xff] }
 0x87b   :  { %2950 = vmatpush.bf16.msrb.mxu2 %v8026_v35  ;;  %2963 = vmatpush.bf16.msrb.mxu3 %v8027_v14  ;;  %v8037_v35 = vld [vmem:[#allocation59_spill] sm:$0xff]  ;;  %v8038_v14 = vld [vmem:[#allocation60_spill] sm:$0xff] }
 0x87d   :  { %2925 = vmatpush.bf16.msrb.mxu0 %v8028_v52  ;;  %2938 = vmatpush.bf16.msrb.mxu1 %v8029_v1  ;;  %v8039_v52 = vld [vmem:[#allocation61_spill] sm:$0xff] }
 0x87f   :  { %2951 = vmatpush.bf16.msrb.mxu2 %v8030_v30  ;;  %2964 = vmatpush.bf16.msrb.mxu3 %v8031_v42 }
 0x881   :  { %2926 = vmatpush.bf16.msrb.mxu0 %v8032_v60  ;;  %2939 = vmatpush.bf16.msrb.mxu1 %v8033_v0 }
 0x883   :  { %2952 = vmatpush.bf16.msrb.mxu2 %v8034_v2  ;;  %2965 = vmatpush.bf16.msrb.mxu3 %v8035_v36 }
 0x885   :  { %2927 = vmatpush.bf16.msrb.mxu0 %v8036_v23  ;;  %2940 = vmatpush.bf16.msrb.mxu1 %v8037_v35  ;;  %v8040_v35 = vld [vmem:[#allocation35_spill] sm:$0xff] }
 0x886   :  { %v2786_v20 = vpop.permute.xlu1 %2785 }
 0x887   :  { %2953 = vmatpush.bf16.msrb.mxu2 %v8038_v14  ;;  %2966 = vmatpush.bf16.msrb.mxu3 %v8039_v52  ;;  %v2788_v31 = vmul.f32 %v2786_v20, %v8040_v35  ;;  %v8041_v14 = vld [vmem:[#allocation37_spill] sm:$0xff]  ;;  %v2790_v32 = vmul.f32 %v2786_v20, %v7539_v51 }
 0x888   :  { %v2789_v13 = vmul.f32 %v2786_v20, %v8041_v14 }
 0x889   :  { %v2792_v52 = vadd.f32 %v2788_v31, %v7537_v49 }
 0x88a   :  { %v2793_v53 = vadd.f32 %v2789_v13, %v7595_v63  ;;  %v2794_v13 = vadd.f32 %v2790_v32, %v7485_v37 }
 0x8b4   :  { %v2670_v1 = vpop.f32.mrf.mxu0  ;;  %v2683_v30 = vpop.f32.mrf.mxu1 }
 0x8b5   :  { %v2671_v41 = vadd.f32 %v2670_v1, %v5685_v40 }
 0x8bb   :  { %v2696_v48 = vpop.f32.mrf.mxu2  ;;  %v2709_v42 = vpop.f32.mrf.mxu3 }
 0x8bc   :  { %v2672_v11 = vpop.f32.mrf.mxu0  ;;  %v2685_v60 = vpop.f32.mrf.mxu1 }
 0x8c3   :  { %v2698_v47 = vpop.f32.mrf.mxu2  ;;  %v2711_v0 = vpop.f32.mrf.mxu3 }
 0x8c4   :  { %v2726_v6 = vpop.f32.mrf.mxu0  ;;  %v2739_v2 = vpop.f32.mrf.mxu1 }
 0x8c5   :  { %v2727_v14 = vadd.f32 %v2726_v6, %v2671_v41 }
 0x8cb   :  { %v2752_v36 = vpop.f32.mrf.mxu2  ;;  %v2765_v43 = vpop.f32.mrf.mxu3 }
 0x8cc   :  { %v2728_v23 = vpop.f32.mrf.mxu0  ;;  %v2741_v18 = vpop.f32.mrf.mxu1 }
 0x8cd   :  { %v2684_v18 = vadd.f32 %v2683_v30, %v5687_v22  ;;  %v2791_v23 = vmul.f32 %v2786_v20, %v7484_v24  ;;  %v2697_v30 = vadd.f32 %v2696_v48, %v5693_v39 }
 0x8cf   :  { %v2740_v35 = vadd.f32 %v2739_v2, %v2684_v18  ;;  %v2795_v31 = vadd.f32 %v2791_v23, %v7540_v4  ;;  %v2753_v6 = vadd.f32 %v2752_v36, %v2697_v30  ;;  %v2710_v36 = vadd.f32 %v2709_v42, %v5698_v54 }
 0x8d1   :  { %v2766_v30 = vadd.f32 %v2765_v43, %v2710_v36  ;;  %v4743_v43 = vmov 12   ;;  %v8047_v36 = vld [vmem:[#allocation8_spill] sm:$0xff] }
 0x8d2   :  { %4399 = vset.pattern.permute.xlu2 %v4743_v43  ;;  %v8061_v43 = vld [vmem:[#allocation22_spill] sm:$0xff] }
 0x8d3   :  { %v2754_v59 = vpop.f32.mrf.mxu2  ;;  %v2767_v11 = vpop.f32.mrf.mxu3 }
 0x8d5   :  { %v2805_v60 = vpop.f32.mrf.mxu0  ;;  %v2818_v47 = vpop.f32.mrf.mxu1 }
 0x8d6   :  { %v2806_v0 = vadd.f32 %v2805_v60, %v2792_v52  ;;  %v2819_v55 = vadd.f32 %v2818_v47, %v2793_v53 }
 0x8d8   :  { %4616 = vtanh.f32 %v2806_v0 }
 0x8d9   :  { %4618 = vtanh.f32 %v2819_v55 }
 0x8da   :  { %4620 = vtanh.f32 %v2727_v14 }
 0x8db   :  { %4622 = vtanh.f32 %v2740_v35 }
 0x8dd   :  { %v2831_v59 = vpop.f32.mrf.mxu2  ;;  %v2844_v11 = vpop.f32.mrf.mxu3 }
 0x8de   :  { %v2832_v53 = vadd.f32 %v2831_v59, %v2794_v13  ;;  %v2807_v52 = vpop.f32.mrf.mxu0  ;;  %v2820_v1 = vpop.f32.mrf.mxu1  ;;  %v2845_v47 = vadd.f32 %v2844_v11, %v2795_v31 }
 0x8df   :  { %v4617_v60 = vpop.eup %4616 }
 0x8e0   :  { %4624 = vtanh.f32 %v2832_v53  ;;  %v4619_v20 = vpop.eup %4618  ;;  %v2849_v41 = vmul.f32 0.5, %v4617_v60 }
 0x8e1   :  { %v2852_v55 = vmul.f32 0.5, %v4619_v20  ;;  %4626 = vtanh.f32 %v2845_v47  ;;  %v4621_v32 = vpop.eup %4620 }
 0x8e2   :  { %v4623_v0 = vpop.eup %4622  ;;  %v2850_v18 = vadd.f32 0.5, %v2849_v41  ;;  %4628 = vtanh.f32 %v2753_v6  ;;  %v2770_v11 = vmul.f32 0.5, %v4621_v32 }
 0x8e3   :  { %v2853_v2 = vadd.f32 0.5, %v2852_v55  ;;  %v2773_v48 = vmul.f32 0.5, %v4623_v0  ;;  %v6782_v0 = vld [vmem:[%s7237_s0] sm:$0xff] }
 0x8e4   :  { %v2771_v60 = vadd.f32 0.5, %v2770_v11  ;;  %2988 = vperm.xlu2 %4399, %v6782_v0   ;;  %v8045_v11 = vld [vmem:[#allocation6_spill] sm:$0xff] }
 0x8e5   :  { %v2833_v23 = vpop.f32.mrf.mxu2  ;;  %v2846_v14 = vpop.f32.mrf.mxu3  ;;  %v2858_v59 = vmul.f32 %v2853_v2, %v6662_v61  ;;  %v2774_v47 = vadd.f32 0.5, %v2773_v48  ;;  %v8046_v48 = vld [vmem:[#allocation7_spill] sm:$0xff] }
 0x8e6   :  { %v4625_v13 = vpop.eup %4624 }
 0x8e7   :  { %v2859_v35 = vmul.f32 %v4625_v13, %v2850_v18  ;;  %v4627_v31 = vpop.eup %4626  ;;  %v2779_v61 = vmul.f32 %v2774_v47, %v6667_v27  ;;  %v8051_v47 = vld [vmem:[#allocation12_spill] sm:$0xff] }
 0x8e8   :  { %v4629_v52 = vpop.eup %4628  ;;  %v2856_v1 = vmul.f32 0.5, %v4627_v31  ;;  %v8044_v31 = vld [vmem:[#allocation5_spill] sm:$0xff] }
 0x8e9   :  { %v6767_v53 = vadd.f32 %v2859_v35, %v2858_v59  ;;  %v2780_v20 = vmul.f32 %v4629_v52, %v2771_v60  ;;  %v8042_v59 = vld [vmem:[#allocation3_spill] sm:$0xff]  ;;  %v8043_v35 = vld [vmem:[#allocation4_spill] sm:$0xff]  ;;  %v8048_v52 = vld [vmem:[#allocation9_spill] sm:$0xff] }
 0x8ea   :  { %v2857_v41 = vadd.f32 0.5, %v2856_v1  ;;  %v8049_v1 = vld [vmem:[#allocation10_spill] sm:$0xff]  ;;  %v8050_v60 = vld [vmem:[#allocation11_spill] sm:$0xff] }
 0x8eb   :  { %4630 = vtanh.f32 %v6767_v53  ;;  %v6772_v32 = vadd.f32 %v2780_v20, %v2779_v61  ;;  %v8053_v20 = vld [vmem:[#allocation14_spill] sm:$0xff]  ;;  %v8056_v61 = vld [vmem:[#allocation17_spill] sm:$0xff] }
 0x8ec   :  { %4632 = vtanh.f32 %v2766_v30  ;;  %v8052_v30 = vld [vmem:[#allocation13_spill] sm:$0xff] }
 0x8ed   :  { %4634 = vtanh.f32 %v6772_v32 }
 0x8f1   :  { %v4631_v6 = vpop.eup %4630 }
 0x8f2   :  { %v2862_v55 = vmul.f32 %v4631_v6, %v2857_v41  ;;  %v4633_v42 = vpop.eup %4632  ;;  %v8054_v41 = vld [vmem:[#allocation15_spill] sm:$0xff]  ;;  %v8055_v6 = vld [vmem:[#allocation16_spill] sm:$0xff] }
 0x8f3   :  { %v2777_v27 = vmul.f32 0.5, %v4633_v42  ;;  %v4635_v18 = vpop.eup %4634  ;;  %v8058_v42 = vld [vmem:[#allocation19_spill] sm:$0xff] }
 0x8f4   :  { %v2863_v2 = vpack.c.bf16 %v2862_v55, %v2862_v55  ;;  %v8057_v55 = vld [vmem:[#allocation18_spill] sm:$0xff] }
 0x8f5   :  { %v2778_v23 = vadd.f32 0.5, %v2777_v27  ;;  %v8060_v27 = vld [vmem:[#allocation21_spill] sm:$0xff] }
 0x8f6   :  { %2872 = vmatmul.bf16.vlgmr.msra.gmra.mxu0 %v2863_v2  ;;  %2885 = vmatmul.bf16.vlgmr.msra.gmra.mxu1 %v2863_v2 }
 0x8f7   :  { %2898 = vmatmul.bf16.vlgmr.msra.gmra.mxu2 %v2863_v2  ;;  %2911 = vmatmul.bf16.vlgmr.msra.gmra.mxu3 %v2863_v2  ;;  %v2783_v14 = vmul.f32 %v4635_v18, %v2778_v23  ;;  %v8062_v18 = vld [vmem:[#allocation23_spill] sm:$0xff]  ;;  %v8063_v23 = vld [vmem:[#allocation24_spill] sm:$0xff] }
 0x8f8   :  { %2999 = vmatpush.bf16.msra.mxu0 %v4816_v3  ;;  %3012 = vmatpush.bf16.msra.mxu1 %v4827_v7 }
 0x8f9   :  { %3025 = vmatpush.bf16.msra.mxu2 %v4829_v8  ;;  %3038 = vmatpush.bf16.msra.mxu3 %v4841_v12  ;;  %v2916_v13 = vpack.c.bf16 %v2783_v14, %v2783_v14  ;;  %v8064_v14 = vld [vmem:[#allocation25_spill] sm:$0xff] }
 0x8fc   :  { %3000 = vmatpush.bf16.msra.mxu0 %v4854_v16  ;;  %3013 = vmatpush.bf16.msra.mxu1 %v4856_v17 }
 0x8fd   :  { %3026 = vmatpush.bf16.msra.mxu2 %v4868_v21  ;;  %3039 = vmatpush.bf16.msra.mxu3 %v4879_v25 }
 0x900   :  { %3001 = vmatpush.bf16.msra.mxu0 %v4891_v29  ;;  %3014 = vmatpush.bf16.msra.mxu1 %v4904_v33 }
 0x901   :  { %3027 = vmatpush.bf16.msra.mxu2 %v4906_v34  ;;  %3040 = vmatpush.bf16.msra.mxu3 %v4918_v38 }
 0x904   :  { %3002 = vmatpush.bf16.msra.mxu0 %v4936_v44  ;;  %3015 = vmatpush.bf16.msra.mxu1 %v4940_v45 }
 0x905   :  { %3028 = vmatpush.bf16.msra.mxu2 %v4942_v46  ;;  %3041 = vmatpush.bf16.msra.mxu3 %v4954_v50 }
 0x906   :  { %4249 = vmatmul.msk.bf16.vlgmr.msrb.gmra.mxu0 %vm683_vm0, %v2916_v13  ;;  %4250 = vmatmul.msk.bf16.vlgmr.msrb.gmra.mxu1 %vm683_vm0, %v2916_v13 }
 0x907   :  { %4251 = vmatmul.msk.bf16.vlgmr.msrb.gmra.mxu2 %vm683_vm0, %v2916_v13  ;;  %4252 = vmatmul.msk.bf16.vlgmr.msrb.gmra.mxu3 %vm683_vm0, %v2916_v13  ;;  %v8065_v13 = vld [vmem:[#allocation26_spill] sm:$0xff] }
 0x908   :  { %3003 = vmatpush.bf16.msra.mxu0 %v4972_v56  ;;  %3016 = vmatpush.bf16.msra.mxu1 %v4976_v57 }
 0x909   :  { %3029 = vmatpush.bf16.msra.mxu2 %v4978_v58  ;;  %3042 = vmatpush.bf16.msra.mxu3 %v4990_v62 }
 0x90c   :  { %3004 = vmatpush.bf16.msra.mxu0 %v5008_v5  ;;  %3017 = vmatpush.bf16.msra.mxu1 %v5015_v9 }
 0x90d   :  { %3030 = vmatpush.bf16.msra.mxu2 %v5017_v10  ;;  %3043 = vmatpush.bf16.msra.mxu3 %v5029_v15 }
 0x910   :  { %3005 = vmatpush.bf16.msra.mxu0 %v5050_v26  ;;  %3018 = vmatpush.bf16.msra.mxu1 %v5058_v28 }
 0x911   :  { %3031 = vmatpush.bf16.msra.mxu2 %v7986_v19  ;;  %3044 = vmatpush.bf16.msra.mxu3 %v8042_v59 }
 0x914   :  { %3006 = vmatpush.bf16.msra.mxu0 %v8043_v35  ;;  %3019 = vmatpush.bf16.msra.mxu1 %v8044_v31 }
 0x915   :  { %3032 = vmatpush.bf16.msra.mxu2 %v8045_v11  ;;  %3045 = vmatpush.bf16.msra.mxu3 %v8046_v48 }
 0x917   :  { %3007 = vmatmul.bf16.vlgmr.msra.gmra.mxu0 %v2863_v2  ;;  %3020 = vmatmul.bf16.vlgmr.msra.gmra.mxu1 %v2863_v2 }
 0x918   :  { %3067 = vmatpush.bf16.msrb.mxu0 %v8047_v36  ;;  %3080 = vmatpush.bf16.msrb.mxu1 %v8048_v52 }
 0x919   :  { %3033 = vmatmul.bf16.vlgmr.msra.gmra.mxu2 %v2863_v2  ;;  %3046 = vmatmul.bf16.vlgmr.msra.gmra.mxu3 %v2863_v2  ;;  %v8059_v2 = vld [vmem:[#allocation20_spill] sm:$0xff] }
 0x91a   :  { %3093 = vmatpush.bf16.msrb.mxu2 %v8049_v1  ;;  %3106 = vmatpush.bf16.msrb.mxu3 %v8050_v60 }
 0x91c   :  { %3068 = vmatpush.bf16.msrb.mxu0 %v8051_v47  ;;  %3081 = vmatpush.bf16.msrb.mxu1 %v8052_v30 }
 0x91e   :  { %3094 = vmatpush.bf16.msrb.mxu2 %v8053_v20  ;;  %3107 = vmatpush.bf16.msrb.mxu3 %v8054_v41 }
 0x920   :  { %3069 = vmatpush.bf16.msrb.mxu0 %v8055_v6  ;;  %3082 = vmatpush.bf16.msrb.mxu1 %v8056_v61  ;;  %v8066_v6 = vld [vmem:[#allocation27_spill] sm:$0xff]  ;;  %v8067_v61 = vld [vmem:[#allocation28_spill] sm:$0xff] }
 0x922   :  { %3095 = vmatpush.bf16.msrb.mxu2 %v8057_v55  ;;  %3108 = vmatpush.bf16.msrb.mxu3 %v8058_v42  ;;  %v8068_v55 = vld [vmem:[#allocation29_spill] sm:$0xff]  ;;  %v8069_v42 = vld [vmem:[#allocation30_spill] sm:$0xff] }
 0x924   :  { %3070 = vmatpush.bf16.msrb.mxu0 %v8059_v2  ;;  %3083 = vmatpush.bf16.msrb.mxu1 %v8060_v27  ;;  %v8070_v2 = vld [vmem:[#allocation31_spill] sm:$0xff]  ;;  %v8071_v27 = vld [vmem:[#allocation32_spill] sm:$0xff] }
 0x926   :  { %3096 = vmatpush.bf16.msrb.mxu2 %v8061_v43  ;;  %3109 = vmatpush.bf16.msrb.mxu3 %v8062_v18  ;;  %v8072_v43 = vld [vmem:[#allocation33_spill] sm:$0xff]  ;;  %v8073_v18 = vld [vmem:[#allocation34_spill] sm:$0xff] }
 0x928   :  { %3071 = vmatpush.bf16.msrb.mxu0 %v8063_v23  ;;  %3084 = vmatpush.bf16.msrb.mxu1 %v8064_v14  ;;  %v8074_v23 = vld [vmem:[#allocation38_spill] sm:$0xff]  ;;  %v8075_v14 = vld [vmem:[#allocation39_spill] sm:$0xff] }
 0x92a   :  { %3097 = vmatpush.bf16.msrb.mxu2 %v8065_v13  ;;  %3110 = vmatpush.bf16.msrb.mxu3 %v8066_v6  ;;  %v8076_v13 = vld [vmem:[#allocation40_spill] sm:$0xff]  ;;  %v8077_v6 = vld [vmem:[#allocation43_spill] sm:$0xff] }
 0x92c   :  { %3072 = vmatpush.bf16.msrb.mxu0 %v8067_v61  ;;  %3085 = vmatpush.bf16.msrb.mxu1 %v8068_v55  ;;  %v8078_v61 = vld [vmem:[#allocation44_spill] sm:$0xff]  ;;  %v8079_v55 = vld [vmem:[#allocation41_spill] sm:$0xff] }
 0x92e   :  { %3098 = vmatpush.bf16.msrb.mxu2 %v8069_v42  ;;  %3111 = vmatpush.bf16.msrb.mxu3 %v8070_v2  ;;  %v8080_v42 = vld [vmem:[#allocation42_spill] sm:$0xff]  ;;  %v8081_v2 = vld [vmem:[#allocation45_spill] sm:$0xff] }
 0x930   :  { %3073 = vmatpush.bf16.msrb.mxu0 %v8071_v27  ;;  %3086 = vmatpush.bf16.msrb.mxu1 %v8072_v43  ;;  %v8082_v27 = vld [vmem:[#allocation46_spill] sm:$0xff]  ;;  %v8083_v43 = vld [vmem:[#allocation47_spill] sm:$0xff] }
 0x932   :  { %3099 = vmatpush.bf16.msrb.mxu2 %v8073_v18  ;;  %3112 = vmatpush.bf16.msrb.mxu3 %v8074_v23  ;;  %v8084_v18 = vld [vmem:[#allocation48_spill] sm:$0xff]  ;;  %v8085_v23 = vld [vmem:[#allocation50_spill] sm:$0xff] }
 0x934   :  { %3074 = vmatpush.bf16.msrb.mxu0 %v8075_v14  ;;  %3087 = vmatpush.bf16.msrb.mxu1 %v8076_v13  ;;  %v8086_v14 = vld [vmem:[#allocation51_spill] sm:$0xff]  ;;  %v8087_v13 = vld [vmem:[#allocation52_spill] sm:$0xff] }
 0x936   :  { %3100 = vmatpush.bf16.msrb.mxu2 %v8079_v55  ;;  %3113 = vmatpush.bf16.msrb.mxu3 %v8080_v42  ;;  %v8090_v55 = vld [vmem:[#allocation57_spill] sm:$0xff]  ;;  %v8091_v42 = vld [vmem:[#allocation58_spill] sm:$0xff] }
 0x938   :  { %3127 = vmatpush.bf16.msra.mxu0 %v8077_v6  ;;  %3140 = vmatpush.bf16.msra.mxu1 %v8078_v61  ;;  %v8088_v6 = vld [vmem:[#allocation53_spill] sm:$0xff]  ;;  %v8089_v61 = vld [vmem:[#allocation54_spill] sm:$0xff] }
 0x93a   :  { %3153 = vmatpush.bf16.msra.mxu2 %v8081_v2  ;;  %3166 = vmatpush.bf16.msra.mxu3 %v8082_v27  ;;  %v8092_v2 = vld [vmem:[#allocation59_spill] sm:$0xff]  ;;  %v8093_v27 = vld [vmem:[#allocation60_spill] sm:$0xff] }
 0x93c   :  { %3128 = vmatpush.bf16.msra.mxu0 %v8083_v43  ;;  %3141 = vmatpush.bf16.msra.mxu1 %v8084_v18  ;;  %v8094_v43 = vld [vmem:[#allocation61_spill] sm:$0xff] }
 0x93e   :  { %3154 = vmatpush.bf16.msra.mxu2 %v8085_v23  ;;  %3167 = vmatpush.bf16.msra.mxu3 %v8086_v14  ;;  %v2989_v60 = vpop.permute.xlu2 %2988 }
 0x93f   :  { %v2993_v19 = vmul.f32 %v2989_v60, %v7539_v51 }
 0x940   :  { %3129 = vmatpush.bf16.msra.mxu0 %v8087_v13  ;;  %3142 = vmatpush.bf16.msra.mxu1 %v8088_v6 }
 0x942   :  { %3155 = vmatpush.bf16.msra.mxu2 %v8089_v61  ;;  %3168 = vmatpush.bf16.msra.mxu3 %v8090_v55 }
 0x944   :  { %3130 = vmatpush.bf16.msra.mxu0 %v8091_v42  ;;  %3143 = vmatpush.bf16.msra.mxu1 %v8092_v2  ;;  %v8095_v2 = vld [vmem:[#allocation35_spill] sm:$0xff] }
 0x945   :  { %v2991_v36 = vmul.f32 %v2989_v60, %v8095_v2 }
 0x946   :  { %3156 = vmatpush.bf16.msra.mxu2 %v8093_v27  ;;  %3169 = vmatpush.bf16.msra.mxu3 %v8094_v43  ;;  %v8096_v27 = vld [vmem:[#allocation37_spill] sm:$0xff] }
 0x947   :  { %v2992_v48 = vmul.f32 %v2989_v60, %v8096_v27  ;;  %v2995_v43 = vadd.f32 %v2991_v36, %v7537_v49 }
 0x949   :  { %v2996_v11 = vadd.f32 %v2992_v48, %v7595_v63  ;;  %v2997_v48 = vadd.f32 %v2993_v19, %v7485_v37 }
 0x973   :  { %v2873_v18 = vpop.f32.mrf.mxu0  ;;  %v2886_v23 = vpop.f32.mrf.mxu1 }
 0x974   :  { %v2874_v59 = vadd.f32 %v2873_v18, %v5685_v40 }
 0x97a   :  { %v2899_v41 = vpop.f32.mrf.mxu2  ;;  %v2912_v14 = vpop.f32.mrf.mxu3 }
 0x97b   :  { %v2875_v20 = vpop.f32.mrf.mxu0  ;;  %v2888_v13 = vpop.f32.mrf.mxu1 }
 0x982   :  { %v2901_v30 = vpop.f32.mrf.mxu2  ;;  %v2914_v6 = vpop.f32.mrf.mxu3 }
 0x983   :  { %v2929_v47 = vpop.f32.mrf.mxu0  ;;  %v2942_v61 = vpop.f32.mrf.mxu1 }
 0x984   :  { %v2930_v27 = vadd.f32 %v2929_v47, %v2874_v59 }
 0x98a   :  { %v2955_v55 = vpop.f32.mrf.mxu2  ;;  %v2968_v1 = vpop.f32.mrf.mxu3 }
 0x98b   :  { %v2931_v42 = vpop.f32.mrf.mxu0  ;;  %v2944_v52 = vpop.f32.mrf.mxu1 }
 0x98c   :  { %v2887_v52 = vadd.f32 %v2886_v23, %v5687_v22  ;;  %v2994_v42 = vmul.f32 %v2989_v60, %v7484_v24  ;;  %v2900_v23 = vadd.f32 %v2899_v41, %v5693_v39 }
 0x98e   :  { %v2943_v2 = vadd.f32 %v2942_v61, %v2887_v52  ;;  %v2998_v36 = vadd.f32 %v2994_v42, %v7540_v4  ;;  %v2956_v47 = vadd.f32 %v2955_v55, %v2900_v23  ;;  %v2913_v55 = vadd.f32 %v2912_v14, %v5698_v54 }
 0x990   :  { %v2969_v23 = vadd.f32 %v2968_v1, %v2913_v55  ;;  %v4744_v1 = vmov 13   ;;  %v8103_v55 = vld [vmem:[#allocation8_spill] sm:$0xff] }
 0x991   :  { %4400 = vset.pattern.permute.xlu0 %v4744_v1  ;;  %v8117_v1 = vld [vmem:[#allocation22_spill] sm:$0xff] }
 0x992   :  { %v2957_v31 = vpop.f32.mrf.mxu2  ;;  %v2970_v20 = vpop.f32.mrf.mxu3  ;;  %3191 = vperm.xlu0 %4400, %v6782_v0  }
 0x994   :  { %v3008_v13 = vpop.f32.mrf.mxu0  ;;  %v3021_v30 = vpop.f32.mrf.mxu1 }
 0x995   :  { %v3009_v6 = vadd.f32 %v3008_v13, %v2995_v43  ;;  %v3022_v35 = vadd.f32 %v3021_v30, %v2996_v11 }
 0x997   :  { %4636 = vtanh.f32 %v3009_v6 }
 0x998   :  { %4638 = vtanh.f32 %v3022_v35 }
 0x999   :  { %4640 = vtanh.f32 %v2930_v27 }
 0x99a   :  { %4642 = vtanh.f32 %v2943_v2 }
 0x99c   :  { %v3034_v31 = vpop.f32.mrf.mxu2  ;;  %v3047_v20 = vpop.f32.mrf.mxu3 }
 0x99d   :  { %v3035_v11 = vadd.f32 %v3034_v31, %v2997_v48  ;;  %v3010_v43 = vpop.f32.mrf.mxu0  ;;  %v3023_v18 = vpop.f32.mrf.mxu1  ;;  %v3048_v30 = vadd.f32 %v3047_v20, %v2998_v36 }
 0x99e   :  { %v4637_v13 = vpop.eup %4636 }
 0x99f   :  { %4644 = vtanh.f32 %v3035_v11  ;;  %v4639_v60 = vpop.eup %4638  ;;  %v3052_v59 = vmul.f32 0.5, %v4637_v13 }
 0x9a0   :  { %v3055_v35 = vmul.f32 0.5, %v4639_v60  ;;  %4646 = vtanh.f32 %v3048_v30  ;;  %v4641_v19 = vpop.eup %4640 }
 0x9a1   :  { %v4643_v6 = vpop.eup %4642  ;;  %v3053_v52 = vadd.f32 0.5, %v3052_v59  ;;  %4648 = vtanh.f32 %v2956_v47  ;;  %v2973_v20 = vmul.f32 0.5, %v4641_v19 }
 0x9a2   :  { %v3056_v61 = vadd.f32 0.5, %v3055_v35  ;;  %v2976_v41 = vmul.f32 0.5, %v4643_v6 }
 0x9a3   :  { %v2974_v13 = vadd.f32 0.5, %v2973_v20  ;;  %v8101_v20 = vld [vmem:[#allocation6_spill] sm:$0xff] }
 0x9a4   :  { %v3036_v42 = vpop.f32.mrf.mxu2  ;;  %v3049_v27 = vpop.f32.mrf.mxu3  ;;  %v3061_v31 = vmul.f32 %v3056_v61, %v6767_v53  ;;  %v2977_v30 = vadd.f32 0.5, %v2976_v41  ;;  %v8102_v41 = vld [vmem:[#allocation7_spill] sm:$0xff] }
 0x9a5   :  { %v4645_v48 = vpop.eup %4644 }
 0x9a6   :  { %v3062_v2 = vmul.f32 %v4645_v48, %v3053_v52  ;;  %v4647_v36 = vpop.eup %4646  ;;  %v2982_v53 = vmul.f32 %v2977_v30, %v6772_v32  ;;  %v8097_v48 = vld [vmem:[#allocation2_spill] sm:$0xff]  ;;  %v8107_v30 = vld [vmem:[#allocation12_spill] sm:$0xff] }
 0x9a7   :  { %v4649_v43 = vpop.eup %4648  ;;  %v3059_v18 = vmul.f32 0.5, %v4647_v36  ;;  %v8100_v36 = vld [vmem:[#allocation5_spill] sm:$0xff] }
 0x9a8   :  { %v6877_v11 = vadd.f32 %v3062_v2, %v3061_v31  ;;  %v2983_v60 = vmul.f32 %v4649_v43, %v2974_v13  ;;  %v8098_v31 = vld [vmem:[#allocation3_spill] sm:$0xff]  ;;  %v8099_v2 = vld [vmem:[#allocation4_spill] sm:$0xff]  ;;  %v8104_v43 = vld [vmem:[#allocation9_spill] sm:$0xff] }
 0x9a9   :  { %v3060_v59 = vadd.f32 0.5, %v3059_v18  ;;  %v8105_v18 = vld [vmem:[#allocation10_spill] sm:$0xff]  ;;  %v8106_v13 = vld [vmem:[#allocation11_spill] sm:$0xff] }
 0x9aa   :  { %4650 = vtanh.f32 %v6877_v11  ;;  %v6882_v19 = vadd.f32 %v2983_v60, %v2982_v53  ;;  %v8109_v60 = vld [vmem:[#allocation14_spill] sm:$0xff]  ;;  %v8112_v53 = vld [vmem:[#allocation17_spill] sm:$0xff] }
 0x9ab   :  { %4652 = vtanh.f32 %v2969_v23  ;;  %v8108_v23 = vld [vmem:[#allocation13_spill] sm:$0xff] }
 0x9ac   :  { %4654 = vtanh.f32 %v6882_v19 }
 0x9b0   :  { %v4651_v47 = vpop.eup %4650 }
 0x9b1   :  { %v3065_v35 = vmul.f32 %v4651_v47, %v3060_v59  ;;  %v4653_v14 = vpop.eup %4652  ;;  %v8110_v59 = vld [vmem:[#allocation15_spill] sm:$0xff]  ;;  %v8111_v47 = vld [vmem:[#allocation16_spill] sm:$0xff] }
 0x9b2   :  { %v2980_v32 = vmul.f32 0.5, %v4653_v14  ;;  %v4655_v6 = vpop.eup %4654  ;;  %v8114_v14 = vld [vmem:[#allocation19_spill] sm:$0xff] }
 0x9b3   :  { %v3066_v61 = vpack.c.bf16 %v3065_v35, %v3065_v35  ;;  %v8113_v35 = vld [vmem:[#allocation18_spill] sm:$0xff] }
 0x9b4   :  { %v2981_v52 = vadd.f32 0.5, %v2980_v32  ;;  %v8116_v32 = vld [vmem:[#allocation21_spill] sm:$0xff] }
 0x9b5   :  { %3075 = vmatmul.bf16.vlgmr.msrb.gmra.mxu0 %v3066_v61  ;;  %3088 = vmatmul.bf16.vlgmr.msrb.gmra.mxu1 %v3066_v61 }
 0x9b6   :  { %3101 = vmatmul.bf16.vlgmr.msrb.gmra.mxu2 %v3066_v61  ;;  %3114 = vmatmul.bf16.vlgmr.msrb.gmra.mxu3 %v3066_v61  ;;  %v2986_v42 = vmul.f32 %v4655_v6, %v2981_v52  ;;  %v8118_v6 = vld [vmem:[#allocation23_spill] sm:$0xff]  ;;  %v8119_v52 = vld [vmem:[#allocation24_spill] sm:$0xff] }
 0x9b7   :  { %3202 = vmatpush.bf16.msrb.mxu0 %v4816_v3  ;;  %3215 = vmatpush.bf16.msrb.mxu1 %v4827_v7 }
 0x9b8   :  { %3228 = vmatpush.bf16.msrb.mxu2 %v4829_v8  ;;  %3241 = vmatpush.bf16.msrb.mxu3 %v4841_v12  ;;  %v3119_v27 = vpack.c.bf16 %v2986_v42, %v2986_v42  ;;  %v8120_v42 = vld [vmem:[#allocation25_spill] sm:$0xff] }
 0x9bb   :  { %3203 = vmatpush.bf16.msrb.mxu0 %v4854_v16  ;;  %3216 = vmatpush.bf16.msrb.mxu1 %v4856_v17 }
 0x9bc   :  { %3229 = vmatpush.bf16.msrb.mxu2 %v4868_v21  ;;  %3242 = vmatpush.bf16.msrb.mxu3 %v4879_v25 }
 0x9bf   :  { %3204 = vmatpush.bf16.msrb.mxu0 %v4891_v29  ;;  %3217 = vmatpush.bf16.msrb.mxu1 %v4904_v33 }
 0x9c0   :  { %3230 = vmatpush.bf16.msrb.mxu2 %v4906_v34  ;;  %3243 = vmatpush.bf16.msrb.mxu3 %v4918_v38 }
 0x9c3   :  { %3205 = vmatpush.bf16.msrb.mxu0 %v4936_v44  ;;  %3218 = vmatpush.bf16.msrb.mxu1 %v4940_v45 }
 0x9c4   :  { %3231 = vmatpush.bf16.msrb.mxu2 %v4942_v46  ;;  %3244 = vmatpush.bf16.msrb.mxu3 %v4954_v50 }
 0x9c5   :  { %4253 = vmatmul.msk.bf16.vlgmr.msra.gmra.mxu0 %vm683_vm0, %v3119_v27  ;;  %4254 = vmatmul.msk.bf16.vlgmr.msra.gmra.mxu1 %vm683_vm0, %v3119_v27 }
 0x9c6   :  { %4255 = vmatmul.msk.bf16.vlgmr.msra.gmra.mxu2 %vm683_vm0, %v3119_v27  ;;  %4256 = vmatmul.msk.bf16.vlgmr.msra.gmra.mxu3 %vm683_vm0, %v3119_v27  ;;  %v8121_v27 = vld [vmem:[#allocation26_spill] sm:$0xff] }
 0x9c7   :  { %3206 = vmatpush.bf16.msrb.mxu0 %v4972_v56  ;;  %3219 = vmatpush.bf16.msrb.mxu1 %v4976_v57 }
 0x9c8   :  { %3232 = vmatpush.bf16.msrb.mxu2 %v4978_v58  ;;  %3245 = vmatpush.bf16.msrb.mxu3 %v4990_v62 }
 0x9cb   :  { %3207 = vmatpush.bf16.msrb.mxu0 %v5008_v5  ;;  %3220 = vmatpush.bf16.msrb.mxu1 %v5015_v9 }
 0x9cc   :  { %3233 = vmatpush.bf16.msrb.mxu2 %v5017_v10  ;;  %3246 = vmatpush.bf16.msrb.mxu3 %v5029_v15 }
 0x9cf   :  { %3208 = vmatpush.bf16.msrb.mxu0 %v5050_v26  ;;  %3221 = vmatpush.bf16.msrb.mxu1 %v5058_v28 }
 0x9d0   :  { %3234 = vmatpush.bf16.msrb.mxu2 %v8097_v48  ;;  %3247 = vmatpush.bf16.msrb.mxu3 %v8098_v31 }
 0x9d3   :  { %3209 = vmatpush.bf16.msrb.mxu0 %v8099_v2  ;;  %3222 = vmatpush.bf16.msrb.mxu1 %v8100_v36 }
 0x9d4   :  { %3235 = vmatpush.bf16.msrb.mxu2 %v8101_v20  ;;  %3248 = vmatpush.bf16.msrb.mxu3 %v8102_v41 }
 0x9d6   :  { %3210 = vmatmul.bf16.vlgmr.msrb.gmra.mxu0 %v3066_v61  ;;  %3223 = vmatmul.bf16.vlgmr.msrb.gmra.mxu1 %v3066_v61 }
 0x9d7   :  { %3270 = vmatpush.bf16.msra.mxu0 %v8103_v55  ;;  %3283 = vmatpush.bf16.msra.mxu1 %v8104_v43 }
 0x9d8   :  { %3236 = vmatmul.bf16.vlgmr.msrb.gmra.mxu2 %v3066_v61  ;;  %3249 = vmatmul.bf16.vlgmr.msrb.gmra.mxu3 %v3066_v61  ;;  %v8115_v61 = vld [vmem:[#allocation20_spill] sm:$0xff] }
 0x9d9   :  { %3296 = vmatpush.bf16.msra.mxu2 %v8105_v18  ;;  %3309 = vmatpush.bf16.msra.mxu3 %v8106_v13 }
 0x9db   :  { %3271 = vmatpush.bf16.msra.mxu0 %v8107_v30  ;;  %3284 = vmatpush.bf16.msra.mxu1 %v8108_v23 }
 0x9dd   :  { %3297 = vmatpush.bf16.msra.mxu2 %v8109_v60  ;;  %3310 = vmatpush.bf16.msra.mxu3 %v8110_v59 }
 0x9df   :  { %3272 = vmatpush.bf16.msra.mxu0 %v8111_v47  ;;  %3285 = vmatpush.bf16.msra.mxu1 %v8112_v53  ;;  %v8122_v47 = vld [vmem:[#allocation27_spill] sm:$0xff]  ;;  %v8123_v53 = vld [vmem:[#allocation28_spill] sm:$0xff] }
 0x9e1   :  { %3298 = vmatpush.bf16.msra.mxu2 %v8113_v35  ;;  %3311 = vmatpush.bf16.msra.mxu3 %v8114_v14  ;;  %v8124_v35 = vld [vmem:[#allocation29_spill] sm:$0xff]  ;;  %v8125_v14 = vld [vmem:[#allocation30_spill] sm:$0xff] }
 0x9e3   :  { %3273 = vmatpush.bf16.msra.mxu0 %v8115_v61  ;;  %3286 = vmatpush.bf16.msra.mxu1 %v8116_v32  ;;  %v8126_v61 = vld [vmem:[#allocation31_spill] sm:$0xff]  ;;  %v8127_v32 = vld [vmem:[#allocation32_spill] sm:$0xff] }
 0x9e5   :  { %3299 = vmatpush.bf16.msra.mxu2 %v8117_v1  ;;  %3312 = vmatpush.bf16.msra.mxu3 %v8118_v6  ;;  %v8128_v1 = vld [vmem:[#allocation33_spill] sm:$0xff]  ;;  %v8129_v6 = vld [vmem:[#allocation34_spill] sm:$0xff] }
 0x9e7   :  { %3274 = vmatpush.bf16.msra.mxu0 %v8119_v52  ;;  %3287 = vmatpush.bf16.msra.mxu1 %v8120_v42  ;;  %v8130_v52 = vld [vmem:[#allocation38_spill] sm:$0xff]  ;;  %v8131_v42 = vld [vmem:[#allocation39_spill] sm:$0xff] }
 0x9e9   :  { %3300 = vmatpush.bf16.msra.mxu2 %v8121_v27  ;;  %3313 = vmatpush.bf16.msra.mxu3 %v8122_v47  ;;  %v8132_v27 = vld [vmem:[#allocation40_spill] sm:$0xff]  ;;  %v8133_v47 = vld [vmem:[#allocation43_spill] sm:$0xff] }
 0x9eb   :  { %3275 = vmatpush.bf16.msra.mxu0 %v8123_v53  ;;  %3288 = vmatpush.bf16.msra.mxu1 %v8124_v35  ;;  %v8134_v53 = vld [vmem:[#allocation44_spill] sm:$0xff]  ;;  %v8135_v35 = vld [vmem:[#allocation41_spill] sm:$0xff] }
 0x9ed   :  { %3301 = vmatpush.bf16.msra.mxu2 %v8125_v14  ;;  %3314 = vmatpush.bf16.msra.mxu3 %v8126_v61  ;;  %v8136_v14 = vld [vmem:[#allocation42_spill] sm:$0xff]  ;;  %v8137_v61 = vld [vmem:[#allocation45_spill] sm:$0xff] }
 0x9ef   :  { %3276 = vmatpush.bf16.msra.mxu0 %v8127_v32  ;;  %3289 = vmatpush.bf16.msra.mxu1 %v8128_v1  ;;  %v8138_v32 = vld [vmem:[#allocation46_spill] sm:$0xff]  ;;  %v8139_v1 = vld [vmem:[#allocation47_spill] sm:$0xff] }
 0x9f1   :  { %3302 = vmatpush.bf16.msra.mxu2 %v8129_v6  ;;  %3315 = vmatpush.bf16.msra.mxu3 %v8130_v52  ;;  %v8140_v6 = vld [vmem:[#allocation48_spill] sm:$0xff]  ;;  %v8141_v52 = vld [vmem:[#allocation50_spill] sm:$0xff] }
 0x9f3   :  { %3277 = vmatpush.bf16.msra.mxu0 %v8131_v42  ;;  %3290 = vmatpush.bf16.msra.mxu1 %v8132_v27  ;;  %v8142_v42 = vld [vmem:[#allocation51_spill] sm:$0xff]  ;;  %v8143_v27 = vld [vmem:[#allocation52_spill] sm:$0xff] }
 0x9f5   :  { %3303 = vmatpush.bf16.msra.mxu2 %v8135_v35  ;;  %3316 = vmatpush.bf16.msra.mxu3 %v8136_v14  ;;  %v8146_v35 = vld [vmem:[#allocation57_spill] sm:$0xff]  ;;  %v8147_v14 = vld [vmem:[#allocation58_spill] sm:$0xff] }
 0x9f7   :  { %3330 = vmatpush.bf16.msrb.mxu0 %v8133_v47  ;;  %3343 = vmatpush.bf16.msrb.mxu1 %v8134_v53  ;;  %v8144_v47 = vld [vmem:[#allocation53_spill] sm:$0xff]  ;;  %v8145_v53 = vld [vmem:[#allocation54_spill] sm:$0xff] }
 0x9f9   :  { %3356 = vmatpush.bf16.msrb.mxu2 %v8137_v61  ;;  %3369 = vmatpush.bf16.msrb.mxu3 %v8138_v32  ;;  %v8148_v61 = vld [vmem:[#allocation59_spill] sm:$0xff]  ;;  %v8149_v32 = vld [vmem:[#allocation60_spill] sm:$0xff] }
 0x9fb   :  { %3331 = vmatpush.bf16.msrb.mxu0 %v8139_v1  ;;  %3344 = vmatpush.bf16.msrb.mxu1 %v8140_v6  ;;  %v8150_v1 = vld [vmem:[#allocation61_spill] sm:$0xff] }
 0x9fd   :  { %3357 = vmatpush.bf16.msrb.mxu2 %v8141_v52  ;;  %3370 = vmatpush.bf16.msrb.mxu3 %v8142_v42 }
 0x9ff   :  { %3332 = vmatpush.bf16.msrb.mxu0 %v8143_v27  ;;  %3345 = vmatpush.bf16.msrb.mxu1 %v8144_v47 }
 0xa01   :  { %3358 = vmatpush.bf16.msrb.mxu2 %v8145_v53  ;;  %3371 = vmatpush.bf16.msrb.mxu3 %v8146_v35 }
 0xa03   :  { %3333 = vmatpush.bf16.msrb.mxu0 %v8147_v14  ;;  %3346 = vmatpush.bf16.msrb.mxu1 %v8148_v61  ;;  %v8151_v61 = vld [vmem:[#allocation35_spill] sm:$0xff] }
 0xa04   :  { %v3192_v13 = vpop.permute.xlu0 %3191 }
 0xa05   :  { %3359 = vmatpush.bf16.msrb.mxu2 %v8149_v32  ;;  %3372 = vmatpush.bf16.msrb.mxu3 %v8150_v1  ;;  %v3194_v55 = vmul.f32 %v3192_v13, %v8151_v61  ;;  %v8152_v32 = vld [vmem:[#allocation37_spill] sm:$0xff]  ;;  %v3196_v48 = vmul.f32 %v3192_v13, %v7539_v51 }
 0xa06   :  { %v3195_v41 = vmul.f32 %v3192_v13, %v8152_v32 }
 0xa07   :  { %v3198_v1 = vadd.f32 %v3194_v55, %v7537_v49 }
 0xa08   :  { %v3199_v20 = vadd.f32 %v3195_v41, %v7595_v63  ;;  %v3200_v41 = vadd.f32 %v3196_v48, %v7485_v37 }
 0xa32   :  { %v3076_v6 = vpop.f32.mrf.mxu0  ;;  %v3089_v52 = vpop.f32.mrf.mxu1 }
 0xa33   :  { %v3077_v31 = vadd.f32 %v3076_v6, %v5685_v40 }
 0xa39   :  { %v3102_v59 = vpop.f32.mrf.mxu2  ;;  %v3115_v42 = vpop.f32.mrf.mxu3 }
 0xa3a   :  { %v3078_v60 = vpop.f32.mrf.mxu0  ;;  %v3091_v27 = vpop.f32.mrf.mxu1 }
 0xa41   :  { %v3104_v23 = vpop.f32.mrf.mxu2  ;;  %v3117_v47 = vpop.f32.mrf.mxu3 }
 0xa42   :  { %v3132_v30 = vpop.f32.mrf.mxu0  ;;  %v3145_v53 = vpop.f32.mrf.mxu1 }
 0xa43   :  { %v3133_v32 = vadd.f32 %v3132_v30, %v3077_v31 }
 0xa49   :  { %v3158_v35 = vpop.f32.mrf.mxu2  ;;  %v3171_v18 = vpop.f32.mrf.mxu3 }
 0xa4a   :  { %v3134_v14 = vpop.f32.mrf.mxu0  ;;  %v3147_v43 = vpop.f32.mrf.mxu1 }
 0xa4b   :  { %v3090_v43 = vadd.f32 %v3089_v52, %v5687_v22  ;;  %v3197_v14 = vmul.f32 %v3192_v13, %v7484_v24  ;;  %v3103_v52 = vadd.f32 %v3102_v59, %v5693_v39 }
 0xa4d   :  { %v3146_v61 = vadd.f32 %v3145_v53, %v3090_v43  ;;  %v3201_v55 = vadd.f32 %v3197_v14, %v7540_v4  ;;  %v3159_v30 = vadd.f32 %v3158_v35, %v3103_v52  ;;  %v3116_v35 = vadd.f32 %v3115_v42, %v5698_v54 }
 0xa4f   :  { %v3172_v52 = vadd.f32 %v3171_v18, %v3116_v35  ;;  %v4745_v18 = vmov 14   ;;  %v8160_v35 = vld [vmem:[#allocation9_spill] sm:$0xff] }
 0xa50   :  { %4401 = vset.pattern.permute.xlu1 %v4745_v18  ;;  %v8174_v18 = vld [vmem:[#allocation23_spill] sm:$0xff] }
 0xa51   :  { %v3160_v36 = vpop.f32.mrf.mxu2  ;;  %v3173_v60 = vpop.f32.mrf.mxu3  ;;  %3394 = vperm.xlu1 %4401, %v6782_v0  }
 0xa53   :  { %v3211_v27 = vpop.f32.mrf.mxu0  ;;  %v3224_v23 = vpop.f32.mrf.mxu1 }
 0xa54   :  { %v3212_v47 = vadd.f32 %v3211_v27, %v3198_v1  ;;  %v3225_v2 = vadd.f32 %v3224_v23, %v3199_v20 }
 0xa56   :  { %4656 = vtanh.f32 %v3212_v47 }
 0xa57   :  { %4658 = vtanh.f32 %v3225_v2 }
 0xa58   :  { %4660 = vtanh.f32 %v3133_v32 }
 0xa59   :  { %4662 = vtanh.f32 %v3146_v61 }
 0xa5b   :  { %v3237_v36 = vpop.f32.mrf.mxu2  ;;  %v3250_v60 = vpop.f32.mrf.mxu3 }
 0xa5c   :  { %v3238_v20 = vadd.f32 %v3237_v36, %v3200_v41  ;;  %v3213_v1 = vpop.f32.mrf.mxu0  ;;  %v3226_v6 = vpop.f32.mrf.mxu1  ;;  %v3251_v23 = vadd.f32 %v3250_v60, %v3201_v55 }
 0xa5d   :  { %v4657_v27 = vpop.eup %4656 }
 0xa5e   :  { %4664 = vtanh.f32 %v3238_v20  ;;  %v4659_v13 = vpop.eup %4658  ;;  %v3255_v31 = vmul.f32 0.5, %v4657_v27 }
 0xa5f   :  { %v3258_v2 = vmul.f32 0.5, %v4659_v13  ;;  %4666 = vtanh.f32 %v3251_v23  ;;  %v4661_v48 = vpop.eup %4660 }
 0xa60   :  { %v4663_v47 = vpop.eup %4662  ;;  %v3256_v43 = vadd.f32 0.5, %v3255_v31  ;;  %4668 = vtanh.f32 %v3159_v30  ;;  %v3176_v60 = vmul.f32 0.5, %v4661_v48 }
 0xa61   :  { %v3259_v53 = vadd.f32 0.5, %v3258_v2  ;;  %v3179_v59 = vmul.f32 0.5, %v4663_v47 }
 0xa62   :  { %v3177_v27 = vadd.f32 0.5, %v3176_v60  ;;  %v8158_v60 = vld [vmem:[#allocation7_spill] sm:$0xff] }
 0xa63   :  { %v3239_v14 = vpop.f32.mrf.mxu2  ;;  %v3252_v32 = vpop.f32.mrf.mxu3  ;;  %v3264_v36 = vmul.f32 %v3259_v53, %v6877_v11  ;;  %v3180_v23 = vadd.f32 0.5, %v3179_v59  ;;  %v8159_v59 = vld [vmem:[#allocation8_spill] sm:$0xff] }
 0xa64   :  { %v4665_v41 = vpop.eup %4664  ;;  %v8153_v32 = vld [vmem:[#allocation2_spill] sm:$0xff] }
 0xa65   :  { %v3265_v61 = vmul.f32 %v4665_v41, %v3256_v43  ;;  %v4667_v55 = vpop.eup %4666  ;;  %v3185_v11 = vmul.f32 %v3180_v23, %v6882_v19  ;;  %v8154_v41 = vld [vmem:[#allocation3_spill] sm:$0xff]  ;;  %v8164_v23 = vld [vmem:[#allocation13_spill] sm:$0xff] }
 0xa66   :  { %v4669_v1 = vpop.eup %4668  ;;  %v3262_v6 = vmul.f32 0.5, %v4667_v55  ;;  %v8157_v55 = vld [vmem:[#allocation6_spill] sm:$0xff] }
 0xa67   :  { %v6982_v20 = vadd.f32 %v3265_v61, %v3264_v36  ;;  %v3186_v13 = vmul.f32 %v4669_v1, %v3177_v27  ;;  %v8155_v36 = vld [vmem:[#allocation4_spill] sm:$0xff]  ;;  %v8156_v61 = vld [vmem:[#allocation5_spill] sm:$0xff]  ;;  %v8161_v1 = vld [vmem:[#allocation10_spill] sm:$0xff] }
 0xa68   :  { %v3263_v31 = vadd.f32 0.5, %v3262_v6  ;;  %v8162_v6 = vld [vmem:[#allocation11_spill] sm:$0xff]  ;;  %v8163_v27 = vld [vmem:[#allocation12_spill] sm:$0xff] }
 0xa69   :  { %4670 = vtanh.f32 %v6982_v20  ;;  %v6987_v48 = vadd.f32 %v3186_v13, %v3185_v11  ;;  %v8166_v13 = vld [vmem:[#allocation15_spill] sm:$0xff]  ;;  %v8169_v11 = vld [vmem:[#allocation18_spill] sm:$0xff] }
 0xa6a   :  { %4672 = vtanh.f32 %v3172_v52  ;;  %v8165_v52 = vld [vmem:[#allocation14_spill] sm:$0xff] }
 0xa6b   :  { %4674 = vtanh.f32 %v6987_v48 }
 0xa6f   :  { %v4671_v30 = vpop.eup %4670 }
 0xa70   :  { %v3268_v2 = vmul.f32 %v4671_v30, %v3263_v31  ;;  %v4673_v42 = vpop.eup %4672  ;;  %v8167_v31 = vld [vmem:[#allocation16_spill] sm:$0xff]  ;;  %v8168_v30 = vld [vmem:[#allocation17_spill] sm:$0xff] }
 0xa71   :  { %v3183_v19 = vmul.f32 0.5, %v4673_v42  ;;  %v4675_v47 = vpop.eup %4674  ;;  %v8172_v42 = vld [vmem:[#allocation21_spill] sm:$0xff] }
 0xa72   :  { %v3269_v53 = vpack.c.bf16 %v3268_v2, %v3268_v2  ;;  %v8170_v2 = vld [vmem:[#allocation19_spill] sm:$0xff] }
 0xa73   :  { %v3184_v43 = vadd.f32 0.5, %v3183_v19  ;;  %v8173_v19 = vld [vmem:[#allocation22_spill] sm:$0xff] }
 0xa74   :  { %3278 = vmatmul.bf16.vlgmr.msra.gmra.mxu0 %v3269_v53  ;;  %3291 = vmatmul.bf16.vlgmr.msra.gmra.mxu1 %v3269_v53 }
 0xa75   :  { %3304 = vmatmul.bf16.vlgmr.msra.gmra.mxu2 %v3269_v53  ;;  %3317 = vmatmul.bf16.vlgmr.msra.gmra.mxu3 %v3269_v53  ;;  %v3189_v14 = vmul.f32 %v4675_v47, %v3184_v43  ;;  %v8175_v47 = vld [vmem:[#allocation24_spill] sm:$0xff]  ;;  %v8176_v43 = vld [vmem:[#allocation25_spill] sm:$0xff] }
 0xa76   :  { %3405 = vmatpush.bf16.msra.mxu0 %v4816_v3  ;;  %3418 = vmatpush.bf16.msra.mxu1 %v4827_v7 }
 0xa77   :  { %3431 = vmatpush.bf16.msra.mxu2 %v4829_v8  ;;  %3444 = vmatpush.bf16.msra.mxu3 %v4841_v12  ;;  %v3322_v0 = vpack.c.bf16 %v3189_v14, %v3189_v14  ;;  %v8177_v14 = vld [vmem:[#allocation26_spill] sm:$0xff] }
 0xa7a   :  { %3406 = vmatpush.bf16.msra.mxu0 %v4854_v16  ;;  %3419 = vmatpush.bf16.msra.mxu1 %v4856_v17 }
 0xa7b   :  { %3432 = vmatpush.bf16.msra.mxu2 %v4868_v21  ;;  %3445 = vmatpush.bf16.msra.mxu3 %v4879_v25 }
 0xa7e   :  { %3407 = vmatpush.bf16.msra.mxu0 %v4891_v29  ;;  %3420 = vmatpush.bf16.msra.mxu1 %v4904_v33 }
 0xa7f   :  { %3433 = vmatpush.bf16.msra.mxu2 %v4906_v34  ;;  %3446 = vmatpush.bf16.msra.mxu3 %v4918_v38 }
 0xa82   :  { %3408 = vmatpush.bf16.msra.mxu0 %v4936_v44  ;;  %3421 = vmatpush.bf16.msra.mxu1 %v4940_v45 }
 0xa83   :  { %3434 = vmatpush.bf16.msra.mxu2 %v4942_v46  ;;  %3447 = vmatpush.bf16.msra.mxu3 %v4954_v50 }
 0xa84   :  { %4257 = vmatmul.msk.bf16.vlgmr.msrb.gmra.mxu0 %vm683_vm0, %v3322_v0  ;;  %4258 = vmatmul.msk.bf16.vlgmr.msrb.gmra.mxu1 %vm683_vm0, %v3322_v0 }
 0xa85   :  { %4259 = vmatmul.msk.bf16.vlgmr.msrb.gmra.mxu2 %vm683_vm0, %v3322_v0  ;;  %4260 = vmatmul.msk.bf16.vlgmr.msrb.gmra.mxu3 %vm683_vm0, %v3322_v0  ;;  %v8178_v0 = vld [vmem:[#allocation27_spill] sm:$0xff] }
 0xa86   :  { %3409 = vmatpush.bf16.msra.mxu0 %v4972_v56  ;;  %3422 = vmatpush.bf16.msra.mxu1 %v4976_v57 }
 0xa87   :  { %3435 = vmatpush.bf16.msra.mxu2 %v4978_v58  ;;  %3448 = vmatpush.bf16.msra.mxu3 %v4990_v62 }
 0xa8a   :  { %3410 = vmatpush.bf16.msra.mxu0 %v5008_v5  ;;  %3423 = vmatpush.bf16.msra.mxu1 %v5015_v9 }
 0xa8b   :  { %3436 = vmatpush.bf16.msra.mxu2 %v5017_v10  ;;  %3449 = vmatpush.bf16.msra.mxu3 %v5029_v15 }
 0xa8e   :  { %3411 = vmatpush.bf16.msra.mxu0 %v5050_v26  ;;  %3424 = vmatpush.bf16.msra.mxu1 %v5058_v28 }
 0xa8f   :  { %3437 = vmatpush.bf16.msra.mxu2 %v8153_v32  ;;  %3450 = vmatpush.bf16.msra.mxu3 %v8154_v41 }
 0xa92   :  { %3412 = vmatpush.bf16.msra.mxu0 %v8155_v36  ;;  %3425 = vmatpush.bf16.msra.mxu1 %v8156_v61 }
 0xa93   :  { %3438 = vmatpush.bf16.msra.mxu2 %v8157_v55  ;;  %3451 = vmatpush.bf16.msra.mxu3 %v8158_v60 }
 0xa95   :  { %3413 = vmatmul.bf16.vlgmr.msra.gmra.mxu0 %v3269_v53  ;;  %3426 = vmatmul.bf16.vlgmr.msra.gmra.mxu1 %v3269_v53 }
 0xa96   :  { %3473 = vmatpush.bf16.msrb.mxu0 %v8159_v59  ;;  %3486 = vmatpush.bf16.msrb.mxu1 %v8160_v35 }
 0xa97   :  { %3439 = vmatmul.bf16.vlgmr.msra.gmra.mxu2 %v3269_v53  ;;  %3452 = vmatmul.bf16.vlgmr.msra.gmra.mxu3 %v3269_v53  ;;  %v8171_v53 = vld [vmem:[#allocation20_spill] sm:$0xff] }
 0xa98   :  { %3499 = vmatpush.bf16.msrb.mxu2 %v8161_v1  ;;  %3512 = vmatpush.bf16.msrb.mxu3 %v8162_v6 }
 0xa9a   :  { %3474 = vmatpush.bf16.msrb.mxu0 %v8163_v27  ;;  %3487 = vmatpush.bf16.msrb.mxu1 %v8164_v23 }
 0xa9c   :  { %3500 = vmatpush.bf16.msrb.mxu2 %v8165_v52  ;;  %3513 = vmatpush.bf16.msrb.mxu3 %v8166_v13 }
 0xa9e   :  { %3475 = vmatpush.bf16.msrb.mxu0 %v8167_v31  ;;  %3488 = vmatpush.bf16.msrb.mxu1 %v8168_v30  ;;  %v8179_v30 = vld [vmem:[#allocation28_spill] sm:$0xff] }
 0xaa0   :  { %3501 = vmatpush.bf16.msrb.mxu2 %v8169_v11  ;;  %3514 = vmatpush.bf16.msrb.mxu3 %v8170_v2  ;;  %v8180_v11 = vld [vmem:[#allocation29_spill] sm:$0xff]  ;;  %v8181_v2 = vld [vmem:[#allocation30_spill] sm:$0xff] }
 0xaa2   :  { %3476 = vmatpush.bf16.msrb.mxu0 %v8171_v53  ;;  %3489 = vmatpush.bf16.msrb.mxu1 %v8172_v42  ;;  %v8182_v53 = vld [vmem:[#allocation31_spill] sm:$0xff]  ;;  %v8183_v42 = vld [vmem:[#allocation32_spill] sm:$0xff] }
 0xaa4   :  { %3502 = vmatpush.bf16.msrb.mxu2 %v8173_v19  ;;  %3515 = vmatpush.bf16.msrb.mxu3 %v8174_v18  ;;  %v8184_v19 = vld [vmem:[#allocation33_spill] sm:$0xff]  ;;  %v8185_v18 = vld [vmem:[#allocation34_spill] sm:$0xff] }
 0xaa6   :  { %3477 = vmatpush.bf16.msrb.mxu0 %v8175_v47  ;;  %3490 = vmatpush.bf16.msrb.mxu1 %v8176_v43  ;;  %v8186_v47 = vld [vmem:[#allocation38_spill] sm:$0xff]  ;;  %v8187_v43 = vld [vmem:[#allocation39_spill] sm:$0xff] }
 0xaa8   :  { %3503 = vmatpush.bf16.msrb.mxu2 %v8177_v14  ;;  %3516 = vmatpush.bf16.msrb.mxu3 %v8178_v0  ;;  %v8188_v14 = vld [vmem:[#allocation40_spill] sm:$0xff]  ;;  %v8189_v0 = vld [vmem:[#allocation43_spill] sm:$0xff] }
 0xaaa   :  { %3478 = vmatpush.bf16.msrb.mxu0 %v8179_v30  ;;  %3491 = vmatpush.bf16.msrb.mxu1 %v8180_v11  ;;  %v8190_v30 = vld [vmem:[#allocation44_spill] sm:$0xff]  ;;  %v8191_v11 = vld [vmem:[#allocation41_spill] sm:$0xff] }
 0xaac   :  { %3504 = vmatpush.bf16.msrb.mxu2 %v8181_v2  ;;  %3517 = vmatpush.bf16.msrb.mxu3 %v8182_v53  ;;  %v8192_v2 = vld [vmem:[#allocation42_spill] sm:$0xff]  ;;  %v8193_v53 = vld [vmem:[#allocation45_spill] sm:$0xff] }
 0xaae   :  { %3479 = vmatpush.bf16.msrb.mxu0 %v8183_v42  ;;  %3492 = vmatpush.bf16.msrb.mxu1 %v8184_v19  ;;  %v8194_v42 = vld [vmem:[#allocation46_spill] sm:$0xff]  ;;  %v8195_v19 = vld [vmem:[#allocation47_spill] sm:$0xff] }
 0xab0   :  { %3505 = vmatpush.bf16.msrb.mxu2 %v8185_v18  ;;  %3518 = vmatpush.bf16.msrb.mxu3 %v8186_v47  ;;  %v8196_v18 = vld [vmem:[#allocation48_spill] sm:$0xff]  ;;  %v8197_v47 = vld [vmem:[#allocation50_spill] sm:$0xff] }
 0xab2   :  { %3480 = vmatpush.bf16.msrb.mxu0 %v8187_v43  ;;  %3493 = vmatpush.bf16.msrb.mxu1 %v8188_v14  ;;  %v8198_v43 = vld [vmem:[#allocation51_spill] sm:$0xff]  ;;  %v8199_v14 = vld [vmem:[#allocation52_spill] sm:$0xff] }
 0xab4   :  { %3506 = vmatpush.bf16.msrb.mxu2 %v8191_v11  ;;  %3519 = vmatpush.bf16.msrb.mxu3 %v8192_v2  ;;  %v8202_v11 = vld [vmem:[#allocation57_spill] sm:$0xff]  ;;  %v8203_v2 = vld [vmem:[#allocation58_spill] sm:$0xff] }
 0xab6   :  { %3533 = vmatpush.bf16.msra.mxu0 %v8189_v0  ;;  %3546 = vmatpush.bf16.msra.mxu1 %v8190_v30  ;;  %v8200_v0 = vld [vmem:[#allocation53_spill] sm:$0xff]  ;;  %v8201_v30 = vld [vmem:[#allocation54_spill] sm:$0xff] }
 0xab8   :  { %3559 = vmatpush.bf16.msra.mxu2 %v8193_v53  ;;  %3572 = vmatpush.bf16.msra.mxu3 %v8194_v42  ;;  %v8204_v53 = vld [vmem:[#allocation59_spill] sm:$0xff]  ;;  %v8205_v42 = vld [vmem:[#allocation60_spill] sm:$0xff] }
 0xaba   :  { %3534 = vmatpush.bf16.msra.mxu0 %v8195_v19  ;;  %3547 = vmatpush.bf16.msra.mxu1 %v8196_v18  ;;  %v8206_v19 = vld [vmem:[#allocation61_spill] sm:$0xff] }
 0xabc   :  { %3560 = vmatpush.bf16.msra.mxu2 %v8197_v47  ;;  %3573 = vmatpush.bf16.msra.mxu3 %v8198_v43 }
 0xabe   :  { %3535 = vmatpush.bf16.msra.mxu0 %v8199_v14  ;;  %3548 = vmatpush.bf16.msra.mxu1 %v8200_v0 }
 0xac0   :  { %3561 = vmatpush.bf16.msra.mxu2 %v8201_v30  ;;  %3574 = vmatpush.bf16.msra.mxu3 %v8202_v11 }
 0xac2   :  { %3536 = vmatpush.bf16.msra.mxu0 %v8203_v2  ;;  %3549 = vmatpush.bf16.msra.mxu1 %v8204_v53  ;;  %v8207_v53 = vld [vmem:[#allocation35_spill] sm:$0xff] }
 0xac3   :  { %v3395_v27 = vpop.permute.xlu1 %3394 }
 0xac4   :  { %3562 = vmatpush.bf16.msra.mxu2 %v8205_v42  ;;  %3575 = vmatpush.bf16.msra.mxu3 %v8206_v19  ;;  %v3397_v35 = vmul.f32 %v3395_v27, %v8207_v53  ;;  %v8208_v42 = vld [vmem:[#allocation37_spill] sm:$0xff]  ;;  %v3399_v41 = vmul.f32 %v3395_v27, %v7539_v51 }
 0xac5   :  { %v3398_v59 = vmul.f32 %v3395_v27, %v8208_v42 }
 0xac6   :  { %v3401_v19 = vadd.f32 %v3397_v35, %v7537_v49 }
 0xac7   :  { %v3402_v60 = vadd.f32 %v3398_v59, %v7595_v63  ;;  %v3403_v59 = vadd.f32 %v3399_v41, %v7485_v37 }
 0xaf1   :  { %v3279_v18 = vpop.f32.mrf.mxu0  ;;  %v3292_v47 = vpop.f32.mrf.mxu1 }
 0xaf2   :  { %v3280_v36 = vadd.f32 %v3279_v18, %v5685_v40 }
 0xaf8   :  { %v3305_v31 = vpop.f32.mrf.mxu2  ;;  %v3318_v43 = vpop.f32.mrf.mxu3 }
 0xaf9   :  { %v3281_v13 = vpop.f32.mrf.mxu0  ;;  %v3294_v14 = vpop.f32.mrf.mxu1 }
 0xb00   :  { %v3307_v52 = vpop.f32.mrf.mxu2  ;;  %v3320_v0 = vpop.f32.mrf.mxu3 }
 0xb01   :  { %v3335_v23 = vpop.f32.mrf.mxu0  ;;  %v3348_v30 = vpop.f32.mrf.mxu1 }
 0xb02   :  { %v3336_v42 = vadd.f32 %v3335_v23, %v3280_v36 }
 0xb08   :  { %v3361_v11 = vpop.f32.mrf.mxu2  ;;  %v3374_v6 = vpop.f32.mrf.mxu3 }
 0xb09   :  { %v3337_v2 = vpop.f32.mrf.mxu0  ;;  %v3350_v1 = vpop.f32.mrf.mxu1 }
 0xb0a   :  { %v3293_v1 = vadd.f32 %v3292_v47, %v5687_v22  ;;  %v3400_v2 = vmul.f32 %v3395_v27, %v7484_v24  ;;  %v3306_v47 = vadd.f32 %v3305_v31, %v5693_v39 }
 0xb0c   :  { %v3349_v53 = vadd.f32 %v3348_v30, %v3293_v1  ;;  %v3404_v35 = vadd.f32 %v3400_v2, %v7540_v4  ;;  %v3362_v23 = vadd.f32 %v3361_v11, %v3306_v47  ;;  %v3319_v11 = vadd.f32 %v3318_v43, %v5698_v54 }
 0xb0e   :  { %v3375_v47 = vadd.f32 %v3374_v6, %v3319_v11  ;;  %v4746_v6 = vmov 15   ;;  %v8241_v11 = vld [vmem:[#allocation38_spill] sm:$0xff] }
 0xb0f   :  { %4402 = vset.pattern.permute.xlu2 %v4746_v6  ;;  %4403 = vset.pattern.permute.xlu0 %v4746_v6  ;;  %v8255_v6 = vld [vmem:[#allocation53_spill] sm:$0xff] }
 0xb10   :  { %v3363_v55 = vpop.f32.mrf.mxu2  ;;  %v3376_v13 = vpop.f32.mrf.mxu3 }
 0xb12   :  { %v3414_v14 = vpop.f32.mrf.mxu0  ;;  %v3427_v52 = vpop.f32.mrf.mxu1 }
 0xb13   :  { %v3415_v0 = vadd.f32 %v3414_v14, %v3401_v19  ;;  %v3428_v61 = vadd.f32 %v3427_v52, %v3402_v60 }
 0xb15   :  { %4676 = vtanh.f32 %v3415_v0 }
 0xb16   :  { %4678 = vtanh.f32 %v3428_v61 }
 0xb17   :  { %4680 = vtanh.f32 %v3336_v42 }
 0xb18   :  { %4682 = vtanh.f32 %v3349_v53 }
 0xb1a   :  { %v3440_v55 = vpop.f32.mrf.mxu2  ;;  %v3453_v13 = vpop.f32.mrf.mxu3 }
 0xb1b   :  { %v3441_v60 = vadd.f32 %v3440_v55, %v3403_v59  ;;  %v3416_v19 = vpop.f32.mrf.mxu0  ;;  %v3429_v18 = vpop.f32.mrf.mxu1  ;;  %v3454_v52 = vadd.f32 %v3453_v13, %v3404_v35 }
 0xb1c   :  { %v4677_v14 = vpop.eup %4676 }
 0xb1d   :  { %4684 = vtanh.f32 %v3441_v60  ;;  %v4679_v27 = vpop.eup %4678  ;;  %v3458_v36 = vmul.f32 0.5, %v4677_v14 }
 0xb1e   :  { %v3461_v61 = vmul.f32 0.5, %v4679_v27  ;;  %4686 = vtanh.f32 %v3454_v52  ;;  %v4681_v41 = vpop.eup %4680 }
 0xb1f   :  { %v4683_v0 = vpop.eup %4682  ;;  %v3459_v1 = vadd.f32 0.5, %v3458_v36  ;;  %4688 = vtanh.f32 %v3362_v23  ;;  %v3379_v13 = vmul.f32 0.5, %v4681_v41 }
 0xb20   :  { %v3462_v30 = vadd.f32 0.5, %v3461_v61  ;;  %v3382_v31 = vmul.f32 0.5, %v4683_v0  ;;  %v4730_v0 = vld [vmem:[%s7237_s0] sm:$0xff] }
 0xb21   :  { %v3380_v14 = vadd.f32 0.5, %v3379_v13  ;;  %3597 = vperm.xlu2 %4402, %v4730_v0   ;;  %v8239_v13 = vld [vmem:[#allocation33_spill] sm:$0xff]  ;;  %v8256_v0 = vld [vmem:[#allocation54_spill] sm:$0xff] }
 0xb22   :  { %v3442_v2 = vpop.f32.mrf.mxu2  ;;  %v3455_v42 = vpop.f32.mrf.mxu3  ;;  %v3467_v55 = vmul.f32 %v3462_v30, %v6982_v20  ;;  %v3383_v52 = vadd.f32 0.5, %v3382_v31  ;;  %v8240_v31 = vld [vmem:[#allocation34_spill] sm:$0xff] }
 0xb23   :  { %v4685_v59 = vpop.eup %4684  ;;  %v8233_v2 = vld [vmem:[#allocation27_spill] sm:$0xff]  ;;  %v8234_v42 = vld [vmem:[#allocation28_spill] sm:$0xff] }
 0xb24   :  { %v3468_v53 = vmul.f32 %v4685_v59, %v3459_v1  ;;  %v4687_v35 = vpop.eup %4686  ;;  %v3388_v20 = vmul.f32 %v3383_v52, %v6987_v48  ;;  %v8232_v1 = vld [vmem:[#allocation26_spill] sm:$0xff]  ;;  %v8235_v59 = vld [vmem:[#allocation29_spill] sm:$0xff]  ;;  %v8245_v52 = vld [vmem:[#allocation44_spill] sm:$0xff] }
 0xb25   :  { %v4689_v19 = vpop.eup %4688  ;;  %v3465_v18 = vmul.f32 0.5, %v4687_v35  ;;  %v8238_v35 = vld [vmem:[#allocation32_spill] sm:$0xff] }
 0xb26   :  { %v7087_v60 = vadd.f32 %v3468_v53, %v3467_v55  ;;  %v3389_v27 = vmul.f32 %v4689_v19, %v3380_v14  ;;  %v8236_v55 = vld [vmem:[#allocation30_spill] sm:$0xff]  ;;  %v8237_v53 = vld [vmem:[#allocation31_spill] sm:$0xff] }
 0xb27   :  { %v3466_v36 = vadd.f32 0.5, %v3465_v18  ;;  %v8242_v19 = vld [vmem:[#allocation39_spill] sm:$0xff]  ;;  %v8243_v18 = vld [vmem:[#allocation40_spill] sm:$0xff] }
 0xb28   :  { %4690 = vtanh.f32 %v7087_v60  ;;  %v7092_v41 = vadd.f32 %v3389_v27, %v3388_v20  ;;  %v8244_v14 = vld [vmem:[#allocation43_spill] sm:$0xff]  ;;  %v8247_v27 = vld [vmem:[#allocation42_spill] sm:$0xff] }
 0xb29   :  { %4692 = vtanh.f32 %v3375_v47  ;;  %v8246_v47 = vld [vmem:[#allocation41_spill] sm:$0xff]  ;;  %v8250_v20 = vld [vmem:[#allocation47_spill] sm:$0xff] }
 0xb2a   :  { %4694 = vtanh.f32 %v7092_v41 }
 0xb2e   :  { %v4691_v23 = vpop.eup %4690 }
 0xb2f   :  { %v3471_v61 = vmul.f32 %v4691_v23, %v3466_v36  ;;  %v4693_v43 = vpop.eup %4692  ;;  %v8248_v36 = vld [vmem:[#allocation45_spill] sm:$0xff]  ;;  %v8249_v23 = vld [vmem:[#allocation46_spill] sm:$0xff] }
 0xb30   :  { %v3386_v48 = vmul.f32 0.5, %v4693_v43  ;;  %v8253_v43 = vld [vmem:[#allocation51_spill] sm:$0xff] }
 0xb31   :  { %v3472_v30 = vpack.c.bf16 %v3471_v61, %v3471_v61  ;;  %v8251_v61 = vld [vmem:[#allocation48_spill] sm:$0xff] }
 0xb33   :  { %3481 = vmatmul.bf16.vlgmr.msrb.gmra.mxu0 %v3472_v30  ;;  %3494 = vmatmul.bf16.vlgmr.msrb.gmra.mxu1 %v3472_v30 }
 0xb34   :  { %3507 = vmatmul.bf16.vlgmr.msrb.gmra.mxu2 %v3472_v30  ;;  %3520 = vmatmul.bf16.vlgmr.msrb.gmra.mxu3 %v3472_v30 }
 0xb35   :  { %3608 = vmatpush.bf16.msrb.mxu0 %v4816_v3  ;;  %3621 = vmatpush.bf16.msrb.mxu1 %v4827_v7  ;;  %v4695_v3 = vpop.eup %4694  ;;  %v3387_v7 = vadd.f32 0.5, %v3386_v48  ;;  %v8254_v48 = vld [vmem:[#allocation52_spill] sm:$0xff] }
 0xb36   :  { %3634 = vmatpush.bf16.msrb.mxu2 %v4829_v8  ;;  %3647 = vmatpush.bf16.msrb.mxu3 %v4841_v12 }
 0xb37   :  { %v3392_v8 = vmul.f32 %v4695_v3, %v3387_v7  ;;  %v8257_v3 = vld [vmem:[#allocation57_spill] sm:$0xff]  ;;  %v8258_v7 = vld [vmem:[#allocation58_spill] sm:$0xff] }
 0xb39   :  { %3609 = vmatpush.bf16.msrb.mxu0 %v4854_v16  ;;  %3622 = vmatpush.bf16.msrb.mxu1 %v4856_v17  ;;  %v3525_v12 = vpack.c.bf16 %v3392_v8, %v3392_v8  ;;  %v8209_v16 = vld [vmem:[#allocation3_spill] sm:$0xff]  ;;  %v8210_v17 = vld [vmem:[#allocation4_spill] sm:$0xff] }
 0xb3a   :  { %3635 = vmatpush.bf16.msrb.mxu2 %v4868_v21  ;;  %3648 = vmatpush.bf16.msrb.mxu3 %v4879_v25  ;;  %v8211_v21 = vld [vmem:[#allocation5_spill] sm:$0xff]  ;;  %v8212_v25 = vld [vmem:[#allocation6_spill] sm:$0xff]  ;;  %v8259_v8 = vld [vmem:[#allocation59_spill] sm:$0xff] }
 0xb3d   :  { %3610 = vmatpush.bf16.msrb.mxu0 %v4891_v29  ;;  %3623 = vmatpush.bf16.msrb.mxu1 %v4904_v33  ;;  %v8213_v29 = vld [vmem:[#allocation7_spill] sm:$0xff]  ;;  %v8214_v33 = vld [vmem:[#allocation8_spill] sm:$0xff] }
 0xb3e   :  { %3636 = vmatpush.bf16.msrb.mxu2 %v4906_v34  ;;  %3649 = vmatpush.bf16.msrb.mxu3 %v4918_v38  ;;  %v8215_v34 = vld [vmem:[#allocation9_spill] sm:$0xff]  ;;  %v8216_v38 = vld [vmem:[#allocation10_spill] sm:$0xff] }
 0xb41   :  { %3611 = vmatpush.bf16.msrb.mxu0 %v4936_v44  ;;  %3624 = vmatpush.bf16.msrb.mxu1 %v4940_v45  ;;  %v8217_v44 = vld [vmem:[#allocation11_spill] sm:$0xff]  ;;  %v8218_v45 = vld [vmem:[#allocation12_spill] sm:$0xff] }
 0xb42   :  { %3637 = vmatpush.bf16.msrb.mxu2 %v4942_v46  ;;  %3650 = vmatpush.bf16.msrb.mxu3 %v4954_v50  ;;  %v8219_v46 = vld [vmem:[#allocation13_spill] sm:$0xff]  ;;  %v8220_v50 = vld [vmem:[#allocation14_spill] sm:$0xff] }
 0xb43   :  { %4261 = vmatmul.msk.bf16.vlgmr.msra.gmra.mxu0 %vm683_vm0, %v3525_v12  ;;  %4262 = vmatmul.msk.bf16.vlgmr.msra.gmra.mxu1 %vm683_vm0, %v3525_v12 }
 0xb44   :  { %4263 = vmatmul.msk.bf16.vlgmr.msra.gmra.mxu2 %vm683_vm0, %v3525_v12  ;;  %4264 = vmatmul.msk.bf16.vlgmr.msra.gmra.mxu3 %vm683_vm0, %v3525_v12  ;;  %v8260_v12 = vld [vmem:[#allocation60_spill] sm:$0xff] }
 0xb45   :  { %3612 = vmatpush.bf16.msrb.mxu0 %v4972_v56  ;;  %3625 = vmatpush.bf16.msrb.mxu1 %v4976_v57  ;;  %v8221_v56 = vld [vmem:[#allocation15_spill] sm:$0xff]  ;;  %v8222_v57 = vld [vmem:[#allocation16_spill] sm:$0xff] }
 0xb46   :  { %3638 = vmatpush.bf16.msrb.mxu2 %v4978_v58  ;;  %3651 = vmatpush.bf16.msrb.mxu3 %v4990_v62  ;;  %v8223_v58 = vld [vmem:[#allocation17_spill] sm:$0xff]  ;;  %v8224_v62 = vld [vmem:[#allocation18_spill] sm:$0xff] }
 0xb49   :  { %3613 = vmatpush.bf16.msrb.mxu0 %v5008_v5  ;;  %3626 = vmatpush.bf16.msrb.mxu1 %v5015_v9  ;;  %v8225_v5 = vld [vmem:[#allocation19_spill] sm:$0xff]  ;;  %v8226_v9 = vld [vmem:[#allocation20_spill] sm:$0xff] }
 0xb4a   :  { %3639 = vmatpush.bf16.msrb.mxu2 %v5017_v10  ;;  %3652 = vmatpush.bf16.msrb.mxu3 %v5029_v15  ;;  %v8227_v10 = vld [vmem:[#allocation21_spill] sm:$0xff]  ;;  %v8228_v15 = vld [vmem:[#allocation22_spill] sm:$0xff] }
 0xb4d   :  { %3614 = vmatpush.bf16.msrb.mxu0 %v5050_v26  ;;  %3627 = vmatpush.bf16.msrb.mxu1 %v5058_v28  ;;  %v8229_v26 = vld [vmem:[#allocation23_spill] sm:$0xff]  ;;  %v8230_v28 = vld [vmem:[#allocation24_spill] sm:$0xff] }
 0xb4e   :  { %3640 = vmatpush.bf16.msrb.mxu2 %v8153_v32  ;;  %3653 = vmatpush.bf16.msrb.mxu3 %v8209_v16  ;;  %v8231_v32 = vld [vmem:[#allocation25_spill] sm:$0xff] }
 0xb4f   :  { %v8261_v16 = vld [vmem:[#allocation61_spill] sm:$0xff] }
 0xb51   :  { %3615 = vmatpush.bf16.msrb.mxu0 %v8210_v17  ;;  %3628 = vmatpush.bf16.msrb.mxu1 %v8211_v21 }
 0xb52   :  { %3641 = vmatpush.bf16.msrb.mxu2 %v8212_v25  ;;  %3654 = vmatpush.bf16.msrb.mxu3 %v8213_v29 }
 0xb54   :  { %3616 = vmatmul.bf16.vlgmr.msrb.gmra.mxu0 %v3472_v30  ;;  %3629 = vmatmul.bf16.vlgmr.msrb.gmra.mxu1 %v3472_v30 }
 0xb55   :  { %3676 = vmatpush.bf16.msra.mxu0 %v8214_v33  ;;  %3689 = vmatpush.bf16.msra.mxu1 %v8215_v34 }
 0xb56   :  { %3642 = vmatmul.bf16.vlgmr.msrb.gmra.mxu2 %v3472_v30  ;;  %3655 = vmatmul.bf16.vlgmr.msrb.gmra.mxu3 %v3472_v30  ;;  %v8252_v30 = vld [vmem:[#allocation50_spill] sm:$0xff] }
 0xb57   :  { %3702 = vmatpush.bf16.msra.mxu2 %v8216_v38  ;;  %3715 = vmatpush.bf16.msra.mxu3 %v8217_v44 }
 0xb59   :  { %3677 = vmatpush.bf16.msra.mxu0 %v8218_v45  ;;  %3690 = vmatpush.bf16.msra.mxu1 %v8219_v46 }
 0xb5b   :  { %3703 = vmatpush.bf16.msra.mxu2 %v8220_v50  ;;  %3716 = vmatpush.bf16.msra.mxu3 %v8221_v56 }
 0xb5d   :  { %3678 = vmatpush.bf16.msra.mxu0 %v8222_v57  ;;  %3691 = vmatpush.bf16.msra.mxu1 %v8223_v58 }
 0xb5f   :  { %3704 = vmatpush.bf16.msra.mxu2 %v8224_v62  ;;  %3717 = vmatpush.bf16.msra.mxu3 %v8225_v5  ;;  %v8262_v5 = vld [vmem:[#allocation35_spill] sm:$0xff] }
 0xb61   :  { %3679 = vmatpush.bf16.msra.mxu0 %v8226_v9  ;;  %3692 = vmatpush.bf16.msra.mxu1 %v8227_v10  ;;  %v8263_v10 = vld [vmem:[#allocation37_spill] sm:$0xff] }
 0xb63   :  { %3705 = vmatpush.bf16.msra.mxu2 %v8228_v15  ;;  %3718 = vmatpush.bf16.msra.mxu3 %v8229_v26 }
 0xb65   :  { %3680 = vmatpush.bf16.msra.mxu0 %v8230_v28  ;;  %3693 = vmatpush.bf16.msra.mxu1 %v8231_v32 }
 0xb67   :  { %3706 = vmatpush.bf16.msra.mxu2 %v8232_v1  ;;  %3719 = vmatpush.bf16.msra.mxu3 %v8233_v2 }
 0xb69   :  { %3681 = vmatpush.bf16.msra.mxu0 %v8234_v42  ;;  %3694 = vmatpush.bf16.msra.mxu1 %v8235_v59 }
 0xb6b   :  { %3707 = vmatpush.bf16.msra.mxu2 %v8236_v55  ;;  %3720 = vmatpush.bf16.msra.mxu3 %v8237_v53 }
 0xb6d   :  { %3682 = vmatpush.bf16.msra.mxu0 %v8238_v35  ;;  %3695 = vmatpush.bf16.msra.mxu1 %v8239_v13 }
 0xb6f   :  { %3708 = vmatpush.bf16.msra.mxu2 %v8240_v31  ;;  %3721 = vmatpush.bf16.msra.mxu3 %v8241_v11 }
 0xb71   :  { %3683 = vmatpush.bf16.msra.mxu0 %v8242_v19  ;;  %3696 = vmatpush.bf16.msra.mxu1 %v8243_v18 }
 0xb73   :  { %3709 = vmatpush.bf16.msra.mxu2 %v8246_v47  ;;  %3722 = vmatpush.bf16.msra.mxu3 %v8247_v27 }
 0xb75   :  { %3736 = vmatpush.bf16.msrb.mxu0 %v8244_v14  ;;  %3749 = vmatpush.bf16.msrb.mxu1 %v8245_v52 }
 0xb77   :  { %3762 = vmatpush.bf16.msrb.mxu2 %v8248_v36  ;;  %3775 = vmatpush.bf16.msrb.mxu3 %v8249_v23 }
 0xb79   :  { %3737 = vmatpush.bf16.msrb.mxu0 %v8250_v20  ;;  %3750 = vmatpush.bf16.msrb.mxu1 %v8251_v61 }
 0xb7b   :  { %3763 = vmatpush.bf16.msrb.mxu2 %v8252_v30  ;;  %3776 = vmatpush.bf16.msrb.mxu3 %v8253_v43  ;;  %v3598_v50 = vpop.permute.xlu2 %3597 }
 0xb7c   :  { %v3600_v9 = vmul.f32 %v3598_v50, %v8262_v5  ;;  %v3601_v15 = vmul.f32 %v3598_v50, %v8263_v10  ;;  %v3602_v35 = vmul.f32 %v3598_v50, %v7539_v51  ;;  %v3603_v31 = vmul.f32 %v3598_v50, %v7484_v24 }
 0xb7d   :  { %3738 = vmatpush.bf16.msrb.mxu0 %v8254_v48  ;;  %3751 = vmatpush.bf16.msrb.mxu1 %v8255_v6 }
 0xb7e   :  { %v3604_v26 = vadd.f32 %v3600_v9, %v7537_v49  ;;  %v3605_v28 = vadd.f32 %v3601_v15, %v7595_v63  ;;  %v3606_v49 = vadd.f32 %v3602_v35, %v7485_v37  ;;  %v3607_v18 = vadd.f32 %v3603_v31, %v7540_v4  ;;  %v4367_v35 = vld [vmem:[%s7244_s7] sm:$0xff] }
 0xb7f   :  { %3764 = vmatpush.bf16.msrb.mxu2 %v8256_v0  ;;  %3777 = vmatpush.bf16.msrb.mxu3 %v8257_v3 }
 0xb81   :  { %3739 = vmatpush.bf16.msrb.mxu0 %v8258_v7  ;;  %3752 = vmatpush.bf16.msrb.mxu1 %v8259_v8 }
 0xb83   :  { %3765 = vmatpush.bf16.msrb.mxu2 %v8260_v12  ;;  %3778 = vmatpush.bf16.msrb.mxu3 %v8261_v16 }
 0xbb0   :  { %v3482_v17 = vpop.f32.mrf.mxu0  ;;  %v3495_v21 = vpop.f32.mrf.mxu1 }
 0xbb1   :  { %v3483_v53 = vadd.f32 %v3482_v17, %v5685_v40  ;;  %v3496_v13 = vadd.f32 %v3495_v21, %v5687_v22 }
 0xbb7   :  { %v3508_v25 = vpop.f32.mrf.mxu2  ;;  %v3521_v29 = vpop.f32.mrf.mxu3 }
 0xbb8   :  { %v3484_v33 = vpop.f32.mrf.mxu0  ;;  %v3497_v34 = vpop.f32.mrf.mxu1  ;;  %v3509_v23 = vadd.f32 %v3508_v25, %v5693_v39  ;;  %v3522_v25 = vadd.f32 %v3521_v29, %v5698_v54 }
 0xbbf   :  { %v3510_v38 = vpop.f32.mrf.mxu2  ;;  %v3523_v44 = vpop.f32.mrf.mxu3 }
 0xbc0   :  { %v3538_v45 = vpop.f32.mrf.mxu0  ;;  %v3551_v46 = vpop.f32.mrf.mxu1 }
 0xbc1   :  { %v3539_v11 = vadd.f32 %v3538_v45, %v3483_v53  ;;  %v3552_v19 = vadd.f32 %v3551_v46, %v3496_v13  ;;  %v4368_v53 = vld [vmem:[%s7244_s7 + $0x8] sm:$0xff] }
 0xbc7   :  { %v3564_v56 = vpop.f32.mrf.mxu2  ;;  %v3577_v57 = vpop.f32.mrf.mxu3 }
 0xbc8   :  { %v3540_v58 = vpop.f32.mrf.mxu0  ;;  %v3553_v62 = vpop.f32.mrf.mxu1  ;;  %v3565_v61 = vadd.f32 %v3564_v56, %v3509_v23  ;;  %v3578_v45 = vadd.f32 %v3577_v57, %v3522_v25 }
 0xbcf   :  { %v3566_v32 = vpop.f32.mrf.mxu2  ;;  %v3579_v1 = vpop.f32.mrf.mxu3 }
 0xbd0   :  { %v4370_v32 = vld [vmem:[%s7244_s7 + $0x18] sm:$0xff]  ;;  %v4369_v1 = vld [vmem:[%s7244_s7 + $0x10] sm:$0xff] }
 0xbd1   :  { %v3617_v2 = vpop.f32.mrf.mxu0  ;;  %v3630_v42 = vpop.f32.mrf.mxu1 }
 0xbd2   :  { %v3618_v59 = vadd.f32 %v3617_v2, %v3604_v26  ;;  %v3631_v55 = vadd.f32 %v3630_v42, %v3605_v28 }
 0xbd4   :  { %4696 = vtanh.f32 %v3618_v59 }
 0xbd5   :  { %4698 = vtanh.f32 %v3631_v55 }
 0xbd6   :  { %4700 = vtanh.f32 %v3539_v11 }
 0xbd7   :  { %4702 = vtanh.f32 %v3552_v19 }
 0xbd9   :  { %v3643_v63 = vpop.f32.mrf.mxu2  ;;  %v3656_v14 = vpop.f32.mrf.mxu3 }
 0xbda   :  { %v3644_v52 = vadd.f32 %v3643_v63, %v3606_v49  ;;  %v3619_v47 = vpop.f32.mrf.mxu0  ;;  %v3632_v27 = vpop.f32.mrf.mxu1  ;;  %v3657_v51 = vadd.f32 %v3656_v14, %v3607_v18  ;;  %v3854_v18 = vld [vmem:[%s7245_s9 + $0x8] sm:$0xff]  ;;  %v3853_v14 = vld [vmem:[%s7245_s9] sm:$0xff] }
 0xbdb   :  { %v4697_v36 = vpop.eup %4696 }
 0xbdc   :  { %4704 = vtanh.f32 %v3644_v52  ;;  %v4699_v24 = vpop.eup %4698  ;;  %v3661_v20 = vmul.f32 0.5, %v4697_v36 }
 0xbdd   :  { %v3664_v30 = vmul.f32 0.5, %v4699_v24  ;;  %4706 = vtanh.f32 %v3657_v51  ;;  %v4701_v37 = vpop.eup %4700 }
 0xbde   :  { %v4703_v48 = vpop.eup %4702  ;;  %v3662_v4 = vadd.f32 0.5, %v3661_v20  ;;  %4708 = vtanh.f32 %v3565_v61  ;;  %v3582_v16 = vmul.f32 0.5, %v4701_v37 }
 0xbdf   :  { %v3665_v43 = vadd.f32 0.5, %v3664_v30  ;;  %v3585_v17 = vmul.f32 0.5, %v4703_v48 }
 0xbe0   :  { %v3583_v38 = vadd.f32 0.5, %v3582_v16 }
 0xbe1   :  { %v3645_v6 = vpop.f32.mrf.mxu2  ;;  %v3658_v0 = vpop.f32.mrf.mxu3  ;;  %v3670_v7 = vmul.f32 %v3665_v43, %v7087_v60  ;;  %v3586_v44 = vadd.f32 0.5, %v3585_v17 }
 0xbe2   :  { %v4705_v3 = vpop.eup %4704 }
 0xbe3   :  { %v3671_v8 = vmul.f32 %v4705_v3, %v3662_v4  ;;  %v4707_v12 = vpop.eup %4706  ;;  %v3591_v58 = vmul.f32 %v3586_v44, %v7092_v41 }
 0xbe4   :  { %v4709_v33 = vpop.eup %4708  ;;  %v3668_v34 = vmul.f32 0.5, %v4707_v12 }
 0xbe5   :  { %v3672_v21 = vadd.f32 %v3671_v8, %v3670_v7  ;;  %v3592_v46 = vmul.f32 %v4709_v33, %v3583_v38  ;;  %v4404_v33 = vld [vmem:[%s7243_s8] ss:$0 sm:$0xff] }
 0xbe6   :  { %v3669_v50 = vadd.f32 0.5, %v3668_v34 }
 0xbe7   :  { %4710 = vtanh.f32 %v3672_v21  ;;  %v7196_v62 = vadd.f32 %v3592_v46, %v3591_v58  ;;  %v4405_v46 = vld [vmem:[%s7246_s10] ss:$0 sm:$0xff] }
 0xbe8   :  { %4712 = vtanh.f32 %v3578_v45 }
 0xbe9   :  { %4714 = vtanh.f32 %v7196_v62 }
 0xbed   :  { %v4711_v56 = vpop.eup %4710 }
 0xbee   :  { %v3674_v60 = vmul.f32 %v4711_v56, %v3669_v50  ;;  %v4713_v9 = vpop.eup %4712 }
 0xbef   :  { %v3589_v29 = vmul.f32 0.5, %v4713_v9  ;;  %v4715_v10 = vpop.eup %4714 }
 0xbf0   :  { %v3675_v5 = vpack.c.bf16 %v3674_v60, %v3674_v60 }
 0xbf1   :  { %v3590_v57 = vadd.f32 0.5, %v3589_v29 }
 0xbf2   :  { %3684 = vmatmul.bf16.vlgmr.msra.gmra.mxu0 %v3675_v5  ;;  %3697 = vmatmul.bf16.vlgmr.msra.gmra.mxu1 %v3675_v5 }
 0xbf3   :  { %3710 = vmatmul.bf16.vlgmr.msra.gmra.mxu2 %v3675_v5  ;;  %3723 = vmatmul.bf16.vlgmr.msra.gmra.mxu3 %v3675_v5  ;;  %v3595_v15 = vmul.f32 %v4715_v10, %v3590_v57 }
 0xbf4   :  { %3843 = vmatpush.bf16.msra.mxu0 %v4370_v32  ;;  %3877 = vmatpush.msra.mxu1 %v3854_v18 }
 0xbf5   :  { %v3728_v26 = vpack.c.bf16 %v3595_v15, %v3595_v15 }
 0xbf6   :  { %3878 = vmatpush.msra.mxu1 %v3853_v14 }
 0xbf8   :  { %3844 = vmatpush.bf16.msra.mxu0 %v4369_v1 }
 0xbfc   :  { %3845 = vmatpush.bf16.msra.mxu0 %v4368_v53 }
 0xc00   :  { %3846 = vmatpush.bf16.msra.mxu0 %v4367_v35 }
 0xc02   :  { %4265 = vmatmul.msk.bf16.vlgmr.msrb.gmra.mxu0 %vm683_vm0, %v3728_v26  ;;  %4266 = vmatmul.msk.bf16.vlgmr.msrb.gmra.mxu1 %vm683_vm0, %v3728_v26 }
 0xc03   :  { %4267 = vmatmul.msk.bf16.vlgmr.msrb.gmra.mxu2 %vm683_vm0, %v3728_v26  ;;  %4268 = vmatmul.msk.bf16.vlgmr.msrb.gmra.mxu3 %vm683_vm0, %v3728_v26 }
 0xc6f   :  { %v3685_v41 = vpop.f32.mrf.mxu0  ;;  %v3698_v28 = vpop.f32.mrf.mxu1 }
 0xc70   :  { %v3686_v13 = vadd.f32 %v3685_v41, %v5685_v40  ;;  %v3699_v31 = vadd.f32 %v3698_v28, %v5687_v22 }
 0xc76   :  { %v3711_v2 = vpop.f32.mrf.mxu2  ;;  %v3724_v42 = vpop.f32.mrf.mxu3 }
 0xc77   :  { %v3687_v59 = vpop.f32.mrf.mxu0  ;;  %v3700_v55 = vpop.f32.mrf.mxu1  ;;  %v3712_v22 = vadd.f32 %v3711_v2, %v5693_v39  ;;  %v3725_v40 = vadd.f32 %v3724_v42, %v5698_v54 }
 0xc7e   :  { %v3713_v11 = vpop.f32.mrf.mxu2  ;;  %v3726_v19 = vpop.f32.mrf.mxu3 }
 0xc7f   :  { %v3741_v49 = vpop.f32.mrf.mxu0  ;;  %v3754_v63 = vpop.f32.mrf.mxu1 }
 0xc80   :  { %v3742_v52 = vadd.f32 %v3741_v49, %v3686_v13  ;;  %v3755_v47 = vadd.f32 %v3754_v63, %v3699_v31 }
 0xc82   :  { %4716 = vtanh.f32 %v3742_v52 }
 0xc83   :  { %4718 = vtanh.f32 %v3755_v47 }
 0xc86   :  { %v3767_v27 = vpop.f32.mrf.mxu2  ;;  %v3780_v36 = vpop.f32.mrf.mxu3 }
 0xc87   :  { %v3768_v51 = vadd.f32 %v3767_v27, %v3712_v22  ;;  %v3743_v23 = vpop.f32.mrf.mxu0  ;;  %v3756_v24 = vpop.f32.mrf.mxu1  ;;  %v3781_v61 = vadd.f32 %v3780_v36, %v3725_v40 }
 0xc88   :  { %v4717_v20 = vpop.eup %4716 }
 0xc89   :  { %v4719_v30 = vpop.eup %4718  ;;  %4720 = vtanh.f32 %v3768_v51  ;;  %v3785_v37 = vmul.f32 0.5, %v4717_v20 }
 0xc8a   :  { %v3788_v43 = vmul.f32 0.5, %v4719_v30  ;;  %4722 = vtanh.f32 %v3781_v61 }
 0xc8b   :  { %v3786_v4 = vadd.f32 0.5, %v3785_v37 }
 0xc8c   :  { %v3789_v48 = vadd.f32 0.5, %v3788_v43 }
 0xc8e   :  { %v3769_v6 = vpop.f32.mrf.mxu2  ;;  %v3782_v0 = vpop.f32.mrf.mxu3  ;;  %v3794_v39 = vmul.f32 %v3789_v48, %v7196_v62 }
 0xc8f   :  { %v4721_v3 = vpop.eup %4720 }
 0xc90   :  { %v3795_v54 = vmul.f32 %v4721_v3, %v3786_v4  ;;  %v4723_v7 = vpop.eup %4722 }
 0xc91   :  { %v3792_v12 = vmul.f32 0.5, %v4723_v7 }
 0xc92   :  { %v3796_v8 = vadd.f32 %v3795_v54, %v3794_v39 }
 0xc93   :  { %v3793_v16 = vadd.f32 0.5, %v3792_v12 }
 0xc94   :  { %4724 = vtanh.f32 %v3796_v8 }
 0xc9a   :  { %v4725_v17 = vpop.eup %4724 }
 0xc9b   :  { %v3798_v21 = vmul.f32 %v4725_v17, %v3793_v16 }
 0xc9d   :  { %v3799_v25 = vpack.c.bf16 %v3798_v21, %v3798_v21 }
 0xc9f   :  { %4285 = vmatmul.msk.bf16.vlgmr.msra.gmra.mxu0 %vm683_vm0, %v3799_v25 }
 0xd1c   :  { %v3848_v34 = vpop.f32.mrf.mxu0 }
 0xd1d   :  { %v3849_v38 = vadd.f32 %v4404_v33, %v3848_v34 }
 0xd1f   :  { %v3852_v44 = vmax.f32 %v3849_v38, 0.0 }
 0xd21   :  { %4286 = vmatmul.msk.f32.vlgmr.msra.gmra.mxu1 %vm3859_vm1, %v3852_v44 }
 0xd24   :  { %v3850_v45 = vpop.f32.mrf.mxu0 }
 0xd9e   :  { %v3880_v50 = vpop.f32.mrf.mxu1 }
 0xd9f   :  { %v3881_v56 = vadd.f32 %v4405_v46, %v3880_v50 }
 0xda1   :  { %3884 = vst.msk [vmem:[%s7247_s11] sm:$0xff] %vm3883_vm2, %v3881_v56 }

</bundles_post_ra>
